<compile_context>
chip_gen: v5e
topology: v5e:2x2
jax: 0.10.0
libtpu: 0.0.40
codegen_flags: <defaults>
</compile_context>

<pallas_src>
import math

import jax
import jax.numpy as jnp
from jax import lax
from jax.experimental import pallas as pl
from jax.experimental.pallas import tpu as pltpu

# Flat-lane halo: in full-row-width flat layout a 3x3 tap of the first conv reads at most
# 4 lanes past H*W (offset 2*W+2 plus (H-2)*W+2 output lanes), so pad every block input by 4.
_PAD = 4


def _round_up(v, m):
    return (v + m - 1) // m * m


def _block_dims(H, W, nblocks):
    dims, h, w = [], H, W
    for _ in range(nblocks):
        dims.append((h, w))
        h, w = (h - 4) // 2, (w - 4) // 2
    return dims


def _flatten_conv_weight(w, cin_pad=None):
    """(Cout, Cin, 3, 3) PyTorch OIHW -> (Cout, 9*Cin'), tap-major / channel-minor."""
    cout, cin = int(w.shape[0]), int(w.shape[1])
    if cin_pad is not None and cin_pad > cin:
        w = jnp.pad(w, ((0, 0), (0, cin_pad - cin), (0, 0), (0, 0)))
        cin = cin_pad
    return jnp.transpose(w, (0, 2, 3, 1)).reshape(cout, 9 * cin)


# ----------------------------------------------------------------------------
# Fused encoder kernel (all blocks + pools, one grid step per sample)
# ----------------------------------------------------------------------------
def _make_encoder_kernel(cfg):
    """cfg: tuple of (H, W, Cin, Cout) per block; channels-major flat layout throughout."""
    nb = len(cfg)

    def kernel(*refs):
        x_ref = refs[0]
        wrefs = refs[1:1 + 4 * nb]                    # per block: Wf1, b1, Wf2, b2
        yrefs = refs[1 + 4 * nb:1 + 5 * nb]           # per-block outputs (flat, full row width)
        stacks = refs[1 + 5 * nb:1 + 7 * nb]          # per block: conv1 / conv2 im2col scratch
        srcs = refs[1 + 7 * nb:]                      # pooled inputs of blocks 1..nb-1

        def im2col(read, stack_ref, cin, L, W):
            # stack_ref[(kh*3+kw)*cin + ci, l] = src[ci, l + kh*W + kw]
            for kh in range(3):
                for kw in range(3):
                    t = kh * 3 + kw
                    stack_ref[pl.ds(t * cin, cin), :] = read(kh * W + kw, L)
            return stack_ref[...]

        def reader_3d(ref):
            return lambda off, L: ref[0, :, pl.ds(off, L)]

        def reader_2d(ref):
            return lambda off, L: ref[:, pl.ds(off, L)]

        def reader_val(val):
            return lambda off, L: val[:, off:off + L]

        read = reader_3d(x_ref)
        for i, (H, W, cin, c) in enumerate(cfg):
            wf1, b1, wf2, b2 = wrefs[4 * i:4 * i + 4]
            st1, st2 = stacks[2 * i], stacks[2 * i + 1]
            L_mid = (H - 2) * W + 2     # conv1 lanes: covers every lane conv2 reads
            L_out = (H - 4) * W         # conv2 lanes: full-row-width block output

            # conv1: single K = 9*Cin MXU matmul + bias + ReLU (value stays in VMEM)
            a1 = jnp.dot(wf1[...], im2col(read, st1, cin, L_mid, W),
                         preferred_element_type=jnp.float32) + b1[...]
            a1 = jnp.maximum(a1, 0.0)

            # conv2: single K = 9*Cout matmul + bias; dense, fully-defined output store
            a2 = jnp.dot(wf2[...], im2col(reader_val(a1), st2, c, L_out, W),
                         preferred_element_type=jnp.float32) + b2[...]
            yrefs[i][0, :, :] = a2

            # fused MaxPool2d(2) -> next block's input scratch.  The pool after the LAST
            # block is skipped (PyTorch computes it but discards the result).
            if i + 1 < nb:
                nxt = srcs[i]
                Ho, Wo = (H - 4) // 2, (W - 4) // 2
                # tiny (2*Wo, Wo) 0/1 stride-2 column selector, built in-kernel
                sel = (lax.broadcasted_iota(jnp.int32, (2 * Wo, Wo), 0)
                       == 2 * lax.broadcasted_iota(jnp.int32, (2 * Wo, Wo), 1)
                       ).astype(jnp.float32)
                for r in range(Ho):
                    base = 2 * r * W
                    row = jnp.maximum(
                        jnp.maximum(a2[:, base:base + 2 * Wo],
                                    a2[:, base + 1:base + 1 + 2 * Wo]),
                        jnp.maximum(a2[:, base + W:base + W + 2 * Wo],
                                    a2[:, base + W + 1:base + W + 1 + 2 * Wo]))
                    nxt[:, pl.ds(r * Wo, Wo)] = jnp.dot(
                        row, sel, preferred_element_type=jnp.float32)
                # zero the 4-lane halo so every later tap read is defined
                nxt[:, pl.ds(Ho * Wo, _PAD)] = jnp.zeros((c, _PAD), jnp.float32)
                read = reader_2d(nxt)

    return kernel


# ----------------------------------------------------------------------------
# Host wrapper
# ----------------------------------------------------------------------------
def encoder_forward(x, params):
    """Matches Encoder.forward: returns the list of per-block outputs (NCHW)."""
    N, C0, H, W = (int(d) for d in x.shape)
    nb = len(params)
    dims = _block_dims(H, W, nb)
    cin0 = max(8, _round_up(C0, 8))          # align im2col sublane groups for block 0

    # ---- cheap host-side layout glue: NCHW -> channels-major flat (+ halo/channel pad) ----
    x_flat = jnp.pad(x.reshape(N, C0, H * W),
                     ((0, 0), (0, cin0 - C0), (0, _PAD)))

    cfg, flat_params, in_specs = [], [], []
    in_specs.append(pl.BlockSpec((1, cin0, H * W + _PAD), lambda n: (n, 0, 0)))
    cin = cin0
    for i, (w1, b1, w2, b2) in enumerate(params):
        c = int(w1.shape[0])
        h, wd = dims[i]
        cfg.append((h, wd, cin, c))
        ops = [_flatten_conv_weight(w1, cin), b1.reshape(c, 1),
               _flatten_conv_weight(w2), b2.reshape(c, 1)]
        flat_params += ops
        in_specs += [pl.BlockSpec(o.shape, lambda n: (0, 0)) for o in ops]
        cin = c

    out_shape, out_specs = [], []
    for (h, wd, _, c) in cfg:
        L_out = (h - 4) * wd
        out_shape.append(jax.ShapeDtypeStruct((N, c, L_out), jnp.float32))
        out_specs.append(pl.BlockSpec((1, c, L_out), lambda n: (n, 0, 0)))

    scratch = []
    for (h, wd, ci, c) in cfg:
        scratch.append(pltpu.VMEM((9 * ci, (h - 2) * wd + 2), jnp.float32))   # conv1 im2col
        scratch.append(pltpu.VMEM((9 * c, (h - 4) * wd), jnp.float32))        # conv2 im2col
    for (h, wd, _, c) in cfg[:-1]:
        ho, wo = (h - 4) // 2, (wd - 4) // 2
        scratch.append(pltpu.VMEM((c, ho * wo + _PAD), jnp.float32))          # pooled input

    # advisory cost estimate: count every HBM operand and the conv/pool FLOPs
    flops = 0
    for idx, (h, wd, ci, c) in enumerate(cfg):
        flops += 2 * c * 9 * ci * ((h - 2) * wd + 2)         # conv1
        flops += 2 * c * 9 * c * ((h - 4) * wd)              # conv2
        if idx + 1 < nb:
            ho, wo = (h - 4) // 2, (wd - 4) // 2
            flops += ho * (2 * c * 2 * wo * wo + 3 * c * 2 * wo)   # pool selectors + maxes
    flops *= N
    bytes_accessed = 4 * (int(x_flat.size)
                          + N * sum(int(o.size) for o in flat_params)
                          + sum(math.prod(s.shape) for s in out_shape))

    outs_flat = pl.pallas_call(
        _make_encoder_kernel(tuple(cfg)),
        out_shape=tuple(out_shape),
        grid=(N,),
        in_specs=in_specs,
        out_specs=tuple(out_specs),
        scratch_shapes=scratch,
        compiler_params=pltpu.CompilerParams(dimension_semantics=("parallel",)),
        cost_estimate=pl.CostEstimate(flops=int(flops), transcendentals=0,
                                      bytes_accessed=int(bytes_accessed)),
    )(x_flat, *flat_params)

    # crop the full-row-width flat outputs to dense NCHW (small host-side glue)
    outs = []
    for y, (h, wd, _, c) in zip(outs_flat, cfg):
        outs.append(y.reshape(N, c, h - 4, wd)[:, :, :, :wd - 4])
    return outs


# ----------------------------------------------------------------------------
# Parameters (PyTorch Conv2d-style init, OIHW weight layout)
# ----------------------------------------------------------------------------
def make_params(key, channels=(3, 16, 32, 64)):
    def conv_p(k, cin, cout):
        k1, k2 = jax.random.split(k)
        bound = 1.0 / math.sqrt(cin * 9)
        w = jax.random.uniform(k1, (cout, cin, 3, 3), jnp.float32, -bound, bound)
        b = jax.random.uniform(k2, (cout,), jnp.float32, -bound, bound)
        return w, b

    params = []
    keys = jax.random.split(key, 2 * (len(channels) - 1))
    for i in range(len(channels) - 1):
        w1, b1 = conv_p(keys[2 * i], channels[i], channels[i + 1])
        w2, b2 = conv_p(keys[2 * i + 1], channels[i + 1], channels[i + 1])
        params.append((w1, b1, w2, b2))
    return params


# ----------------------------------------------------------------------------
# Pure-JAX reference (correctness check only)
# ----------------------------------------------------------------------------
def encoder_reference(x, params):
    def conv(z, w, b):
        y = lax.conv_general_dilated(
            z, w, window_strides=(1, 1), padding='VALID',
            dimension_numbers=('NCHW', 'OIHW', 'NCHW'),
            precision=lax.Precision.HIGHEST)
        return y + b.reshape(1, -1, 1, 1)

    outs, feat = [], x
    for w1, b1, w2, b2 in params:
        a = jnp.maximum(conv(feat, w1, b1), 0.0)
        a = conv(a, w2, b2)
        outs.append(a)
        feat = lax.reduce_window(a, -jnp.inf, lax.max,
                                 (1, 1, 2, 2), (1, 1, 2, 2), 'VALID')
    return outs


if __name__ == "__main__":
    key = jax.random.PRNGKey(0)
    pkey, xkey = jax.random.split(key)
    params = make_params(pkey)                 # channels = (3, 16, 32, 64)
    # 3 input channels; 36x36 keeps every conv / pool spatially valid across the 3 blocks.
    x = jax.random.normal(xkey, (2, 3, 36, 36), dtype=jnp.float32)

    fwd = jax.jit(encoder_forward)
    outs = fwd(x, params)
    jax.block_until_ready(outs)

    expected = [(2, 16, 32, 32), (2, 32, 12, 12), (2, 64, 2, 2)]
    for o, s in zip(outs, expected):
        assert o.shape == s, (o.shape, s)

    refs = jax.jit(encoder_reference)(x, params)
    for o, r in zip(outs, refs):
        err = float(jnp.max(jnp.abs(o - r)))
        assert err < 2e-2, err

    print("KERNEL_OK")
</pallas_src>

<mosaic_0001>
module attributes {stable_mosaic.version = 11 : i64} {
  func.func @kernel(%arg0: i32, %arg1: memref<1x8x1300xf32, #tpu.memory_space<vmem>>, %arg2: memref<16x72xf32, #tpu.memory_space<vmem>>, %arg3: memref<16x1xf32, #tpu.memory_space<vmem>>, %arg4: memref<16x144xf32, #tpu.memory_space<vmem>>, %arg5: memref<16x1xf32, #tpu.memory_space<vmem>>, %arg6: memref<32x144xf32, #tpu.memory_space<vmem>>, %arg7: memref<32x1xf32, #tpu.memory_space<vmem>>, %arg8: memref<32x288xf32, #tpu.memory_space<vmem>>, %arg9: memref<32x1xf32, #tpu.memory_space<vmem>>, %arg10: memref<64x288xf32, #tpu.memory_space<vmem>>, %arg11: memref<64x1xf32, #tpu.memory_space<vmem>>, %arg12: memref<64x576xf32, #tpu.memory_space<vmem>>, %arg13: memref<64x1xf32, #tpu.memory_space<vmem>>, %arg14: memref<1x16x1152xf32, #tpu.memory_space<vmem>>, %arg15: memref<1x32x192xf32, #tpu.memory_space<vmem>>, %arg16: memref<1x64x12xf32, #tpu.memory_space<vmem>>, %arg17: memref<72x1226xf32, #tpu.memory_space<vmem>>, %arg18: memref<144x1152xf32, #tpu.memory_space<vmem>>, %arg19: memref<144x226xf32, #tpu.memory_space<vmem>>, %arg20: memref<288x192xf32, #tpu.memory_space<vmem>>, %arg21: memref<288x26xf32, #tpu.memory_space<vmem>>, %arg22: memref<576x12xf32, #tpu.memory_space<vmem>>, %arg23: memref<16x260xf32, #tpu.memory_space<vmem>>, %arg24: memref<32x40xf32, #tpu.memory_space<vmem>>) attributes {dimension_semantics = [#tpu.dimension_semantics<parallel>], iteration_bounds = array<i64: 2>, scalar_prefetch = 0 : i64, scratch_operands = 8 : i64, tpu.core_type = #tpu.core_type<tc>, window_params = [{transform_indices = @transform_0, window_bounds = array<i64: 1, 8, 1300>}, {pipeline_mode = #tpu.pipeline_mode<synchronous>, transform_indices = @transform_1, window_bounds = array<i64: 16, 72>}, {pipeline_mode = #tpu.pipeline_mode<synchronous>, transform_indices = @transform_2, window_bounds = array<i64: 16, 1>}, {pipeline_mode = #tpu.pipeline_mode<synchronous>, transform_indices = @transform_3, window_bounds = array<i64: 16, 144>}, {pipeline_mode = #tpu.pipeline_mode<synchronous>, transform_indices = @transform_4, window_bounds = array<i64: 16, 1>}, {pipeline_mode = #tpu.pipeline_mode<synchronous>, transform_indices = @transform_5, window_bounds = array<i64: 32, 144>}, {pipeline_mode = #tpu.pipeline_mode<synchronous>, transform_indices = @transform_6, window_bounds = array<i64: 32, 1>}, {pipeline_mode = #tpu.pipeline_mode<synchronous>, transform_indices = @transform_7, window_bounds = array<i64: 32, 288>}, {pipeline_mode = #tpu.pipeline_mode<synchronous>, transform_indices = @transform_8, window_bounds = array<i64: 32, 1>}, {pipeline_mode = #tpu.pipeline_mode<synchronous>, transform_indices = @transform_9, window_bounds = array<i64: 64, 288>}, {pipeline_mode = #tpu.pipeline_mode<synchronous>, transform_indices = @transform_10, window_bounds = array<i64: 64, 1>}, {pipeline_mode = #tpu.pipeline_mode<synchronous>, transform_indices = @transform_11, window_bounds = array<i64: 64, 576>}, {pipeline_mode = #tpu.pipeline_mode<synchronous>, transform_indices = @transform_12, window_bounds = array<i64: 64, 1>}, {transform_indices = @transform_13, window_bounds = array<i64: 1, 16, 1152>}, {transform_indices = @transform_14, window_bounds = array<i64: 1, 32, 192>}, {transform_indices = @transform_15, window_bounds = array<i64: 1, 64, 12>}]} {
    %c0 = arith.constant 0 : index
    %c0_0 = arith.constant 0 : index
    %0 = vector.load %arg2[%c0, %c0_0] : memref<16x72xf32, #tpu.memory_space<vmem>>, vector<16x72xf32>
    %c0_1 = arith.constant 0 : index
    %c0_2 = arith.constant 0 : index
    %c0_3 = arith.constant 0 : index
    %1 = vector.load %arg1[%c0_1, %c0_2, %c0_3] : memref<1x8x1300xf32, #tpu.memory_space<vmem>>, vector<1x8x1226xf32>
    %2 = vector.shape_cast %1 : vector<1x8x1226xf32> to vector<8x1226xf32>
    %c0_4 = arith.constant 0 : index
    %c0_5 = arith.constant 0 : index
    %3 = vector.load %arg17[%c0_4, %c0_5] : memref<72x1226xf32, #tpu.memory_space<vmem>>, vector<8x1226xf32>
    tpu.vector_store %arg17[%c0_4, %c0_5], %2 {strides = array<i32>} : memref<72x1226xf32, #tpu.memory_space<vmem>>, vector<8x1226xf32>,
    %c0_6 = arith.constant 0 : index
    %c0_7 = arith.constant 0 : index
    %c1 = arith.constant 1 : index
    %4 = vector.load %arg1[%c0_6, %c0_7, %c1] : memref<1x8x1300xf32, #tpu.memory_space<vmem>>, vector<1x8x1226xf32>
    %5 = vector.shape_cast %4 : vector<1x8x1226xf32> to vector<8x1226xf32>
    %c8 = arith.constant 8 : index
    %c0_8 = arith.constant 0 : index
    %6 = vector.load %arg17[%c8, %c0_8] : memref<72x1226xf32, #tpu.memory_space<vmem>>, vector<8x1226xf32>
    tpu.vector_store %arg17[%c8, %c0_8], %5 {strides = array<i32>} : memref<72x1226xf32, #tpu.memory_space<vmem>>, vector<8x1226xf32>,
    %c0_9 = arith.constant 0 : index
    %c0_10 = arith.constant 0 : index
    %c2 = arith.constant 2 : index
    %7 = vector.load %arg1[%c0_9, %c0_10, %c2] : memref<1x8x1300xf32, #tpu.memory_space<vmem>>, vector<1x8x1226xf32>
    %8 = vector.shape_cast %7 : vector<1x8x1226xf32> to vector<8x1226xf32>
    %c16 = arith.constant 16 : index
    %c0_11 = arith.constant 0 : index
    %9 = vector.load %arg17[%c16, %c0_11] : memref<72x1226xf32, #tpu.memory_space<vmem>>, vector<8x1226xf32>
    tpu.vector_store %arg17[%c16, %c0_11], %8 {strides = array<i32>} : memref<72x1226xf32, #tpu.memory_space<vmem>>, vector<8x1226xf32>,
    %c0_12 = arith.constant 0 : index
    %c0_13 = arith.constant 0 : index
    %c36 = arith.constant 36 : index
    %10 = vector.load %arg1[%c0_12, %c0_13, %c36] : memref<1x8x1300xf32, #tpu.memory_space<vmem>>, vector<1x8x1226xf32>
    %11 = vector.shape_cast %10 : vector<1x8x1226xf32> to vector<8x1226xf32>
    %c24 = arith.constant 24 : index
    %c0_14 = arith.constant 0 : index
    %12 = vector.load %arg17[%c24, %c0_14] : memref<72x1226xf32, #tpu.memory_space<vmem>>, vector<8x1226xf32>
    tpu.vector_store %arg17[%c24, %c0_14], %11 {strides = array<i32>} : memref<72x1226xf32, #tpu.memory_space<vmem>>, vector<8x1226xf32>,
    %c0_15 = arith.constant 0 : index
    %c0_16 = arith.constant 0 : index
    %c37 = arith.constant 37 : index
    %13 = vector.load %arg1[%c0_15, %c0_16, %c37] : memref<1x8x1300xf32, #tpu.memory_space<vmem>>, vector<1x8x1226xf32>
    %14 = vector.shape_cast %13 : vector<1x8x1226xf32> to vector<8x1226xf32>
    %c32 = arith.constant 32 : index
    %c0_17 = arith.constant 0 : index
    %15 = vector.load %arg17[%c32, %c0_17] : memref<72x1226xf32, #tpu.memory_space<vmem>>, vector<8x1226xf32>
    tpu.vector_store %arg17[%c32, %c0_17], %14 {strides = array<i32>} : memref<72x1226xf32, #tpu.memory_space<vmem>>, vector<8x1226xf32>,
    %c0_18 = arith.constant 0 : index
    %c0_19 = arith.constant 0 : index
    %c38 = arith.constant 38 : index
    %16 = vector.load %arg1[%c0_18, %c0_19, %c38] : memref<1x8x1300xf32, #tpu.memory_space<vmem>>, vector<1x8x1226xf32>
    %17 = vector.shape_cast %16 : vector<1x8x1226xf32> to vector<8x1226xf32>
    %c40 = arith.constant 40 : index
    %c0_20 = arith.constant 0 : index
    %18 = vector.load %arg17[%c40, %c0_20] : memref<72x1226xf32, #tpu.memory_space<vmem>>, vector<8x1226xf32>
    tpu.vector_store %arg17[%c40, %c0_20], %17 {strides = array<i32>} : memref<72x1226xf32, #tpu.memory_space<vmem>>, vector<8x1226xf32>,
    %c0_21 = arith.constant 0 : index
    %c0_22 = arith.constant 0 : index
    %c72 = arith.constant 72 : index
    %19 = vector.load %arg1[%c0_21, %c0_22, %c72] : memref<1x8x1300xf32, #tpu.memory_space<vmem>>, vector<1x8x1226xf32>
    %20 = vector.shape_cast %19 : vector<1x8x1226xf32> to vector<8x1226xf32>
    %c48 = arith.constant 48 : index
    %c0_23 = arith.constant 0 : index
    %21 = vector.load %arg17[%c48, %c0_23] : memref<72x1226xf32, #tpu.memory_space<vmem>>, vector<8x1226xf32>
    tpu.vector_store %arg17[%c48, %c0_23], %20 {strides = array<i32>} : memref<72x1226xf32, #tpu.memory_space<vmem>>, vector<8x1226xf32>,
    %c0_24 = arith.constant 0 : index
    %c0_25 = arith.constant 0 : index
    %c73 = arith.constant 73 : index
    %22 = vector.load %arg1[%c0_24, %c0_25, %c73] : memref<1x8x1300xf32, #tpu.memory_space<vmem>>, vector<1x8x1226xf32>
    %23 = vector.shape_cast %22 : vector<1x8x1226xf32> to vector<8x1226xf32>
    %c56 = arith.constant 56 : index
    %c0_26 = arith.constant 0 : index
    %24 = vector.load %arg17[%c56, %c0_26] : memref<72x1226xf32, #tpu.memory_space<vmem>>, vector<8x1226xf32>
    tpu.vector_store %arg17[%c56, %c0_26], %23 {strides = array<i32>} : memref<72x1226xf32, #tpu.memory_space<vmem>>, vector<8x1226xf32>,
    %c0_27 = arith.constant 0 : index
    %c0_28 = arith.constant 0 : index
    %c74 = arith.constant 74 : index
    %25 = vector.load %arg1[%c0_27, %c0_28, %c74] : memref<1x8x1300xf32, #tpu.memory_space<vmem>>, vector<1x8x1226xf32>
    %26 = vector.shape_cast %25 : vector<1x8x1226xf32> to vector<8x1226xf32>
    %c64 = arith.constant 64 : index
    %c0_29 = arith.constant 0 : index
    %27 = vector.load %arg17[%c64, %c0_29] : memref<72x1226xf32, #tpu.memory_space<vmem>>, vector<8x1226xf32>
    tpu.vector_store %arg17[%c64, %c0_29], %26 {strides = array<i32>} : memref<72x1226xf32, #tpu.memory_space<vmem>>, vector<8x1226xf32>,
    %c0_30 = arith.constant 0 : index
    %c0_31 = arith.constant 0 : index
    %28 = vector.load %arg17[%c0_30, %c0_31] : memref<72x1226xf32, #tpu.memory_space<vmem>>, vector<72x1226xf32>
    %cst = arith.constant dense<0.000000e+00> : vector<16x1226xf32>
    %29 = tpu.matmul %0, %28, %cst {dimension_numbers = #tpu.dot_dimension_numbers<[1], [0], [0], [1], [0, 0, 1, 1], [], []>} : vector<16x72xf32>, vector<72x1226xf32>, vector<16x1226xf32> -> vector<16x1226xf32>
    %c0_32 = arith.constant 0 : index
    %c0_33 = arith.constant 0 : index
    %30 = vector.load %arg3[%c0_32, %c0_33] : memref<16x1xf32, #tpu.memory_space<vmem>>, vector<16x1xf32>
    %31 = vector.broadcast %30 : vector<16x1xf32> to vector<16x1226xf32>
    %32 = arith.addf %29, %31 : vector<16x1226xf32>
    %cst_34 = arith.constant 0.000000e+00 : f32
    %33 = vector.broadcast %cst_34 : f32 to vector<16x1226xf32>
    %34 = arith.maximumf %32, %33 : vector<16x1226xf32>
    %c0_35 = arith.constant 0 : index
    %c0_36 = arith.constant 0 : index
    %35 = vector.load %arg4[%c0_35, %c0_36] : memref<16x144xf32, #tpu.memory_space<vmem>>, vector<16x144xf32>
    %36 = vector.extract_strided_slice %34 {offsets = [0, 0], sizes = [16, 1152], strides = [1, 1]} : vector<16x1226xf32> to vector<16x1152xf32>
    %c0_37 = arith.constant 0 : index
    %c0_38 = arith.constant 0 : index
    %37 = vector.load %arg18[%c0_37, %c0_38] : memref<144x1152xf32, #tpu.memory_space<vmem>>, vector<16x1152xf32>
    tpu.vector_store %arg18[%c0_37, %c0_38], %36 {strides = array<i32>} : memref<144x1152xf32, #tpu.memory_space<vmem>>, vector<16x1152xf32>,
    %38 = vector.extract_strided_slice %34 {offsets = [0, 1], sizes = [16, 1152], strides = [1, 1]} : vector<16x1226xf32> to vector<16x1152xf32>
    %c16_39 = arith.constant 16 : index
    %c0_40 = arith.constant 0 : index
    %39 = vector.load %arg18[%c16_39, %c0_40] : memref<144x1152xf32, #tpu.memory_space<vmem>>, vector<16x1152xf32>
    tpu.vector_store %arg18[%c16_39, %c0_40], %38 {strides = array<i32>} : memref<144x1152xf32, #tpu.memory_space<vmem>>, vector<16x1152xf32>,
    %40 = vector.extract_strided_slice %34 {offsets = [0, 2], sizes = [16, 1152], strides = [1, 1]} : vector<16x1226xf32> to vector<16x1152xf32>
    %c32_41 = arith.constant 32 : index
    %c0_42 = arith.constant 0 : index
    %41 = vector.load %arg18[%c32_41, %c0_42] : memref<144x1152xf32, #tpu.memory_space<vmem>>, vector<16x1152xf32>
    tpu.vector_store %arg18[%c32_41, %c0_42], %40 {strides = array<i32>} : memref<144x1152xf32, #tpu.memory_space<vmem>>, vector<16x1152xf32>,
    %42 = vector.extract_strided_slice %34 {offsets = [0, 36], sizes = [16, 1152], strides = [1, 1]} : vector<16x1226xf32> to vector<16x1152xf32>
    %c48_43 = arith.constant 48 : index
    %c0_44 = arith.constant 0 : index
    %43 = vector.load %arg18[%c48_43, %c0_44] : memref<144x1152xf32, #tpu.memory_space<vmem>>, vector<16x1152xf32>
    tpu.vector_store %arg18[%c48_43, %c0_44], %42 {strides = array<i32>} : memref<144x1152xf32, #tpu.memory_space<vmem>>, vector<16x1152xf32>,
    %44 = vector.extract_strided_slice %34 {offsets = [0, 37], sizes = [16, 1152], strides = [1, 1]} : vector<16x1226xf32> to vector<16x1152xf32>
    %c64_45 = arith.constant 64 : index
    %c0_46 = arith.constant 0 : index
    %45 = vector.load %arg18[%c64_45, %c0_46] : memref<144x1152xf32, #tpu.memory_space<vmem>>, vector<16x1152xf32>
    tpu.vector_store %arg18[%c64_45, %c0_46], %44 {strides = array<i32>} : memref<144x1152xf32, #tpu.memory_space<vmem>>, vector<16x1152xf32>,
    %46 = vector.extract_strided_slice %34 {offsets = [0, 38], sizes = [16, 1152], strides = [1, 1]} : vector<16x1226xf32> to vector<16x1152xf32>
    %c80 = arith.constant 80 : index
    %c0_47 = arith.constant 0 : index
    %47 = vector.load %arg18[%c80, %c0_47] : memref<144x1152xf32, #tpu.memory_space<vmem>>, vector<16x1152xf32>
    tpu.vector_store %arg18[%c80, %c0_47], %46 {strides = array<i32>} : memref<144x1152xf32, #tpu.memory_space<vmem>>, vector<16x1152xf32>,
    %48 = vector.extract_strided_slice %34 {offsets = [0, 72], sizes = [16, 1152], strides = [1, 1]} : vector<16x1226xf32> to vector<16x1152xf32>
    %c96 = arith.constant 96 : index
    %c0_48 = arith.constant 0 : index
    %49 = vector.load %arg18[%c96, %c0_48] : memref<144x1152xf32, #tpu.memory_space<vmem>>, vector<16x1152xf32>
    tpu.vector_store %arg18[%c96, %c0_48], %48 {strides = array<i32>} : memref<144x1152xf32, #tpu.memory_space<vmem>>, vector<16x1152xf32>,
    %50 = vector.extract_strided_slice %34 {offsets = [0, 73], sizes = [16, 1152], strides = [1, 1]} : vector<16x1226xf32> to vector<16x1152xf32>
    %c112 = arith.constant 112 : index
    %c0_49 = arith.constant 0 : index
    %51 = vector.load %arg18[%c112, %c0_49] : memref<144x1152xf32, #tpu.memory_space<vmem>>, vector<16x1152xf32>
    tpu.vector_store %arg18[%c112, %c0_49], %50 {strides = array<i32>} : memref<144x1152xf32, #tpu.memory_space<vmem>>, vector<16x1152xf32>,
    %52 = vector.extract_strided_slice %34 {offsets = [0, 74], sizes = [16, 1152], strides = [1, 1]} : vector<16x1226xf32> to vector<16x1152xf32>
    %c128 = arith.constant 128 : index
    %c0_50 = arith.constant 0 : index
    %53 = vector.load %arg18[%c128, %c0_50] : memref<144x1152xf32, #tpu.memory_space<vmem>>, vector<16x1152xf32>
    tpu.vector_store %arg18[%c128, %c0_50], %52 {strides = array<i32>} : memref<144x1152xf32, #tpu.memory_space<vmem>>, vector<16x1152xf32>,
    %c0_51 = arith.constant 0 : index
    %c0_52 = arith.constant 0 : index
    %54 = vector.load %arg18[%c0_51, %c0_52] : memref<144x1152xf32, #tpu.memory_space<vmem>>, vector<144x1152xf32>
    %cst_53 = arith.constant dense<0.000000e+00> : vector<16x1152xf32>
    %55 = tpu.matmul %35, %54, %cst_53 {dimension_numbers = #tpu.dot_dimension_numbers<[1], [0], [0], [1], [0, 0, 1, 1], [], []>} : vector<16x144xf32>, vector<144x1152xf32>, vector<16x1152xf32> -> vector<16x1152xf32>
    %c0_54 = arith.constant 0 : index
    %c0_55 = arith.constant 0 : index
    %56 = vector.load %arg5[%c0_54, %c0_55] : memref<16x1xf32, #tpu.memory_space<vmem>>, vector<16x1xf32>
    %57 = vector.broadcast %56 : vector<16x1xf32> to vector<16x1152xf32>
    %58 = arith.addf %55, %57 : vector<16x1152xf32>
    %c0_56 = arith.constant 0 : index
    %c0_57 = arith.constant 0 : index
    %c0_58 = arith.constant 0 : index
    %59 = vector.load %arg14[%c0_56, %c0_57, %c0_58] : memref<1x16x1152xf32, #tpu.memory_space<vmem>>, vector<1x16x1152xf32>
    %60 = vector.shape_cast %59 : vector<1x16x1152xf32> to vector<16x1152xf32>
    %61 = vector.shape_cast %58 : vector<16x1152xf32> to vector<1x16x1152xf32>
    tpu.vector_store %arg14[%c0_56, %c0_57, %c0_58], %61 {strides = array<i32>} : memref<1x16x1152xf32, #tpu.memory_space<vmem>>, vector<1x16x1152xf32>,
    %62 = tpu.iota {dimensions = array<i32: 0>} : vector<32x16xi32>
    %63 = tpu.iota {dimensions = array<i32: 1>} : vector<32x16xi32>
    %c2_i32 = arith.constant 2 : i32
    %64 = vector.broadcast %c2_i32 : i32 to vector<32x16xi32>
    %65 = arith.muli %64, %63 : vector<32x16xi32>
    %66 = arith.cmpi eq, %62, %65 : vector<32x16xi32>
    %67 = arith.extui %66 : vector<32x16xi1> to vector<32x16xi32>
    %68 = arith.sitofp %67 : vector<32x16xi32> to vector<32x16xf32>
    %69 = vector.extract_strided_slice %58 {offsets = [0, 0], sizes = [16, 32], strides = [1, 1]} : vector<16x1152xf32> to vector<16x32xf32>
    %70 = vector.extract_strided_slice %58 {offsets = [0, 1], sizes = [16, 32], strides = [1, 1]} : vector<16x1152xf32> to vector<16x32xf32>
    %71 = arith.maximumf %69, %70 : vector<16x32xf32>
    %72 = vector.extract_strided_slice %58 {offsets = [0, 36], sizes = [16, 32], strides = [1, 1]} : vector<16x1152xf32> to vector<16x32xf32>
    %73 = vector.extract_strided_slice %58 {offsets = [0, 37], sizes = [16, 32], strides = [1, 1]} : vector<16x1152xf32> to vector<16x32xf32>
    %74 = arith.maximumf %72, %73 : vector<16x32xf32>
    %75 = arith.maximumf %71, %74 : vector<16x32xf32>
    %cst_59 = arith.constant dense<0.000000e+00> : vector<16x16xf32>
    %76 = tpu.matmul %75, %68, %cst_59 {dimension_numbers = #tpu.dot_dimension_numbers<[1], [0], [0], [1], [0, 0, 1, 1], [], []>} : vector<16x32xf32>, vector<32x16xf32>, vector<16x16xf32> -> vector<16x16xf32>
    %c0_60 = arith.constant 0 : index
    %c0_61 = arith.constant 0 : index
    %77 = vector.load %arg23[%c0_60, %c0_61] : memref<16x260xf32, #tpu.memory_space<vmem>>, vector<16x16xf32>
    tpu.vector_store %arg23[%c0_60, %c0_61], %76 {strides = array<i32>} : memref<16x260xf32, #tpu.memory_space<vmem>>, vector<16x16xf32>,
    %78 = vector.extract_strided_slice %58 {offsets = [0, 72], sizes = [16, 32], strides = [1, 1]} : vector<16x1152xf32> to vector<16x32xf32>
    %79 = vector.extract_strided_slice %58 {offsets = [0, 73], sizes = [16, 32], strides = [1, 1]} : vector<16x1152xf32> to vector<16x32xf32>
    %80 = arith.maximumf %78, %79 : vector<16x32xf32>
    %81 = vector.extract_strided_slice %58 {offsets = [0, 108], sizes = [16, 32], strides = [1, 1]} : vector<16x1152xf32> to vector<16x32xf32>
    %82 = vector.extract_strided_slice %58 {offsets = [0, 109], sizes = [16, 32], strides = [1, 1]} : vector<16x1152xf32> to vector<16x32xf32>
    %83 = arith.maximumf %81, %82 : vector<16x32xf32>
    %84 = arith.maximumf %80, %83 : vector<16x32xf32>
    %cst_62 = arith.constant dense<0.000000e+00> : vector<16x16xf32>
    %85 = tpu.matmul %84, %68, %cst_62 {dimension_numbers = #tpu.dot_dimension_numbers<[1], [0], [0], [1], [0, 0, 1, 1], [], []>} : vector<16x32xf32>, vector<32x16xf32>, vector<16x16xf32> -> vector<16x16xf32>
    %c0_63 = arith.constant 0 : index
    %c16_64 = arith.constant 16 : index
    %86 = vector.load %arg23[%c0_63, %c16_64] : memref<16x260xf32, #tpu.memory_space<vmem>>, vector<16x16xf32>
    tpu.vector_store %arg23[%c0_63, %c16_64], %85 {strides = array<i32>} : memref<16x260xf32, #tpu.memory_space<vmem>>, vector<16x16xf32>,
    %87 = vector.extract_strided_slice %58 {offsets = [0, 144], sizes = [16, 32], strides = [1, 1]} : vector<16x1152xf32> to vector<16x32xf32>
    %88 = vector.extract_strided_slice %58 {offsets = [0, 145], sizes = [16, 32], strides = [1, 1]} : vector<16x1152xf32> to vector<16x32xf32>
    %89 = arith.maximumf %87, %88 : vector<16x32xf32>
    %90 = vector.extract_strided_slice %58 {offsets = [0, 180], sizes = [16, 32], strides = [1, 1]} : vector<16x1152xf32> to vector<16x32xf32>
    %91 = vector.extract_strided_slice %58 {offsets = [0, 181], sizes = [16, 32], strides = [1, 1]} : vector<16x1152xf32> to vector<16x32xf32>
    %92 = arith.maximumf %90, %91 : vector<16x32xf32>
    %93 = arith.maximumf %89, %92 : vector<16x32xf32>
    %cst_65 = arith.constant dense<0.000000e+00> : vector<16x16xf32>
    %94 = tpu.matmul %93, %68, %cst_65 {dimension_numbers = #tpu.dot_dimension_numbers<[1], [0], [0], [1], [0, 0, 1, 1], [], []>} : vector<16x32xf32>, vector<32x16xf32>, vector<16x16xf32> -> vector<16x16xf32>
    %c0_66 = arith.constant 0 : index
    %c32_67 = arith.constant 32 : index
    %95 = vector.load %arg23[%c0_66, %c32_67] : memref<16x260xf32, #tpu.memory_space<vmem>>, vector<16x16xf32>
    tpu.vector_store %arg23[%c0_66, %c32_67], %94 {strides = array<i32>} : memref<16x260xf32, #tpu.memory_space<vmem>>, vector<16x16xf32>,
    %96 = vector.extract_strided_slice %58 {offsets = [0, 216], sizes = [16, 32], strides = [1, 1]} : vector<16x1152xf32> to vector<16x32xf32>
    %97 = vector.extract_strided_slice %58 {offsets = [0, 217], sizes = [16, 32], strides = [1, 1]} : vector<16x1152xf32> to vector<16x32xf32>
    %98 = arith.maximumf %96, %97 : vector<16x32xf32>
    %99 = vector.extract_strided_slice %58 {offsets = [0, 252], sizes = [16, 32], strides = [1, 1]} : vector<16x1152xf32> to vector<16x32xf32>
    %100 = vector.extract_strided_slice %58 {offsets = [0, 253], sizes = [16, 32], strides = [1, 1]} : vector<16x1152xf32> to vector<16x32xf32>
    %101 = arith.maximumf %99, %100 : vector<16x32xf32>
    %102 = arith.maximumf %98, %101 : vector<16x32xf32>
    %cst_68 = arith.constant dense<0.000000e+00> : vector<16x16xf32>
    %103 = tpu.matmul %102, %68, %cst_68 {dimension_numbers = #tpu.dot_dimension_numbers<[1], [0], [0], [1], [0, 0, 1, 1], [], []>} : vector<16x32xf32>, vector<32x16xf32>, vector<16x16xf32> -> vector<16x16xf32>
    %c0_69 = arith.constant 0 : index
    %c48_70 = arith.constant 48 : index
    %104 = vector.load %arg23[%c0_69, %c48_70] : memref<16x260xf32, #tpu.memory_space<vmem>>, vector<16x16xf32>
    tpu.vector_store %arg23[%c0_69, %c48_70], %103 {strides = array<i32>} : memref<16x260xf32, #tpu.memory_space<vmem>>, vector<16x16xf32>,
    %105 = vector.extract_strided_slice %58 {offsets = [0, 288], sizes = [16, 32], strides = [1, 1]} : vector<16x1152xf32> to vector<16x32xf32>
    %106 = vector.extract_strided_slice %58 {offsets = [0, 289], sizes = [16, 32], strides = [1, 1]} : vector<16x1152xf32> to vector<16x32xf32>
    %107 = arith.maximumf %105, %106 : vector<16x32xf32>
    %108 = vector.extract_strided_slice %58 {offsets = [0, 324], sizes = [16, 32], strides = [1, 1]} : vector<16x1152xf32> to vector<16x32xf32>
    %109 = vector.extract_strided_slice %58 {offsets = [0, 325], sizes = [16, 32], strides = [1, 1]} : vector<16x1152xf32> to vector<16x32xf32>
    %110 = arith.maximumf %108, %109 : vector<16x32xf32>
    %111 = arith.maximumf %107, %110 : vector<16x32xf32>
    %cst_71 = arith.constant dense<0.000000e+00> : vector<16x16xf32>
    %112 = tpu.matmul %111, %68, %cst_71 {dimension_numbers = #tpu.dot_dimension_numbers<[1], [0], [0], [1], [0, 0, 1, 1], [], []>} : vector<16x32xf32>, vector<32x16xf32>, vector<16x16xf32> -> vector<16x16xf32>
    %c0_72 = arith.constant 0 : index
    %c64_73 = arith.constant 64 : index
    %113 = vector.load %arg23[%c0_72, %c64_73] : memref<16x260xf32, #tpu.memory_space<vmem>>, vector<16x16xf32>
    tpu.vector_store %arg23[%c0_72, %c64_73], %112 {strides = array<i32>} : memref<16x260xf32, #tpu.memory_space<vmem>>, vector<16x16xf32>,
    %114 = vector.extract_strided_slice %58 {offsets = [0, 360], sizes = [16, 32], strides = [1, 1]} : vector<16x1152xf32> to vector<16x32xf32>
    %115 = vector.extract_strided_slice %58 {offsets = [0, 361], sizes = [16, 32], strides = [1, 1]} : vector<16x1152xf32> to vector<16x32xf32>
    %116 = arith.maximumf %114, %115 : vector<16x32xf32>
    %117 = vector.extract_strided_slice %58 {offsets = [0, 396], sizes = [16, 32], strides = [1, 1]} : vector<16x1152xf32> to vector<16x32xf32>
    %118 = vector.extract_strided_slice %58 {offsets = [0, 397], sizes = [16, 32], strides = [1, 1]} : vector<16x1152xf32> to vector<16x32xf32>
    %119 = arith.maximumf %117, %118 : vector<16x32xf32>
    %120 = arith.maximumf %116, %119 : vector<16x32xf32>
    %cst_74 = arith.constant dense<0.000000e+00> : vector<16x16xf32>
    %121 = tpu.matmul %120, %68, %cst_74 {dimension_numbers = #tpu.dot_dimension_numbers<[1], [0], [0], [1], [0, 0, 1, 1], [], []>} : vector<16x32xf32>, vector<32x16xf32>, vector<16x16xf32> -> vector<16x16xf32>
    %c0_75 = arith.constant 0 : index
    %c80_76 = arith.constant 80 : index
    %122 = vector.load %arg23[%c0_75, %c80_76] : memref<16x260xf32, #tpu.memory_space<vmem>>, vector<16x16xf32>
    tpu.vector_store %arg23[%c0_75, %c80_76], %121 {strides = array<i32>} : memref<16x260xf32, #tpu.memory_space<vmem>>, vector<16x16xf32>,
    %123 = vector.extract_strided_slice %58 {offsets = [0, 432], sizes = [16, 32], strides = [1, 1]} : vector<16x1152xf32> to vector<16x32xf32>
    %124 = vector.extract_strided_slice %58 {offsets = [0, 433], sizes = [16, 32], strides = [1, 1]} : vector<16x1152xf32> to vector<16x32xf32>
    %125 = arith.maximumf %123, %124 : vector<16x32xf32>
    %126 = vector.extract_strided_slice %58 {offsets = [0, 468], sizes = [16, 32], strides = [1, 1]} : vector<16x1152xf32> to vector<16x32xf32>
    %127 = vector.extract_strided_slice %58 {offsets = [0, 469], sizes = [16, 32], strides = [1, 1]} : vector<16x1152xf32> to vector<16x32xf32>
    %128 = arith.maximumf %126, %127 : vector<16x32xf32>
    %129 = arith.maximumf %125, %128 : vector<16x32xf32>
    %cst_77 = arith.constant dense<0.000000e+00> : vector<16x16xf32>
    %130 = tpu.matmul %129, %68, %cst_77 {dimension_numbers = #tpu.dot_dimension_numbers<[1], [0], [0], [1], [0, 0, 1, 1], [], []>} : vector<16x32xf32>, vector<32x16xf32>, vector<16x16xf32> -> vector<16x16xf32>
    %c0_78 = arith.constant 0 : index
    %c96_79 = arith.constant 96 : index
    %131 = vector.load %arg23[%c0_78, %c96_79] : memref<16x260xf32, #tpu.memory_space<vmem>>, vector<16x16xf32>
    tpu.vector_store %arg23[%c0_78, %c96_79], %130 {strides = array<i32>} : memref<16x260xf32, #tpu.memory_space<vmem>>, vector<16x16xf32>,
    %132 = vector.extract_strided_slice %58 {offsets = [0, 504], sizes = [16, 32], strides = [1, 1]} : vector<16x1152xf32> to vector<16x32xf32>
    %133 = vector.extract_strided_slice %58 {offsets = [0, 505], sizes = [16, 32], strides = [1, 1]} : vector<16x1152xf32> to vector<16x32xf32>
    %134 = arith.maximumf %132, %133 : vector<16x32xf32>
    %135 = vector.extract_strided_slice %58 {offsets = [0, 540], sizes = [16, 32], strides = [1, 1]} : vector<16x1152xf32> to vector<16x32xf32>
    %136 = vector.extract_strided_slice %58 {offsets = [0, 541], sizes = [16, 32], strides = [1, 1]} : vector<16x1152xf32> to vector<16x32xf32>
    %137 = arith.maximumf %135, %136 : vector<16x32xf32>
    %138 = arith.maximumf %134, %137 : vector<16x32xf32>
    %cst_80 = arith.constant dense<0.000000e+00> : vector<16x16xf32>
    %139 = tpu.matmul %138, %68, %cst_80 {dimension_numbers = #tpu.dot_dimension_numbers<[1], [0], [0], [1], [0, 0, 1, 1], [], []>} : vector<16x32xf32>, vector<32x16xf32>, vector<16x16xf32> -> vector<16x16xf32>
    %c0_81 = arith.constant 0 : index
    %c112_82 = arith.constant 112 : index
    %140 = vector.load %arg23[%c0_81, %c112_82] : memref<16x260xf32, #tpu.memory_space<vmem>>, vector<16x16xf32>
    tpu.vector_store %arg23[%c0_81, %c112_82], %139 {strides = array<i32>} : memref<16x260xf32, #tpu.memory_space<vmem>>, vector<16x16xf32>,
    %141 = vector.extract_strided_slice %58 {offsets = [0, 576], sizes = [16, 32], strides = [1, 1]} : vector<16x1152xf32> to vector<16x32xf32>
    %142 = vector.extract_strided_slice %58 {offsets = [0, 577], sizes = [16, 32], strides = [1, 1]} : vector<16x1152xf32> to vector<16x32xf32>
    %143 = arith.maximumf %141, %142 : vector<16x32xf32>
    %144 = vector.extract_strided_slice %58 {offsets = [0, 612], sizes = [16, 32], strides = [1, 1]} : vector<16x1152xf32> to vector<16x32xf32>
    %145 = vector.extract_strided_slice %58 {offsets = [0, 613], sizes = [16, 32], strides = [1, 1]} : vector<16x1152xf32> to vector<16x32xf32>
    %146 = arith.maximumf %144, %145 : vector<16x32xf32>
    %147 = arith.maximumf %143, %146 : vector<16x32xf32>
    %cst_83 = arith.constant dense<0.000000e+00> : vector<16x16xf32>
    %148 = tpu.matmul %147, %68, %cst_83 {dimension_numbers = #tpu.dot_dimension_numbers<[1], [0], [0], [1], [0, 0, 1, 1], [], []>} : vector<16x32xf32>, vector<32x16xf32>, vector<16x16xf32> -> vector<16x16xf32>
    %c0_84 = arith.constant 0 : index
    %c128_85 = arith.constant 128 : index
    %149 = vector.load %arg23[%c0_84, %c128_85] : memref<16x260xf32, #tpu.memory_space<vmem>>, vector<16x16xf32>
    tpu.vector_store %arg23[%c0_84, %c128_85], %148 {strides = array<i32>} : memref<16x260xf32, #tpu.memory_space<vmem>>, vector<16x16xf32>,
    %150 = vector.extract_strided_slice %58 {offsets = [0, 648], sizes = [16, 32], strides = [1, 1]} : vector<16x1152xf32> to vector<16x32xf32>
    %151 = vector.extract_strided_slice %58 {offsets = [0, 649], sizes = [16, 32], strides = [1, 1]} : vector<16x1152xf32> to vector<16x32xf32>
    %152 = arith.maximumf %150, %151 : vector<16x32xf32>
    %153 = vector.extract_strided_slice %58 {offsets = [0, 684], sizes = [16, 32], strides = [1, 1]} : vector<16x1152xf32> to vector<16x32xf32>
    %154 = vector.extract_strided_slice %58 {offsets = [0, 685], sizes = [16, 32], strides = [1, 1]} : vector<16x1152xf32> to vector<16x32xf32>
    %155 = arith.maximumf %153, %154 : vector<16x32xf32>
    %156 = arith.maximumf %152, %155 : vector<16x32xf32>
    %cst_86 = arith.constant dense<0.000000e+00> : vector<16x16xf32>
    %157 = tpu.matmul %156, %68, %cst_86 {dimension_numbers = #tpu.dot_dimension_numbers<[1], [0], [0], [1], [0, 0, 1, 1], [], []>} : vector<16x32xf32>, vector<32x16xf32>, vector<16x16xf32> -> vector<16x16xf32>
    %c0_87 = arith.constant 0 : index
    %c144 = arith.constant 144 : index
    %158 = vector.load %arg23[%c0_87, %c144] : memref<16x260xf32, #tpu.memory_space<vmem>>, vector<16x16xf32>
    tpu.vector_store %arg23[%c0_87, %c144], %157 {strides = array<i32>} : memref<16x260xf32, #tpu.memory_space<vmem>>, vector<16x16xf32>,
    %159 = vector.extract_strided_slice %58 {offsets = [0, 720], sizes = [16, 32], strides = [1, 1]} : vector<16x1152xf32> to vector<16x32xf32>
    %160 = vector.extract_strided_slice %58 {offsets = [0, 721], sizes = [16, 32], strides = [1, 1]} : vector<16x1152xf32> to vector<16x32xf32>
    %161 = arith.maximumf %159, %160 : vector<16x32xf32>
    %162 = vector.extract_strided_slice %58 {offsets = [0, 756], sizes = [16, 32], strides = [1, 1]} : vector<16x1152xf32> to vector<16x32xf32>
    %163 = vector.extract_strided_slice %58 {offsets = [0, 757], sizes = [16, 32], strides = [1, 1]} : vector<16x1152xf32> to vector<16x32xf32>
    %164 = arith.maximumf %162, %163 : vector<16x32xf32>
    %165 = arith.maximumf %161, %164 : vector<16x32xf32>
    %cst_88 = arith.constant dense<0.000000e+00> : vector<16x16xf32>
    %166 = tpu.matmul %165, %68, %cst_88 {dimension_numbers = #tpu.dot_dimension_numbers<[1], [0], [0], [1], [0, 0, 1, 1], [], []>} : vector<16x32xf32>, vector<32x16xf32>, vector<16x16xf32> -> vector<16x16xf32>
    %c0_89 = arith.constant 0 : index
    %c160 = arith.constant 160 : index
    %167 = vector.load %arg23[%c0_89, %c160] : memref<16x260xf32, #tpu.memory_space<vmem>>, vector<16x16xf32>
    tpu.vector_store %arg23[%c0_89, %c160], %166 {strides = array<i32>} : memref<16x260xf32, #tpu.memory_space<vmem>>, vector<16x16xf32>,
    %168 = vector.extract_strided_slice %58 {offsets = [0, 792], sizes = [16, 32], strides = [1, 1]} : vector<16x1152xf32> to vector<16x32xf32>
    %169 = vector.extract_strided_slice %58 {offsets = [0, 793], sizes = [16, 32], strides = [1, 1]} : vector<16x1152xf32> to vector<16x32xf32>
    %170 = arith.maximumf %168, %169 : vector<16x32xf32>
    %171 = vector.extract_strided_slice %58 {offsets = [0, 828], sizes = [16, 32], strides = [1, 1]} : vector<16x1152xf32> to vector<16x32xf32>
    %172 = vector.extract_strided_slice %58 {offsets = [0, 829], sizes = [16, 32], strides = [1, 1]} : vector<16x1152xf32> to vector<16x32xf32>
    %173 = arith.maximumf %171, %172 : vector<16x32xf32>
    %174 = arith.maximumf %170, %173 : vector<16x32xf32>
    %cst_90 = arith.constant dense<0.000000e+00> : vector<16x16xf32>
    %175 = tpu.matmul %174, %68, %cst_90 {dimension_numbers = #tpu.dot_dimension_numbers<[1], [0], [0], [1], [0, 0, 1, 1], [], []>} : vector<16x32xf32>, vector<32x16xf32>, vector<16x16xf32> -> vector<16x16xf32>
    %c0_91 = arith.constant 0 : index
    %c176 = arith.constant 176 : index
    %176 = vector.load %arg23[%c0_91, %c176] : memref<16x260xf32, #tpu.memory_space<vmem>>, vector<16x16xf32>
    tpu.vector_store %arg23[%c0_91, %c176], %175 {strides = array<i32>} : memref<16x260xf32, #tpu.memory_space<vmem>>, vector<16x16xf32>,
    %177 = vector.extract_strided_slice %58 {offsets = [0, 864], sizes = [16, 32], strides = [1, 1]} : vector<16x1152xf32> to vector<16x32xf32>
    %178 = vector.extract_strided_slice %58 {offsets = [0, 865], sizes = [16, 32], strides = [1, 1]} : vector<16x1152xf32> to vector<16x32xf32>
    %179 = arith.maximumf %177, %178 : vector<16x32xf32>
    %180 = vector.extract_strided_slice %58 {offsets = [0, 900], sizes = [16, 32], strides = [1, 1]} : vector<16x1152xf32> to vector<16x32xf32>
    %181 = vector.extract_strided_slice %58 {offsets = [0, 901], sizes = [16, 32], strides = [1, 1]} : vector<16x1152xf32> to vector<16x32xf32>
    %182 = arith.maximumf %180, %181 : vector<16x32xf32>
    %183 = arith.maximumf %179, %182 : vector<16x32xf32>
    %cst_92 = arith.constant dense<0.000000e+00> : vector<16x16xf32>
    %184 = tpu.matmul %183, %68, %cst_92 {dimension_numbers = #tpu.dot_dimension_numbers<[1], [0], [0], [1], [0, 0, 1, 1], [], []>} : vector<16x32xf32>, vector<32x16xf32>, vector<16x16xf32> -> vector<16x16xf32>
    %c0_93 = arith.constant 0 : index
    %c192 = arith.constant 192 : index
    %185 = vector.load %arg23[%c0_93, %c192] : memref<16x260xf32, #tpu.memory_space<vmem>>, vector<16x16xf32>
    tpu.vector_store %arg23[%c0_93, %c192], %184 {strides = array<i32>} : memref<16x260xf32, #tpu.memory_space<vmem>>, vector<16x16xf32>,
    %186 = vector.extract_strided_slice %58 {offsets = [0, 936], sizes = [16, 32], strides = [1, 1]} : vector<16x1152xf32> to vector<16x32xf32>
    %187 = vector.extract_strided_slice %58 {offsets = [0, 937], sizes = [16, 32], strides = [1, 1]} : vector<16x1152xf32> to vector<16x32xf32>
    %188 = arith.maximumf %186, %187 : vector<16x32xf32>
    %189 = vector.extract_strided_slice %58 {offsets = [0, 972], sizes = [16, 32], strides = [1, 1]} : vector<16x1152xf32> to vector<16x32xf32>
    %190 = vector.extract_strided_slice %58 {offsets = [0, 973], sizes = [16, 32], strides = [1, 1]} : vector<16x1152xf32> to vector<16x32xf32>
    %191 = arith.maximumf %189, %190 : vector<16x32xf32>
    %192 = arith.maximumf %188, %191 : vector<16x32xf32>
    %cst_94 = arith.constant dense<0.000000e+00> : vector<16x16xf32>
    %193 = tpu.matmul %192, %68, %cst_94 {dimension_numbers = #tpu.dot_dimension_numbers<[1], [0], [0], [1], [0, 0, 1, 1], [], []>} : vector<16x32xf32>, vector<32x16xf32>, vector<16x16xf32> -> vector<16x16xf32>
    %c0_95 = arith.constant 0 : index
    %c208 = arith.constant 208 : index
    %194 = vector.load %arg23[%c0_95, %c208] : memref<16x260xf32, #tpu.memory_space<vmem>>, vector<16x16xf32>
    tpu.vector_store %arg23[%c0_95, %c208], %193 {strides = array<i32>} : memref<16x260xf32, #tpu.memory_space<vmem>>, vector<16x16xf32>,
    %195 = vector.extract_strided_slice %58 {offsets = [0, 1008], sizes = [16, 32], strides = [1, 1]} : vector<16x1152xf32> to vector<16x32xf32>
    %196 = vector.extract_strided_slice %58 {offsets = [0, 1009], sizes = [16, 32], strides = [1, 1]} : vector<16x1152xf32> to vector<16x32xf32>
    %197 = arith.maximumf %195, %196 : vector<16x32xf32>
    %198 = vector.extract_strided_slice %58 {offsets = [0, 1044], sizes = [16, 32], strides = [1, 1]} : vector<16x1152xf32> to vector<16x32xf32>
    %199 = vector.extract_strided_slice %58 {offsets = [0, 1045], sizes = [16, 32], strides = [1, 1]} : vector<16x1152xf32> to vector<16x32xf32>
    %200 = arith.maximumf %198, %199 : vector<16x32xf32>
    %201 = arith.maximumf %197, %200 : vector<16x32xf32>
    %cst_96 = arith.constant dense<0.000000e+00> : vector<16x16xf32>
    %202 = tpu.matmul %201, %68, %cst_96 {dimension_numbers = #tpu.dot_dimension_numbers<[1], [0], [0], [1], [0, 0, 1, 1], [], []>} : vector<16x32xf32>, vector<32x16xf32>, vector<16x16xf32> -> vector<16x16xf32>
    %c0_97 = arith.constant 0 : index
    %c224 = arith.constant 224 : index
    %203 = vector.load %arg23[%c0_97, %c224] : memref<16x260xf32, #tpu.memory_space<vmem>>, vector<16x16xf32>
    tpu.vector_store %arg23[%c0_97, %c224], %202 {strides = array<i32>} : memref<16x260xf32, #tpu.memory_space<vmem>>, vector<16x16xf32>,
    %204 = vector.extract_strided_slice %58 {offsets = [0, 1080], sizes = [16, 32], strides = [1, 1]} : vector<16x1152xf32> to vector<16x32xf32>
    %205 = vector.extract_strided_slice %58 {offsets = [0, 1081], sizes = [16, 32], strides = [1, 1]} : vector<16x1152xf32> to vector<16x32xf32>
    %206 = arith.maximumf %204, %205 : vector<16x32xf32>
    %207 = vector.extract_strided_slice %58 {offsets = [0, 1116], sizes = [16, 32], strides = [1, 1]} : vector<16x1152xf32> to vector<16x32xf32>
    %208 = vector.extract_strided_slice %58 {offsets = [0, 1117], sizes = [16, 32], strides = [1, 1]} : vector<16x1152xf32> to vector<16x32xf32>
    %209 = arith.maximumf %207, %208 : vector<16x32xf32>
    %210 = arith.maximumf %206, %209 : vector<16x32xf32>
    %cst_98 = arith.constant dense<0.000000e+00> : vector<16x16xf32>
    %211 = tpu.matmul %210, %68, %cst_98 {dimension_numbers = #tpu.dot_dimension_numbers<[1], [0], [0], [1], [0, 0, 1, 1], [], []>} : vector<16x32xf32>, vector<32x16xf32>, vector<16x16xf32> -> vector<16x16xf32>
    %c0_99 = arith.constant 0 : index
    %c240 = arith.constant 240 : index
    %212 = vector.load %arg23[%c0_99, %c240] : memref<16x260xf32, #tpu.memory_space<vmem>>, vector<16x16xf32>
    tpu.vector_store %arg23[%c0_99, %c240], %211 {strides = array<i32>} : memref<16x260xf32, #tpu.memory_space<vmem>>, vector<16x16xf32>,
    %cst_100 = arith.constant 0.000000e+00 : f32
    %213 = vector.broadcast %cst_100 : f32 to vector<16x4xf32>
    %c0_101 = arith.constant 0 : index
    %c256 = arith.constant 256 : index
    %214 = vector.load %arg23[%c0_101, %c256] : memref<16x260xf32, #tpu.memory_space<vmem>>, vector<16x4xf32>
    tpu.vector_store %arg23[%c0_101, %c256], %213 {strides = array<i32>} : memref<16x260xf32, #tpu.memory_space<vmem>>, vector<16x4xf32>,
    %c0_102 = arith.constant 0 : index
    %c0_103 = arith.constant 0 : index
    %215 = vector.load %arg6[%c0_102, %c0_103] : memref<32x144xf32, #tpu.memory_space<vmem>>, vector<32x144xf32>
    %c0_104 = arith.constant 0 : index
    %c0_105 = arith.constant 0 : index
    %216 = vector.load %arg23[%c0_104, %c0_105] : memref<16x260xf32, #tpu.memory_space<vmem>>, vector<16x226xf32>
    %c0_106 = arith.constant 0 : index
    %c0_107 = arith.constant 0 : index
    %217 = vector.load %arg19[%c0_106, %c0_107] : memref<144x226xf32, #tpu.memory_space<vmem>>, vector<16x226xf32>
    tpu.vector_store %arg19[%c0_106, %c0_107], %216 {strides = array<i32>} : memref<144x226xf32, #tpu.memory_space<vmem>>, vector<16x226xf32>,
    %c0_108 = arith.constant 0 : index
    %c1_109 = arith.constant 1 : index
    %218 = vector.load %arg23[%c0_108, %c1_109] : memref<16x260xf32, #tpu.memory_space<vmem>>, vector<16x226xf32>
    %c16_110 = arith.constant 16 : index
    %c0_111 = arith.constant 0 : index
    %219 = vector.load %arg19[%c16_110, %c0_111] : memref<144x226xf32, #tpu.memory_space<vmem>>, vector<16x226xf32>
    tpu.vector_store %arg19[%c16_110, %c0_111], %218 {strides = array<i32>} : memref<144x226xf32, #tpu.memory_space<vmem>>, vector<16x226xf32>,
    %c0_112 = arith.constant 0 : index
    %c2_113 = arith.constant 2 : index
    %220 = vector.load %arg23[%c0_112, %c2_113] : memref<16x260xf32, #tpu.memory_space<vmem>>, vector<16x226xf32>
    %c32_114 = arith.constant 32 : index
    %c0_115 = arith.constant 0 : index
    %221 = vector.load %arg19[%c32_114, %c0_115] : memref<144x226xf32, #tpu.memory_space<vmem>>, vector<16x226xf32>
    tpu.vector_store %arg19[%c32_114, %c0_115], %220 {strides = array<i32>} : memref<144x226xf32, #tpu.memory_space<vmem>>, vector<16x226xf32>,
    %c0_116 = arith.constant 0 : index
    %c16_117 = arith.constant 16 : index
    %222 = vector.load %arg23[%c0_116, %c16_117] : memref<16x260xf32, #tpu.memory_space<vmem>>, vector<16x226xf32>
    %c48_118 = arith.constant 48 : index
    %c0_119 = arith.constant 0 : index
    %223 = vector.load %arg19[%c48_118, %c0_119] : memref<144x226xf32, #tpu.memory_space<vmem>>, vector<16x226xf32>
    tpu.vector_store %arg19[%c48_118, %c0_119], %222 {strides = array<i32>} : memref<144x226xf32, #tpu.memory_space<vmem>>, vector<16x226xf32>,
    %c0_120 = arith.constant 0 : index
    %c17 = arith.constant 17 : index
    %224 = vector.load %arg23[%c0_120, %c17] : memref<16x260xf32, #tpu.memory_space<vmem>>, vector<16x226xf32>
    %c64_121 = arith.constant 64 : index
    %c0_122 = arith.constant 0 : index
    %225 = vector.load %arg19[%c64_121, %c0_122] : memref<144x226xf32, #tpu.memory_space<vmem>>, vector<16x226xf32>
    tpu.vector_store %arg19[%c64_121, %c0_122], %224 {strides = array<i32>} : memref<144x226xf32, #tpu.memory_space<vmem>>, vector<16x226xf32>,
    %c0_123 = arith.constant 0 : index
    %c18 = arith.constant 18 : index
    %226 = vector.load %arg23[%c0_123, %c18] : memref<16x260xf32, #tpu.memory_space<vmem>>, vector<16x226xf32>
    %c80_124 = arith.constant 80 : index
    %c0_125 = arith.constant 0 : index
    %227 = vector.load %arg19[%c80_124, %c0_125] : memref<144x226xf32, #tpu.memory_space<vmem>>, vector<16x226xf32>
    tpu.vector_store %arg19[%c80_124, %c0_125], %226 {strides = array<i32>} : memref<144x226xf32, #tpu.memory_space<vmem>>, vector<16x226xf32>,
    %c0_126 = arith.constant 0 : index
    %c32_127 = arith.constant 32 : index
    %228 = vector.load %arg23[%c0_126, %c32_127] : memref<16x260xf32, #tpu.memory_space<vmem>>, vector<16x226xf32>
    %c96_128 = arith.constant 96 : index
    %c0_129 = arith.constant 0 : index
    %229 = vector.load %arg19[%c96_128, %c0_129] : memref<144x226xf32, #tpu.memory_space<vmem>>, vector<16x226xf32>
    tpu.vector_store %arg19[%c96_128, %c0_129], %228 {strides = array<i32>} : memref<144x226xf32, #tpu.memory_space<vmem>>, vector<16x226xf32>,
    %c0_130 = arith.constant 0 : index
    %c33 = arith.constant 33 : index
    %230 = vector.load %arg23[%c0_130, %c33] : memref<16x260xf32, #tpu.memory_space<vmem>>, vector<16x226xf32>
    %c112_131 = arith.constant 112 : index
    %c0_132 = arith.constant 0 : index
    %231 = vector.load %arg19[%c112_131, %c0_132] : memref<144x226xf32, #tpu.memory_space<vmem>>, vector<16x226xf32>
    tpu.vector_store %arg19[%c112_131, %c0_132], %230 {strides = array<i32>} : memref<144x226xf32, #tpu.memory_space<vmem>>, vector<16x226xf32>,
    %c0_133 = arith.constant 0 : index
    %c34 = arith.constant 34 : index
    %232 = vector.load %arg23[%c0_133, %c34] : memref<16x260xf32, #tpu.memory_space<vmem>>, vector<16x226xf32>
    %c128_134 = arith.constant 128 : index
    %c0_135 = arith.constant 0 : index
    %233 = vector.load %arg19[%c128_134, %c0_135] : memref<144x226xf32, #tpu.memory_space<vmem>>, vector<16x226xf32>
    tpu.vector_store %arg19[%c128_134, %c0_135], %232 {strides = array<i32>} : memref<144x226xf32, #tpu.memory_space<vmem>>, vector<16x226xf32>,
    %c0_136 = arith.constant 0 : index
    %c0_137 = arith.constant 0 : index
    %234 = vector.load %arg19[%c0_136, %c0_137] : memref<144x226xf32, #tpu.memory_space<vmem>>, vector<144x226xf32>
    %cst_138 = arith.constant dense<0.000000e+00> : vector<32x226xf32>
    %235 = tpu.matmul %215, %234, %cst_138 {dimension_numbers = #tpu.dot_dimension_numbers<[1], [0], [0], [1], [0, 0, 1, 1], [], []>} : vector<32x144xf32>, vector<144x226xf32>, vector<32x226xf32> -> vector<32x226xf32>
    %c0_139 = arith.constant 0 : index
    %c0_140 = arith.constant 0 : index
    %236 = vector.load %arg7[%c0_139, %c0_140] : memref<32x1xf32, #tpu.memory_space<vmem>>, vector<32x1xf32>
    %237 = vector.broadcast %236 : vector<32x1xf32> to vector<32x226xf32>
    %238 = arith.addf %235, %237 : vector<32x226xf32>
    %cst_141 = arith.constant 0.000000e+00 : f32
    %239 = vector.broadcast %cst_141 : f32 to vector<32x226xf32>
    %240 = arith.maximumf %238, %239 : vector<32x226xf32>
    %c0_142 = arith.constant 0 : index
    %c0_143 = arith.constant 0 : index
    %241 = vector.load %arg8[%c0_142, %c0_143] : memref<32x288xf32, #tpu.memory_space<vmem>>, vector<32x288xf32>
    %242 = vector.extract_strided_slice %240 {offsets = [0, 0], sizes = [32, 192], strides = [1, 1]} : vector<32x226xf32> to vector<32x192xf32>
    %c0_144 = arith.constant 0 : index
    %c0_145 = arith.constant 0 : index
    %243 = vector.load %arg20[%c0_144, %c0_145] : memref<288x192xf32, #tpu.memory_space<vmem>>, vector<32x192xf32>
    tpu.vector_store %arg20[%c0_144, %c0_145], %242 {strides = array<i32>} : memref<288x192xf32, #tpu.memory_space<vmem>>, vector<32x192xf32>,
    %244 = vector.extract_strided_slice %240 {offsets = [0, 1], sizes = [32, 192], strides = [1, 1]} : vector<32x226xf32> to vector<32x192xf32>
    %c32_146 = arith.constant 32 : index
    %c0_147 = arith.constant 0 : index
    %245 = vector.load %arg20[%c32_146, %c0_147] : memref<288x192xf32, #tpu.memory_space<vmem>>, vector<32x192xf32>
    tpu.vector_store %arg20[%c32_146, %c0_147], %244 {strides = array<i32>} : memref<288x192xf32, #tpu.memory_space<vmem>>, vector<32x192xf32>,
    %246 = vector.extract_strided_slice %240 {offsets = [0, 2], sizes = [32, 192], strides = [1, 1]} : vector<32x226xf32> to vector<32x192xf32>
    %c64_148 = arith.constant 64 : index
    %c0_149 = arith.constant 0 : index
    %247 = vector.load %arg20[%c64_148, %c0_149] : memref<288x192xf32, #tpu.memory_space<vmem>>, vector<32x192xf32>
    tpu.vector_store %arg20[%c64_148, %c0_149], %246 {strides = array<i32>} : memref<288x192xf32, #tpu.memory_space<vmem>>, vector<32x192xf32>,
    %248 = vector.extract_strided_slice %240 {offsets = [0, 16], sizes = [32, 192], strides = [1, 1]} : vector<32x226xf32> to vector<32x192xf32>
    %c96_150 = arith.constant 96 : index
    %c0_151 = arith.constant 0 : index
    %249 = vector.load %arg20[%c96_150, %c0_151] : memref<288x192xf32, #tpu.memory_space<vmem>>, vector<32x192xf32>
    tpu.vector_store %arg20[%c96_150, %c0_151], %248 {strides = array<i32>} : memref<288x192xf32, #tpu.memory_space<vmem>>, vector<32x192xf32>,
    %250 = vector.extract_strided_slice %240 {offsets = [0, 17], sizes = [32, 192], strides = [1, 1]} : vector<32x226xf32> to vector<32x192xf32>
    %c128_152 = arith.constant 128 : index
    %c0_153 = arith.constant 0 : index
    %251 = vector.load %arg20[%c128_152, %c0_153] : memref<288x192xf32, #tpu.memory_space<vmem>>, vector<32x192xf32>
    tpu.vector_store %arg20[%c128_152, %c0_153], %250 {strides = array<i32>} : memref<288x192xf32, #tpu.memory_space<vmem>>, vector<32x192xf32>,
    %252 = vector.extract_strided_slice %240 {offsets = [0, 18], sizes = [32, 192], strides = [1, 1]} : vector<32x226xf32> to vector<32x192xf32>
    %c160_154 = arith.constant 160 : index
    %c0_155 = arith.constant 0 : index
    %253 = vector.load %arg20[%c160_154, %c0_155] : memref<288x192xf32, #tpu.memory_space<vmem>>, vector<32x192xf32>
    tpu.vector_store %arg20[%c160_154, %c0_155], %252 {strides = array<i32>} : memref<288x192xf32, #tpu.memory_space<vmem>>, vector<32x192xf32>,
    %254 = vector.extract_strided_slice %240 {offsets = [0, 32], sizes = [32, 192], strides = [1, 1]} : vector<32x226xf32> to vector<32x192xf32>
    %c192_156 = arith.constant 192 : index
    %c0_157 = arith.constant 0 : index
    %255 = vector.load %arg20[%c192_156, %c0_157] : memref<288x192xf32, #tpu.memory_space<vmem>>, vector<32x192xf32>
    tpu.vector_store %arg20[%c192_156, %c0_157], %254 {strides = array<i32>} : memref<288x192xf32, #tpu.memory_space<vmem>>, vector<32x192xf32>,
    %256 = vector.extract_strided_slice %240 {offsets = [0, 33], sizes = [32, 192], strides = [1, 1]} : vector<32x226xf32> to vector<32x192xf32>
    %c224_158 = arith.constant 224 : index
    %c0_159 = arith.constant 0 : index
    %257 = vector.load %arg20[%c224_158, %c0_159] : memref<288x192xf32, #tpu.memory_space<vmem>>, vector<32x192xf32>
    tpu.vector_store %arg20[%c224_158, %c0_159], %256 {strides = array<i32>} : memref<288x192xf32, #tpu.memory_space<vmem>>, vector<32x192xf32>,
    %258 = vector.extract_strided_slice %240 {offsets = [0, 34], sizes = [32, 192], strides = [1, 1]} : vector<32x226xf32> to vector<32x192xf32>
    %c256_160 = arith.constant 256 : index
    %c0_161 = arith.constant 0 : index
    %259 = vector.load %arg20[%c256_160, %c0_161] : memref<288x192xf32, #tpu.memory_space<vmem>>, vector<32x192xf32>
    tpu.vector_store %arg20[%c256_160, %c0_161], %258 {strides = array<i32>} : memref<288x192xf32, #tpu.memory_space<vmem>>, vector<32x192xf32>,
    %c0_162 = arith.constant 0 : index
    %c0_163 = arith.constant 0 : index
    %260 = vector.load %arg20[%c0_162, %c0_163] : memref<288x192xf32, #tpu.memory_space<vmem>>, vector<288x192xf32>
    %cst_164 = arith.constant dense<0.000000e+00> : vector<32x192xf32>
    %261 = tpu.matmul %241, %260, %cst_164 {dimension_numbers = #tpu.dot_dimension_numbers<[1], [0], [0], [1], [0, 0, 1, 1], [], []>} : vector<32x288xf32>, vector<288x192xf32>, vector<32x192xf32> -> vector<32x192xf32>
    %c0_165 = arith.constant 0 : index
    %c0_166 = arith.constant 0 : index
    %262 = vector.load %arg9[%c0_165, %c0_166] : memref<32x1xf32, #tpu.memory_space<vmem>>, vector<32x1xf32>
    %263 = vector.broadcast %262 : vector<32x1xf32> to vector<32x192xf32>
    %264 = arith.addf %261, %263 : vector<32x192xf32>
    %c0_167 = arith.constant 0 : index
    %c0_168 = arith.constant 0 : index
    %c0_169 = arith.constant 0 : index
    %265 = vector.load %arg15[%c0_167, %c0_168, %c0_169] : memref<1x32x192xf32, #tpu.memory_space<vmem>>, vector<1x32x192xf32>
    %266 = vector.shape_cast %265 : vector<1x32x192xf32> to vector<32x192xf32>
    %267 = vector.shape_cast %264 : vector<32x192xf32> to vector<1x32x192xf32>
    tpu.vector_store %arg15[%c0_167, %c0_168, %c0_169], %267 {strides = array<i32>} : memref<1x32x192xf32, #tpu.memory_space<vmem>>, vector<1x32x192xf32>,
    %268 = tpu.iota {dimensions = array<i32: 0>} : vector<12x6xi32>
    %269 = tpu.iota {dimensions = array<i32: 1>} : vector<12x6xi32>
    %c2_i32_170 = arith.constant 2 : i32
    %270 = vector.broadcast %c2_i32_170 : i32 to vector<12x6xi32>
    %271 = arith.muli %270, %269 : vector<12x6xi32>
    %272 = arith.cmpi eq, %268, %271 : vector<12x6xi32>
    %273 = arith.extui %272 : vector<12x6xi1> to vector<12x6xi32>
    %274 = arith.sitofp %273 : vector<12x6xi32> to vector<12x6xf32>
    %275 = vector.extract_strided_slice %264 {offsets = [0, 0], sizes = [32, 12], strides = [1, 1]} : vector<32x192xf32> to vector<32x12xf32>
    %276 = vector.extract_strided_slice %264 {offsets = [0, 1], sizes = [32, 12], strides = [1, 1]} : vector<32x192xf32> to vector<32x12xf32>
    %277 = arith.maximumf %275, %276 : vector<32x12xf32>
    %278 = vector.extract_strided_slice %264 {offsets = [0, 16], sizes = [32, 12], strides = [1, 1]} : vector<32x192xf32> to vector<32x12xf32>
    %279 = vector.extract_strided_slice %264 {offsets = [0, 17], sizes = [32, 12], strides = [1, 1]} : vector<32x192xf32> to vector<32x12xf32>
    %280 = arith.maximumf %278, %279 : vector<32x12xf32>
    %281 = arith.maximumf %277, %280 : vector<32x12xf32>
    %cst_171 = arith.constant dense<0.000000e+00> : vector<32x6xf32>
    %282 = tpu.matmul %281, %274, %cst_171 {dimension_numbers = #tpu.dot_dimension_numbers<[1], [0], [0], [1], [0, 0, 1, 1], [], []>} : vector<32x12xf32>, vector<12x6xf32>, vector<32x6xf32> -> vector<32x6xf32>
    %c0_172 = arith.constant 0 : index
    %c0_173 = arith.constant 0 : index
    %283 = vector.load %arg24[%c0_172, %c0_173] : memref<32x40xf32, #tpu.memory_space<vmem>>, vector<32x6xf32>
    tpu.vector_store %arg24[%c0_172, %c0_173], %282 {strides = array<i32>} : memref<32x40xf32, #tpu.memory_space<vmem>>, vector<32x6xf32>,
    %284 = vector.extract_strided_slice %264 {offsets = [0, 32], sizes = [32, 12], strides = [1, 1]} : vector<32x192xf32> to vector<32x12xf32>
    %285 = vector.extract_strided_slice %264 {offsets = [0, 33], sizes = [32, 12], strides = [1, 1]} : vector<32x192xf32> to vector<32x12xf32>
    %286 = arith.maximumf %284, %285 : vector<32x12xf32>
    %287 = vector.extract_strided_slice %264 {offsets = [0, 48], sizes = [32, 12], strides = [1, 1]} : vector<32x192xf32> to vector<32x12xf32>
    %288 = vector.extract_strided_slice %264 {offsets = [0, 49], sizes = [32, 12], strides = [1, 1]} : vector<32x192xf32> to vector<32x12xf32>
    %289 = arith.maximumf %287, %288 : vector<32x12xf32>
    %290 = arith.maximumf %286, %289 : vector<32x12xf32>
    %cst_174 = arith.constant dense<0.000000e+00> : vector<32x6xf32>
    %291 = tpu.matmul %290, %274, %cst_174 {dimension_numbers = #tpu.dot_dimension_numbers<[1], [0], [0], [1], [0, 0, 1, 1], [], []>} : vector<32x12xf32>, vector<12x6xf32>, vector<32x6xf32> -> vector<32x6xf32>
    %c0_175 = arith.constant 0 : index
    %c6 = arith.constant 6 : index
    %292 = vector.load %arg24[%c0_175, %c6] : memref<32x40xf32, #tpu.memory_space<vmem>>, vector<32x6xf32>
    tpu.vector_store %arg24[%c0_175, %c6], %291 {strides = array<i32>} : memref<32x40xf32, #tpu.memory_space<vmem>>, vector<32x6xf32>,
    %293 = vector.extract_strided_slice %264 {offsets = [0, 64], sizes = [32, 12], strides = [1, 1]} : vector<32x192xf32> to vector<32x12xf32>
    %294 = vector.extract_strided_slice %264 {offsets = [0, 65], sizes = [32, 12], strides = [1, 1]} : vector<32x192xf32> to vector<32x12xf32>
    %295 = arith.maximumf %293, %294 : vector<32x12xf32>
    %296 = vector.extract_strided_slice %264 {offsets = [0, 80], sizes = [32, 12], strides = [1, 1]} : vector<32x192xf32> to vector<32x12xf32>
    %297 = vector.extract_strided_slice %264 {offsets = [0, 81], sizes = [32, 12], strides = [1, 1]} : vector<32x192xf32> to vector<32x12xf32>
    %298 = arith.maximumf %296, %297 : vector<32x12xf32>
    %299 = arith.maximumf %295, %298 : vector<32x12xf32>
    %cst_176 = arith.constant dense<0.000000e+00> : vector<32x6xf32>
    %300 = tpu.matmul %299, %274, %cst_176 {dimension_numbers = #tpu.dot_dimension_numbers<[1], [0], [0], [1], [0, 0, 1, 1], [], []>} : vector<32x12xf32>, vector<12x6xf32>, vector<32x6xf32> -> vector<32x6xf32>
    %c0_177 = arith.constant 0 : index
    %c12 = arith.constant 12 : index
    %301 = vector.load %arg24[%c0_177, %c12] : memref<32x40xf32, #tpu.memory_space<vmem>>, vector<32x6xf32>
    tpu.vector_store %arg24[%c0_177, %c12], %300 {strides = array<i32>} : memref<32x40xf32, #tpu.memory_space<vmem>>, vector<32x6xf32>,
    %302 = vector.extract_strided_slice %264 {offsets = [0, 96], sizes = [32, 12], strides = [1, 1]} : vector<32x192xf32> to vector<32x12xf32>
    %303 = vector.extract_strided_slice %264 {offsets = [0, 97], sizes = [32, 12], strides = [1, 1]} : vector<32x192xf32> to vector<32x12xf32>
    %304 = arith.maximumf %302, %303 : vector<32x12xf32>
    %305 = vector.extract_strided_slice %264 {offsets = [0, 112], sizes = [32, 12], strides = [1, 1]} : vector<32x192xf32> to vector<32x12xf32>
    %306 = vector.extract_strided_slice %264 {offsets = [0, 113], sizes = [32, 12], strides = [1, 1]} : vector<32x192xf32> to vector<32x12xf32>
    %307 = arith.maximumf %305, %306 : vector<32x12xf32>
    %308 = arith.maximumf %304, %307 : vector<32x12xf32>
    %cst_178 = arith.constant dense<0.000000e+00> : vector<32x6xf32>
    %309 = tpu.matmul %308, %274, %cst_178 {dimension_numbers = #tpu.dot_dimension_numbers<[1], [0], [0], [1], [0, 0, 1, 1], [], []>} : vector<32x12xf32>, vector<12x6xf32>, vector<32x6xf32> -> vector<32x6xf32>
    %c0_179 = arith.constant 0 : index
    %c18_180 = arith.constant 18 : index
    %310 = vector.load %arg24[%c0_179, %c18_180] : memref<32x40xf32, #tpu.memory_space<vmem>>, vector<32x6xf32>
    tpu.vector_store %arg24[%c0_179, %c18_180], %309 {strides = array<i32>} : memref<32x40xf32, #tpu.memory_space<vmem>>, vector<32x6xf32>,
    %311 = vector.extract_strided_slice %264 {offsets = [0, 128], sizes = [32, 12], strides = [1, 1]} : vector<32x192xf32> to vector<32x12xf32>
    %312 = vector.extract_strided_slice %264 {offsets = [0, 129], sizes = [32, 12], strides = [1, 1]} : vector<32x192xf32> to vector<32x12xf32>
    %313 = arith.maximumf %311, %312 : vector<32x12xf32>
    %314 = vector.extract_strided_slice %264 {offsets = [0, 144], sizes = [32, 12], strides = [1, 1]} : vector<32x192xf32> to vector<32x12xf32>
    %315 = vector.extract_strided_slice %264 {offsets = [0, 145], sizes = [32, 12], strides = [1, 1]} : vector<32x192xf32> to vector<32x12xf32>
    %316 = arith.maximumf %314, %315 : vector<32x12xf32>
    %317 = arith.maximumf %313, %316 : vector<32x12xf32>
    %cst_181 = arith.constant dense<0.000000e+00> : vector<32x6xf32>
    %318 = tpu.matmul %317, %274, %cst_181 {dimension_numbers = #tpu.dot_dimension_numbers<[1], [0], [0], [1], [0, 0, 1, 1], [], []>} : vector<32x12xf32>, vector<12x6xf32>, vector<32x6xf32> -> vector<32x6xf32>
    %c0_182 = arith.constant 0 : index
    %c24_183 = arith.constant 24 : index
    %319 = vector.load %arg24[%c0_182, %c24_183] : memref<32x40xf32, #tpu.memory_space<vmem>>, vector<32x6xf32>
    tpu.vector_store %arg24[%c0_182, %c24_183], %318 {strides = array<i32>} : memref<32x40xf32, #tpu.memory_space<vmem>>, vector<32x6xf32>,
    %320 = vector.extract_strided_slice %264 {offsets = [0, 160], sizes = [32, 12], strides = [1, 1]} : vector<32x192xf32> to vector<32x12xf32>
    %321 = vector.extract_strided_slice %264 {offsets = [0, 161], sizes = [32, 12], strides = [1, 1]} : vector<32x192xf32> to vector<32x12xf32>
    %322 = arith.maximumf %320, %321 : vector<32x12xf32>
    %323 = vector.extract_strided_slice %264 {offsets = [0, 176], sizes = [32, 12], strides = [1, 1]} : vector<32x192xf32> to vector<32x12xf32>
    %324 = vector.extract_strided_slice %264 {offsets = [0, 177], sizes = [32, 12], strides = [1, 1]} : vector<32x192xf32> to vector<32x12xf32>
    %325 = arith.maximumf %323, %324 : vector<32x12xf32>
    %326 = arith.maximumf %322, %325 : vector<32x12xf32>
    %cst_184 = arith.constant dense<0.000000e+00> : vector<32x6xf32>
    %327 = tpu.matmul %326, %274, %cst_184 {dimension_numbers = #tpu.dot_dimension_numbers<[1], [0], [0], [1], [0, 0, 1, 1], [], []>} : vector<32x12xf32>, vector<12x6xf32>, vector<32x6xf32> -> vector<32x6xf32>
    %c0_185 = arith.constant 0 : index
    %c30 = arith.constant 30 : index
    %328 = vector.load %arg24[%c0_185, %c30] : memref<32x40xf32, #tpu.memory_space<vmem>>, vector<32x6xf32>
    tpu.vector_store %arg24[%c0_185, %c30], %327 {strides = array<i32>} : memref<32x40xf32, #tpu.memory_space<vmem>>, vector<32x6xf32>,
    %cst_186 = arith.constant 0.000000e+00 : f32
    %329 = vector.broadcast %cst_186 : f32 to vector<32x4xf32>
    %c0_187 = arith.constant 0 : index
    %c36_188 = arith.constant 36 : index
    %330 = vector.load %arg24[%c0_187, %c36_188] : memref<32x40xf32, #tpu.memory_space<vmem>>, vector<32x4xf32>
    tpu.vector_store %arg24[%c0_187, %c36_188], %329 {strides = array<i32>} : memref<32x40xf32, #tpu.memory_space<vmem>>, vector<32x4xf32>,
    %c0_189 = arith.constant 0 : index
    %c0_190 = arith.constant 0 : index
    %331 = vector.load %arg10[%c0_189, %c0_190] : memref<64x288xf32, #tpu.memory_space<vmem>>, vector<64x288xf32>
    %c0_191 = arith.constant 0 : index
    %c0_192 = arith.constant 0 : index
    %332 = vector.load %arg24[%c0_191, %c0_192] : memref<32x40xf32, #tpu.memory_space<vmem>>, vector<32x26xf32>
    %c0_193 = arith.constant 0 : index
    %c0_194 = arith.constant 0 : index
    %333 = vector.load %arg21[%c0_193, %c0_194] : memref<288x26xf32, #tpu.memory_space<vmem>>, vector<32x26xf32>
    tpu.vector_store %arg21[%c0_193, %c0_194], %332 {strides = array<i32>} : memref<288x26xf32, #tpu.memory_space<vmem>>, vector<32x26xf32>,
    %c0_195 = arith.constant 0 : index
    %c1_196 = arith.constant 1 : index
    %334 = vector.load %arg24[%c0_195, %c1_196] : memref<32x40xf32, #tpu.memory_space<vmem>>, vector<32x26xf32>
    %c32_197 = arith.constant 32 : index
    %c0_198 = arith.constant 0 : index
    %335 = vector.load %arg21[%c32_197, %c0_198] : memref<288x26xf32, #tpu.memory_space<vmem>>, vector<32x26xf32>
    tpu.vector_store %arg21[%c32_197, %c0_198], %334 {strides = array<i32>} : memref<288x26xf32, #tpu.memory_space<vmem>>, vector<32x26xf32>,
    %c0_199 = arith.constant 0 : index
    %c2_200 = arith.constant 2 : index
    %336 = vector.load %arg24[%c0_199, %c2_200] : memref<32x40xf32, #tpu.memory_space<vmem>>, vector<32x26xf32>
    %c64_201 = arith.constant 64 : index
    %c0_202 = arith.constant 0 : index
    %337 = vector.load %arg21[%c64_201, %c0_202] : memref<288x26xf32, #tpu.memory_space<vmem>>, vector<32x26xf32>
    tpu.vector_store %arg21[%c64_201, %c0_202], %336 {strides = array<i32>} : memref<288x26xf32, #tpu.memory_space<vmem>>, vector<32x26xf32>,
    %c0_203 = arith.constant 0 : index
    %c6_204 = arith.constant 6 : index
    %338 = vector.load %arg24[%c0_203, %c6_204] : memref<32x40xf32, #tpu.memory_space<vmem>>, vector<32x26xf32>
    %c96_205 = arith.constant 96 : index
    %c0_206 = arith.constant 0 : index
    %339 = vector.load %arg21[%c96_205, %c0_206] : memref<288x26xf32, #tpu.memory_space<vmem>>, vector<32x26xf32>
    tpu.vector_store %arg21[%c96_205, %c0_206], %338 {strides = array<i32>} : memref<288x26xf32, #tpu.memory_space<vmem>>, vector<32x26xf32>,
    %c0_207 = arith.constant 0 : index
    %c7 = arith.constant 7 : index
    %340 = vector.load %arg24[%c0_207, %c7] : memref<32x40xf32, #tpu.memory_space<vmem>>, vector<32x26xf32>
    %c128_208 = arith.constant 128 : index
    %c0_209 = arith.constant 0 : index
    %341 = vector.load %arg21[%c128_208, %c0_209] : memref<288x26xf32, #tpu.memory_space<vmem>>, vector<32x26xf32>
    tpu.vector_store %arg21[%c128_208, %c0_209], %340 {strides = array<i32>} : memref<288x26xf32, #tpu.memory_space<vmem>>, vector<32x26xf32>,
    %c0_210 = arith.constant 0 : index
    %c8_211 = arith.constant 8 : index
    %342 = vector.load %arg24[%c0_210, %c8_211] : memref<32x40xf32, #tpu.memory_space<vmem>>, vector<32x26xf32>
    %c160_212 = arith.constant 160 : index
    %c0_213 = arith.constant 0 : index
    %343 = vector.load %arg21[%c160_212, %c0_213] : memref<288x26xf32, #tpu.memory_space<vmem>>, vector<32x26xf32>
    tpu.vector_store %arg21[%c160_212, %c0_213], %342 {strides = array<i32>} : memref<288x26xf32, #tpu.memory_space<vmem>>, vector<32x26xf32>,
    %c0_214 = arith.constant 0 : index
    %c12_215 = arith.constant 12 : index
    %344 = vector.load %arg24[%c0_214, %c12_215] : memref<32x40xf32, #tpu.memory_space<vmem>>, vector<32x26xf32>
    %c192_216 = arith.constant 192 : index
    %c0_217 = arith.constant 0 : index
    %345 = vector.load %arg21[%c192_216, %c0_217] : memref<288x26xf32, #tpu.memory_space<vmem>>, vector<32x26xf32>
    tpu.vector_store %arg21[%c192_216, %c0_217], %344 {strides = array<i32>} : memref<288x26xf32, #tpu.memory_space<vmem>>, vector<32x26xf32>,
    %c0_218 = arith.constant 0 : index
    %c13 = arith.constant 13 : index
    %346 = vector.load %arg24[%c0_218, %c13] : memref<32x40xf32, #tpu.memory_space<vmem>>, vector<32x26xf32>
    %c224_219 = arith.constant 224 : index
    %c0_220 = arith.constant 0 : index
    %347 = vector.load %arg21[%c224_219, %c0_220] : memref<288x26xf32, #tpu.memory_space<vmem>>, vector<32x26xf32>
    tpu.vector_store %arg21[%c224_219, %c0_220], %346 {strides = array<i32>} : memref<288x26xf32, #tpu.memory_space<vmem>>, vector<32x26xf32>,
    %c0_221 = arith.constant 0 : index
    %c14 = arith.constant 14 : index
    %348 = vector.load %arg24[%c0_221, %c14] : memref<32x40xf32, #tpu.memory_space<vmem>>, vector<32x26xf32>
    %c256_222 = arith.constant 256 : index
    %c0_223 = arith.constant 0 : index
    %349 = vector.load %arg21[%c256_222, %c0_223] : memref<288x26xf32, #tpu.memory_space<vmem>>, vector<32x26xf32>
    tpu.vector_store %arg21[%c256_222, %c0_223], %348 {strides = array<i32>} : memref<288x26xf32, #tpu.memory_space<vmem>>, vector<32x26xf32>,
    %c0_224 = arith.constant 0 : index
    %c0_225 = arith.constant 0 : index
    %350 = vector.load %arg21[%c0_224, %c0_225] : memref<288x26xf32, #tpu.memory_space<vmem>>, vector<288x26xf32>
    %cst_226 = arith.constant dense<0.000000e+00> : vector<64x26xf32>
    %351 = tpu.matmul %331, %350, %cst_226 {dimension_numbers = #tpu.dot_dimension_numbers<[1], [0], [0], [1], [0, 0, 1, 1], [], []>} : vector<64x288xf32>, vector<288x26xf32>, vector<64x26xf32> -> vector<64x26xf32>
    %c0_227 = arith.constant 0 : index
    %c0_228 = arith.constant 0 : index
    %352 = vector.load %arg11[%c0_227, %c0_228] : memref<64x1xf32, #tpu.memory_space<vmem>>, vector<64x1xf32>
    %353 = vector.broadcast %352 : vector<64x1xf32> to vector<64x26xf32>
    %354 = arith.addf %351, %353 : vector<64x26xf32>
    %cst_229 = arith.constant 0.000000e+00 : f32
    %355 = vector.broadcast %cst_229 : f32 to vector<64x26xf32>
    %356 = arith.maximumf %354, %355 : vector<64x26xf32>
    %c0_230 = arith.constant 0 : index
    %c0_231 = arith.constant 0 : index
    %357 = vector.load %arg12[%c0_230, %c0_231] : memref<64x576xf32, #tpu.memory_space<vmem>>, vector<64x576xf32>
    %358 = vector.extract_strided_slice %356 {offsets = [0, 0], sizes = [64, 12], strides = [1, 1]} : vector<64x26xf32> to vector<64x12xf32>
    %c0_232 = arith.constant 0 : index
    %c0_233 = arith.constant 0 : index
    %359 = vector.load %arg22[%c0_232, %c0_233] : memref<576x12xf32, #tpu.memory_space<vmem>>, vector<64x12xf32>
    tpu.vector_store %arg22[%c0_232, %c0_233], %358 {strides = array<i32>} : memref<576x12xf32, #tpu.memory_space<vmem>>, vector<64x12xf32>,
    %360 = vector.extract_strided_slice %356 {offsets = [0, 1], sizes = [64, 12], strides = [1, 1]} : vector<64x26xf32> to vector<64x12xf32>
    %c64_234 = arith.constant 64 : index
    %c0_235 = arith.constant 0 : index
    %361 = vector.load %arg22[%c64_234, %c0_235] : memref<576x12xf32, #tpu.memory_space<vmem>>, vector<64x12xf32>
    tpu.vector_store %arg22[%c64_234, %c0_235], %360 {strides = array<i32>} : memref<576x12xf32, #tpu.memory_space<vmem>>, vector<64x12xf32>,
    %362 = vector.extract_strided_slice %356 {offsets = [0, 2], sizes = [64, 12], strides = [1, 1]} : vector<64x26xf32> to vector<64x12xf32>
    %c128_236 = arith.constant 128 : index
    %c0_237 = arith.constant 0 : index
    %363 = vector.load %arg22[%c128_236, %c0_237] : memref<576x12xf32, #tpu.memory_space<vmem>>, vector<64x12xf32>
    tpu.vector_store %arg22[%c128_236, %c0_237], %362 {strides = array<i32>} : memref<576x12xf32, #tpu.memory_space<vmem>>, vector<64x12xf32>,
    %364 = vector.extract_strided_slice %356 {offsets = [0, 6], sizes = [64, 12], strides = [1, 1]} : vector<64x26xf32> to vector<64x12xf32>
    %c192_238 = arith.constant 192 : index
    %c0_239 = arith.constant 0 : index
    %365 = vector.load %arg22[%c192_238, %c0_239] : memref<576x12xf32, #tpu.memory_space<vmem>>, vector<64x12xf32>
    tpu.vector_store %arg22[%c192_238, %c0_239], %364 {strides = array<i32>} : memref<576x12xf32, #tpu.memory_space<vmem>>, vector<64x12xf32>,
    %366 = vector.extract_strided_slice %356 {offsets = [0, 7], sizes = [64, 12], strides = [1, 1]} : vector<64x26xf32> to vector<64x12xf32>
    %c256_240 = arith.constant 256 : index
    %c0_241 = arith.constant 0 : index
    %367 = vector.load %arg22[%c256_240, %c0_241] : memref<576x12xf32, #tpu.memory_space<vmem>>, vector<64x12xf32>
    tpu.vector_store %arg22[%c256_240, %c0_241], %366 {strides = array<i32>} : memref<576x12xf32, #tpu.memory_space<vmem>>, vector<64x12xf32>,
    %368 = vector.extract_strided_slice %356 {offsets = [0, 8], sizes = [64, 12], strides = [1, 1]} : vector<64x26xf32> to vector<64x12xf32>
    %c320 = arith.constant 320 : index
    %c0_242 = arith.constant 0 : index
    %369 = vector.load %arg22[%c320, %c0_242] : memref<576x12xf32, #tpu.memory_space<vmem>>, vector<64x12xf32>
    tpu.vector_store %arg22[%c320, %c0_242], %368 {strides = array<i32>} : memref<576x12xf32, #tpu.memory_space<vmem>>, vector<64x12xf32>,
    %370 = vector.extract_strided_slice %356 {offsets = [0, 12], sizes = [64, 12], strides = [1, 1]} : vector<64x26xf32> to vector<64x12xf32>
    %c384 = arith.constant 384 : index
    %c0_243 = arith.constant 0 : index
    %371 = vector.load %arg22[%c384, %c0_243] : memref<576x12xf32, #tpu.memory_space<vmem>>, vector<64x12xf32>
    tpu.vector_store %arg22[%c384, %c0_243], %370 {strides = array<i32>} : memref<576x12xf32, #tpu.memory_space<vmem>>, vector<64x12xf32>,
    %372 = vector.extract_strided_slice %356 {offsets = [0, 13], sizes = [64, 12], strides = [1, 1]} : vector<64x26xf32> to vector<64x12xf32>
    %c448 = arith.constant 448 : index
    %c0_244 = arith.constant 0 : index
    %373 = vector.load %arg22[%c448, %c0_244] : memref<576x12xf32, #tpu.memory_space<vmem>>, vector<64x12xf32>
    tpu.vector_store %arg22[%c448, %c0_244], %372 {strides = array<i32>} : memref<576x12xf32, #tpu.memory_space<vmem>>, vector<64x12xf32>,
    %374 = vector.extract_strided_slice %356 {offsets = [0, 14], sizes = [64, 12], strides = [1, 1]} : vector<64x26xf32> to vector<64x12xf32>
    %c512 = arith.constant 512 : index
    %c0_245 = arith.constant 0 : index
    %375 = vector.load %arg22[%c512, %c0_245] : memref<576x12xf32, #tpu.memory_space<vmem>>, vector<64x12xf32>
    tpu.vector_store %arg22[%c512, %c0_245], %374 {strides = array<i32>} : memref<576x12xf32, #tpu.memory_space<vmem>>, vector<64x12xf32>,
    %c0_246 = arith.constant 0 : index
    %c0_247 = arith.constant 0 : index
    %376 = vector.load %arg22[%c0_246, %c0_247] : memref<576x12xf32, #tpu.memory_space<vmem>>, vector<576x12xf32>
    %cst_248 = arith.constant dense<0.000000e+00> : vector<64x12xf32>
    %377 = tpu.matmul %357, %376, %cst_248 {dimension_numbers = #tpu.dot_dimension_numbers<[1], [0], [0], [1], [0, 0, 1, 1], [], []>} : vector<64x576xf32>, vector<576x12xf32>, vector<64x12xf32> -> vector<64x12xf32>
    %c0_249 = arith.constant 0 : index
    %c0_250 = arith.constant 0 : index
    %378 = vector.load %arg13[%c0_249, %c0_250] : memref<64x1xf32, #tpu.memory_space<vmem>>, vector<64x1xf32>
    %379 = vector.broadcast %378 : vector<64x1xf32> to vector<64x12xf32>
    %380 = arith.addf %377, %379 : vector<64x12xf32>
    %c0_251 = arith.constant 0 : index
    %c0_252 = arith.constant 0 : index
    %c0_253 = arith.constant 0 : index
    %381 = vector.load %arg16[%c0_251, %c0_252, %c0_253] : memref<1x64x12xf32, #tpu.memory_space<vmem>>, vector<1x64x12xf32>
    %382 = vector.shape_cast %381 : vector<1x64x12xf32> to vector<64x12xf32>
    %383 = vector.shape_cast %380 : vector<64x12xf32> to vector<1x64x12xf32>
    tpu.vector_store %arg16[%c0_251, %c0_252, %c0_253], %383 {strides = array<i32>} : memref<1x64x12xf32, #tpu.memory_space<vmem>>, vector<1x64x12xf32>,
    return
  }
  func.func @transform_0(%arg0: i32) -> (i32, i32, i32) {
    %c0_i32 = arith.constant 0 : i32
    %c0_i32_0 = arith.constant 0 : i32
    %c0_i32_1 = arith.constant 0 : i32
    return %arg0, %c0_i32, %c0_i32_0 : i32, i32, i32
  }
  func.func @transform_1(%arg0: i32) -> (i32, i32) {
    %c0_i32 = arith.constant 0 : i32
    %c0_i32_0 = arith.constant 0 : i32
    %c0_i32_1 = arith.constant 0 : i32
    return %c0_i32, %c0_i32_0 : i32, i32
  }
  func.func @transform_2(%arg0: i32) -> (i32, i32) {
    %c0_i32 = arith.constant 0 : i32
    %c0_i32_0 = arith.constant 0 : i32
    %c0_i32_1 = arith.constant 0 : i32
    return %c0_i32, %c0_i32_0 : i32, i32
  }
  func.func @transform_3(%arg0: i32) -> (i32, i32) {
    %c0_i32 = arith.constant 0 : i32
    %c0_i32_0 = arith.constant 0 : i32
    %c0_i32_1 = arith.constant 0 : i32
    return %c0_i32, %c0_i32_0 : i32, i32
  }
  func.func @transform_4(%arg0: i32) -> (i32, i32) {
    %c0_i32 = arith.constant 0 : i32
    %c0_i32_0 = arith.constant 0 : i32
    %c0_i32_1 = arith.constant 0 : i32
    return %c0_i32, %c0_i32_0 : i32, i32
  }
  func.func @transform_5(%arg0: i32) -> (i32, i32) {
    %c0_i32 = arith.constant 0 : i32
    %c0_i32_0 = arith.constant 0 : i32
    %c0_i32_1 = arith.constant 0 : i32
    return %c0_i32, %c0_i32_0 : i32, i32
  }
  func.func @transform_6(%arg0: i32) -> (i32, i32) {
    %c0_i32 = arith.constant 0 : i32
    %c0_i32_0 = arith.constant 0 : i32
    %c0_i32_1 = arith.constant 0 : i32
    return %c0_i32, %c0_i32_0 : i32, i32
  }
  func.func @transform_7(%arg0: i32) -> (i32, i32) {
    %c0_i32 = arith.constant 0 : i32
    %c0_i32_0 = arith.constant 0 : i32
    %c0_i32_1 = arith.constant 0 : i32
    return %c0_i32, %c0_i32_0 : i32, i32
  }
  func.func @transform_8(%arg0: i32) -> (i32, i32) {
    %c0_i32 = arith.constant 0 : i32
    %c0_i32_0 = arith.constant 0 : i32
    %c0_i32_1 = arith.constant 0 : i32
    return %c0_i32, %c0_i32_0 : i32, i32
  }
  func.func @transform_9(%arg0: i32) -> (i32, i32) {
    %c0_i32 = arith.constant 0 : i32
    %c0_i32_0 = arith.constant 0 : i32
    %c0_i32_1 = arith.constant 0 : i32
    return %c0_i32, %c0_i32_0 : i32, i32
  }
  func.func @transform_10(%arg0: i32) -> (i32, i32) {
    %c0_i32 = arith.constant 0 : i32
    %c0_i32_0 = arith.constant 0 : i32
    %c0_i32_1 = arith.constant 0 : i32
    return %c0_i32, %c0_i32_0 : i32, i32
  }
  func.func @transform_11(%arg0: i32) -> (i32, i32) {
    %c0_i32 = arith.constant 0 : i32
    %c0_i32_0 = arith.constant 0 : i32
    %c0_i32_1 = arith.constant 0 : i32
    return %c0_i32, %c0_i32_0 : i32, i32
  }
  func.func @transform_12(%arg0: i32) -> (i32, i32) {
    %c0_i32 = arith.constant 0 : i32
    %c0_i32_0 = arith.constant 0 : i32
    %c0_i32_1 = arith.constant 0 : i32
    return %c0_i32, %c0_i32_0 : i32, i32
  }
  func.func @transform_13(%arg0: i32) -> (i32, i32, i32) {
    %c0_i32 = arith.constant 0 : i32
    %c0_i32_0 = arith.constant 0 : i32
    %c0_i32_1 = arith.constant 0 : i32
    return %arg0, %c0_i32, %c0_i32_0 : i32, i32, i32
  }
  func.func @transform_14(%arg0: i32) -> (i32, i32, i32) {
    %c0_i32 = arith.constant 0 : i32
    %c0_i32_0 = arith.constant 0 : i32
    %c0_i32_1 = arith.constant 0 : i32
    return %arg0, %c0_i32, %c0_i32_0 : i32, i32, i32
  }
  func.func @transform_15(%arg0: i32) -> (i32, i32, i32) {
    %c0_i32 = arith.constant 0 : i32
    %c0_i32_0 = arith.constant 0 : i32
    %c0_i32_1 = arith.constant 0 : i32
    return %arg0, %c0_i32, %c0_i32_0 : i32, i32, i32
  }
}

</mosaic_0001>

<bundles_post_ra>
// kernel: encoder_forward.1
= control target key start
LH: loop header
LB: loop body
LE: loop exit
PB: predicated region body
PF: predicated region fallthrough
CT: control target
= control target key end

     0   :  { %s7472_s18 = smov 0   ;;  %s10920_s0 = inlined_call_operand.vmem [shape: f32[2,8,1300], index: 0, kind: input, shape index: {}]   ;;  %s10921_s1 = inlined_call_operand.vmem [shape: f32[16,72], index: 1, kind: input, shape index: {}]   ;;  %s10922_s2 = inlined_call_operand.vmem [shape: f32[16,1], index: 2, kind: input, shape index: {}]   ;;  %s10923_s3 = inlined_call_operand.vmem [shape: f32[16,144], index: 3, kind: input, shape index: {}]   ;;  %s10924_s4 = inlined_call_operand.vmem [shape: f32[16,1], index: 4, kind: input, shape index: {}]   ;;  %s10925_s5 = inlined_call_operand.vmem [shape: f32[32,144], index: 5, kind: input, shape index: {}]   ;;  %s10926_s6 = inlined_call_operand.vmem [shape: f32[32,1], index: 6, kind: input, shape index: {}]   ;;  %s10927_s7 = inlined_call_operand.vmem [shape: f32[32,288], index: 7, kind: input, shape index: {}]   ;;  %s10928_s8 = inlined_call_operand.vmem [shape: f32[32,1], index: 8, kind: input, shape index: {}]   ;;  %s10929_s9 = inlined_call_operand.vmem [shape: f32[64,288], index: 9, kind: input, shape index: {}]   ;;  %s10930_s10 = inlined_call_operand.vmem [shape: f32[64,1], index: 10, kind: input, shape index: {}]   ;;  %s10931_s11 = inlined_call_operand.vmem [shape: f32[64,576], index: 11, kind: input, shape index: {}]   ;;  %s10932_s12 = inlined_call_operand.vmem [shape: f32[64,1], index: 12, kind: input, shape index: {}]   ;;  %s10933_s13 = inlined_call_operand.vmem [shape: f32[2,16,1152], index: 13, kind: output, shape index: {0}]   ;;  %s10934_s14 = inlined_call_operand.vmem [shape: f32[2,32,192], index: 14, kind: output, shape index: {1}]   ;;  %s10935_s15 = inlined_call_operand.vmem [shape: f32[2,64,12], index: 15, kind: output, shape index: {2}]  }
   0x1 LB: > { %s6669_s19 = sadd.s32 4294967295, %s7352_s18   ;;  %p6673_p0 = scmp.ge.s32.totalorder %s7352_s18, 1  ;;  %s7352_s18 = sphi %s7472_s18, %s26_s18  }
   0x2   : > { %p442_p1 = scmp.lt.s32.totalorder %s7352_s18, 3 }
   0x4   : > { %p443_p2 = pnand %p6673_p0, %p442_p1 }
   0x5   : > { %p500_p3 = scmp.lt.s32.totalorder (!%p443_p2), %s6669_s19, 1  ;;  %s7354_s24 = smov (!%p443_p2), 54  }
   0x6   : > { %446 = sbr.rel (%p443_p2) target bundleno = 3668 (0xe54), region = 72  ;;  %s7355_s25 = smov (!%p443_p2), 55  }
   0x7   : > { %s7356_s26 = smov (!%p443_p2), 56   ;;  %s7357_s27 = smov (!%p443_p2), 90  }
   0x8   : > { %s7358_s28 = smov (!%p443_p2), 91   ;;  %s7359_s29 = smov (!%p443_p2), 92  }
   0x9   : > { %s10977_s30 = smov (!%p443_p2), 126   ;;  %s7361_s16 = smov (!%p443_p2), 127  }
   0xa   : > { %s10970_s21 = smov (!%p443_p2), 112   ;;  %s7365_s22 = smov (!%p443_p2), 96  }
   0xb   : > { %s11027_s19 = smov (!%p500_p3, %s6669_s19), 1  ;;  %vm1012_vm0 = vcmask 449536   ;;  %vm1087_vm1 = vcmask 441344   ;;  %vm937_vm2 = vcmask 457728   ;;  %vm863_vm3 = vcmask 736256   ;;  %v7702_v57 = vld [vmem:[%s10921_s1] sm:$0xff] }
   0xc   : > { %s6892_s20 = smul.u32 88, %s11027_s19  ;;  %vm793_vm4 = vcmask 744448   ;;  %vm723_vm5 = vcmask 752640   ;;  %vm653_vm6 = vcmask 1031168   ;;  %vm583_vm7 = vcmask 1039360   ;;  %s7373_s17 = smov 16  }
   0xd   : > { %vm1220_vm8 = vcmask 588800   ;;  %vm541_vm9 = vcmask 605184   ;;  %vm2445_vm10 = vcmask 130048   ;;  %vm2924_vm15 = vcmask 261120  }
   0xe   : > { %s7486_s23 = scalar_lea.vmem %s10920_s0, %s6892_s20  ;;  %s6893_s20 = smul.u32 144, %s11027_s19 }
   0xf   : > { %v7489_v0 = vld [vmem:[%s7486_s23 + $0x10] sm:$0xff]  ;;  %v7492_v1 = vld [vmem:[%s7486_s23] sm:$0xff]  ;;  %v7495_v2 = vld [vmem:[%s7486_s23 + $0x8] sm:$0xff] }
  0x10   : > { %1069 = vrot.lane.b32.xlu1 %v7489_v0, %s7354_s24  ;;  %1065 = vrot.lane.b32.xlu0 %v7492_v1, %s7354_s24  ;;  %v7516_v3 = vld [vmem:[%s7486_s23 + $0x18] sm:$0xff]  ;;  %v7535_v4 = vld [vmem:[%s7486_s23 + $0x20] sm:$0xff] }
  0x11   : > { %992 = vrot.lane.b32.xlu2 %v7495_v2, %s7355_s25  ;;  %v7556_v5 = vld [vmem:[%s7486_s23 + $0x28] sm:$0xff]  ;;  %v7571_v6 = vld [vmem:[%s7486_s23 + $0x30] sm:$0xff]  ;;  %v7592_v10 = vld [vmem:[%s7486_s23 + $0x38] sm:$0xff] }
  0x12   : > { %v7627_v21 = vld [vmem:[%s7486_s23 + $0x40] sm:$0xff]  ;;  %v7711_v62 = vld [vmem:[%s7486_s23 + $0x48] sm:$0xff] }
  0x13   : > { %542 = vst.msk [vmem:[#allocation2 + $0x48] sm:$0xff] %vm541_vm9, %v7711_v62 }
  0x18   : > { %1067 = vrot.lane.b32.xlu0 %v7495_v2, %s7354_s24  ;;  %990 = vrot.lane.b32.xlu1 %v7492_v1, %s7355_s25 }
  0x19   : > { %994 = vrot.lane.b32.xlu2 %v7489_v0, %s7355_s25 }
  0x20   : > { %917 = vrot.lane.b32.xlu1 %v7495_v2, %s7356_s26  ;;  %915 = vrot.lane.b32.xlu0 %v7492_v1, %s7356_s26 }
  0x21   : > { %919 = vrot.lane.b32.xlu2 %v7489_v0, %s7356_s26 }
  0x28   : > { %845 = vrot.lane.b32.xlu1 %v7495_v2, %s7357_s27  ;;  %843 = vrot.lane.b32.xlu0 %v7492_v1, %s7357_s27 }
  0x29   : > { %847 = vrot.lane.b32.xlu2 %v7489_v0, %s7357_s27 }
  0x30   : > { %775 = vrot.lane.b32.xlu1 %v7495_v2, %s7358_s28  ;;  %773 = vrot.lane.b32.xlu0 %v7492_v1, %s7358_s28 }
  0x31   : > { %777 = vrot.lane.b32.xlu2 %v7489_v0, %s7358_s28 }
  0x38   : > { %705 = vrot.lane.b32.xlu1 %v7495_v2, %s7359_s29  ;;  %703 = vrot.lane.b32.xlu0 %v7492_v1, %s7359_s29 }
  0x39   : > { %707 = vrot.lane.b32.xlu2 %v7489_v0, %s7359_s29 }
  0x40   : > { %635 = vrot.lane.b32.xlu1 %v7495_v2, %s10977_s30  ;;  %633 = vrot.lane.b32.xlu0 %v7492_v1, %s10977_s30 }
  0x41   : > { %637 = vrot.lane.b32.xlu2 %v7489_v0, %s10977_s30 }
  0x48   : > { %1071 = vrot.lane.b32.xlu0 %v7516_v3, %s7354_s24  ;;  %563 = vrot.lane.b32.xlu1 %v7492_v1, %s7361_s16 }
  0x49   : > { %565 = vrot.lane.b32.xlu2 %v7495_v2, %s7361_s16 }
  0x50   : > { %567 = vrot.lane.b32.xlu0 %v7489_v0, %s7361_s16  ;;  %996 = vrot.lane.b32.xlu1 %v7516_v3, %s7355_s25 }
  0x51   : > { %921 = vrot.lane.b32.xlu2 %v7516_v3, %s7356_s26 }
  0x58   : > { %849 = vrot.lane.b32.xlu0 %v7516_v3, %s7357_s27  ;;  %1073 = vrot.lane.b32.xlu1 %v7535_v4, %s7354_s24 }
  0x59   : > { %779 = vrot.lane.b32.xlu2 %v7516_v3, %s7358_s28 }
  0x60   : > { %998 = vrot.lane.b32.xlu0 %v7535_v4, %s7355_s25  ;;  %709 = vrot.lane.b32.xlu1 %v7516_v3, %s7359_s29 }
  0x61   : > { %923 = vrot.lane.b32.xlu2 %v7535_v4, %s7356_s26 }
  0x68   : > { %639 = vrot.lane.b32.xlu0 %v7516_v3, %s10977_s30  ;;  %851 = vrot.lane.b32.xlu1 %v7535_v4, %s7357_s27 }
  0x69   : > { %569 = vrot.lane.b32.xlu2 %v7516_v3, %s7361_s16 }
  0x6b   : > { %v993_v7 = vpop.permute.xlu2 %992 }
  0x70   : > { %781 = vrot.lane.b32.xlu0 %v7535_v4, %s7358_s28  ;;  %711 = vrot.lane.b32.xlu1 %v7535_v4, %s7359_s29 }
  0x71   : > { %1075 = vrot.lane.b32.xlu2 %v7556_v5, %s7354_s24 }
  0x73   : > { %v7587_v8 = vpop.permute.xlu2 %994 }
  0x74   : > { %v1014_v9 = vsel %vm1012_vm0, %v993_v7, %v7587_v8 }
  0x78   : > { %641 = vrot.lane.b32.xlu0 %v7535_v4, %s10977_s30  ;;  %1000 = vrot.lane.b32.xlu1 %v7556_v5, %s7355_s25 }
  0x79   : > { %571 = vrot.lane.b32.xlu2 %v7535_v4, %s7361_s16 }
  0x7b   : > { %v7600_v11 = vpop.permute.xlu2 %919 }
  0x80   : > { %925 = vrot.lane.b32.xlu0 %v7556_v5, %s7356_s26  ;;  %853 = vrot.lane.b32.xlu1 %v7556_v5, %s7357_s27 }
  0x81   : > { %1077 = vrot.lane.b32.xlu2 %v7571_v6, %s7354_s24 }
  0x82   : > { %v7608_v12 = vpop.permute.xlu1 %1069  ;;  %v1066_v13 = vpop.permute.xlu0 %1065 }
  0x83   : > { %v7610_v14 = vpop.permute.xlu2 %847 }
  0x88   : > { %783 = vrot.lane.b32.xlu0 %v7556_v5, %s7358_s28  ;;  %1002 = vrot.lane.b32.xlu1 %v7571_v6, %s7355_s25 }
  0x89   : > { %713 = vrot.lane.b32.xlu2 %v7556_v5, %s7359_s29 }
  0x8a   : > { %v1068_v15 = vpop.permute.xlu0 %1067  ;;  %v991_v16 = vpop.permute.xlu1 %990 }
  0x8b   : > { %v1088_v17 = vsel %vm1087_vm1, %v1066_v13, %v1068_v15  ;;  %v1089_v18 = vsel %vm1087_vm1, %v1068_v15, %v7608_v12  ;;  %v1013_v19 = vsel %vm1012_vm0, %v991_v16, %v993_v7  ;;  %v778_v20 = vpop.permute.xlu2 %777  ;;  %v7725_v7 = vld [vmem:[%s10921_s1 + $0x8] sm:$0xff] }
  0x8c   : > { %1234 = vmatpush.msra.mxu0 %v1088_v17  ;;  %1257 = vmatpush.msra.mxu1 %v1089_v18 }
  0x8e   : > { %1235 = vmatpush.msra.mxu0 %v1013_v19  ;;  %1258 = vmatpush.msra.mxu1 %v1014_v9  ;;  %v978_v19 = vld [vmem:[%s7486_s23 + $0x50] sm:$0xff]  ;;  %s7369_s23 = smov 80  }
  0x90   : > { %927 = vrot.lane.b32.xlu0 %v7571_v6, %s7356_s26  ;;  %643 = vrot.lane.b32.xlu1 %v7556_v5, %s10977_s30 }
  0x91   : > { %855 = vrot.lane.b32.xlu2 %v7571_v6, %s7357_s27 }
  0x92   : > { %v918_v22 = vpop.permute.xlu1 %917  ;;  %v916_v23 = vpop.permute.xlu0 %915 }
  0x93   : > { %v939_v24 = vsel %vm937_vm2, %v918_v22, %v7600_v11  ;;  %v938_v25 = vsel %vm937_vm2, %v916_v23, %v918_v22  ;;  %v7634_v26 = vpop.permute.xlu2 %707 }
  0x94   : > { %1236 = vmatpush.msra.mxu0 %v938_v25  ;;  %1259 = vmatpush.msra.mxu1 %v939_v24 }
  0x98   : > { %1079 = vrot.lane.b32.xlu0 %v7592_v10, %s7354_s24  ;;  %573 = vrot.lane.b32.xlu1 %v7556_v5, %s7361_s16 }
  0x99   : > { %785 = vrot.lane.b32.xlu2 %v7571_v6, %s7358_s28 }
  0x9a   : > { %v846_v27 = vpop.permute.xlu1 %845  ;;  %v844_v28 = vpop.permute.xlu0 %843 }
  0x9b   : > { %v865_v29 = vsel %vm863_vm3, %v846_v27, %v7610_v14  ;;  %v864_v30 = vsel %vm863_vm3, %v844_v28, %v846_v27  ;;  %v7645_v31 = vpop.permute.xlu2 %637 }
  0x9c   : > { %1237 = vmatpush.msra.mxu0 %v864_v30  ;;  %1260 = vmatpush.msra.mxu1 %v865_v29 }
  0xa0   : > { %1004 = vrot.lane.b32.xlu0 %v7592_v10, %s7355_s25  ;;  %715 = vrot.lane.b32.xlu1 %v7571_v6, %s7359_s29 }
  0xa1   : > { %929 = vrot.lane.b32.xlu2 %v7592_v10, %s7356_s26 }
  0xa2   : > { %v776_v32 = vpop.permute.xlu1 %775  ;;  %v774_v33 = vpop.permute.xlu0 %773 }
  0xa3   : > { %v795_v34 = vsel %vm793_vm4, %v776_v32, %v778_v20  ;;  %v794_v35 = vsel %vm793_vm4, %v774_v33, %v776_v32  ;;  %v566_v36 = vpop.permute.xlu2 %565 }
  0xa4   : > { %1238 = vmatpush.msra.mxu0 %v794_v35  ;;  %1261 = vmatpush.msra.mxu1 %v795_v34 }
  0xa8   : > { %645 = vrot.lane.b32.xlu0 %v7571_v6, %s10977_s30  ;;  %857 = vrot.lane.b32.xlu1 %v7592_v10, %s7357_s27 }
  0xa9   : > { %575 = vrot.lane.b32.xlu2 %v7571_v6, %s7361_s16 }
  0xaa   : > { %v706_v37 = vpop.permute.xlu1 %705  ;;  %v704_v38 = vpop.permute.xlu0 %703 }
  0xab   : > { %v725_v39 = vsel %vm723_vm5, %v706_v37, %v7634_v26  ;;  %v724_v40 = vsel %vm723_vm5, %v704_v38, %v706_v37  ;;  %v922_v41 = vpop.permute.xlu2 %921  ;;  %v1208_v37 = vld [vmem:[%s10922_s2] sm:$0xff]  ;;  %v1209_v38 = vld [vmem:[%s10922_s2 + $0x8] sm:$0xff] }
  0xac   : > { %v940_v42 = vsel %vm937_vm2, %v7600_v11, %v922_v41  ;;  %1239 = vmatpush.msra.mxu0 %v724_v40  ;;  %1262 = vmatpush.msra.mxu1 %v725_v39 }
  0xb0   : > { %787 = vrot.lane.b32.xlu0 %v7592_v10, %s7358_s28  ;;  %717 = vrot.lane.b32.xlu1 %v7592_v10, %s7359_s29 }
  0xb1   : > { %1081 = vrot.lane.b32.xlu2 %v7627_v21, %s7354_s24 }
  0xb2   : > { %v636_v43 = vpop.permute.xlu1 %635  ;;  %v634_v44 = vpop.permute.xlu0 %633 }
  0xb3   : > { %v655_v45 = vsel %vm653_vm6, %v636_v43, %v7645_v31  ;;  %v654_v46 = vsel %vm653_vm6, %v634_v44, %v636_v43  ;;  %v7675_v47 = vpop.permute.xlu2 %779 }
  0xb4   : > { %v796_v48 = vsel %vm793_vm4, %v778_v20, %v7675_v47  ;;  %1240 = vmatpush.msra.mxu0 %v654_v46  ;;  %1263 = vmatpush.msra.mxu1 %v655_v45 }
  0xb8   : > { %647 = vrot.lane.b32.xlu0 %v7592_v10, %s10977_s30  ;;  %1006 = vrot.lane.b32.xlu1 %v7627_v21, %s7355_s25 }
  0xb9   : > { %577 = vrot.lane.b32.xlu2 %v7592_v10, %s7361_s16 }
  0xba   : > { %v1072_v49 = vpop.permute.xlu0 %1071  ;;  %v564_v50 = vpop.permute.xlu1 %563 }
  0xbb   : > { %v1090_v51 = vsel %vm1087_vm1, %v7608_v12, %v1072_v49  ;;  %v7687_v52 = vpop.permute.xlu2 %923  ;;  %v584_v53 = vsel %vm583_vm7, %v564_v50, %v566_v36  ;;  %v7362_v12 = vmov 0  }
  0xbc   : > { %v941_v54 = vsel %vm937_vm2, %v922_v41, %v7687_v52  ;;  %1241 = vmatpush.msra.mxu0 %v584_v53  ;;  %1280 = vmatpush.msra.mxu2 %v1090_v51 }
  0xbd   : > { %6941 = vset.pattern.permute.xlu0 %v7362_v12  ;;  %6940 = vset.pattern.permute.xlu2 %v7362_v12 }
  0xbe   : > { %1242 = vmatpush.msra.mxu0 %v7492_v1  ;;  %7342 = vset.pattern.permute.xlu1 %v7362_v12 }
  0xbf   : > { %6680 = vmatmul.msk.f32.vlgmr.msra.gmra.mxu0 %vm1220_vm8, %v7702_v57 }
  0xc0   : > { %931 = vrot.lane.b32.xlu0 %v7627_v21, %s7356_s26  ;;  %859 = vrot.lane.b32.xlu1 %v7627_v21, %s7357_s27 }
  0xc1   : > { %789 = vrot.lane.b32.xlu2 %v7627_v21, %s7358_s28 }
  0xc2   : > { %v568_v55 = vpop.permute.xlu0 %567  ;;  %v997_v56 = vpop.permute.xlu1 %996 }
  0xc3   : > { %v585_v58 = vsel %vm583_vm7, %v566_v36, %v568_v55  ;;  %v570_v59 = vpop.permute.xlu2 %569  ;;  %v1015_v60 = vsel %vm1012_vm0, %v7587_v8, %v997_v56 }
  0xc4   : > { %v586_v61 = vsel %vm583_vm7, %v568_v55, %v570_v59  ;;  %1264 = vmatpush.msra.mxu1 %v585_v58  ;;  %1281 = vmatpush.msra.mxu2 %v1015_v60 }
  0xc6   : > { %1282 = vmatpush.msra.mxu2 %v940_v42  ;;  %1265 = vmatpush.msra.mxu1 %v7495_v2 }
  0xc7   : > { %6682 = vmatmul.msk.f32.vlgmr.msra.gmra.mxu1 %vm1220_vm8, %v7702_v57  ;;  %6681 = vmatmul.msk.f32.gmra.mxu0 %vm1220_vm8, %v7725_v7 }
  0xc8   : > { %1083 = vrot.lane.b32.xlu0 %v7711_v62, %s7354_s24  ;;  %719 = vrot.lane.b32.xlu1 %v7627_v21, %s7359_s29 }
  0xc9   : > { %1008 = vrot.lane.b32.xlu2 %v7711_v62, %s7355_s25 }
  0xca   : > { %v850_v63 = vpop.permute.xlu0 %849  ;;  %v1074_v1 = vpop.permute.xlu1 %1073 }
  0xcb   : > { %v866_v2 = vsel %vm863_vm3, %v7610_v14, %v850_v63  ;;  %v1076_v8 = vpop.permute.xlu2 %1075  ;;  %v1091_v9 = vsel %vm1087_vm1, %v1072_v49, %v1074_v1 }
  0xcc   : > { %v1092_v11 = vsel %vm1087_vm1, %v1074_v1, %v1076_v8  ;;  %1283 = vmatpush.msra.mxu2 %v866_v2  ;;  %1303 = vmatpush.msra.mxu3 %v1091_v9 }
  0xcd   : > { %1326 = vmatpush.msrb.mxu0 %v1092_v11 }
  0xce   : > { %1284 = vmatpush.msra.mxu2 %v796_v48 }
  0xcf   : > { %6683 = vmatmul.msk.f32.gmra.mxu1 %vm1220_vm8, %v7725_v7 }
  0xd0   : > { %649 = vrot.lane.b32.xlu0 %v7627_v21, %s10977_s30  ;;  %933 = vrot.lane.b32.xlu1 %v7711_v62, %s7356_s26 }
  0xd1   : > { %579 = vrot.lane.b32.xlu2 %v7627_v21, %s7361_s16 }
  0xd2   : > { %v999_v13 = vpop.permute.xlu0 %998  ;;  %v710_v14 = vpop.permute.xlu1 %709 }
  0xd3   : > { %v1016_v15 = vsel %vm1012_vm0, %v997_v56, %v999_v13  ;;  %v7742_v16 = vpop.permute.xlu2 %571  ;;  %v726_v17 = vsel %vm723_vm5, %v7634_v26, %v710_v14 }
  0xd4   : > { %v587_v18 = vsel %vm583_vm7, %v570_v59, %v7742_v16  ;;  %1285 = vmatpush.msra.mxu2 %v726_v17  ;;  %1304 = vmatpush.msra.mxu3 %v1016_v15 }
  0xd6   : > { %1305 = vmatpush.msra.mxu3 %v941_v54 }
  0xd8   : > { %861 = vrot.lane.b32.xlu0 %v7711_v62, %s7357_s27  ;;  %791 = vrot.lane.b32.xlu1 %v7711_v62, %s7358_s28 }
  0xd9   : > { %1085 = vrot.lane.b32.xlu2 %v978_v19, %s7354_s24 }
  0xda   : > { %v640_v20 = vpop.permute.xlu0 %639  ;;  %v852_v22 = vpop.permute.xlu1 %851 }
  0xdb   : > { %v656_v23 = vsel %vm653_vm6, %v7645_v31, %v640_v20  ;;  %v7756_v24 = vpop.permute.xlu2 %1077  ;;  %v867_v25 = vsel %vm863_vm3, %v850_v63, %v852_v22 }
  0xdc   : > { %v1093_v26 = vsel %vm1087_vm1, %v1076_v8, %v7756_v24  ;;  %1286 = vmatpush.msra.mxu2 %v656_v23  ;;  %1306 = vmatpush.msra.mxu3 %v867_v25 }
  0xdd   : > { %1349 = vmatpush.msrb.mxu1 %v1093_v26 }
  0xde   : > { %1287 = vmatpush.msra.mxu2 %v586_v61 }
  0xe0   : > { %721 = vrot.lane.b32.xlu0 %v7711_v62, %s7359_s29  ;;  %1010 = vrot.lane.b32.xlu1 %v978_v19, %s7355_s25 }
  0xe1   : > { %1288 = vmatpush.msra.mxu2 %v7489_v0  ;;  %651 = vrot.lane.b32.xlu2 %v7711_v62, %s10977_s30 }
  0xe2   : > { %v782_v27 = vpop.permute.xlu0 %781  ;;  %v712_v28 = vpop.permute.xlu1 %711  ;;  %6684 = vmatmul.msk.f32.vlgmr.msra.gmra.mxu2 %vm1220_vm8, %v7702_v57 }
  0xe3   : > { %v797_v29 = vsel %vm793_vm4, %v7675_v47, %v782_v27  ;;  %v7771_v30 = vpop.permute.xlu2 %713  ;;  %v727_v31 = vsel %vm723_vm5, %v710_v14, %v712_v28 }
  0xe4   : > { %v728_v32 = vsel %vm723_vm5, %v712_v28, %v7771_v30  ;;  %1307 = vmatpush.msra.mxu3 %v797_v29 }
  0xe6   : > { %1308 = vmatpush.msra.mxu3 %v727_v31 }
  0xe8   : > { %935 = vrot.lane.b32.xlu0 %v978_v19, %s7356_s26  ;;  %581 = vrot.lane.b32.xlu1 %v7711_v62, %s7361_s16 }
  0xe9   : > { %1217 = vperm.xlu2 %6940, %v1209_v38  }
  0xea   : > { %v642_v0 = vpop.permute.xlu0 %641  ;;  %v1001_v33 = vpop.permute.xlu1 %1000  ;;  %6685 = vmatmul.msk.f32.gmra.mxu2 %vm1220_vm8, %v7725_v7 }
  0xeb   : > { %v657_v34 = vsel %vm653_vm6, %v640_v20, %v642_v0  ;;  %v1017_v35 = vsel %vm1012_vm0, %v999_v13, %v1001_v33  ;;  %v7783_v36 = vpop.permute.xlu2 %855 }
  0xec   : > { %1309 = vmatpush.msra.mxu3 %v657_v34  ;;  %1327 = vmatpush.msrb.mxu0 %v1017_v35 }
  0xee   : > { %1310 = vmatpush.msra.mxu3 %v587_v18 }
  0xf0   : > { %1212 = vperm.xlu0 %6941, %v1208_v37   ;;  %1311 = vmatpush.msra.mxu3 %v7516_v3 }
  0xf1   : > { %6686 = vmatmul.msk.f32.vlgmr.msra.gmra.mxu3 %vm1220_vm8, %v7702_v57 }
  0xf2   : > { %v926_v39 = vpop.permute.xlu0 %925  ;;  %v854_v40 = vpop.permute.xlu1 %853 }
  0xf3   : > { %v942_v41 = vsel %vm937_vm2, %v7687_v52, %v926_v39  ;;  %v868_v42 = vsel %vm863_vm3, %v852_v22, %v854_v40  ;;  %v869_v43 = vsel %vm863_vm3, %v854_v40, %v7783_v36  ;;  %v786_v44 = vpop.permute.xlu2 %785 }
  0xf4   : > { %1328 = vmatpush.msrb.mxu0 %v942_v41 }
  0xf6   : > { %1329 = vmatpush.msrb.mxu0 %v868_v42 }
  0xf9   : > { %6687 = vmatmul.msk.f32.gmra.mxu3 %vm1220_vm8, %v7725_v7 }
  0xfa   : > { %v784_v3 = vpop.permute.xlu0 %783  ;;  %v1003_v45 = vpop.permute.xlu1 %1002 }
  0xfb   : > { %v798_v46 = vsel %vm793_vm4, %v782_v27, %v784_v3  ;;  %v799_v47 = vsel %vm793_vm4, %v784_v3, %v786_v44  ;;  %v1018_v48 = vsel %vm1012_vm0, %v1001_v33, %v1003_v45  ;;  %v7804_v49 = vpop.permute.xlu2 %929 }
  0xfc   : > { %1330 = vmatpush.msrb.mxu0 %v798_v46  ;;  %1350 = vmatpush.msrb.mxu1 %v1018_v48 }
  0xfe   : > { %1331 = vmatpush.msrb.mxu0 %v728_v32 }
 0x102   : > { %v928_v50 = vpop.permute.xlu0 %927  ;;  %v644_v51 = vpop.permute.xlu1 %643 }
 0x103   : > { %v943_v52 = vsel %vm937_vm2, %v926_v39, %v928_v50  ;;  %v944_v53 = vsel %vm937_vm2, %v928_v50, %v7804_v49  ;;  %v658_v54 = vsel %vm653_vm6, %v642_v0, %v644_v51  ;;  %v576_v55 = vpop.permute.xlu2 %575 }
 0x104   : > { %1332 = vmatpush.msrb.mxu0 %v658_v54  ;;  %1351 = vmatpush.msrb.mxu1 %v943_v52 }
 0x106   : > { %1352 = vmatpush.msrb.mxu1 %v869_v43 }
 0x108   : > { %1353 = vmatpush.msrb.mxu1 %v799_v47 }
 0x10a   : > { %v1080_v56 = vpop.permute.xlu0 %1079  ;;  %v574_v58 = vpop.permute.xlu1 %573 }
 0x10b   : > { %v1094_v59 = vsel %vm1087_vm1, %v7756_v24, %v1080_v56  ;;  %v588_v60 = vsel %vm583_vm7, %v7742_v16, %v574_v58  ;;  %v589_v61 = vsel %vm583_vm7, %v574_v58, %v576_v55  ;;  %v1082_v63 = vpop.permute.xlu2 %1081 }
 0x10c   : > { %v1095_v1 = vsel %vm1087_vm1, %v1080_v56, %v1082_v63  ;;  %1333 = vmatpush.msrb.mxu0 %v588_v60  ;;  %1372 = vmatpush.msrb.mxu2 %v1094_v59 }
 0x10d   : > { %1395 = vmatpush.msrb.mxu3 %v1095_v1 }
 0x10e   : > { %1334 = vmatpush.msrb.mxu0 %v7535_v4 }
 0x10f   : > { %6688 = vmatmul.msk.f32.vlgmr.msrb.gmra.mxu0 %vm1220_vm8, %v7702_v57 }
 0x112   : > { %v1005_v2 = vpop.permute.xlu0 %1004  ;;  %v716_v8 = vpop.permute.xlu1 %715 }
 0x113   : > { %v1019_v9 = vsel %vm1012_vm0, %v1003_v45, %v1005_v2  ;;  %v729_v11 = vsel %vm723_vm5, %v7771_v30, %v716_v8  ;;  %v578_v12 = vpop.permute.xlu2 %577 }
 0x114   : > { %v590_v13 = vsel %vm583_vm7, %v576_v55, %v578_v12  ;;  %1354 = vmatpush.msrb.mxu1 %v729_v11  ;;  %1373 = vmatpush.msrb.mxu2 %v1019_v9 }
 0x116   : > { %1374 = vmatpush.msrb.mxu2 %v944_v53 }
 0x117   : > { %6689 = vmatmul.msk.f32.gmra.mxu0 %vm1220_vm8, %v7725_v7 }
 0x11a   : > { %v646_v4 = vpop.permute.xlu0 %645  ;;  %v858_v14 = vpop.permute.xlu1 %857 }
 0x11b   : > { %v659_v15 = vsel %vm653_vm6, %v644_v51, %v646_v4  ;;  %v870_v16 = vsel %vm863_vm3, %v7783_v36, %v858_v14  ;;  %v7828_v17 = vpop.permute.xlu2 %789 }
 0x11c   : > { %1355 = vmatpush.msrb.mxu1 %v659_v15  ;;  %1375 = vmatpush.msrb.mxu2 %v870_v16 }
 0x11e   : > { %1356 = vmatpush.msrb.mxu1 %v589_v61 }
 0x120   : > { %1357 = vmatpush.msrb.mxu1 %v7556_v5 }
 0x121   : > { %6690 = vmatmul.msk.f32.vlgmr.msrb.gmra.mxu1 %vm1220_vm8, %v7702_v57 }
 0x122   : > { %v788_v18 = vpop.permute.xlu0 %787  ;;  %v718_v19 = vpop.permute.xlu1 %717 }
 0x123   : > { %v800_v20 = vsel %vm793_vm4, %v786_v44, %v788_v18  ;;  %v801_v22 = vsel %vm793_vm4, %v788_v18, %v7828_v17  ;;  %v730_v23 = vsel %vm723_vm5, %v716_v8, %v718_v19  ;;  %v1009_v24 = vpop.permute.xlu2 %1008 }
 0x124   : > { %1376 = vmatpush.msrb.mxu2 %v800_v20 }
 0x126   : > { %1377 = vmatpush.msrb.mxu2 %v730_v23 }
 0x129   : > { %6691 = vmatmul.msk.f32.gmra.mxu1 %vm1220_vm8, %v7725_v7 }
 0x12a   : > { %v648_v62 = vpop.permute.xlu0 %647  ;;  %v1007_v5 = vpop.permute.xlu1 %1006 }
 0x12b   : > { %v660_v25 = vsel %vm653_vm6, %v646_v4, %v648_v62  ;;  %v1020_v26 = vsel %vm1012_vm0, %v1005_v2, %v1007_v5  ;;  %v1021_v27 = vsel %vm1012_vm0, %v1007_v5, %v1009_v24  ;;  %v580_v28 = vpop.permute.xlu2 %579 }
 0x12c   : > { %v591_v29 = vsel %vm583_vm7, %v578_v12, %v580_v28  ;;  %1378 = vmatpush.msrb.mxu2 %v660_v25  ;;  %1396 = vmatpush.msrb.mxu3 %v1020_v26 }
 0x12e   : > { %1379 = vmatpush.msrb.mxu2 %v590_v13 }
 0x130   : > { %1380 = vmatpush.msrb.mxu2 %v7571_v6 }
 0x131   : > { %6692 = vmatmul.msk.f32.vlgmr.msrb.gmra.mxu2 %vm1220_vm8, %v7702_v57 }
 0x132   : > { %v932_v30 = vpop.permute.xlu0 %931  ;;  %v860_v31 = vpop.permute.xlu1 %859 }
 0x133   : > { %v945_v32 = vsel %vm937_vm2, %v7804_v49, %v932_v30  ;;  %v871_v0 = vsel %vm863_vm3, %v858_v14, %v860_v31  ;;  %v1086_v33 = vpop.permute.xlu2 %1085 }
 0x134   : > { %1397 = vmatpush.msrb.mxu3 %v945_v32 }
 0x136   : > { %1398 = vmatpush.msrb.mxu3 %v871_v0 }
 0x138   : > { %1399 = vmatpush.msrb.mxu3 %v801_v22  ;;  %v1127_v22 = vld [vmem:[#allocation2 + $0x48] sm:$0xff] }
 0x139   : > { %6693 = vmatmul.msk.f32.gmra.mxu2 %vm1220_vm8, %v7725_v7 }
 0x13a   : > { %v1084_v34 = vpop.permute.xlu0 %1083  ;;  %v720_v35 = vpop.permute.xlu1 %719 }
 0x13b   : > { %v1096_v6 = vsel %vm1087_vm1, %v1082_v63, %v1084_v34  ;;  %v731_v36 = vsel %vm723_vm5, %v718_v19, %v720_v35  ;;  %v1097_v37 = vsel %vm1087_vm1, %v1084_v34, %v1086_v33  ;;  %v652_v38 = vpop.permute.xlu2 %651 }
 0x13c   : > { %1400 = vmatpush.msrb.mxu3 %v731_v36  ;;  %1418 = vmatpush.msra.mxu0 %v1096_v6  ;;  %1117 = vst.msk [vmem:[#allocation2 + $0x2c8] sm:$0xff] %vm541_vm9, %v1097_v37  ;;  %v1244_v51 = vpop.f32.mrf.mxu0 }
 0x13d   : > { %682 = vst.msk [vmem:[#allocation2 + $0xe8] sm:$0xff] %vm541_vm9, %v652_v38 }
 0x13e   : > { %1419 = vmatpush.msra.mxu0 %v1021_v27 }
 0x142   : > { %v650_v39 = vpop.permute.xlu0 %649  ;;  %v934_v40 = vpop.permute.xlu1 %933 }
 0x143   : > { %v661_v41 = vsel %vm653_vm6, %v648_v62, %v650_v39  ;;  %v946_v42 = vsel %vm937_vm2, %v932_v30, %v934_v40  ;;  %v662_v43 = vsel %vm653_vm6, %v650_v39, %v652_v38  ;;  %v1207_v44 = vld [vmem:[#allocation2 + $0x2c8] sm:$0xff]  ;;  %v7884_v60 = vpop.permute.xlu2 %1217 }
 0x144   : > { %1401 = vmatpush.msrb.mxu3 %v661_v41  ;;  %1420 = vmatpush.msra.mxu0 %v946_v42  ;;  %v1267_v52 = vpop.f32.mrf.mxu1  ;;  %v1247_v2 = vpop.f32.mrf.mxu0  ;;  %v1147_v19 = vld [vmem:[#allocation2 + $0xe8] sm:$0xff] }
 0x145   : > { %1441 = vmatpush.msra.mxu1 %v1207_v44  ;;  %v7895_v12 = vadd.f32 %v1247_v2, %v7884_v60 }
 0x146   : > { %1402 = vmatpush.msrb.mxu3 %v591_v29 }
 0x147   : > { %v1467_v16 = vmax.f32 %v7895_v12, 0.0 }
 0x148   : > { %1403 = vmatpush.msrb.mxu3 %v7592_v10 }
 0x149   : > { %6694 = vmatmul.msk.f32.vlgmr.msrb.gmra.mxu3 %vm1220_vm8, %v7702_v57 }
 0x14a   : > { %v862_v3 = vpop.permute.xlu0 %861  ;;  %v792_v45 = vpop.permute.xlu1 %791 }
 0x14b   : > { %v872_v46 = vsel %vm863_vm3, %v860_v31, %v862_v3  ;;  %892 = vst.msk [vmem:[#allocation2 + $0x1d8] sm:$0xff] %vm541_vm9, %v862_v3  ;;  %v802_v47 = vsel %vm793_vm4, %v7828_v17, %v792_v45 }
 0x14c   : > { %1421 = vmatpush.msra.mxu0 %v872_v46  ;;  %822 = vst.msk [vmem:[#allocation2 + $0x188] sm:$0xff] %vm541_vm9, %v792_v45  ;;  %v1270_v8 = vpop.f32.mrf.mxu1 }
 0x14d   : > { %v7898_v13 = vadd.f32 %v1270_v8, %v7884_v60 }
 0x14e   : > { %1422 = vmatpush.msra.mxu0 %v802_v47 }
 0x14f   : > { %v10951_v17 = vmax.f32 %v7898_v13, 0.0 }
 0x151   : > { %6695 = vmatmul.msk.f32.gmra.mxu3 %vm1220_vm8, %v7725_v7  ;;  %v6982_v23 = vpack.i.bf16 %v10951_v17, %v1467_v16 }
 0x152   : > { %v722_v10 = vpop.permute.xlu0 %721  ;;  %v1011_v48 = vpop.permute.xlu1 %1010  ;;  %v1177_v11 = vld [vmem:[#allocation2 + $0x1d8] sm:$0xff] }
 0x153   : > { %v732_v49 = vsel %vm723_vm5, %v720_v35, %v722_v10  ;;  %752 = vst.msk [vmem:[#allocation2 + $0x138] sm:$0xff] %vm541_vm9, %v722_v10  ;;  %v1022_v50 = vsel %vm1012_vm0, %v1009_v24, %v1011_v48  ;;  %v1167_v4 = vld [vmem:[#allocation2 + $0x188] sm:$0xff] }
 0x154   : > { %1423 = vmatpush.msra.mxu0 %v732_v49  ;;  %1042 = vst.msk [vmem:[#allocation2 + $0x278] sm:$0xff] %vm541_vm9, %v1022_v50 }
 0x156   : > { %1424 = vmatpush.msra.mxu0 %v662_v43 }
 0x15a   : > { %v936_v53 = vpop.permute.xlu0 %935  ;;  %v582_v54 = vpop.permute.xlu1 %581  ;;  %v1157_v15 = vld [vmem:[#allocation2 + $0x138] sm:$0xff] }
 0x15b   : > { %v947_v55 = vsel %vm937_vm2, %v934_v40, %v936_v53  ;;  %v592_v56 = vsel %vm583_vm7, %v580_v28, %v582_v54  ;;  %612 = vst.msk [vmem:[#allocation2 + $0x98] sm:$0xff] %vm541_vm9, %v582_v54  ;;  %v1197_v58 = vld [vmem:[#allocation2 + $0x278] sm:$0xff] }
 0x15c   : > { %967 = vst.msk [vmem:[#allocation2 + $0x228] sm:$0xff] %vm541_vm9, %v947_v55  ;;  %1425 = vmatpush.msra.mxu0 %v592_v56  ;;  %1442 = vmatpush.msra.mxu1 %v1197_v58  ;;  %vm3286_vm9 = vcmask 786048  }
 0x15e   : > { %1426 = vmatpush.msra.mxu0 %v7627_v21 }
 0x15f   : > { %6696 = vmatmul.msk.f32.vlgmr.msra.gmra.mxu0 %vm1220_vm8, %v7702_v57 }
 0x162   : > { %v7882_v59 = vpop.permute.xlu0 %1212  ;;  %v1137_v20 = vld [vmem:[#allocation2 + $0x98] sm:$0xff] }
 0x163   : > { %v7887_v61 = vadd.f32 %v1244_v51, %v7882_v59  ;;  %v7890_v63 = vadd.f32 %v1267_v52, %v7882_v59  ;;  %v1187_v1 = vld [vmem:[#allocation2 + $0x228] sm:$0xff] }
 0x164   : > { %1443 = vmatpush.msra.mxu1 %v1187_v1 }
 0x165   : > { %v1457_v9 = vmax.f32 %v7887_v61, 0.0  ;;  %v10950_v21 = vmax.f32 %v7890_v63, 0.0  ;;  %v1290_v18 = vpop.f32.mrf.mxu2 }
 0x166   : > { %1444 = vmatpush.msra.mxu1 %v1177_v11  ;;  %v7924_v5 = vadd.f32 %v1290_v18, %v7882_v59 }
 0x167   : > { %v6957_v14 = vpack.i.bf16 %v10950_v21, %v1457_v9  ;;  %6697 = vmatmul.msk.f32.gmra.mxu0 %vm1220_vm8, %v7725_v7 }
 0x168   : > { %1445 = vmatpush.msra.mxu1 %v1167_v4  ;;  %v10947_v26 = vmax.f32 %v7924_v5, 0.0 }
 0x169   : > { %6958 = vrot.lane.b32.xlu0 %v6957_v14, %s7358_s28  ;;  %6953 = vrot.lane.b32.xlu1 %v6957_v14, %s7357_s27 }
 0x16a   : > { %6943 = vrot.lane.b32.xlu2 %v6957_v14, %s7355_s25  ;;  %1446 = vmatpush.msra.mxu1 %v1157_v15 }
 0x16c   : > { %1447 = vmatpush.msra.mxu1 %v1147_v19 }
 0x16d   : > { %v1293_v24 = vpop.f32.mrf.mxu2 }
 0x16e   : > { %1448 = vmatpush.msra.mxu1 %v1137_v20  ;;  %v7921_v62 = vadd.f32 %v1293_v24, %v7884_v60 }
 0x170   : > { %1449 = vmatpush.msra.mxu1 %v1127_v22  ;;  %v10949_v25 = vmax.f32 %v7921_v62, 0.0 }
 0x171   : > { %6698 = vmatmul.msk.f32.vlgmr.msra.gmra.mxu1 %vm1220_vm8, %v7702_v57  ;;  %6973 = vrot.lane.b32.xlu0 %v6957_v14, %s7361_s16 }
 0x172   : > { %6983 = vrot.lane.b32.xlu1 %v6982_v23, %s7355_s25  ;;  %6948 = vrot.lane.b32.xlu2 %v6957_v14, %s7356_s26  ;;  %v7022_v27 = vpack.i.bf16 %v10947_v26, %v10949_v25 }
 0x174   : > { %v1313_v57 = vpop.f32.mrf.mxu3 }
 0x175   : > { %v7944_v29 = vadd.f32 %v1313_v57, %v7882_v59 }
 0x177   : > { %v10946_v32 = vmax.f32 %v7944_v29, 0.0 }
 0x179   : > { %6699 = vmatmul.msk.f32.gmra.mxu1 %vm1220_vm8, %v7725_v7  ;;  %6993 = vrot.lane.b32.xlu0 %v6982_v23, %s7357_s27  ;;  %vm3205_vm8 = vcmask 654848  }
 0x17a   : > { %6988 = vrot.lane.b32.xlu1 %v6982_v23, %s7356_s26  ;;  %6963 = vrot.lane.b32.xlu2 %v6957_v14, %s7359_s29 }
 0x17c   : > { %v1316_v7 = vpop.f32.mrf.mxu3 }
 0x17d   : > { %v7941_v28 = vadd.f32 %v1316_v7, %v7884_v60 }
 0x17f   : > { %v10948_v30 = vmax.f32 %v7941_v28, 0.0 }
 0x181   : > { %7023 = vrot.lane.b32.xlu0 %v7022_v27, %s7355_s25  ;;  %v7052_v0 = vpack.i.bf16 %v10946_v32, %v10948_v30 }
 0x182   : > { %7003 = vrot.lane.b32.xlu1 %v6982_v23, %s7359_s29  ;;  %6968 = vrot.lane.b32.xlu2 %v6957_v14, %s10977_s30 }
 0x189   : > { %7028 = vrot.lane.b32.xlu0 %v7022_v27, %s7356_s26 }
 0x18a   : > { %7008 = vrot.lane.b32.xlu1 %v6982_v23, %s10977_s30  ;;  %6978 = vrot.lane.b32.xlu2 %v6957_v14, %s7354_s24 }
 0x18c   : > { %v1336_v31 = vpop.f32.mrf.mxu0 }
 0x18d   : > { %v7962_v35 = vadd.f32 %v1336_v31, %v7882_v59 }
 0x18f   : > { %v10944_v36 = vmax.f32 %v7962_v35, 0.0 }
 0x191   : > { %7053 = vrot.lane.b32.xlu0 %v7052_v0, %s7357_s27 }
 0x192   : > { %7013 = vrot.lane.b32.xlu1 %v6982_v23, %s7361_s16  ;;  %6998 = vrot.lane.b32.xlu2 %v6982_v23, %s7358_s28 }
 0x194   : > { %v1339_v33 = vpop.f32.mrf.mxu0 }
 0x195   : > { %v7959_v34 = vadd.f32 %v1339_v33, %v7884_v60 }
 0x197   : > { %v10945_v6 = vmax.f32 %v7959_v34, 0.0 }
 0x199   : > { %7058 = vrot.lane.b32.xlu0 %v7022_v27, %s7359_s29  ;;  %v7973_v38 = vpack.i.bf16 %v10944_v36, %v10945_v6 }
 0x19a   : > { %7038 = vrot.lane.b32.xlu1 %v7022_v27, %s7357_s27  ;;  %7018 = vrot.lane.b32.xlu2 %v6982_v23, %s7354_s24 }
 0x19e   : > { %v1359_v37 = vpop.f32.mrf.mxu1 }
 0x19f   : > { %v7985_v41 = vadd.f32 %v1359_v37, %v7882_v59 }
 0x1a1   : > { %7068 = vrot.lane.b32.xlu0 %v7973_v38, %s7355_s25  ;;  %v10942_v43 = vmax.f32 %v7985_v41, 0.0 }
 0x1a2   : > { %7048 = vrot.lane.b32.xlu1 %v7022_v27, %s7358_s28  ;;  %7033 = vrot.lane.b32.xlu2 %v7052_v0, %s7355_s25 }
 0x1a6   : > { %v1362_v39 = vpop.f32.mrf.mxu1 }
 0x1a7   : > { %v7980_v40 = vadd.f32 %v1362_v39, %v7884_v60 }
 0x1a9   : > { %7083 = vrot.lane.b32.xlu0 %v7973_v38, %s7357_s27  ;;  %v10943_v42 = vmax.f32 %v7980_v40, 0.0 }
 0x1aa   : > { %7073 = vrot.lane.b32.xlu1 %v7973_v38, %s7356_s26  ;;  %7043 = vrot.lane.b32.xlu2 %v7052_v0, %s7356_s26 }
 0x1ab   : > { %v7996_v44 = vpack.i.bf16 %v10942_v43, %v10943_v42 }
 0x1b1   : > { %7098 = vrot.lane.b32.xlu0 %v7052_v0, %s7359_s29 }
 0x1b2   : > { %7063 = vrot.lane.b32.xlu2 %v7052_v0, %s7358_s28  ;;  %7078 = vrot.lane.b32.xlu1 %v7996_v44, %s7355_s25 }
 0x1b4   : > { %v1382_v3 = vpop.f32.mrf.mxu2 }
 0x1b5   : > { %v8010_v47 = vadd.f32 %v1382_v3, %v7882_v59 }
 0x1b7   : > { %v10940_v49 = vmax.f32 %v8010_v47, 0.0 }
 0x1b9   : > { %7113 = vrot.lane.b32.xlu0 %v7022_v27, %s7361_s16 }
 0x1ba   : > { %7093 = vrot.lane.b32.xlu2 %v7996_v44, %s7356_s26  ;;  %7088 = vrot.lane.b32.xlu1 %v7022_v27, %s10977_s30 }
 0x1bc   : > { %v1385_v45 = vpop.f32.mrf.mxu2 }
 0x1bd   : > { %v8007_v46 = vadd.f32 %v1385_v45, %v7884_v60 }
 0x1bf   : > { %v10941_v10 = vmax.f32 %v8007_v46, 0.0 }
 0x1c1   : > { %7128 = vrot.lane.b32.xlu0 %v7052_v0, %s10977_s30  ;;  %v8024_v50 = vpack.i.bf16 %v10940_v49, %v10941_v10 }
 0x1c2   : > { %7108 = vrot.lane.b32.xlu2 %v7022_v27, %s7354_s24  ;;  %7103 = vrot.lane.b32.xlu1 %v7973_v38, %s7358_s28 }
 0x1c4   : > { %v8017_v48 = vpop.permute.xlu2 %6943 }
 0x1c5   : > { %v6946_v19 = vunpack.i.h.bf16 %v8017_v48  ;;  %v6945_v20 = vunpack.i.l.bf16 %v8017_v48 }
 0x1c7   : > { %v2123_v37 = vsel %vm1012_vm0, %v6945_v20, %v6946_v19 }
 0x1c9   : > { %7143 = vrot.lane.b32.xlu0 %v8024_v50, %s7355_s25 }
 0x1ca   : > { %7123 = vrot.lane.b32.xlu2 %v7052_v0, %s7354_s24  ;;  %7118 = vrot.lane.b32.xlu1 %v7996_v44, %s7357_s27 }
 0x1cc   : > { %v8031_v51 = vpop.permute.xlu2 %6948  ;;  %v1405_v52 = vpop.f32.mrf.mxu3 }
 0x1cd   : > { %v8058_v8 = vadd.f32 %v1405_v52, %v7882_v59 }
 0x1cf   : > { %v10938_v57 = vmax.f32 %v8058_v8, 0.0 }
 0x1d1   : > { %7158 = vrot.lane.b32.xlu0 %v7996_v44, %s7359_s29 }
 0x1d2   : > { %7138 = vrot.lane.b32.xlu2 %v7996_v44, %s7358_s28  ;;  %7133 = vrot.lane.b32.xlu1 %v7973_v38, %s7359_s29 }
 0x1d4   : > { %v8039_v53 = vpop.permute.xlu2 %6963  ;;  %v1408_v1 = vpop.f32.mrf.mxu3 }
 0x1d5   : > { %v8053_v2 = vadd.f32 %v1408_v1, %v7884_v60  ;;  %v6950_v1 = vunpack.i.l.bf16 %v8031_v51  ;;  %v6965_v17 = vunpack.i.l.bf16 %v8039_v53 }
 0x1d7   : > { %v10939_v4 = vmax.f32 %v8053_v2, 0.0 }
 0x1d9   : > { %7173 = vrot.lane.b32.xlu0 %v7996_v44, %s10977_s30 }
 0x1da   : > { %7153 = vrot.lane.b32.xlu2 %v7973_v38, %s10977_s30  ;;  %7148 = vrot.lane.b32.xlu1 %v7052_v0, %s7361_s16  ;;  %v8090_v0 = vpack.i.bf16 %v10938_v57, %v10939_v4 }
 0x1db   : > { %v8046_v54 = vpop.permute.xlu0 %6958  ;;  %v8048_v55 = vpop.permute.xlu1 %6953 }
 0x1dc   : > { %v8050_v56 = vpop.permute.xlu2 %6968  ;;  %v1428_v58 = vpop.f32.mrf.mxu0 }
 0x1dd   : > { %v8072_v18 = vadd.f32 %v1428_v58, %v7882_v59  ;;  %v6951_v58 = vunpack.i.h.bf16 %v8031_v51 }
 0x1df   : > { %v10936_v31 = vmax.f32 %v8072_v18, 0.0  ;;  %v2029_v57 = vsel %vm937_vm2, %v6950_v1, %v6951_v58 }
 0x1e1   : > { %7188 = vrot.lane.b32.xlu0 %v7996_v44, %s7361_s16 }
 0x1e2   : > { %7168 = vrot.lane.b32.xlu2 %v7973_v38, %s7361_s16  ;;  %7163 = vrot.lane.b32.xlu1 %v8024_v50, %s7356_s26 }
 0x1e3   : > { %v8064_v11 = vpop.permute.xlu0 %6973 }
 0x1e4   : > { %v8067_v14 = vpop.permute.xlu1 %6983  ;;  %v8069_v15 = vpop.permute.xlu2 %6978 }
 0x1e5   : > { %v6986_v22 = vunpack.i.h.bf16 %v8067_v14  ;;  %v6985_v23 = vunpack.i.l.bf16 %v8067_v14  ;;  %v1431_v24 = vpop.f32.mrf.mxu0  ;;  %v10953_v6 = vunpack.i.h.bf16 %v8069_v15  ;;  %v6980_v32 = vunpack.i.l.bf16 %v8069_v15 }
 0x1e6   : > { %v8080_v27 = vadd.f32 %v1431_v24, %v7884_v60 }
 0x1e7   : > { %v2132_v7 = vsel %vm1012_vm0, %v6985_v23, %v6986_v22 }
 0x1e8   : > { %2452 = vmatpush.msra.mxu2 %v2132_v7  ;;  %v10937_v33 = vmax.f32 %v8080_v27, 0.0 }
 0x1ea   : > { %7183 = vrot.lane.b32.xlu2 %v8090_v0, %s7355_s25  ;;  %2453 = vmatpush.msra.mxu2 %v2123_v37  ;;  %v8102_v39 = vpack.i.bf16 %v10936_v31, %v10937_v33  ;;  %v6956_v31 = vunpack.i.h.bf16 %v8048_v55  ;;  %v6955_v33 = vunpack.i.l.bf16 %v8048_v55  ;;  %v8314_v55 = vld [vmem:[%s10923_s3 + $0x10] sm:$0xff] }
 0x1eb   : > { %v8104_v3 = vpop.permute.xlu0 %6993  ;;  %7178 = vrot.lane.b32.xlu1 %v8024_v50, %s7357_s27 }
 0x1ec   : > { %v8108_v45 = vpop.permute.xlu1 %6988  ;;  %v8110_v52 = vpop.permute.xlu2 %6998  ;;  %7203 = vrot.lane.b32.xlu0 %v8102_v39, %s7355_s25  ;;  %v6996_v24 = vunpack.i.h.bf16 %v8104_v3  ;;  %v6995_v7 = vunpack.i.l.bf16 %v8104_v3  ;;  %v1935_v36 = vsel %vm863_vm3, %v6955_v33, %v6956_v31  ;;  %v10956_v33 = vunpack.i.h.bf16 %v8039_v53 }
 0x1ed   : > { %v6991_v20 = vunpack.i.h.bf16 %v8108_v45  ;;  %v6990_v23 = vunpack.i.l.bf16 %v8108_v45  ;;  %v7001_v4 = vunpack.i.h.bf16 %v8110_v52  ;;  %v7000_v49 = vunpack.i.l.bf16 %v8110_v52 }
 0x1ee   : > { %v1747_v14 = vsel %vm723_vm5, %v6965_v17, %v10956_v33 }
 0x1ef   : > { %v2038_v37 = vsel %vm937_vm2, %v6990_v23, %v6991_v20  ;;  %v1944_v23 = vsel %vm863_vm3, %v6995_v7, %v6996_v24 }
 0x1f0   : > { %2454 = vmatpush.msra.mxu2 %v2038_v37  ;;  %v10955_v37 = vunpack.i.h.bf16 %v8046_v54 }
 0x1f2   : > { %7198 = vrot.lane.b32.xlu2 %v7973_v38, %s7354_s24  ;;  %2455 = vmatpush.msra.mxu2 %v2029_v57  ;;  %v6960_v38 = vunpack.i.l.bf16 %v8046_v54  ;;  %v8147_v57 = vpop.f32.mrf.mxu1 }
 0x1f3   : > { %v8132_v10 = vpop.permute.xlu0 %7023  ;;  %7193 = vrot.lane.b32.xlu1 %v8024_v50, %s7358_s28  ;;  %v1452_v51 = vadd.f32 %v8147_v57, %v7882_v59 }
 0x1f4   : > { %v8140_v1 = vpop.permute.xlu1 %7003  ;;  %v8142_v43 = vpop.permute.xlu2 %7018  ;;  %2456 = vmatpush.msra.mxu2 %v1944_v23  ;;  %7218 = vrot.lane.b32.xlu0 %v8102_v39, %s7356_s26  ;;  %v1850_v23 = vsel %vm793_vm4, %v7000_v49, %v7001_v4  ;;  %v7025_v26 = vunpack.i.l.bf16 %v8132_v10  ;;  %v1841_v49 = vsel %vm793_vm4, %v6960_v38, %v10955_v37 }
 0x1f5   : > { %v10952_v42 = vunpack.i.h.bf16 %v8142_v43  ;;  %v7020_v7 = vunpack.i.l.bf16 %v8142_v43  ;;  %v10954_v30 = vunpack.i.h.bf16 %v8140_v1  ;;  %v7005_v25 = vunpack.i.l.bf16 %v8140_v1 }
 0x1f6   : > { %2457 = vmatpush.msra.mxu2 %v1935_v36  ;;  %v7026_v36 = vunpack.i.h.bf16 %v8132_v10  ;;  %v10984_v52 = vunpack.i.h.bf16 %v8140_v1 }
 0x1f7   : > { %v2226_v21 = vsel %vm1087_vm1, %v7020_v7, %v10952_v42  ;;  %v2217_v7 = vsel %vm1087_vm1, %v6980_v32, %v10953_v6  ;;  %v8179_v42 = vld [vmem:[%s10923_s3 + $0x8] sm:$0xff]  ;;  %v1756_v38 = vsel %vm723_vm5, %v7005_v25, %v10954_v30  ;;  %v6971_v32 = vunpack.i.h.bf16 %v8050_v56 }
 0x1f8   : > { %2458 = vmatpush.msra.mxu2 %v1850_v23  ;;  %2489 = vmatpush.msra.mxu3 %v2226_v21  ;;  %v2133_v21 = vsel %vm1012_vm0, %v6986_v22, %v7025_v26  ;;  %v6970_v23 = vunpack.i.l.bf16 %v8050_v56 }
 0x1fa   : > { %7213 = vrot.lane.b32.xlu2 %v8024_v50, %s7359_s29  ;;  %2459 = vmatpush.msra.mxu2 %v1841_v49  ;;  %v1454_v33 = vpop.f32.mrf.mxu1 }
 0x1fb   : > { %2490 = vmatpush.msra.mxu3 %v2217_v7  ;;  %v7029_v10 = vpop.permute.xlu0 %7028  ;;  %7208 = vrot.lane.b32.xlu1 %v8090_v0, %s7356_s26  ;;  %v1455_v45 = vadd.f32 %v1454_v33, %v7884_v60  ;;  %v6976_v33 = vunpack.i.h.bf16 %v8064_v11 }
 0x1fc   : > { %v7030_v49 = vunpack.i.l.bf16 %v7029_v10  ;;  %v8191_v6 = vpop.permute.xlu1 %7008  ;;  %v8193_v7 = vpop.permute.xlu2 %7033  ;;  %2460 = vmatpush.msra.mxu2 %v1756_v38  ;;  %7233 = vrot.lane.b32.xlu0 %v8102_v39, %s7357_s27  ;;  %v7031_v38 = vunpack.i.h.bf16 %v7029_v10  ;;  %v1653_v10 = vsel %vm653_vm6, %v6970_v23, %v6971_v32 }
 0x1fd   : > { %2498 = vmatpush.msrb.mxu3 %v2133_v21  ;;  %v7011_v25 = vunpack.i.h.bf16 %v8191_v6  ;;  %v7010_v22 = vunpack.i.l.bf16 %v8191_v6  ;;  %v7035_v30 = vunpack.i.l.bf16 %v8193_v7  ;;  %v2124_v21 = vsel %vm1012_vm0, %v6946_v19, %v7026_v36 }
 0x1fe   : > { %6700 = vmatmul.msk.f32.vlgmr.msra.gmra.mxu3 %vm2445_vm10, %v8179_v42  ;;  %v7036_v37 = vunpack.i.h.bf16 %v8193_v7  ;;  %2461 = vmatpush.msra.mxu2 %v1747_v14  ;;  %v2039_v17 = vsel %vm937_vm2, %v6991_v20, %v7030_v49  ;;  %v2030_v20 = vsel %vm937_vm2, %v6951_v58, %v7031_v38  ;;  %v8233_v14 = vld [vmem:[%s10923_s3 + $0x18] sm:$0xff]  ;;  %v1476_v59 = vmax.f32 %v1455_v45, 0.0 }
 0x1ff   : > { %2499 = vmatpush.msrb.mxu3 %v2124_v21  ;;  %v1662_v48 = vsel %vm653_vm6, %v7010_v22, %v7011_v25  ;;  %v2134_v19 = vsel %vm1012_vm0, %v7025_v26, %v7035_v30 }
 0x200   : > { %2462 = vmatpush.msra.mxu2 %v1662_v48  ;;  %2544 = vmatpush.msrb.mxu1 %v2134_v19  ;;  %v2125_v26 = vsel %vm1012_vm0, %v7026_v36, %v7036_v37  ;;  %v6975_v36 = vunpack.i.l.bf16 %v8064_v11  ;;  %v10988_v11 = vmax.f32 %v7898_v13, 0.0 }
 0x201   : > { %2500 = vmatpush.msrb.mxu3 %v2039_v17 }
 0x202   : > { %7228 = vrot.lane.b32.xlu2 %v8024_v50, %s10977_s30  ;;  %2463 = vmatpush.msra.mxu2 %v1653_v10  ;;  %v1466_v10 = vmax.f32 %v1452_v51, 0.0 }
 0x203   : > { %2501 = vmatpush.msrb.mxu3 %v2030_v20  ;;  %2545 = vmatpush.msrb.mxu1 %v2125_v26  ;;  %v8235_v60 = vpop.permute.xlu0 %7053 }
 0x204   : > { %v8240_v23 = vpop.permute.xlu1 %7013  ;;  %v8242_v58 = vpop.permute.xlu2 %7043  ;;  %7223 = vrot.lane.b32.xlu1 %v8090_v0, %s7357_s27  ;;  %7248 = vrot.lane.b32.xlu0 %v7996_v44, %s7354_s24  ;;  %v1559_v44 = vsel %vm583_vm7, %v6975_v36, %v6976_v33  ;;  %v8269_v20 = vpack.i.bf16 %v1466_v10, %v1476_v59  ;;  %v8282_v36 = vld [vmem:[%s10923_s3] sm:$0xff] }
 0x205   : > { %v7016_v22 = vunpack.i.h.bf16 %v8240_v23  ;;  %v7015_v21 = vunpack.i.l.bf16 %v8240_v23  ;;  %v7045_v17 = vunpack.i.l.bf16 %v8242_v58  ;;  %v7046_v57 = vunpack.i.h.bf16 %v8242_v58 }
 0x206   : > { %6701 = vmatmul.msk.f32.gmra.mxu3 %vm2445_vm10, %v8233_v14 }
 0x207   : > { %v1568_v48 = vsel %vm583_vm7, %v7015_v21, %v7016_v22  ;;  %v2040_v19 = vsel %vm937_vm2, %v7030_v49, %v7045_v17  ;;  %v2031_v45 = vsel %vm937_vm2, %v7031_v38, %v7046_v57  ;;  %v7055_v38 = vunpack.i.l.bf16 %v8235_v60 }
 0x208   : > { %2464 = vmatpush.msra.mxu2 %v1568_v48  ;;  %2546 = vmatpush.msrb.mxu1 %v2040_v19  ;;  %v7056_v48 = vunpack.i.h.bf16 %v8235_v60 }
 0x20a   : > { %7243 = vrot.lane.b32.xlu2 %v8090_v0, %s7358_s28  ;;  %2465 = vmatpush.msra.mxu2 %v1559_v44 }
 0x20b   : > { %2547 = vmatpush.msrb.mxu1 %v2031_v45  ;;  %v8271_v26 = vpop.permute.xlu0 %7058 }
 0x20c   : > { %v7039_v49 = vpop.permute.xlu1 %7038  ;;  %v8273_v51 = vpop.permute.xlu2 %7063  ;;  %2466 = vmatpush.msra.mxu2 %v1467_v16  ;;  %7238 = vrot.lane.b32.xlu1 %v8269_v20, %s7355_s25  ;;  %v7060_v45 = vunpack.i.l.bf16 %v8271_v26  ;;  %s8940_s25 = scalar_lea.vmem %s10933_s13, %s6893_s20  ;;  %s7374_s20 = smov 48  }
 0x20d   : > { %v7041_v21 = vunpack.i.h.bf16 %v7039_v49  ;;  %v7040_v59 = vunpack.i.l.bf16 %v7039_v49  ;;  %7263 = vrot.lane.b32.xlu0 %v8269_v20, %s7356_s26 }
 0x20e   : > { %2467 = vmatpush.msra.mxu2 %v1457_v9 }
 0x20f   : > { %v1945_v12 = vsel %vm863_vm3, %v6996_v24, %v7040_v59  ;;  %v1946_v16 = vsel %vm863_vm3, %v7040_v59, %v7055_v38  ;;  %2468 = vmatmul.f32.vlgmr.msra.gmra.mxu2 %v8282_v36  ;;  %v1936_v19 = vsel %vm863_vm3, %v6956_v31, %v7041_v21  ;;  %v1937_v61 = vsel %vm863_vm3, %v7041_v21, %v7056_v48 }
 0x210   : > { %2502 = vmatpush.msrb.mxu3 %v1945_v12  ;;  %2548 = vmatpush.msrb.mxu1 %v1946_v16  ;;  %v7065_v31 = vunpack.i.l.bf16 %v8273_v51  ;;  %v7066_v59 = vunpack.i.h.bf16 %v8273_v51  ;;  %v7061_v12 = vunpack.i.h.bf16 %v8271_v26  ;;  %v10983_v16 = vunpack.i.h.bf16 %v8046_v54 }
 0x212   : > { %7258 = vrot.lane.b32.xlu2 %v8102_v39, %s7358_s28  ;;  %2503 = vmatpush.msrb.mxu3 %v1936_v19 }
 0x213   : > { %2549 = vmatpush.msrb.mxu1 %v1937_v61  ;;  %v8305_v9 = vpop.permute.xlu0 %7068  ;;  %v1757_v61 = vsel %vm723_vm5, %v10984_v52, %v7060_v45 }
 0x214   : > { %v7049_v3 = vpop.permute.xlu1 %7048  ;;  %v8307_v24 = vpop.permute.xlu2 %7093  ;;  %7253 = vrot.lane.b32.xlu1 %v8024_v50, %s7361_s16  ;;  %v7070_v1 = vunpack.i.l.bf16 %v8305_v9  ;;  %v10990_v51 = vunpack.i.h.bf16 %v8305_v9 }
 0x215   : > { %v7051_v10 = vunpack.i.h.bf16 %v7049_v3  ;;  %v7050_v44 = vunpack.i.l.bf16 %v7049_v3  ;;  %7278 = vrot.lane.b32.xlu0 %v8102_v39, %s7359_s29 }
 0x217   : > { %v1851_v49 = vsel %vm793_vm4, %v7001_v4, %v7050_v44  ;;  %v1852_v21 = vsel %vm793_vm4, %v7050_v44, %v7065_v31  ;;  %2471 = vmatmul.f32.gmra.mxu2 %v8314_v55  ;;  %v1842_v19 = vsel %vm793_vm4, %v10983_v16, %v7051_v10  ;;  %v1843_v4 = vsel %vm793_vm4, %v7051_v10, %v7066_v59 }
 0x218   : > { %2504 = vmatpush.msrb.mxu3 %v1851_v49  ;;  %2550 = vmatpush.msrb.mxu1 %v1852_v21  ;;  %v10985_v21 = vunpack.i.h.bf16 %v8039_v53  ;;  %v10986_v16 = vunpack.i.h.bf16 %v8142_v43  ;;  %v2135_v43 = vsel %vm1012_vm0, %v7035_v30, %v7070_v1 }
 0x21a   : > { %7273 = vrot.lane.b32.xlu2 %v8090_v0, %s7359_s29  ;;  %2505 = vmatpush.msrb.mxu3 %v1842_v19  ;;  %v1748_v10 = vsel %vm723_vm5, %v10985_v21, %v7061_v12 }
 0x21b   : > { %2551 = vmatpush.msrb.mxu1 %v1843_v4  ;;  %v8340_v3 = vpop.permute.xlu0 %7083  ;;  %v10957_v4 = vunpack.i.h.bf16 %v8305_v9 }
 0x21c   : > { %v8342_v26 = vpop.permute.xlu1 %7073  ;;  %v7109_v54 = vpop.permute.xlu2 %7108  ;;  %2506 = vmatpush.msrb.mxu3 %v1757_v61  ;;  %7268 = vrot.lane.b32.xlu1 %v8024_v50, %s7354_s24  ;;  %v10987_v50 = vunpack.i.h.bf16 %v8069_v15 }
 0x21d   : > { %v7111_v44 = vunpack.i.h.bf16 %v7109_v54  ;;  %v7110_v49 = vunpack.i.l.bf16 %v7109_v54  ;;  %7293 = vrot.lane.b32.xlu0 %v8102_v39, %s10977_s30  ;;  %v7075_v53 = vunpack.i.l.bf16 %v8342_v26  ;;  %v7076_v54 = vunpack.i.h.bf16 %v8342_v26 }
 0x21e   : > { %2507 = vmatpush.msrb.mxu3 %v1748_v10  ;;  %v2126_v21 = vsel %vm1012_vm0, %v7036_v37, %v10957_v4  ;;  %v7085_v37 = vunpack.i.l.bf16 %v8340_v3 }
 0x21f   : > { %v2227_v19 = vsel %vm1087_vm1, %v10986_v16, %v7110_v49  ;;  %v2218_v52 = vsel %vm1087_vm1, %v10987_v50, %v7111_v44  ;;  %v2041_v7 = vsel %vm937_vm2, %v7045_v17, %v7075_v53  ;;  %v2032_v4 = vsel %vm937_vm2, %v7046_v57, %v7076_v54 }
 0x220   : > { %2535 = vmatpush.msrb.mxu0 %v2227_v19  ;;  %v1947_v58 = vsel %vm863_vm3, %v7055_v38, %v7085_v37 }
 0x222   : > { %7288 = vrot.lane.b32.xlu2 %v8090_v0, %s10977_s30  ;;  %2536 = vmatpush.msrb.mxu0 %v2218_v52 }
 0x223   : > { %v8367_v61 = vpop.permute.xlu0 %7098  ;;  %6702 = vmatmul.msk.f32.vlgmr.msrb.gmra.mxu0 %vm2445_vm10, %v8179_v42 }
 0x224   : > { %2590 = vmatpush.msra.mxu0 %v2135_v43  ;;  %v8370_v15 = vpop.permute.xlu2 %7123  ;;  %v7101_v10 = vunpack.i.h.bf16 %v8367_v61  ;;  %v7100_v16 = vunpack.i.l.bf16 %v8367_v61  ;;  %7283 = vrot.lane.b32.xlu1 %v8269_v20, %s7357_s27  ;;  %v8381_v30 = vpop.permute.xlu1 %7078  ;;  %s10958_s27 = smov 120  }
 0x225   : > { %v7126_v19 = vunpack.i.h.bf16 %v8370_v15  ;;  %v7125_v50 = vunpack.i.l.bf16 %v8370_v15  ;;  %7308 = vrot.lane.b32.xlu0 %v8090_v0, %s7361_s16 }
 0x226   : > { %2591 = vmatpush.msra.mxu0 %v2126_v21  ;;  %v1758_v52 = vsel %vm723_vm5, %v7060_v45, %v7100_v16  ;;  %v7086_v21 = vunpack.i.h.bf16 %v8340_v3  ;;  %v1749_v17 = vsel %vm723_vm5, %v7061_v12, %v7101_v10 }
 0x227   : > { %v2228_v43 = vsel %vm1087_vm1, %v7110_v49, %v7125_v50  ;;  %2552 = vmatpush.msrb.mxu1 %v1758_v52  ;;  %v2219_v45 = vsel %vm1087_vm1, %v7111_v44, %v7126_v19 }
 0x228   : > { %2592 = vmatpush.msra.mxu0 %v2041_v7  ;;  %2581 = vmatpush.msrb.mxu2 %v2228_v43 }
 0x229   : > { %2553 = vmatpush.msrb.mxu1 %v1749_v17 }
 0x22a   : > { %2593 = vmatpush.msra.mxu0 %v2032_v4  ;;  %7303 = vrot.lane.b32.xlu2 %v8090_v0, %s7354_s24  ;;  %v1938_v0 = vsel %vm863_vm3, %v7056_v48, %v7086_v21 }
 0x22b   : > { %2582 = vmatpush.msrb.mxu2 %v2219_v45  ;;  %v8420_v57 = vpop.permute.xlu0 %7113  ;;  %6703 = vmatmul.msk.f32.gmra.mxu0 %vm2445_vm10, %v8233_v14 }
 0x22c   : > { %2594 = vmatpush.msra.mxu0 %v1947_v58  ;;  %6704 = vmatmul.msk.f32.vlgmr.msrb.gmra.mxu2 %vm2445_vm10, %v8179_v42  ;;  %v8424_v12 = vpop.permute.xlu2 %7138  ;;  %v7089_v44 = vpop.permute.xlu1 %7088  ;;  %v7115_v4 = vunpack.i.l.bf16 %v8420_v57  ;;  %v7116_v48 = vunpack.i.h.bf16 %v8420_v57  ;;  %v7080_v58 = vunpack.i.l.bf16 %v8381_v30 }
 0x22d   : > { %7298 = vrot.lane.b32.xlu1 %v8269_v20, %s7358_s28  ;;  %v7091_v38 = vunpack.i.h.bf16 %v7089_v44  ;;  %v7090_v49 = vunpack.i.l.bf16 %v7089_v44  ;;  %7323 = vrot.lane.b32.xlu0 %v8269_v20, %s10977_s30  ;;  %v7081_v44 = vunpack.i.h.bf16 %v8381_v30  ;;  %v10992_v30 = vmax.f32 %v7941_v28, 0.0  ;;  %s10962_s28 = smov 64  }
 0x22e   : > { %2595 = vmatpush.msra.mxu0 %v1938_v0  ;;  %v1569_v6 = vsel %vm583_vm7, %v7016_v22, %v7115_v4  ;;  %v1560_v23 = vsel %vm583_vm7, %v6976_v33, %v7116_v48 }
 0x22f   : > { %v1663_v60 = vsel %vm653_vm6, %v7011_v25, %v7090_v49  ;;  %v1654_v7 = vsel %vm653_vm6, %v6971_v32, %v7091_v38 }
 0x230   : > { %2508 = vmatpush.msrb.mxu3 %v1663_v60 }
 0x232   : > { %7318 = vrot.lane.b32.xlu2 %v8269_v20, %s7359_s29  ;;  %2509 = vmatpush.msrb.mxu3 %v1654_v7  ;;  %v7096_v7 = vunpack.i.h.bf16 %v8307_v24 }
 0x233   : > { %v8447_v52 = vpop.permute.xlu0 %7128 }
 0x234   : > { %6705 = vmatmul.msk.f32.gmra.mxu2 %vm2445_vm10, %v8233_v14  ;;  %v8456_v25 = vpop.permute.xlu2 %7153  ;;  %v7131_v56 = vunpack.i.h.bf16 %v8447_v52  ;;  %v7130_v32 = vunpack.i.l.bf16 %v8447_v52  ;;  %v8462_v43 = vpop.permute.xlu1 %7103  ;;  %2510 = vmatpush.msrb.mxu3 %v1569_v6 }
 0x235   : > { %7313 = vrot.lane.b32.xlu1 %v8102_v39, %s7361_s16  ;;  %v7105_v17 = vunpack.i.l.bf16 %v8462_v43  ;;  %7338 = vrot.lane.b32.xlu0 %v8269_v20, %s7354_s24  ;;  %v7106_v22 = vunpack.i.h.bf16 %v8462_v43  ;;  %v2033_v43 = vsel %vm937_vm2, %v7076_v54, %v7096_v7  ;;  %v7140_v54 = vunpack.i.l.bf16 %v8424_v12 }
 0x236   : > { %2511 = vmatpush.msrb.mxu3 %v1560_v23  ;;  %v1664_v45 = vsel %vm653_vm6, %v7090_v49, %v7130_v32  ;;  %v1655_v33 = vsel %vm653_vm6, %v7091_v38, %v7131_v56  ;;  %v10989_v49 = vmax.f32 %v7890_v63, 0.0  ;;  %v2136_v38 = vsel %vm1012_vm0, %v7070_v1, %v7080_v58  ;;  %v2433_v23 = vld [vmem:[%s10924_s4] sm:$0xff] }
 0x237   : > { %2554 = vmatpush.msrb.mxu1 %v1664_v45  ;;  %v1853_v0 = vsel %vm793_vm4, %v7065_v31, %v7105_v17  ;;  %v1844_v31 = vsel %vm793_vm4, %v7066_v59, %v7106_v22  ;;  %v2127_v59 = vsel %vm1012_vm0, %v10990_v51, %v7081_v44  ;;  %v1854_v51 = vsel %vm793_vm4, %v7105_v17, %v7140_v54 }
 0x238   : > { %2512 = vmatpush.msrb.mxu3 %v10988_v11  ;;  %2596 = vmatpush.msra.mxu0 %v1853_v0 }
 0x239   : > { %2555 = vmatpush.msrb.mxu1 %v1655_v33 }
 0x23a   : > { %7333 = vrot.lane.b32.xlu2 %v8102_v39, %s7354_s24  ;;  %2513 = vmatpush.msrb.mxu3 %v10989_v49  ;;  %v7095_v39 = vunpack.i.l.bf16 %v8307_v24  ;;  %s7370_s24 = smov 104  }
 0x23b   : > { %v8493_v13 = vpop.permute.xlu0 %7143  ;;  %2597 = vmatpush.msra.mxu0 %v1844_v31  ;;  %2514 = vmatmul.f32.vlgmr.msrb.gmra.mxu3 %v8282_v36  ;;  %v7141_v31 = vunpack.i.h.bf16 %v8424_v12 }
 0x23c   : > { %v8501_v60 = vpop.permute.xlu2 %7168  ;;  %2636 = vmatpush.msra.mxu3 %v2136_v38  ;;  %v8505_v63 = vpop.permute.xlu1 %7118  ;;  %v2042_v6 = vsel %vm937_vm2, %v7075_v53, %v7095_v39 }
 0x23d   : > { %7328 = vrot.lane.b32.xlu1 %v8269_v20, %s7361_s16  ;;  %v7120_v1 = vunpack.i.l.bf16 %v8505_v63  ;;  %v2434_v20 = vld [vmem:[%s10924_s4 + $0x8] sm:$0xff]  ;;  %v7121_v9 = vunpack.i.h.bf16 %v8505_v63 }
 0x23e   : > { %2637 = vmatpush.msra.mxu3 %v2127_v59 }
 0x23f   : > { %v1948_v53 = vsel %vm863_vm3, %v7085_v37, %v7120_v1  ;;  %v1939_v49 = vsel %vm863_vm3, %v7086_v21, %v7121_v9  ;;  %v7155_v37 = vunpack.i.l.bf16 %v8456_v25  ;;  %v1845_v21 = vsel %vm793_vm4, %v7106_v22, %v7141_v31 }
 0x240   : > { %2638 = vmatpush.msra.mxu3 %v2042_v6 }
 0x242   : > { %2442 = vperm.xlu2 %6940, %v2434_v20   ;;  %2639 = vmatpush.msra.mxu3 %v2033_v43  ;;  %v7156_v20 = vunpack.i.h.bf16 %v8456_v25  ;;  %v1665_v25 = vsel %vm653_vm6, %v7130_v32, %v7155_v37  ;;  %v7170_v43 = vunpack.i.l.bf16 %v8501_v60 }
 0x243   : > { %v8532_v45 = vpop.permute.xlu0 %7158  ;;  %2517 = vmatmul.f32.gmra.mxu3 %v8314_v55 }
 0x244   : > { %v8540_v0 = vpop.permute.xlu2 %7183  ;;  %2640 = vmatpush.msra.mxu3 %v1948_v53  ;;  %v7134_v26 = vpop.permute.xlu1 %7133  ;;  %v7160_v38 = vunpack.i.l.bf16 %v8532_v45  ;;  %v7161_v3 = vunpack.i.h.bf16 %v8532_v45  ;;  %v1656_v53 = vsel %vm653_vm6, %v7131_v56, %v7156_v20 }
 0x245   : > { %2437 = vperm.xlu1 %7342, %v2433_v23   ;;  %v7136_v11 = vunpack.i.h.bf16 %v7134_v26  ;;  %v7135_v33 = vunpack.i.l.bf16 %v7134_v26 }
 0x246   : > { %2641 = vmatpush.msra.mxu3 %v1939_v49 }
 0x247   : > { %v1759_v59 = vsel %vm723_vm5, %v7100_v16, %v7135_v33  ;;  %v1750_v6 = vsel %vm723_vm5, %v7101_v10, %v7136_v11  ;;  %v1760_v16 = vsel %vm723_vm5, %v7135_v33, %v7160_v38  ;;  %v1751_v22 = vsel %vm723_vm5, %v7136_v11, %v7161_v3 }
 0x248   : > { %2642 = vmatpush.msra.mxu3 %v1854_v51  ;;  %2598 = vmatpush.msra.mxu0 %v1759_v59  ;;  %v7145_v51 = vunpack.i.l.bf16 %v8493_v13 }
 0x24a   : > { %2643 = vmatpush.msra.mxu3 %v1845_v21  ;;  %2599 = vmatpush.msra.mxu0 %v1750_v6  ;;  %v7146_v6 = vunpack.i.h.bf16 %v8493_v13 }
 0x24b   : > { %v8565_v17 = vpop.permute.xlu0 %7173 }
 0x24c   : > { %v8574_v23 = vpop.permute.xlu2 %7198  ;;  %v7175_v61 = vunpack.i.l.bf16 %v8565_v17  ;;  %2644 = vmatpush.msra.mxu3 %v1760_v16  ;;  %v7149_v10 = vpop.permute.xlu1 %7148  ;;  %2600 = vmatpush.msra.mxu0 %v1665_v25  ;;  %v7176_v33 = vunpack.i.h.bf16 %v8565_v17  ;;  %v7171_v16 = vunpack.i.h.bf16 %v8501_v60  ;;  %v7186_v17 = vunpack.i.h.bf16 %v8540_v0 }
 0x24d   : > { %v7201_v26 = vunpack.i.h.bf16 %v8574_v23  ;;  %v7200_v32 = vunpack.i.l.bf16 %v8574_v23  ;;  %v7150_v49 = vunpack.i.l.bf16 %v7149_v10  ;;  %v7151_v59 = vunpack.i.h.bf16 %v7149_v10 }
 0x24e   : > { %2645 = vmatpush.msra.mxu3 %v1751_v22  ;;  %2601 = vmatpush.msra.mxu0 %v1656_v53  ;;  %v1666_v11 = vsel %vm653_vm6, %v7155_v37, %v7175_v61  ;;  %v10991_v22 = vmax.f32 %v7921_v62, 0.0 }
 0x24f   : > { %v2229_v52 = vsel %vm1087_vm1, %v7125_v50, %v7200_v32  ;;  %v1570_v56 = vsel %vm583_vm7, %v7115_v4, %v7150_v49  ;;  %v1571_v21 = vsel %vm583_vm7, %v7150_v49, %v7170_v43  ;;  %v2220_v37 = vsel %vm1087_vm1, %v7126_v19, %v7201_v26 }
 0x250   : > { %2627 = vmatpush.msra.mxu2 %v2229_v52  ;;  %2646 = vmatpush.msra.mxu3 %v1666_v11  ;;  %v1657_v50 = vsel %vm653_vm6, %v7156_v20, %v7176_v33  ;;  %v2137_v4 = vsel %vm1012_vm0, %v7080_v58, %v7145_v51  ;;  %v1561_v15 = vsel %vm583_vm7, %v7116_v48, %v7151_v59  ;;  %v10993_v49 = vmax.f32 %v7924_v5, 0.0 }
 0x251   : > { %2556 = vmatpush.msrb.mxu1 %v1570_v56  ;;  %2602 = vmatpush.msra.mxu0 %v1571_v21  ;;  %v1562_v60 = vsel %vm583_vm7, %v7151_v59, %v7171_v16  ;;  %v2128_v20 = vsel %vm1012_vm0, %v7081_v44, %v7146_v6  ;;  %v10994_v59 = vmax.f32 %v7944_v29, 0.0  ;;  %v10995_v5 = vmax.f32 %v7959_v34, 0.0 }
 0x252   : > { %2628 = vmatpush.msra.mxu2 %v2220_v37  ;;  %2647 = vmatpush.msra.mxu3 %v1657_v50  ;;  %v10996_v11 = vmax.f32 %v7962_v35, 0.0 }
 0x253   : > { %v8617_v19 = vpop.permute.xlu0 %7188  ;;  %2557 = vmatpush.msrb.mxu1 %v1561_v15  ;;  %2603 = vmatpush.msra.mxu0 %v1562_v60 }
 0x254   : > { %2682 = vmatpush.msrb.mxu2 %v2137_v4  ;;  %v8620_v25 = vpop.permute.xlu2 %7213  ;;  %v7191_v58 = vunpack.i.h.bf16 %v8617_v19  ;;  %v7190_v57 = vunpack.i.l.bf16 %v8617_v19  ;;  %v8631_v48 = vpop.permute.xlu1 %7163 }
 0x255   : > { %6706 = vmatmul.msk.f32.vlgmr.msra.gmra.mxu2 %vm2445_vm10, %v8179_v42  ;;  %v7165_v10 = vunpack.i.l.bf16 %v8631_v48  ;;  %2558 = vmatpush.msrb.mxu1 %v10991_v22  ;;  %v7166_v53 = vunpack.i.h.bf16 %v8631_v48  ;;  %v7215_v50 = vunpack.i.l.bf16 %v8620_v25 }
 0x256   : > { %2683 = vmatpush.msrb.mxu2 %v2128_v20  ;;  %2604 = vmatpush.msra.mxu0 %v10992_v30  ;;  %v1572_v44 = vsel %vm583_vm7, %v7170_v43, %v7190_v57  ;;  %v1563_v28 = vsel %vm583_vm7, %v7171_v16, %v7191_v58 }
 0x257   : > { %2559 = vmatpush.msrb.mxu1 %v10993_v49  ;;  %2648 = vmatpush.msra.mxu3 %v1572_v44  ;;  %v2043_v62 = vsel %vm937_vm2, %v7095_v39, %v7165_v10  ;;  %v2034_v29 = vsel %vm937_vm2, %v7096_v7, %v7166_v53 }
 0x258   : > { %2605 = vmatpush.msra.mxu0 %v10994_v59  ;;  %2560 = vmatmul.f32.vlgmr.msrb.gmra.mxu1 %v8282_v36 }
 0x259   : > { %2606 = vmatmul.f32.vlgmr.msra.gmra.mxu0 %v8282_v36  ;;  %2649 = vmatpush.msra.mxu3 %v1563_v28 }
 0x25a   : > { %2684 = vmatpush.msrb.mxu2 %v2043_v62 }
 0x25b   : > { %2650 = vmatpush.msra.mxu3 %v10995_v5 }
 0x25c   : > { %v8663_v39 = vpop.permute.xlu2 %7228  ;;  %2685 = vmatpush.msrb.mxu2 %v2034_v29 }
 0x25d   : > { %6707 = vmatmul.msk.f32.gmra.mxu2 %vm2445_vm10, %v8233_v14  ;;  %v8667_v43 = vpop.permute.xlu1 %7178  ;;  %2651 = vmatpush.msra.mxu3 %v10996_v11  ;;  %v7230_v15 = vunpack.i.l.bf16 %v8663_v39  ;;  %v7231_v22 = vunpack.i.h.bf16 %v8663_v39 }
 0x25e   : > { %v7181_v34 = vunpack.i.h.bf16 %v8667_v43  ;;  %v7180_v52 = vunpack.i.l.bf16 %v8667_v43  ;;  %2652 = vmatmul.f32.vlgmr.msra.gmra.mxu3 %v8282_v36  ;;  %v8674_v24 = vpop.permute.xlu0 %7203 }
 0x25f   : > { %v1658_v30 = vsel %vm653_vm6, %v7176_v33, %v7231_v22 }
 0x260   : > { %2563 = vmatmul.f32.gmra.mxu1 %v8314_v55  ;;  %v1949_v7 = vsel %vm863_vm3, %v7120_v1, %v7180_v52  ;;  %v1940_v35 = vsel %vm863_vm3, %v7121_v9, %v7181_v34  ;;  %v7216_v9 = vunpack.i.h.bf16 %v8620_v25 }
 0x261   : > { %2609 = vmatmul.f32.gmra.mxu0 %v8314_v55  ;;  %2686 = vmatpush.msrb.mxu2 %v1949_v7 }
 0x262   : > { %v1752_v12 = vsel %vm723_vm5, %v7161_v3, %v7216_v9 }
 0x263   : > { %2687 = vmatpush.msrb.mxu2 %v1940_v35 }
 0x264   : > { %v8688_v56 = vpop.permute.xlu2 %7243 }
 0x265   : > { %v8690_v21 = vpop.permute.xlu1 %7193 }
 0x266   : > { %v7196_v16 = vunpack.i.h.bf16 %v8690_v21  ;;  %v7195_v37 = vunpack.i.l.bf16 %v8690_v21  ;;  %2655 = vmatmul.f32.gmra.mxu3 %v8314_v55  ;;  %v8695_v1 = vpop.permute.xlu0 %7218 }
 0x268   : > { %v1855_v63 = vsel %vm793_vm4, %v7140_v54, %v7195_v37  ;;  %v1846_v4 = vsel %vm793_vm4, %v7141_v31, %v7196_v16  ;;  %v1761_v54 = vsel %vm723_vm5, %v7160_v38, %v7215_v50  ;;  %v1667_v38 = vsel %vm653_vm6, %v7175_v61, %v7230_v15 }
 0x269   : > { %2688 = vmatpush.msrb.mxu2 %v1855_v63  ;;  %v7185_v61 = vunpack.i.l.bf16 %v8540_v0 }
 0x26b   : > { %2689 = vmatpush.msrb.mxu2 %v1846_v4 }
 0x26c   : > { %v8710_v60 = vpop.permute.xlu2 %7258 }
 0x26d   : > { %v8717_v20 = vpop.permute.xlu1 %7208  ;;  %2690 = vmatpush.msrb.mxu2 %v1761_v54 }
 0x26e   : > { %v8725_v31 = vpop.permute.xlu0 %7233  ;;  %v7210_v5 = vunpack.i.l.bf16 %v8717_v20  ;;  %v7211_v23 = vunpack.i.h.bf16 %v8717_v20 }
 0x26f   : > { %2691 = vmatpush.msrb.mxu2 %v1752_v12  ;;  %v7246_v12 = vunpack.i.h.bf16 %v8688_v56 }
 0x270   : > { %v2035_v13 = vsel %vm937_vm2, %v7166_v53, %v7211_v23 }
 0x271   : > { %2692 = vmatpush.msrb.mxu2 %v1667_v38 }
 0x273   : > { %2693 = vmatpush.msrb.mxu2 %v1658_v30 }
 0x274   : > { %v8737_v45 = vpop.permute.xlu2 %7273 }
 0x275   : > { %v7275_v30 = vunpack.i.l.bf16 %v8737_v45 }
 0x276   : > { %v8739_v3 = vpop.permute.xlu1 %7223  ;;  %v8741_v44 = vpop.permute.xlu0 %7248 }
 0x277   : > { %v7251_v49 = vunpack.i.h.bf16 %v8741_v44  ;;  %v7250_v62 = vunpack.i.l.bf16 %v8741_v44  ;;  %v7225_v7 = vunpack.i.l.bf16 %v8739_v3  ;;  %v7226_v35 = vunpack.i.h.bf16 %v8739_v3 }
 0x278   : > { %v1762_v19 = vsel %vm723_vm5, %v7215_v50, %v7275_v30 }
 0x279   : > { %v2230_v59 = vsel %vm1087_vm1, %v7200_v32, %v7250_v62  ;;  %v2221_v28 = vsel %vm1087_vm1, %v7201_v26, %v7251_v49  ;;  %v2138_v32 = vsel %vm1012_vm0, %v7145_v51, %v7185_v61  ;;  %v2129_v26 = vsel %vm1012_vm0, %v7146_v6, %v7186_v17 }
 0x27a   : > { %2673 = vmatpush.msra.mxu1 %v2230_v59  ;;  %v2044_v51 = vsel %vm937_vm2, %v7165_v10, %v7210_v5  ;;  %v7245_v6 = vunpack.i.l.bf16 %v8688_v56  ;;  %v1950_v10 = vsel %vm863_vm3, %v7180_v52, %v7225_v7  ;;  %v1941_v38 = vsel %vm863_vm3, %v7181_v34, %v7226_v35 }
 0x27c   : > { %v8750_v33 = vpop.permute.xlu2 %7288  ;;  %2674 = vmatpush.msra.mxu1 %v2221_v28  ;;  %v1856_v59 = vsel %vm793_vm4, %v7195_v37, %v7245_v6  ;;  %v7276_v28 = vunpack.i.h.bf16 %v8737_v45 }
 0x27d   : > { %6708 = vmatmul.msk.f32.vlgmr.msra.gmra.mxu1 %vm2445_vm10, %v8179_v42 }
 0x27e   : > { %v8758_v29 = vpop.permute.xlu1 %7238  ;;  %2728 = vmatpush.msrb.mxu1 %v2138_v32  ;;  %v10997_v32 = vmax.f32 %v7980_v40, 0.0  ;;  %v10998_v40 = vmax.f32 %v7985_v41, 0.0 }
 0x27f   : > { %v8767_v11 = vpop.permute.xlu0 %7263 }
 0x280   : > { %2729 = vmatpush.msrb.mxu1 %v2129_v26 }
 0x281   : > { %v8856_v41 = vpop.f32.mrf.mxu3 }
 0x282   : > { %2730 = vmatpush.msrb.mxu1 %v2044_v51 }
 0x284   : > { %v8782_v63 = vpop.permute.xlu2 %7303  ;;  %2731 = vmatpush.msrb.mxu1 %v2035_v13  ;;  %v7240_v13 = vunpack.i.l.bf16 %v8758_v29 }
 0x285   : > { %6709 = vmatmul.msk.f32.gmra.mxu1 %vm2445_vm10, %v8233_v14 }
 0x286   : > { %v8790_v4 = vpop.permute.xlu1 %7253  ;;  %2732 = vmatpush.msrb.mxu1 %v1950_v10  ;;  %v7290_v10 = vunpack.i.l.bf16 %v8750_v33 }
 0x287   : > { %v7256_v54 = vunpack.i.h.bf16 %v8790_v4  ;;  %v7255_v48 = vunpack.i.l.bf16 %v8790_v4  ;;  %v8801_v53 = vpop.permute.xlu0 %7278 }
 0x288   : > { %2733 = vmatpush.msrb.mxu1 %v1941_v38  ;;  %v7306_v38 = vunpack.i.h.bf16 %v8782_v63 }
 0x289   : > { %v1573_v52 = vsel %vm583_vm7, %v7190_v57, %v7255_v48  ;;  %v1564_v43 = vsel %vm583_vm7, %v7191_v58, %v7256_v54  ;;  %v1847_v57 = vsel %vm793_vm4, %v7196_v16, %v7246_v12  ;;  %v7305_v58 = vunpack.i.l.bf16 %v8782_v63  ;;  %v2495_v20 = vpop.f32.mrf.mxu3 }
 0x28a   : > { %2694 = vmatpush.msrb.mxu2 %v1573_v52  ;;  %2734 = vmatpush.msrb.mxu1 %v1856_v59  ;;  %v7205_v16 = vunpack.i.l.bf16 %v8674_v24  ;;  %v7206_v59 = vunpack.i.h.bf16 %v8674_v24  ;;  %v1753_v63 = vsel %vm723_vm5, %v7216_v9, %v7276_v28  ;;  %v7265_v9 = vunpack.i.l.bf16 %v8767_v11 }
 0x28c   : > { %v8825_v34 = vpop.permute.xlu2 %7318  ;;  %2695 = vmatpush.msrb.mxu2 %v1564_v43  ;;  %2735 = vmatpush.msrb.mxu1 %v1847_v57  ;;  %v7241_v43 = vunpack.i.h.bf16 %v8758_v29  ;;  %v2140_v25 = vsel %vm1012_vm0, %v7205_v16, %v7240_v13  ;;  %v7266_v13 = vunpack.i.h.bf16 %v8767_v11 }
 0x28e   : > { %v7269_v37 = vpop.permute.xlu1 %7268  ;;  %2696 = vmatpush.msrb.mxu2 %v10997_v32  ;;  %2736 = vmatpush.msrb.mxu1 %v1762_v19  ;;  %v2139_v32 = vsel %vm1012_vm0, %v7185_v61, %v7205_v16  ;;  %v2130_v61 = vsel %vm1012_vm0, %v7186_v17, %v7206_v59  ;;  %v2131_v16 = vsel %vm1012_vm0, %v7206_v59, %v7241_v43  ;;  %v7221_v17 = vunpack.i.h.bf16 %v8695_v1 }
 0x28f   : > { %v7271_v26 = vunpack.i.h.bf16 %v7269_v37  ;;  %v7270_v51 = vunpack.i.l.bf16 %v7269_v37  ;;  %v8841_v21 = vpop.permute.xlu0 %7293  ;;  %vm3371_vm0 = vcmask 64512  }
 0x290   : > { %2697 = vmatpush.msrb.mxu2 %v10998_v40  ;;  %2737 = vmatpush.msrb.mxu1 %v1753_v63  ;;  %v2037_v43 = vsel %vm937_vm2, %v7221_v17, %v7266_v13  ;;  %v7260_v63 = vunpack.i.l.bf16 %v8710_v60  ;;  %v7281_v13 = vunpack.i.h.bf16 %v8801_v53 }
 0x291   : > { %2698 = vmatmul.f32.vlgmr.msrb.gmra.mxu2 %v8282_v36  ;;  %v2231_v50 = vsel %vm1087_vm1, %v7250_v62, %v7270_v51  ;;  %v2232_v52 = vsel %vm1087_vm1, %v7270_v51, %v7305_v58  ;;  %v7291_v62 = vunpack.i.h.bf16 %v8750_v33  ;;  %v2222_v24 = vsel %vm1087_vm1, %v7251_v49, %v7271_v26 }
 0x292   : > { %v8854_v57 = vpop.f32.mrf.mxu2  ;;  %2719 = vmatpush.msrb.mxu0 %v2231_v50  ;;  %2765 = vmatpush.msrb.mxu3 %v2232_v52  ;;  %v2223_v29 = vsel %vm1087_vm1, %v7271_v26, %v7306_v38  ;;  %v1668_v49 = vsel %vm653_vm6, %v7230_v15, %v7290_v10  ;;  %v7220_v26 = vunpack.i.l.bf16 %v8695_v1 }
 0x293   : > { %2738 = vmatpush.msrb.mxu1 %v1668_v49  ;;  %v1659_v0 = vsel %vm653_vm6, %v7231_v22, %v7291_v62  ;;  %v7235_v22 = vunpack.i.l.bf16 %v8725_v31 }
 0x294   : > { %v8868_v37 = vpop.permute.xlu2 %7333  ;;  %2720 = vmatpush.msrb.mxu0 %v2222_v24  ;;  %2766 = vmatpush.msrb.mxu3 %v2223_v29  ;;  %v2046_v1 = vsel %vm937_vm2, %v7220_v26, %v7265_v9  ;;  %v7236_v24 = vunpack.i.h.bf16 %v8725_v31  ;;  %v7261_v31 = vunpack.i.h.bf16 %v8710_v60 }
 0x295   : > { %v7336_v19 = vunpack.i.h.bf16 %v8868_v37  ;;  %v7335_v44 = vunpack.i.l.bf16 %v8868_v37  ;;  %6710 = vmatmul.msk.f32.vlgmr.msrb.gmra.mxu0 %vm2445_vm10, %v8179_v42  ;;  %2739 = vmatpush.msrb.mxu1 %v1659_v0  ;;  %v2045_v42 = vsel %vm937_vm2, %v7210_v5, %v7220_v26  ;;  %v2036_v5 = vsel %vm937_vm2, %v7211_v23, %v7221_v17  ;;  %v8953_v26 = vld [vmem:[%s10923_s3 + $0x8] sm:$0xff] }
 0x296   : > { %2774 = vmatpush.msra.mxu0 %v2139_v32  ;;  %2820 = vmatpush.msra.mxu3 %v2140_v25  ;;  %v7284_v51 = vpop.permute.xlu1 %7283  ;;  %v1951_v23 = vsel %vm863_vm3, %v7225_v7, %v7235_v22  ;;  %v1942_v4 = vsel %vm863_vm3, %v7226_v35, %v7236_v24  ;;  %v7280_v35 = vunpack.i.l.bf16 %v8801_v53  ;;  %v7295_v17 = vunpack.i.l.bf16 %v8841_v21 }
 0x297   : > { %v2233_v40 = vsel %vm1087_vm1, %v7305_v58, %v7335_v44  ;;  %v8898_v15 = vpop.permute.xlu0 %7308  ;;  %v7285_v50 = vunpack.i.l.bf16 %v7284_v51  ;;  %v2224_v39 = vsel %vm1087_vm1, %v7306_v38, %v7336_v19  ;;  %v7286_v59 = vunpack.i.h.bf16 %v7284_v51  ;;  %6712 = vmatmul.msk.f32.vlgmr.msrb.gmra.mxu3 %vm2445_vm10, %v8953_v26 }
 0x298   : > { %2775 = vmatpush.msra.mxu0 %v2130_v61  ;;  %2821 = vmatpush.msra.mxu3 %v2131_v16  ;;  %v7311_v11 = vunpack.i.h.bf16 %v8898_v15  ;;  %v7310_v58 = vunpack.i.l.bf16 %v8898_v15  ;;  %v10999_v51 = vmax.f32 %v8007_v46, 0.0  ;;  %v7320_v61 = vunpack.i.l.bf16 %v8825_v34 }
 0x299   : > { %2811 = vmatpush.msra.mxu2 %v2233_v40  ;;  %v1952_v25 = vsel %vm863_vm3, %v7235_v22, %v7285_v50  ;;  %v1943_v60 = vsel %vm863_vm3, %v7236_v24, %v7286_v59  ;;  %v11000_v46 = vmax.f32 %v8010_v47, 0.0  ;;  %v7321_v40 = vunpack.i.h.bf16 %v8825_v34 }
 0x29a   : > { %2701 = vmatmul.f32.gmra.mxu2 %v8314_v55  ;;  %2776 = vmatpush.msra.mxu0 %v2045_v42  ;;  %v2472_v52 = vpop.f32.mrf.mxu2  ;;  %v1574_v38 = vsel %vm583_vm7, %v7255_v48, %v7310_v58  ;;  %v1565_v48 = vsel %vm583_vm7, %v7256_v54, %v7311_v11  ;;  %v1763_v53 = vsel %vm723_vm5, %v7275_v30, %v7280_v35  ;;  %v7296_v47 = vunpack.i.h.bf16 %v8841_v21  ;;  %v7344_v30 = vld [vmem:[%s10923_s3 + $0x18] sm:$0xff] }
 0x29b   : > { %2812 = vmatpush.msra.mxu2 %v2224_v39  ;;  %2822 = vmatpush.msra.mxu3 %v2046_v1  ;;  %v1754_v34 = vsel %vm723_vm5, %v7276_v28, %v7281_v13  ;;  %v1755_v39 = vsel %vm723_vm5, %v7281_v13, %v7321_v40  ;;  %v1669_v21 = vsel %vm653_vm6, %v7290_v10, %v7295_v17  ;;  %v11004_v15 = vmax.f32 %v8072_v18, 0.0 }
 0x29c   : > { %2777 = vmatpush.msra.mxu0 %v2036_v5  ;;  %2740 = vmatpush.msrb.mxu1 %v1574_v38  ;;  %v8924_v29 = vpop.permute.xlu2 %2442  ;;  %v1660_v38 = vsel %vm653_vm6, %v7291_v62, %v7296_v47  ;;  %vm3886_vm2 = vcmask 31744   ;;  %vm3031_vm3 = vcmask 261248  }
 0x29d   : > { %2823 = vmatpush.msra.mxu3 %v2037_v43  ;;  %v2473_v32 = vadd.f32 %v2472_v52, %v8924_v29  ;;  %6711 = vmatmul.msk.f32.gmra.mxu0 %vm2445_vm10, %v8233_v14  ;;  %v1857_v14 = vsel %vm793_vm4, %v7245_v6, %v7260_v63  ;;  %v1848_v6 = vsel %vm793_vm4, %v7246_v12, %v7261_v31 }
 0x29e   : > { %2778 = vmatpush.msra.mxu0 %v1951_v23  ;;  %2741 = vmatpush.msrb.mxu1 %v1565_v48  ;;  %v1764_v12 = vsel %vm723_vm5, %v7280_v35, %v7320_v61  ;;  %v11002_v23 = vmax.f32 %v8058_v8, 0.0 }
 0x29f   : > { %2824 = vmatpush.msra.mxu3 %v1952_v25  ;;  %v7299_v7 = vpop.permute.xlu1 %7298  ;;  %v8947_v54 = vadd.f32 %v2495_v20, %v2473_v32  ;;  %v7324_v3 = vpop.permute.xlu0 %7323  ;;  %v11001_v20 = vmax.f32 %v8053_v2, 0.0  ;;  %v11003_v2 = vmax.f32 %v8080_v27, 0.0 }
 0x2a0   : > { %v7301_v9 = vunpack.i.h.bf16 %v7299_v7  ;;  %v7300_v49 = vunpack.i.l.bf16 %v7299_v7  ;;  %2779 = vmatpush.msra.mxu0 %v1942_v4  ;;  %2742 = vmatpush.msrb.mxu1 %v10999_v51  ;;  %v7325_v56 = vunpack.i.l.bf16 %v7324_v3  ;;  %v7326_v50 = vunpack.i.h.bf16 %v7324_v3  ;;  %v2538_v27 = vpop.f32.mrf.mxu0 }
 0x2a1   : > { %2825 = vmatpush.msra.mxu3 %v1943_v60  ;;  %2875 = vst [vmem:[%s8940_s25 + $0x48] sm:$0xff] %v8947_v54 }
 0x2a2   : > { %2780 = vmatpush.msra.mxu0 %v1857_v14  ;;  %v1858_v16 = vsel %vm793_vm4, %v7260_v63, %v7300_v49  ;;  %6714 = vmatmul.msk.f32.vlgmr.msra.gmra.mxu2 %vm2445_vm10, %v8953_v26  ;;  %v1849_v0 = vsel %vm793_vm4, %v7261_v31, %v7301_v9  ;;  %v1670_v28 = vsel %vm653_vm6, %v7295_v17, %v7325_v56  ;;  %vm3079_vm4 = vcmask 392448  }
 0x2a3   : > { %2826 = vmatpush.msra.mxu3 %v1858_v16  ;;  %2743 = vmatpush.msrb.mxu1 %v11000_v46  ;;  %v1661_v10 = vsel %vm653_vm6, %v7296_v47, %v7326_v50 }
 0x2a4   : > { %2781 = vmatpush.msra.mxu0 %v1848_v6  ;;  %2744 = vmatmul.f32.vlgmr.msrb.gmra.mxu1 %v8282_v36 }
 0x2a5   : > { %2827 = vmatpush.msra.mxu3 %v1849_v0 }
 0x2a6   : > { %2782 = vmatpush.msra.mxu0 %v1763_v53  ;;  %6713 = vmatmul.msk.f32.gmra.mxu3 %vm2445_vm10, %v7344_v30 }
 0x2a7   : > { %v7314_v42 = vpop.permute.xlu1 %7313  ;;  %2828 = vmatpush.msra.mxu3 %v1764_v12  ;;  %v7339_v1 = vpop.permute.xlu0 %7338 }
 0x2a8   : > { %2783 = vmatpush.msra.mxu0 %v1754_v34  ;;  %v7315_v22 = vunpack.i.l.bf16 %v7314_v42  ;;  %v7340_v45 = vunpack.i.l.bf16 %v7339_v1  ;;  %v7341_v52 = vunpack.i.h.bf16 %v7339_v1  ;;  %v7316_v5 = vunpack.i.h.bf16 %v7314_v42  ;;  %v2541_v25 = vpop.f32.mrf.mxu0 }
 0x2a9   : > { %2829 = vmatpush.msra.mxu3 %v1755_v39 }
 0x2aa   : > { %2784 = vmatpush.msra.mxu0 %v1669_v21  ;;  %6715 = vmatmul.msk.f32.gmra.mxu2 %vm2445_vm10, %v7344_v30  ;;  %v2234_v59 = vsel %vm1087_vm1, %v7335_v44, %v7340_v45  ;;  %v1575_v43 = vsel %vm583_vm7, %v7310_v58, %v7315_v22  ;;  %v2225_v33 = vsel %vm1087_vm1, %v7336_v19, %v7341_v52  ;;  %vm3248_vm1 = vcmask 195584  }
 0x2ab   : > { %2830 = vmatpush.msra.mxu3 %v1670_v28  ;;  %6890 = vmatpush.msra.mxu1 %v2234_v59  ;;  %v1566_v44 = vsel %vm583_vm7, %v7311_v11, %v7316_v5  ;;  %v7345_v11 = vld [vmem:[%s10923_s3] sm:$0xff] }
 0x2ac   : > { %2785 = vmatpush.msra.mxu0 %v1660_v38  ;;  %2747 = vmatmul.f32.gmra.mxu1 %v8314_v55 }
 0x2ad   : > { %2831 = vmatpush.msra.mxu3 %v1661_v10  ;;  %6891 = vmatpush.msra.mxu1 %v2225_v33 }
 0x2ae   : > { %2786 = vmatpush.msra.mxu0 %v1575_v43 }
 0x2af   : > { %v7329_v62 = vpop.permute.xlu1 %7328 }
 0x2b0   : > { %v7331_v63 = vunpack.i.h.bf16 %v7329_v62  ;;  %v7330_v24 = vunpack.i.l.bf16 %v7329_v62  ;;  %2787 = vmatpush.msra.mxu0 %v1566_v44 }
 0x2b2   : > { %2788 = vmatpush.msra.mxu0 %v11001_v20  ;;  %v1576_v58 = vsel %vm583_vm7, %v7315_v22, %v7330_v24  ;;  %v1567_v37 = vsel %vm583_vm7, %v7316_v5, %v7331_v63 }
 0x2b3   : > { %2832 = vmatpush.msra.mxu3 %v1576_v58 }
 0x2b4   : > { %2789 = vmatpush.msra.mxu0 %v11002_v23  ;;  %6717 = vmatmul.msk.f32.vlgmr.msra.gmra.mxu1 %vm2445_vm10, %v7344_v30 }
 0x2b5   : > { %2790 = vmatmul.f32.vlgmr.msra.gmra.mxu0 %v8282_v36  ;;  %2833 = vmatpush.msra.mxu3 %v1567_v37 }
 0x2b6   : > { %2857 = vmatpush.msrb.mxu0 %v2234_v59 }
 0x2b7   : > { %v9022_v19 = vpop.permute.xlu1 %2437  ;;  %2834 = vmatpush.msra.mxu3 %v11003_v2 }
 0x2b8   : > { %2858 = vmatpush.msrb.mxu0 %v2225_v33  ;;  %v2470_v8 = vadd.f32 %v8854_v57, %v9022_v19 }
 0x2b9   : > { %2835 = vmatpush.msra.mxu3 %v11004_v15 }
 0x2ba   : > { %2836 = vmatmul.f32.vlgmr.msra.gmra.mxu3 %v7345_v11  ;;  %v9034_v36 = vadd.f32 %v8856_v41, %v2470_v8  ;;  %v2584_v41 = vpop.f32.mrf.mxu2 }
 0x2bc   : > { %2906 = vrot.lane.b32.xlu2 %v9034_v36, %s7361_s16  ;;  %2866 = vst [vmem:[%s8940_s25] sm:$0xff] %v9034_v36 }
 0x2bd   : > { %2793 = vmatmul.f32.gmra.mxu0 %v8314_v55 }
 0x2be   : > { %v2515_v57 = vpop.f32.mrf.mxu3 }
 0x2bf   : > { %v2516_v18 = vadd.f32 %v2515_v57, %v9022_v19 }
 0x2c1   : > { %v9043_v48 = vadd.f32 %v2538_v27, %v2516_v18 }
 0x2c2   : > { %2839 = vmatmul.f32.gmra.mxu3 %v8314_v55  ;;  %v2587_v7 = vpop.f32.mrf.mxu2 }
 0x2c3   : > { %2867 = vst [vmem:[%s8940_s25 + $0x8] sm:$0xff] %v9043_v48  ;;  %2958 = vrot.lane.b32.xlu0 %v9043_v48, %s7361_s16 }
 0x2c4   : > { %2908 = vrot.lane.b32.xlu2 %v8947_v54, %s7361_s16 }
 0x2c5   : > { %6716 = vmatmul.msk.f32.vlgmr.msrb.gmra.mxu0 %vm2445_vm10, %v8953_v26 }
 0x2c6   : > { %v2518_v32 = vpop.f32.mrf.mxu3 }
 0x2c7   : > { %v2519_v55 = vadd.f32 %v2518_v32, %v8924_v29 }
 0x2c9   : > { %v9054_v31 = vadd.f32 %v2541_v25, %v2519_v55 }
 0x2cb   : > { %2876 = vst [vmem:[%s8940_s25 + $0x50] sm:$0xff] %v9054_v31  ;;  %2960 = vrot.lane.b32.xlu0 %v9054_v31, %s7361_s16 }
 0x2d5   : > { %v2561_v4 = vpop.f32.mrf.mxu1 }
 0x2d6   : > { %v2562_v9 = vadd.f32 %v2561_v4, %v9022_v19  ;;  %v2607_v49 = vpop.f32.mrf.mxu0 }
 0x2d7   : > { %v2608_v60 = vadd.f32 %v2607_v49, %v9022_v19 }
 0x2d8   : > { %v2630_v26 = vpop.f32.mrf.mxu2  ;;  %v9062_v3 = vadd.f32 %v2584_v41, %v2562_v9 }
 0x2d9   : > { %v9064_v35 = vadd.f32 %v2630_v26, %v2608_v60 }
 0x2da   : > { %2868 = vst [vmem:[%s8940_s25 + $0x10] sm:$0xff] %v9062_v3  ;;  %3084 = vrot.lane.b32.xlu1 %v9062_v3, %s7361_s16 }
 0x2db   : > { %2869 = vst [vmem:[%s8940_s25 + $0x18] sm:$0xff] %v9064_v35 }
 0x2dd   : > { %v2564_v14 = vpop.f32.mrf.mxu1 }
 0x2de   : > { %v2565_v51 = vadd.f32 %v2564_v14, %v8924_v29  ;;  %v2610_v61 = vpop.f32.mrf.mxu0 }
 0x2df   : > { %v2611_v16 = vadd.f32 %v2610_v61, %v8924_v29 }
 0x2e0   : > { %v9074_v13 = vadd.f32 %v2587_v7, %v2565_v51  ;;  %v2633_v6 = vpop.f32.mrf.mxu2 }
 0x2e1   : > { %v9076_v46 = vadd.f32 %v2633_v6, %v2611_v16  ;;  %v2653_v40 = vpop.f32.mrf.mxu3 }
 0x2e2   : > { %2877 = vst [vmem:[%s8940_s25 + $0x58] sm:$0xff] %v9074_v13  ;;  %3086 = vrot.lane.b32.xlu1 %v9074_v13, %s7361_s16  ;;  %v2654_v0 = vadd.f32 %v2653_v40, %v9022_v19 }
 0x2e3   : > { %2878 = vst [vmem:[%s8940_s25 + $0x60] sm:$0xff] %v9076_v46 }
 0x2e9   : > { %v2656_v56 = vpop.f32.mrf.mxu3 }
 0x2ea   : > { %3210 = vrot.lane.b32.xlu1 %v9064_v35, %s7361_s16  ;;  %v2657_v12 = vadd.f32 %v2656_v56, %v8924_v29 }
 0x2fa   : > { %v2676_v17 = vpop.f32.mrf.mxu1 }
 0x2fb   : > { %v9087_v53 = vadd.f32 %v2676_v17, %v2654_v0  ;;  %v2884_v17 = vlaneseq }
 0x2fd   : > { %2870 = vst [vmem:[%s8940_s25 + $0x20] sm:$0xff] %v9087_v53  ;;  %3333 = vrot.lane.b32.xlu0 %v9087_v53, %s7361_s16  ;;  %v2885_v56 = vshrl.u32 %v2884_v17, 7 }
 0x302   : > { %v2679_v47 = vpop.f32.mrf.mxu1 }
 0x303   : > { %v9094_v42 = vadd.f32 %v2679_v47, %v2657_v12  ;;  %v2890_v12 = vand.u32 127, %v2884_v17 }
 0x305   : > { %2879 = vst [vmem:[%s8940_s25 + $0x68] sm:$0xff] %v9094_v42  ;;  %3212 = vrot.lane.b32.xlu0 %v9076_v46, %s7361_s16  ;;  %3335 = vrot.lane.b32.xlu2 %v9094_v42, %s7361_s16 }
 0x312   : > { %v2722_v34 = vpop.f32.mrf.mxu0 }
 0x314   : > { %v2699_v50 = vpop.f32.mrf.mxu2 }
 0x315   : > { %v2700_v39 = vadd.f32 %v2699_v50, %v9022_v19  ;;  %v2891_v50 = vmul.u32 2, %v2890_v12 }
 0x316   : > { %v2907_v1 = vpop.permute.xlu2 %2906 }
 0x317   : > { %v9103_v30 = vadd.f32 %v2722_v34, %v2700_v39  ;;  %v9111_v28 = vmax.f32 %v9034_v36, %v2907_v1  ;;  %v2888_v34 = vadd.s32 24, %v2885_v56  ;;  %v2887_v39 = vadd.s32 16, %v2885_v56 }
 0x318   : > { %vm9255_vm14 = vcmp.eq.s32.totalorder %v2885_v56, %v2891_v50 }
 0x319   : > { %2871 = vst [vmem:[%s8940_s25 + $0x28] sm:$0xff] %v9103_v30  ;;  %3414 = vrot.lane.b32.xlu1 %v9103_v30, %s7361_s16  ;;  %vm9226_vm11 = vcmp.eq.s32.totalorder %v2888_v34, %v2891_v50  ;;  %vm9233_vm12 = vcmp.eq.s32.totalorder %v2887_v39, %v2891_v50 }
 0x31a   : > { %v2725_v21 = vpop.f32.mrf.mxu0  ;;  %v2768_v59 = vpop.f32.mrf.mxu3 }
 0x31d   : > { %v2702_v22 = vpop.f32.mrf.mxu2 }
 0x31e   : > { %v2703_v45 = vadd.f32 %v2702_v22, %v8924_v29  ;;  %v2909_v60 = vpop.permute.xlu2 %2908 }
 0x31f   : > { %v9189_v61 = vmax.f32 %v8947_v54, %v2909_v60 }
 0x320   : > { %v9113_v52 = vadd.f32 %v2725_v21, %v2703_v45 }
 0x321   : > { %v2745_v5 = vpop.f32.mrf.mxu1  ;;  %2916 = vrot.lane.b32.xlu1 %v9111_v28, %s7359_s29 }
 0x322   : > { %2880 = vst [vmem:[%s8940_s25 + $0x70] sm:$0xff] %v9113_v52  ;;  %v2746_v38 = vadd.f32 %v2745_v5, %v9022_v19  ;;  %v7363_v5 = vmov 1.0  }
 0x323   : > { %6722 = vmatpush.msk.msrb.mxu2 %vm9226_vm11, %v7363_v5  ;;  %6728 = vmatpush.msk.msra.mxu0 %vm9226_vm11, %v7363_v5 }
 0x324   : > { %v9120_v10 = vadd.f32 %v2768_v59, %v2746_v38  ;;  %6734 = vmatpush.msk.msrb.mxu1 %vm9226_vm11, %v7363_v5  ;;  %6746 = vmatpush.msk.msrb.mxu3 %vm9226_vm11, %v7363_v5 }
 0x325   : > { %v2814_v63 = vpop.f32.mrf.mxu2  ;;  %6723 = vmatpush.msk.msrb.mxu2 %vm9233_vm12, %v7363_v5  ;;  %6729 = vmatpush.msk.msra.mxu0 %vm9233_vm12, %v7363_v5 }
 0x326   : > { %2872 = vst [vmem:[%s8940_s25 + $0x30] sm:$0xff] %v9120_v10  ;;  %3530 = vrot.lane.b32.xlu2 %v9120_v10, %s7361_s16  ;;  %6735 = vmatpush.msk.msrb.mxu1 %vm9233_vm12, %v7363_v5 }
 0x327   : > { %6747 = vmatpush.msk.msrb.mxu3 %vm9233_vm12, %v7363_v5 }
 0x329   : > { %v2748_v43 = vpop.f32.mrf.mxu1  ;;  %v2771_v62 = vpop.f32.mrf.mxu3 }
 0x32a   : > { %v2749_v33 = vadd.f32 %v2748_v43, %v8924_v29 }
 0x32c   : > { %v9127_v44 = vadd.f32 %v2771_v62, %v2749_v33 }
 0x32d   : > { %v2817_v15 = vpop.f32.mrf.mxu2 }
 0x32e   : > { %2881 = vst [vmem:[%s8940_s25 + $0x78] sm:$0xff] %v9127_v44  ;;  %3532 = vrot.lane.b32.xlu0 %v9127_v44, %s7361_s16 }
 0x331   : > { %v2863_v25 = vpop.f32.mrf.mxu1 }
 0x332   : > { %v2791_v24 = vpop.f32.mrf.mxu0 }
 0x333   : > { %v2792_v20 = vadd.f32 %v2791_v24, %v9022_v19 }
 0x335   : > { %v9134_v58 = vadd.f32 %v2814_v63, %v2792_v20  ;;  %v2959_v23 = vpop.permute.xlu0 %2958 }
 0x336   : > { %3416 = vrot.lane.b32.xlu0 %v9113_v52, %s7361_s16  ;;  %v2962_v37 = vsel %vm583_vm7, %v2907_v1, %v2959_v23  ;;  %v9170_v49 = vmax.f32 %v9043_v48, %v2959_v23  ;;  %v2886_v1 = vadd.s32 8, %v2885_v56 }
 0x337   : > { %2873 = vst [vmem:[%s8940_s25 + $0x38] sm:$0xff] %v9134_v58  ;;  %v2968_v2 = vmax.f32 %v9034_v36, %v2962_v37 }
 0x338   : > { %vm9242_vm13 = vcmp.eq.s32.totalorder %v2886_v1, %v2891_v50 }
 0x339   : > { %2976 = vrot.lane.b32.xlu1 %v2968_v2, %s7359_s29  ;;  %6724 = vmatpush.msk.msrb.mxu2 %vm9242_vm13, %v7363_v5 }
 0x33a   : > { %v2794_v8 = vpop.f32.mrf.mxu0  ;;  %6730 = vmatpush.msk.msra.mxu0 %vm9242_vm13, %v7363_v5  ;;  %6736 = vmatpush.msk.msrb.mxu1 %vm9242_vm13, %v7363_v5 }
 0x33b   : > { %v2795_v11 = vadd.f32 %v2794_v8, %v8924_v29  ;;  %6725 = vmatpush.msk.msrb.mxu2 %vm9255_vm14, %v7363_v5  ;;  %6748 = vmatpush.msk.msrb.mxu3 %vm9242_vm13, %v7363_v5 }
 0x33c   : > { %6731 = vmatpush.msk.msra.mxu0 %vm9255_vm14, %v7363_v5  ;;  %6737 = vmatpush.msk.msrb.mxu1 %vm9255_vm14, %v7363_v5 }
 0x33d   : > { %v9144_v27 = vadd.f32 %v2817_v15, %v2795_v11  ;;  %v2837_v57 = vpop.f32.mrf.mxu3  ;;  %6740 = vmatpush.msk.msra.mxu2 %vm9226_vm11, %v7363_v5  ;;  %6749 = vmatpush.msk.msrb.mxu3 %vm9255_vm14, %v7363_v5 }
 0x33e   : > { %v2838_v18 = vadd.f32 %v2837_v57, %v9022_v19  ;;  %6758 = vmatpush.msk.msra.mxu1 %vm9226_vm11, %v7363_v5  ;;  %6752 = vmatpush.msk.msrb.mxu0 %vm9226_vm11, %v7363_v5 }
 0x33f   : > { %2882 = vst [vmem:[%s8940_s25 + $0x80] sm:$0xff] %v9144_v27  ;;  %6741 = vmatpush.msk.msra.mxu2 %vm9233_vm12, %v7363_v5  ;;  %6770 = vmatpush.msk.msra.mxu3 %vm9226_vm11, %v7363_v5 }
 0x340   : > { %6759 = vmatpush.msk.msra.mxu1 %vm9233_vm12, %v7363_v5  ;;  %6753 = vmatpush.msk.msrb.mxu0 %vm9233_vm12, %v7363_v5 }
 0x341   : > { %6742 = vmatpush.msk.msra.mxu2 %vm9242_vm13, %v7363_v5  ;;  %6771 = vmatpush.msk.msra.mxu3 %vm9233_vm12, %v7363_v5 }
 0x342   : > { %v2860_v41 = vpop.f32.mrf.mxu0  ;;  %6760 = vmatpush.msk.msra.mxu1 %vm9242_vm13, %v7363_v5  ;;  %6754 = vmatpush.msk.msrb.mxu0 %vm9242_vm13, %v7363_v5 }
 0x343   : > { %v9149_v32 = vadd.f32 %v2860_v41, %v2838_v18  ;;  %6743 = vmatpush.msk.msra.mxu2 %vm9255_vm14, %v7363_v5  ;;  %6772 = vmatpush.msk.msra.mxu3 %vm9242_vm13, %v7363_v5 }
 0x344   : > { %6761 = vmatpush.msk.msra.mxu1 %vm9255_vm14, %v7363_v5  ;;  %6755 = vmatpush.msk.msrb.mxu0 %vm9255_vm14, %v7363_v5 }
 0x345   : > { %2874 = vst [vmem:[%s8940_s25 + $0x40] sm:$0xff] %v9149_v32  ;;  %v2840_v36 = vpop.f32.mrf.mxu3  ;;  %3768 = vrot.lane.b32.xlu0 %v9149_v32, %s7361_s16  ;;  %6773 = vmatpush.msk.msra.mxu3 %vm9255_vm14, %v7363_v5 }
 0x346   : > { %v2841_v55 = vadd.f32 %v2840_v36, %v8924_v29  ;;  %v2961_v29 = vpop.permute.xlu0 %2960 }
 0x347   : > { %v2963_v26 = vsel %vm583_vm7, %v2909_v60, %v2961_v29  ;;  %v9194_v16 = vmax.f32 %v9054_v31, %v2961_v29 }
 0x348   : > { %v9156_v7 = vadd.f32 %v2863_v25, %v2841_v55  ;;  %v2970_v51 = vmax.f32 %v8947_v54, %v2963_v26 }
 0x34a   : > { %2883 = vst [vmem:[%s8940_s25 + $0x88] sm:$0xff] %v9156_v7  ;;  %3770 = vrot.lane.b32.xlu2 %v9156_v7, %s7361_s16  ;;  %s7367_s25 = smov 8  }
 0x34c   : > { %v9164_v19 = vpop.permute.xlu1 %3084 }
 0x34d   : > { %3654 = vrot.lane.b32.xlu0 %v9134_v58, %s7361_s16  ;;  %v3088_v4 = vsel %vm583_vm7, %v2959_v23, %v9164_v19 }
 0x34e   : > { %v3094_v9 = vmax.f32 %v9043_v48, %v3088_v4  ;;  %v9183_v48 = vmax.f32 %v9062_v3, %v9164_v19 }
 0x350   : > { %3102 = vrot.lane.b32.xlu1 %v3094_v9, %s7359_s29 }
 0x352   : > { %2978 = vrot.lane.b32.xlu2 %v9170_v49, %s7359_s29 }
 0x354   : > { %v9178_v14 = vpop.permute.xlu1 %3086 }
 0x355   : > { %3656 = vrot.lane.b32.xlu0 %v9144_v27, %s7361_s16  ;;  %v9208_v54 = vmax.f32 %v9074_v13, %v9178_v14  ;;  %v3089_v33 = vsel %vm583_vm7, %v2961_v29, %v9178_v14 }
 0x356   : > { %v3096_v63 = vmax.f32 %v9054_v31, %v3089_v33 }
 0x358   : > { %2980 = vrot.lane.b32.xlu1 %v2970_v51, %s7359_s29 }
 0x35a   : > { %3104 = vrot.lane.b32.xlu2 %v9183_v48, %s7359_s29 }
 0x35c   : > { %v9196_v6 = vpop.permute.xlu1 %3210 }
 0x35d   : > { %2918 = vrot.lane.b32.xlu0 %v9189_v61, %s7359_s29  ;;  %v9202_v40 = vmax.f32 %v9064_v35, %v9196_v6 }
 0x35f   : > { %v9212_v0 = vpop.permute.xlu2 %3335 }
 0x360   : > { %v9216_v47 = vmax.f32 %v9094_v42, %v9212_v0 }
 0x362   : > { %2982 = vrot.lane.b32.xlu2 %v9194_v16, %s7359_s29 }
 0x365   : > { %3226 = vrot.lane.b32.xlu0 %v9202_v40, %s7359_s29 }
 0x36a   : > { %3108 = vrot.lane.b32.xlu2 %v9208_v54, %s7359_s29 }
 0x36f   : > { %v9218_v22 = vpop.permute.xlu0 %3333 }
 0x370   : > { %v9224_v21 = vmax.f32 %v9087_v53, %v9218_v22 }
 0x372   : > { %3351 = vrot.lane.b32.xlu2 %v9216_v47, %s7359_s29  ;;  %3349 = vrot.lane.b32.xlu1 %v9224_v21, %s7359_s29 }
 0x377   : > { %v9279_v62 = vpop.permute.xlu0 %3212 }
 0x378   : > { %v9290_v24 = vmax.f32 %v9076_v46, %v9279_v62 }
 0x37a   : > { %3228 = vrot.lane.b32.xlu0 %v9290_v24, %s7359_s29  ;;  %3106 = vrot.lane.b32.xlu1 %v3096_v63, %s7359_s29 }
 0x380   : > { %v9325_v31 = vpop.permute.xlu2 %3530 }
 0x381   : > { %v9341_v20 = vmax.f32 %v9120_v10, %v9325_v31 }
 0x383   : > { %3550 = vrot.lane.b32.xlu1 %v9341_v20, %s7359_s29 }
 0x38b   : > { %v3415_v23 = vpop.permute.xlu1 %3414 }
 0x38c   : > { %v3418_v37 = vsel %vm583_vm7, %v9218_v22, %v3415_v23  ;;  %v3534_v8 = vsel %vm583_vm7, %v3415_v23, %v9325_v31  ;;  %v9393_v25 = vmax.f32 %v9103_v30, %v3415_v23 }
 0x38d   : > { %v3424_v2 = vmax.f32 %v9087_v53, %v3418_v37  ;;  %v3540_v57 = vmax.f32 %v9103_v30, %v3534_v8 }
 0x38f   : > { %3432 = vrot.lane.b32.xlu1 %v3424_v2, %s7359_s29 }
 0x393   : > { %v2917_v15 = vpop.permute.xlu1 %2916 }
 0x394   : > { %v2922_v11 = vmax.f32 %v9111_v28, %v2917_v15 }
 0x396   : > { %6726 = vmatmul.msk.f32.vlgmr.msrb.gmra.mxu2 %vm2924_vm15, %v2922_v11 }
 0x397   : > { %3548 = vrot.lane.b32.xlu1 %v3540_v57, %s7359_s29  ;;  %6764 = vmatpush.msk.msrb.mxu2 %vm9226_vm11, %v7363_v5 }
 0x399   : > { %6765 = vmatpush.msk.msrb.mxu2 %vm9233_vm12, %v7363_v5 }
 0x39b   : > { %6766 = vmatpush.msk.msrb.mxu2 %vm9242_vm13, %v7363_v5 }
 0x39d   : > { %6767 = vmatpush.msk.msrb.mxu2 %vm9255_vm14, %v7363_v5 }
 0x3a0   : > { %v9382_v53 = vpop.permute.xlu0 %3532 }
 0x3a1   : > { %v9386_v18 = vmax.f32 %v9127_v44, %v9382_v53 }
 0x3a3   : > { %3554 = vrot.lane.b32.xlu2 %v9386_v18, %s7359_s29 }
 0x3a4   : > { %v9390_v41 = vpop.permute.xlu2 %3770 }
 0x3a5   : > { %v9408_v30 = vmax.f32 %v9156_v7, %v9390_v41 }
 0x3a8   : > { %v3417_v36 = vpop.permute.xlu0 %3416 }
 0x3a9   : > { %v9396_v55 = vmax.f32 %v9113_v52, %v3417_v36  ;;  %v3535_v4 = vsel %vm583_vm7, %v3417_v36, %v9382_v53  ;;  %v3419_v7 = vsel %vm583_vm7, %v9212_v0, %v3417_v36 }
 0x3aa   : > { %v3542_v9 = vmax.f32 %v9113_v52, %v3535_v4  ;;  %v3426_v12 = vmax.f32 %v9094_v42, %v3419_v7 }
 0x3ab   : > { %3438 = vrot.lane.b32.xlu0 %v9396_v55, %s7359_s29  ;;  %3434 = vrot.lane.b32.xlu2 %v9393_v25, %s7359_s29  ;;  %v2977_v51 = vpop.permute.xlu1 %2976 }
 0x3ac   : > { %3552 = vrot.lane.b32.xlu1 %v3542_v9, %s7359_s29  ;;  %v2979_v29 = vpop.permute.xlu2 %2978 }
 0x3ad   : > { %v3036_v26 = vmax.f32 %v9170_v49, %v2979_v29  ;;  %v2984_v23 = vsel %vm723_vm5, %v2977_v51, %v2979_v29 }
 0x3ae   : > { %v2988_v15 = vmax.f32 %v9111_v28, %v2984_v23  ;;  %v3337_v28 = vsel %vm583_vm7, %v9196_v6, %v9218_v22 }
 0x3b4   : > { %3786 = vrot.lane.b32.xlu1 %v9408_v30, %s7359_s29  ;;  %v3105_v17 = vpop.permute.xlu2 %3104 }
 0x3b5   : > { %v3162_v34 = vmax.f32 %v9183_v48, %v3105_v17 }
 0x3b7   : > { %v9412_v60 = vpop.permute.xlu0 %3768 }
 0x3b8   : > { %v9416_v52 = vmax.f32 %v9149_v32, %v9412_v60 }
 0x3ba   : > { %3784 = vrot.lane.b32.xlu2 %v9416_v52, %s7359_s29 }
 0x3bc   : > { %3040 = vrot.lane.b32.xlu1 %v3036_v26, %s10970_s21  ;;  %v2983_v39 = vpop.permute.xlu2 %2982 }
 0x3bd   : > { %v3037_v42 = vmax.f32 %v9194_v16, %v2983_v39 }
 0x3bf   : > { %v9424_v56 = vpop.permute.xlu0 %3654 }
 0x3c0   : > { %v9429_v32 = vmax.f32 %v9134_v58, %v9424_v56 }
 0x3c2   : > { %3670 = vrot.lane.b32.xlu0 %v9429_v32, %s7359_s29  ;;  %3436 = vrot.lane.b32.xlu2 %v3426_v12, %s7359_s29  ;;  %v3103_v50 = vpop.permute.xlu1 %3102 }
 0x3c3   : > { %v3110_v2 = vsel %vm723_vm5, %v3103_v50, %v3105_v17 }
 0x3c4   : > { %3166 = vrot.lane.b32.xlu1 %v3162_v34, %s7365_s22  ;;  %v3109_v11 = vpop.permute.xlu2 %3108  ;;  %v3114_v36 = vmax.f32 %v9170_v49, %v3110_v2  ;;  %v3343_v49 = vmax.f32 %v9064_v35, %v3337_v28 }
 0x3c5   : > { %v3163_v4 = vmax.f32 %v9208_v54, %v3109_v11  ;;  %v3214_v54 = vsel %vm583_vm7, %v9164_v19, %v9196_v6 }
 0x3c6   : > { %v3220_v7 = vmax.f32 %v9062_v3, %v3214_v54  ;;  %v3215_v3 = vsel %vm583_vm7, %v9178_v14, %v9279_v62 }
 0x3c7   : > { %v9436_v1 = vpop.permute.xlu0 %3656  ;;  %v3222_v6 = vmax.f32 %v9074_v13, %v3215_v3 }
 0x3c8   : > { %v9441_v33 = vmax.f32 %v9144_v27, %v9436_v1 }
 0x3ca   : > { %3672 = vrot.lane.b32.xlu2 %v9441_v33, %s7359_s29  ;;  %3042 = vrot.lane.b32.xlu0 %v3037_v42, %s10970_s21  ;;  %v2981_v48 = vpop.permute.xlu1 %2980  ;;  %s7366_s29 = smov 40  }
 0x3cb   : > { %v2985_v63 = vsel %vm723_vm5, %v2981_v48, %v2983_v39 }
 0x3cc   : > { %v2989_v37 = vmax.f32 %v9189_v61, %v2985_v63  ;;  %v3352_v9 = vpop.permute.xlu2 %3351 }
 0x3cd   : > { %v3358_v29 = vmax.f32 %v9216_v47, %v3352_v9 }
 0x3ce   : > { %2994 = vrot.lane.b32.xlu1 %v2989_v37, %s7356_s26 }
 0x3cf   : > { %v2919_v8 = vpop.permute.xlu0 %2918 }
 0x3d0   : > { %v2923_v57 = vmax.f32 %v9189_v61, %v2919_v8 }
 0x3d2   : > { %6727 = vmatmul.msk.f32.gmra.mxu2 %vm2924_vm15, %v2923_v57  ;;  %2992 = vrot.lane.b32.xlu2 %v2988_v15, %s7356_s26  ;;  %s10960_s26 = smov 24  }
 0x3d3   : > { %3118 = vrot.lane.b32.xlu0 %v3114_v36, %s7366_s29 }
 0x3d6   : > { %3168 = vrot.lane.b32.xlu1 %v3163_v4, %s7365_s22 }
 0x3d7   : > { %v3227_v61 = vpop.permute.xlu0 %3226 }
 0x3d8   : > { %v3232_v22 = vmax.f32 %v3220_v7, %v3227_v61  ;;  %v3233_v19 = vmax.f32 %v9202_v40, %v3227_v61 }
 0x3de   : > { %3369 = vrot.lane.b32.xlu1 %v3358_v29, %s7367_s25 }
 0x3e4   : > { %v3350_v26 = vpop.permute.xlu1 %3349 }
 0x3e5   : > { %v3355_v51 = vmax.f32 %v3343_v49, %v3350_v26  ;;  %v3356_v17 = vmax.f32 %v9224_v21, %v3350_v26 }
 0x3e7   : > { %3363 = vrot.lane.b32.xlu2 %v3355_v51, %s7367_s25  ;;  %3365 = vrot.lane.b32.xlu0 %v3356_v17, %s7367_s25 }
 0x3ec   : > { %v3229_v12 = vpop.permute.xlu0 %3228  ;;  %v3107_v34 = vpop.permute.xlu1 %3106 }
 0x3ed   : > { %v3235_v35 = vmax.f32 %v9290_v24, %v3229_v12  ;;  %v3111_v50 = vsel %vm723_vm5, %v3107_v34, %v3109_v11  ;;  %v3234_v63 = vmax.f32 %v3222_v6, %v3229_v12 }
 0x3ee   : > { %v3115_v39 = vmax.f32 %v9194_v16, %v3111_v50  ;;  %v3338_v16 = vsel %vm583_vm7, %v9279_v62, %v9212_v0 }
 0x3ef   : > { %3240 = vrot.lane.b32.xlu2 %v3232_v22, %s10960_s26  ;;  %3291 = vrot.lane.b32.xlu1 %v3235_v35, %s7369_s23  ;;  %v3345_v48 = vmax.f32 %v9076_v46, %v3338_v16 }
 0x3f0   : > { %3120 = vrot.lane.b32.xlu0 %v3115_v39, %s7366_s29  ;;  %s7375_s29 = smov 72  }
 0x3f1   : > { %v3357_v23 = vmax.f32 %v3345_v48, %v3352_v9 }
 0x3f5   : > { %v3551_v24 = vpop.permute.xlu1 %3550 }
 0x3f6   : > { %v3607_v46 = vmax.f32 %v9341_v20, %v3551_v24 }
 0x3f7   : > { %3289 = vrot.lane.b32.xlu2 %v3233_v19, %s7369_s23 }
 0x3f8   : > { %3242 = vrot.lane.b32.xlu0 %v3233_v19, %s10960_s26 }
 0x3fd   : > { %v3555_v42 = vpop.permute.xlu2 %3554 }
 0x3fe   : > { %v3608_v40 = vmax.f32 %v9386_v18, %v3555_v42  ;;  %v3772_v18 = vsel %vm583_vm7, %v9424_v56, %v9412_v60 }
 0x3ff   : > { %3244 = vrot.lane.b32.xlu2 %v3234_v63, %s10960_s26  ;;  %v3778_v8 = vmax.f32 %v9134_v58, %v3772_v18  ;;  %v7378_v18 = vmov 0.0  }
 0x400   : > { %3613 = vrot.lane.b32.xlu1 %v3608_v40, %s7370_s24  ;;  %3367 = vrot.lane.b32.xlu0 %v3357_v23, %s7367_s25  ;;  %s7376_s25 = smov 88   ;;  %3888 = vst.msk [vmem:[#allocation8 + $0x28] sm:$0xff] %vm3886_vm2, %v7378_v18 }
 0x401   : > { %v3433_v14 = vpop.permute.xlu1 %3432  ;;  %3887 = vst.msk [vmem:[#allocation8 + $0x10] sm:$0xff] %vm3886_vm2, %v7378_v18  ;;  %vm4063_vm2 = vcmask 785408  }
 0x405   : > { %v3435_v37 = vpop.permute.xlu2 %3434 }
 0x406   : > { %v3440_v0 = vsel %vm723_vm5, %v3433_v14, %v3435_v37  ;;  %v3483_v13 = vmax.f32 %v9393_v25, %v3435_v37 }
 0x407   : > { %v3444_v62 = vmax.f32 %v9224_v21, %v3440_v0 }
 0x408   : > { %3487 = vrot.lane.b32.xlu1 %v3483_v13, %s10958_s27  ;;  %3611 = vrot.lane.b32.xlu0 %v3607_v46, %s7370_s24  ;;  %s10964_s24 = smov 32  }
 0x409   : > { %3448 = vrot.lane.b32.xlu2 %v3444_v62, %s10962_s28  ;;  %v3549_v2 = vpop.permute.xlu1 %3548 }
 0x40a   : > { %v3556_v21 = vsel %vm723_vm5, %v3549_v2, %v3551_v24 }
 0x40b   : > { %v3560_v11 = vmax.f32 %v9393_v25, %v3556_v21 }
 0x410   : > { %3246 = vrot.lane.b32.xlu0 %v3235_v35, %s10960_s26  ;;  %s7385_s26 = smov 12  }
 0x414   : > { %v3785_v15 = vpop.permute.xlu2 %3784 }
 0x415   : > { %v3790_v20 = vmax.f32 %v3778_v8, %v3785_v15  ;;  %v3791_v51 = vmax.f32 %v9416_v52, %v3785_v15  ;;  %v9645_v15 = vld [vmem:[#allocation8 + $0x28] sm:$0xff] }
 0x417   : > { %3798 = vrot.lane.b32.xlu1 %v3790_v20, %s7373_s17 }
 0x418   : > { %3564 = vrot.lane.b32.xlu0 %v3560_v11, %s7374_s20  ;;  %v9651_v11 = vld [vmem:[#allocation8 + $0x10] sm:$0xff] }
 0x419   : > { %v2948_v57 = vpop.f32.mrf.mxu2 }
 0x41a   : > { %2954 = vst.msk [vmem:[#allocation8] sm:$0xff] %vm2445_vm10, %v2948_v57 }
 0x41c   : > { %v3437_v60 = vpop.permute.xlu2 %3436 }
 0x41d   : > { %v3439_v36 = vpop.permute.xlu0 %3438 }
 0x41e   : > { %v3484_v4 = vmax.f32 %v9396_v55, %v3439_v36  ;;  %v3553_v58 = vpop.permute.xlu1 %3552  ;;  %v3441_v25 = vsel %vm723_vm5, %v3437_v60, %v3439_v36 }
 0x41f   : > { %v3557_v9 = vsel %vm723_vm5, %v3553_v58, %v3555_v42  ;;  %v3445_v49 = vmax.f32 %v9216_v47, %v3441_v25  ;;  %vm3157_vm5 = vcmask 523648  }
 0x420   : > { %v3561_v29 = vmax.f32 %v9396_v55, %v3557_v9  ;;  %3489 = vrot.lane.b32.xlu2 %v3484_v4, %s10958_s27  ;;  %v3658_v55 = vsel %vm583_vm7, %v9325_v31, %v9424_v56  ;;  %s7386_s27 = smov 30  }
 0x421   : > { %v3662_v47 = vmax.f32 %v9120_v10, %v3658_v55  ;;  %v3659_v10 = vsel %vm583_vm7, %v9382_v53, %v9436_v1 }
 0x422   : > { %3566 = vrot.lane.b32.xlu0 %v3561_v29, %s7374_s20 }
 0x424   : > { %v3673_v28 = vpop.permute.xlu2 %3672 }
 0x425   : > { %v3722_v53 = vmax.f32 %v9441_v33, %v3673_v28 }
 0x426   : > { %v3787_v61 = vpop.permute.xlu1 %3786 }
 0x427   : > { %v3793_v34 = vmax.f32 %v9408_v30, %v3787_v61 }
 0x428   : > { %3450 = vrot.lane.b32.xlu2 %v3445_v49, %s10962_s28 }
 0x42c   : > { %v2993_v26 = vpop.permute.xlu2 %2992 }
 0x42d   : > { %6732 = vmatmul.msk.f32.vlgmr.msra.gmra.mxu0 %vm2924_vm15, %v2993_v26 }
 0x42e   : > { %v3041_v17 = vpop.permute.xlu1 %3040  ;;  %6776 = vmatpush.msk.msra.mxu0 %vm9226_vm11, %v7363_v5 }
 0x42f   : > { %6738 = vmatmul.msk.f32.vlgmr.msrb.gmra.mxu1 %vm2924_vm15, %v3041_v17 }
 0x430   : > { %3845 = vrot.lane.b32.xlu2 %v3791_v51, %s7375_s29  ;;  %6782 = vmatpush.msk.msrb.mxu1 %vm9226_vm11, %v7363_v5 }
 0x431   : > { %6777 = vmatpush.msk.msra.mxu0 %vm9233_vm12, %v7363_v5 }
 0x432   : > { %6783 = vmatpush.msk.msrb.mxu1 %vm9233_vm12, %v7363_v5 }
 0x433   : > { %6778 = vmatpush.msk.msra.mxu0 %vm9242_vm13, %v7363_v5 }
 0x434   : > { %v3671_v31 = vpop.permute.xlu0 %3670  ;;  %6784 = vmatpush.msk.msrb.mxu1 %vm9242_vm13, %v7363_v5 }
 0x435   : > { %v3676_v52 = vmax.f32 %v3662_v47, %v3671_v31  ;;  %v3721_v56 = vmax.f32 %v9429_v32, %v3671_v31  ;;  %6779 = vmatpush.msk.msra.mxu0 %vm9255_vm14, %v7363_v5  ;;  %v3663_v32 = vmax.f32 %v9127_v44, %v3659_v10  ;;  %v3773_v44 = vsel %vm583_vm7, %v9436_v1, %v9390_v41 }
 0x436   : > { %v3167_v54 = vpop.permute.xlu1 %3166  ;;  %6785 = vmatpush.msk.msrb.mxu1 %vm9255_vm14, %v7363_v5  ;;  %v3780_v22 = vmax.f32 %v9144_v27, %v3773_v44 }
 0x437   : > { %3725 = vrot.lane.b32.xlu0 %v3721_v56, %s7376_s25  ;;  %3680 = vrot.lane.b32.xlu1 %v3676_v52, %s10964_s24  ;;  %v3677_v12 = vmax.f32 %v3663_v32, %v3673_v28 }
 0x438   : > { %6750 = vmatmul.msk.f32.vlgmr.msrb.gmra.mxu3 %vm2924_vm15, %v3167_v54  ;;  %3800 = vrot.lane.b32.xlu2 %v3791_v51, %s7373_s17  ;;  %v3792_v50 = vmax.f32 %v3780_v22, %v3787_v61 }
 0x439   : > { %6794 = vmatpush.msk.msrb.mxu3 %vm9226_vm11, %v7363_v5 }
 0x43b   : > { %6795 = vmatpush.msk.msrb.mxu3 %vm9233_vm12, %v7363_v5 }
 0x43c   : > { %v3043_v7 = vpop.permute.xlu0 %3042 }
 0x43d   : > { %6739 = vmatmul.msk.f32.gmra.mxu1 %vm2924_vm15, %v3043_v7  ;;  %6796 = vmatpush.msk.msrb.mxu3 %vm9242_vm13, %v7363_v5 }
 0x43f   : > { %3847 = vrot.lane.b32.xlu1 %v3793_v34, %s7375_s29  ;;  %3682 = vrot.lane.b32.xlu0 %v3677_v12, %s10964_s24  ;;  %s7379_s29 = smov 95  }
 0x440   : > { %3727 = vrot.lane.b32.xlu2 %v3722_v53, %s7376_s25  ;;  %6797 = vmatpush.msk.msrb.mxu3 %vm9255_vm14, %v7363_v5  ;;  %v2995_v30 = vpop.permute.xlu1 %2994  ;;  %s7384_s25 = smov 6  }
 0x441   : > { %6733 = vmatmul.msk.f32.gmra.mxu0 %vm2924_vm15, %v2995_v30  ;;  %v3364_v35 = vpop.permute.xlu2 %3363 }
 0x445   : > { %v3119_v33 = vpop.permute.xlu0 %3118 }
 0x446   : > { %6744 = vmatmul.msk.f32.vlgmr.msra.gmra.mxu2 %vm2924_vm15, %v3119_v33 }
 0x447   : > { %3804 = vrot.lane.b32.xlu1 %v3793_v34, %s7373_s17  ;;  %3802 = vrot.lane.b32.xlu0 %v3792_v50, %s7373_s17 }
 0x448   : > { %6788 = vmatpush.msk.msra.mxu2 %vm9226_vm11, %v7363_v5  ;;  %v3169_v41 = vpop.permute.xlu1 %3168  ;;  %4098 = vrot.lane.b32.xlu2 %v9645_v15, %s7379_s29 }
 0x449   : > { %6751 = vmatmul.msk.f32.gmra.mxu3 %vm2924_vm15, %v3169_v41  ;;  %v3241_v27 = vpop.permute.xlu2 %3240 }
 0x44a   : > { %6789 = vmatpush.msk.msra.mxu2 %vm9233_vm12, %v7363_v5 }
 0x44c   : > { %6790 = vmatpush.msk.msra.mxu2 %vm9242_vm13, %v7363_v5 }
 0x44e   : > { %6791 = vmatpush.msk.msra.mxu2 %vm9255_vm14, %v7363_v5 }
 0x450   : > { %v3370_v19 = vpop.permute.xlu1 %3369  ;;  %4092 = vrot.lane.b32.xlu2 %v9651_v11, %s7379_s29 }
 0x451   : > { %v3290_v1 = vpop.permute.xlu2 %3289 }
 0x452   : > { %6762 = vmatmul.msk.f32.vlgmr.msra.gmra.mxu1 %vm2924_vm15, %v3290_v1 }
 0x453   : > { %6806 = vmatpush.msk.msra.mxu1 %vm9226_vm11, %v7363_v5 }
 0x455   : > { %v2951_v39 = vpop.f32.mrf.mxu2  ;;  %6807 = vmatpush.msk.msra.mxu1 %vm9233_vm12, %v7363_v5 }
 0x456   : > { %2955 = vst.msk [vmem:[#allocation8 + $0x18] sm:$0xff] %vm2445_vm10, %v2951_v39 }
 0x457   : > { %6808 = vmatpush.msk.msra.mxu1 %vm9242_vm13, %v7363_v5 }
 0x459   : > { %v3366_v3 = vpop.permute.xlu0 %3365  ;;  %v3245_v16 = vpop.permute.xlu2 %3244  ;;  %6809 = vmatpush.msk.msra.mxu1 %vm9255_vm14, %v7363_v5 }
 0x45a   : > { %v3372_v48 = vsel %vm3371_vm0, %v3364_v35, %v3366_v3 }
 0x461   : > { %v3292_v6 = vpop.permute.xlu1 %3291 }
 0x462   : > { %v3121_v42 = vpop.permute.xlu0 %3120  ;;  %6763 = vmatmul.msk.f32.gmra.mxu1 %vm2924_vm15, %v3292_v6 }
 0x463   : > { %v3449_v24 = vpop.permute.xlu2 %3448  ;;  %6745 = vmatmul.msk.f32.gmra.mxu2 %vm2924_vm15, %v3121_v42 }
 0x464   : > { %6774 = vmatmul.msk.f32.vlgmr.msra.gmra.mxu3 %vm2924_vm15, %v3449_v24 }
 0x46a   : > { %v3243_v40 = vpop.permute.xlu0 %3242 }
 0x46b   : > { %v3249_v63 = vsel %vm3248_vm1, %v3241_v27, %v3243_v40  ;;  %6768 = vmatmul.msk.f32.vlgmr.msrb.gmra.mxu2 %vm2924_vm15, %v3372_v48 }
 0x46c   : > { %6756 = vmatmul.msk.f32.vlgmr.msrb.gmra.mxu0 %vm2924_vm15, %v3249_v63  ;;  %6812 = vmatpush.msk.msrb.mxu2 %vm9226_vm11, %v7363_v5 }
 0x46d   : > { %6800 = vmatpush.msk.msrb.mxu0 %vm9226_vm11, %v7363_v5  ;;  %vm3328_vm11 = vcmask 917248  }
 0x46e   : > { %6813 = vmatpush.msk.msrb.mxu2 %vm9233_vm12, %v7363_v5 }
 0x46f   : > { %6801 = vmatpush.msk.msrb.mxu0 %vm9233_vm12, %v7363_v5  ;;  %vm3409_vm12 = vcmask 1048448  }
 0x470   : > { %6814 = vmatpush.msk.msrb.mxu2 %vm9242_vm13, %v7363_v5 }
 0x471   : > { %6802 = vmatpush.msk.msrb.mxu0 %vm9242_vm13, %v7363_v5 }
 0x472   : > { %v3368_v23 = vpop.permute.xlu0 %3367  ;;  %6815 = vmatpush.msk.msrb.mxu2 %vm9255_vm14, %v7363_v5  ;;  %v3614_v0 = vpop.permute.xlu1 %3613 }
 0x473   : > { %v3373_v45 = vsel %vm3371_vm0, %v3368_v23, %v3370_v19  ;;  %6803 = vmatpush.msk.msrb.mxu0 %vm9255_vm14, %v7363_v5  ;;  %vm3902_vm0 = vcmask 801792  }
 0x474   : > { %6769 = vmatmul.msk.f32.gmra.mxu2 %vm2924_vm15, %v3373_v45 }
 0x47a   : > { %v3490_v38 = vpop.permute.xlu2 %3489  ;;  %v3612_v14 = vpop.permute.xlu0 %3611 }
 0x47b   : > { %v3488_v2 = vpop.permute.xlu1 %3487 }
 0x47c   : > { %6792 = vmatmul.msk.f32.vlgmr.msra.gmra.mxu2 %vm2924_vm15, %v3612_v14 }
 0x482   : > { %v3451_v37 = vpop.permute.xlu2 %3450  ;;  %v3247_v13 = vpop.permute.xlu0 %3246 }
 0x483   : > { %6775 = vmatmul.msk.f32.gmra.mxu3 %vm2924_vm15, %v3451_v37  ;;  %v3250_v62 = vsel %vm3248_vm1, %v3245_v16, %v3247_v13  ;;  %vm3974_vm1 = vcmask 916480  }
 0x484   : > { %6757 = vmatmul.msk.f32.gmra.mxu0 %vm2924_vm15, %v3250_v62  ;;  %6793 = vmatmul.msk.f32.gmra.mxu2 %vm2924_vm15, %v3614_v0 }
 0x489   : > { %v3799_v57 = vpop.permute.xlu1 %3798 }
 0x48a   : > { %v3565_v46 = vpop.permute.xlu0 %3564  ;;  %v3846_v8 = vpop.permute.xlu2 %3845 }
 0x48b   : > { %6786 = vmatmul.msk.f32.vlgmr.msrb.gmra.mxu1 %vm2924_vm15, %v3565_v46 }
 0x48c   : > { %6780 = vmatmul.msk.f32.vlgmr.msra.gmra.mxu0 %vm2924_vm15, %v3488_v2  ;;  %6816 = vmatmul.msk.f32.vlgmr.msrb.gmra.mxu2 %vm2924_vm15, %v3846_v8 }
 0x492   : > { %v3801_v20 = vpop.permute.xlu2 %3800 }
 0x493   : > { %v3806_v60 = vsel %vm2445_vm10, %v3799_v57, %v3801_v20 }
 0x494   : > { %v3567_v21 = vpop.permute.xlu0 %3566  ;;  %6781 = vmatmul.msk.f32.gmra.mxu0 %vm2924_vm15, %v3490_v38 }
 0x495   : > { %6787 = vmatmul.msk.f32.gmra.mxu1 %vm2924_vm15, %v3567_v21 }
 0x49a   : > { %v3728_v29 = vpop.permute.xlu2 %3727 }
 0x49d   : > { %6810 = vmatmul.msk.f32.vlgmr.msra.gmra.mxu1 %vm2924_vm15, %v3806_v60 }
 0x4a2   : > { %v9679_v44 = vpop.permute.xlu2 %4098 }
 0x4a9   : > { %v3726_v36 = vpop.permute.xlu0 %3725  ;;  %v3681_v4 = vpop.permute.xlu1 %3680 }
 0x4aa   : > { %v3017_v58 = vpop.f32.mrf.mxu0  ;;  %6798 = vmatmul.msk.f32.vlgmr.msrb.gmra.mxu3 %vm2924_vm15, %v3681_v4  ;;  %6804 = vmatmul.msk.f32.vlgmr.msrb.gmra.mxu0 %vm2924_vm15, %v3726_v36  ;;  %v9685_v50 = vpop.permute.xlu2 %4092 }
 0x4ab   : > { %3025 = vrot.lane.b32.xlu0 %v3017_v58, %s7373_s17 }
 0x4ac   : > { %v3065_v9 = vpop.f32.mrf.mxu1 }
 0x4ad   : > { %3073 = vrot.lane.b32.xlu1 %v3065_v9, %s10964_s24 }
 0x4b1   : > { %v3848_v25 = vpop.permute.xlu1 %3847  ;;  %v3683_v28 = vpop.permute.xlu0 %3682 }
 0x4b2   : > { %6799 = vmatmul.msk.f32.gmra.mxu3 %vm2924_vm15, %v3683_v28  ;;  %6805 = vmatmul.msk.f32.gmra.mxu0 %vm2924_vm15, %v3728_v29 }
 0x4b3   : > { %6817 = vmatmul.msk.f32.gmra.mxu2 %vm2924_vm15, %v3848_v25 }
 0x4b9   : > { %v3805_v49 = vpop.permute.xlu1 %3804  ;;  %v3803_v61 = vpop.permute.xlu0 %3802 }
 0x4ba   : > { %v3068_v26 = vpop.f32.mrf.mxu1  ;;  %v3807_v51 = vsel %vm2445_vm10, %v3803_v61, %v3805_v49 }
 0x4bb   : > { %3075 = vrot.lane.b32.xlu1 %v3068_v26, %s10964_s24  ;;  %6811 = vmatmul.msk.f32.gmra.mxu1 %vm2924_vm15, %v3807_v51  ;;  %v3191_v17 = vpop.f32.mrf.mxu3 }
 0x4bc   : > { %3199 = vrot.lane.b32.xlu0 %v3191_v17, %s10962_s28 }
 0x4be   : > { %v3020_v55 = vpop.f32.mrf.mxu0 }
 0x4bf   : > { %3027 = vrot.lane.b32.xlu2 %v3020_v55, %s7373_s17 }
 0x4c9   : > { %v3143_v47 = vpop.f32.mrf.mxu2 }
 0x4ca   : > { %3151 = vrot.lane.b32.xlu2 %v3143_v47, %s7374_s20 }
 0x4cc   : > { %v3194_v31 = vpop.f32.mrf.mxu3 }
 0x4cf   : > { %v3314_v52 = vpop.f32.mrf.mxu1 }
 0x4d2   : > { %3201 = vrot.lane.b32.xlu2 %v3194_v31, %s10962_s28 }
 0x4da   : > { %3322 = vrot.lane.b32.xlu2 %v3314_v52, %s7365_s22  ;;  %v4189_v52 = vld [vmem:[%s10926_s6 + $0x18] sm:$0xff] }
 0x4df   : > { %v3317_v7 = vpop.f32.mrf.mxu1 }
 0x4e6   : > { %v3146_v54 = vpop.f32.mrf.mxu2 }
 0x4e7   : > { %v3473_v56 = vpop.f32.mrf.mxu3  ;;  %3153 = vrot.lane.b32.xlu1 %v3146_v54, %s7374_s20 }
 0x4e8   : > { %3479 = vst.msk [vmem:[#allocation8 + $0x8] sm:$0xff] %vm2445_vm10, %v3473_v56  ;;  %v4188_v56 = vld [vmem:[%s10926_s6 + $0x10] sm:$0xff] }
 0x4e9   : > { %v3272_v10 = vpop.f32.mrf.mxu0 }
 0x4ee   : > { %v3395_v32 = vpop.f32.mrf.mxu2 }
 0x4ef   : > { %3280 = vrot.lane.b32.xlu1 %v3272_v10, %s7369_s23 }
 0x4f7   : > { %v3398_v12 = vpop.f32.mrf.mxu2  ;;  %3324 = vrot.lane.b32.xlu1 %v3317_v7, %s7365_s22 }
 0x4f8   : > { %3405 = vrot.lane.b32.xlu2 %v3398_v12, %s10970_s21 }
 0x4ff   : > { %3403 = vrot.lane.b32.xlu1 %v3395_v32, %s10970_s21  ;;  %v3636_v30 = vpop.f32.mrf.mxu2 }
 0x501   : > { %v3275_v34 = vpop.f32.mrf.mxu0 }
 0x502   : > { %3282 = vrot.lane.b32.xlu0 %v3275_v34, %s7369_s23  ;;  %v4187_v34 = vld [vmem:[%s10926_s6 + $0x8] sm:$0xff] }
 0x506   : > { %v3476_v53 = vpop.f32.mrf.mxu3 }
 0x507   : > { %3480 = vst.msk [vmem:[#allocation8 + $0x20] sm:$0xff] %vm2445_vm10, %v3476_v53  ;;  %3644 = vrot.lane.b32.xlu1 %v3636_v30, %s7374_s20  ;;  %v3639_v33 = vpop.f32.mrf.mxu2 }
 0x508   : > { %v3589_v22 = vpop.f32.mrf.mxu1 }
 0x509   : > { %v3512_v35 = vpop.f32.mrf.mxu0 }
 0x50a   : > { %3597 = vrot.lane.b32.xlu0 %v3589_v22, %s10964_s24  ;;  %3520 = vrot.lane.b32.xlu2 %v3512_v35, %s7373_s17 }
 0x50f   : > { %v3870_v39 = vpop.f32.mrf.mxu2 }
 0x511   : > { %v3515_v27 = vpop.f32.mrf.mxu0 }
 0x512   : > { %v3592_v41 = vpop.f32.mrf.mxu1  ;;  %3522 = vrot.lane.b32.xlu0 %v3515_v27, %s7373_s17  ;;  %s10966_s17 = smov 111  }
 0x513   : > { %3599 = vrot.lane.b32.xlu2 %v3592_v41, %s10964_s24  ;;  %s10973_s24 = smov 116  }
 0x519   : > { %v3028_v1 = vpop.permute.xlu2 %3027 }
 0x51a   : > { %3033 = vst.msk [vmem:[#allocation8 + $0x18] sm:$0xff] %vm3031_vm3, %v3028_v1  ;;  %3646 = vrot.lane.b32.xlu0 %v3639_v33, %s7374_s20  ;;  %v3829_v48 = vpop.f32.mrf.mxu1  ;;  %s10968_s20 = smov 94  }
 0x51b   : > { %3878 = vrot.lane.b32.xlu2 %v3870_v39, %s10970_s21 }
 0x51d   : > { %v3026_v19 = vpop.permute.xlu0 %3025 }
 0x51e   : > { %3032 = vst.msk [vmem:[#allocation8] sm:$0xff] %vm3031_vm3, %v3026_v19 }
 0x51f   : > { %v3074_v3 = vpop.permute.xlu1 %3073 }
 0x520   : > { %3080 = vst.msk [vmem:[#allocation8] sm:$0xff] %vm3079_vm4, %v3074_v3 }
 0x524   : > { %v3152_v16 = vpop.permute.xlu2 %3151 }
 0x525   : > { %3158 = vst.msk [vmem:[#allocation8] sm:$0xff] %vm3157_vm5, %v3152_v16 }
 0x527   : > { %v3750_v6 = vpop.f32.mrf.mxu0 }
 0x528   : > { %3758 = vrot.lane.b32.xlu0 %v3750_v6, %s7369_s23 }
 0x52c   : > { %v3202_v14 = vpop.permute.xlu2 %3201 }
 0x52d   : > { %v3076_v24 = vpop.permute.xlu1 %3075  ;;  %v3705_v63 = vpop.f32.mrf.mxu3 }
 0x52e   : > { %3081 = vst.msk [vmem:[#allocation8 + $0x18] sm:$0xff] %vm3079_vm4, %v3076_v24  ;;  %v3200_v42 = vpop.permute.xlu0 %3199 }
 0x52f   : > { %v3753_v40 = vpop.f32.mrf.mxu0  ;;  %3206 = vst.msk [vmem:[#allocation8] sm:$0xff] %vm3205_vm8, %v3200_v42 }
 0x530   : > { %3760 = vrot.lane.b32.xlu2 %v3753_v40, %s7369_s23  ;;  %3837 = vrot.lane.b32.xlu0 %v3829_v48, %s7365_s22  ;;  %s7380_s23 = smov 110  }
 0x534   : > { %v3323_v37 = vpop.permute.xlu2 %3322 }
 0x535   : > { %v3708_v38 = vpop.f32.mrf.mxu3 }
 0x536   : > { %v3873_v23 = vpop.f32.mrf.mxu2 }
 0x537   : > { %3880 = vrot.lane.b32.xlu1 %v3873_v23, %s10970_s21 }
 0x538   : > { %v3832_v45 = vpop.f32.mrf.mxu1  ;;  %3713 = vrot.lane.b32.xlu2 %v3705_v63, %s10962_s28 }
 0x539   : > { %3839 = vrot.lane.b32.xlu0 %v3832_v45, %s7365_s22 }
 0x53f   : > { %3715 = vrot.lane.b32.xlu1 %v3708_v38, %s10962_s28  ;;  %s10972_s28 = sshll.u32 %s11027_s19, 6 }
 0x540   : > { %4061 = vrot.lane.b32.xlu2 %v9645_v15, %s7365_s22 }
 0x548   : > { %4055 = vrot.lane.b32.xlu2 %v9651_v11, %s7365_s22 }
 0x552   : > { %v3406_v13 = vpop.permute.xlu2 %3405 }
 0x559   : > { %v3154_v0 = vpop.permute.xlu1 %3153 }
 0x55a   : > { %3159 = vst.msk [vmem:[#allocation8 + $0x18] sm:$0xff] %vm3157_vm5, %v3154_v0 }
 0x55b   : > { %3207 = vst.msk [vmem:[#allocation8 + $0x18] sm:$0xff] %vm3205_vm8, %v3202_v14 }
 0x561   : > { %v3281_v62 = vpop.permute.xlu1 %3280 }
 0x562   : > { %3287 = vst.msk [vmem:[#allocation8] sm:$0xff] %vm3286_vm9, %v3281_v62 }
 0x563   : > { %3329 = vst.msk [vmem:[#allocation8] sm:$0xff] %vm3328_vm11, %v3323_v37 }
 0x564   : > { %v3521_v46 = vpop.permute.xlu2 %3520 }
 0x565   : > { %3526 = vst.msk [vmem:[#allocation8 + $0x8] sm:$0xff] %vm3031_vm3, %v3521_v46 }
 0x569   : > { %v3325_v2 = vpop.permute.xlu1 %3324 }
 0x56d   : > { %v3600_v20 = vpop.permute.xlu2 %3599 }
 0x571   : > { %v3404_v8 = vpop.permute.xlu1 %3403 }
 0x572   : > { %3410 = vst.msk [vmem:[#allocation8] sm:$0xff] %vm3409_vm12, %v3404_v8 }
 0x574   : > { %v3283_v21 = vpop.permute.xlu0 %3282 }
 0x575   : > { %3288 = vst.msk [vmem:[#allocation8 + $0x18] sm:$0xff] %vm3286_vm9, %v3283_v21  ;;  %v3879_v58 = vpop.permute.xlu2 %3878 }
 0x576   : > { %3330 = vst.msk [vmem:[#allocation8 + $0x18] sm:$0xff] %vm3328_vm11, %v3325_v2 }
 0x577   : > { %3411 = vst.msk [vmem:[#allocation8 + $0x18] sm:$0xff] %vm3409_vm12, %v3406_v13 }
 0x579   : > { %v9717_v57 = vld [vmem:[#allocation8] sm:$0xff]  ;;  %v3645_v36 = vpop.permute.xlu1 %3644 }
 0x57a   : > { %4088 = vrot.lane.b32.xlu2 %v9717_v57, %s7379_s29  ;;  %4051 = vrot.lane.b32.xlu0 %v9717_v57, %s7365_s22 }
 0x57b   : > { %3966 = vrot.lane.b32.xlu1 %v9717_v57, %s10970_s21 }
 0x57c   : > { %v3598_v60 = vpop.permute.xlu0 %3597 }
 0x57d   : > { %3603 = vst.msk [vmem:[#allocation8 + $0x8] sm:$0xff] %vm3079_vm4, %v3598_v60 }
 0x57e   : > { %3650 = vst.msk [vmem:[#allocation8 + $0x8] sm:$0xff] %vm3157_vm5, %v3645_v36  ;;  %v9727_v4 = vld [vmem:[#allocation8 + $0x18] sm:$0xff] }
 0x582   : > { %4020 = vrot.lane.b32.xlu0 %v9717_v57, %s7380_s23  ;;  %3970 = vrot.lane.b32.xlu2 %v9727_v4, %s10970_s21 }
 0x583   : > { %4057 = vrot.lane.b32.xlu1 %v9727_v4, %s7365_s22 }
 0x584   : > { %v3523_v9 = vpop.permute.xlu0 %3522 }
 0x585   : > { %3527 = vst.msk [vmem:[#allocation8 + $0x20] sm:$0xff] %vm3031_vm3, %v3523_v9  ;;  %vm4028_vm3 = vcmask 900096  }
 0x586   : > { %3604 = vst.msk [vmem:[#allocation8 + $0x20] sm:$0xff] %vm3079_vm4, %v3600_v20  ;;  %vm4100_vm4 = vcmask 777216  }
 0x58a   : > { %v3761_v29 = vpop.permute.xlu2 %3760  ;;  %3993 = vrot.lane.b32.xlu0 %v9717_v57, %s10966_s17 }
 0x58c   : > { %v3647_v25 = vpop.permute.xlu0 %3646 }
 0x58d   : > { %3651 = vst.msk [vmem:[#allocation8 + $0x20] sm:$0xff] %vm3157_vm5, %v3647_v25  ;;  %vm4001_vm5 = vcmask 908288  }
 0x592   : > { %v3714_v28 = vpop.permute.xlu2 %3713  ;;  %4094 = vrot.lane.b32.xlu0 %v9727_v4, %s7379_s29 }
 0x593   : > { %3719 = vst.msk [vmem:[#allocation8 + $0x8] sm:$0xff] %vm3205_vm8, %v3714_v28 }
 0x59a   : > { %v3759_v49 = vpop.permute.xlu0 %3758  ;;  %4024 = vrot.lane.b32.xlu0 %v9727_v4, %s7380_s23  ;;  %v4062_v31 = vpop.permute.xlu2 %4061 }
 0x59b   : > { %3764 = vst.msk [vmem:[#allocation8 + $0x8] sm:$0xff] %vm3286_vm9, %v3759_v49 }
 0x5a2   : > { %v3838_v61 = vpop.permute.xlu0 %3837  ;;  %3997 = vrot.lane.b32.xlu0 %v9727_v4, %s10966_s17 }
 0x5a3   : > { %3843 = vst.msk [vmem:[#allocation8 + $0x8] sm:$0xff] %vm3328_vm11, %v3838_v61 }
 0x5a4   : > { %3884 = vst.msk [vmem:[#allocation8 + $0x8] sm:$0xff] %vm3409_vm12, %v3879_v58 }
 0x5a9   : > { %v3881_v26 = vpop.permute.xlu1 %3880 }
 0x5aa   : > { %3944 = vrot.lane.b32.xlu0 %v9727_v4, %s10977_s30 }
 0x5ab   : > { %v4040_v51 = vld [vmem:[#allocation8 + $0x8] sm:$0xff]  ;;  %v3840_v55 = vpop.permute.xlu0 %3839 }
 0x5ac   : > { %4053 = vrot.lane.b32.xlu1 %v4040_v51, %s7365_s22  ;;  %3968 = vrot.lane.b32.xlu2 %v4040_v51, %s10970_s21  ;;  %3903 = vst.msk [vmem:[#allocation4 + $0x8] sm:$0xff] %vm3902_vm0, %v4040_v51 }
 0x5b1   : > { %v3716_v17 = vpop.permute.xlu1 %3715 }
 0x5b2   : > { %3720 = vst.msk [vmem:[#allocation8 + $0x20] sm:$0xff] %vm3205_vm8, %v3716_v17  ;;  %4090 = vrot.lane.b32.xlu0 %v4040_v51, %s7379_s29  ;;  %vm4137_vm8 = vcmask 769024  }
 0x5b3   : > { %3765 = vst.msk [vmem:[#allocation8 + $0x20] sm:$0xff] %vm3286_vm9, %v3761_v29  ;;  %vm4359_vm9 = vcmask 523264  }
 0x5b4   : > { %3844 = vst.msk [vmem:[#allocation8 + $0x20] sm:$0xff] %vm3328_vm11, %v3840_v55  ;;  %4022 = vrot.lane.b32.xlu1 %v4040_v51, %s7380_s23  ;;  %vm5237_vm11 = vcmask 195728  }
 0x5b5   : > { %3885 = vst.msk [vmem:[#allocation8 + $0x20] sm:$0xff] %vm3409_vm12, %v3881_v26  ;;  %vm5339_vm12 = vcmask 244928  }
 0x5ba   : > { %3942 = vrot.lane.b32.xlu0 %v4040_v51, %s10977_s30 }
 0x5bc   : > { %v4043_v47 = vld [vmem:[#allocation8 + $0x20] sm:$0xff]  ;;  %3995 = vrot.lane.b32.xlu1 %v4040_v51, %s10966_s17 }
 0x5bd   : > { %4059 = vrot.lane.b32.xlu2 %v4043_v47, %s7365_s22  ;;  %3905 = vst.msk [vmem:[#allocation4 + $0x18] sm:$0xff] %vm3902_vm0, %v4043_v47 }
 0x5c2   : > { %3972 = vrot.lane.b32.xlu0 %v4043_v47, %s10970_s21  ;;  %s11013_s21 = smov 112  }
 0x5c4   : > { %4096 = vrot.lane.b32.xlu1 %v4043_v47, %s7379_s29 }
 0x5c5   : > { %3940 = vrot.lane.b32.xlu2 %v9717_v57, %s10977_s30 }
 0x5ca   : > { %3914 = vrot.lane.b32.xlu0 %v9717_v57, %s7361_s16 }
 0x5cc   : > { %3918 = vrot.lane.b32.xlu1 %v9727_v4, %s7361_s16 }
 0x5cd   : > { %3920 = vrot.lane.b32.xlu2 %v4043_v47, %s7361_s16 }
 0x5d2   : > { %4135 = vrot.lane.b32.xlu0 %v9645_v15, %s10968_s20  ;;  %v4056_v15 = vpop.permute.xlu2 %4055 }
 0x5d4   : > { %4026 = vrot.lane.b32.xlu1 %v4043_v47, %s7380_s23 }
 0x5d5   : > { %4133 = vrot.lane.b32.xlu2 %v4043_v47, %s10968_s20 }
 0x5da   : > { %4131 = vrot.lane.b32.xlu0 %v9727_v4, %s10968_s20  ;;  %v4089_v10 = vpop.permute.xlu2 %4088 }
 0x5dc   : > { %3999 = vrot.lane.b32.xlu1 %v4043_v47, %s10966_s17  ;;  %s11015_s17 = smov 94  }
 0x5dd   : > { %4129 = vrot.lane.b32.xlu2 %v9651_v11, %s10968_s20  ;;  %v4186_v11 = vld [vmem:[%s10926_s6] sm:$0xff] }
 0x5e2   : > { %4202 = vperm.xlu0 %6941, %v4188_v56   ;;  %v3971_v7 = vpop.permute.xlu2 %3970 }
 0x5e4   : > { %3946 = vrot.lane.b32.xlu1 %v4043_v47, %s10977_s30 }
 0x5e5   : > { %4207 = vperm.xlu2 %6940, %v4189_v52  }
 0x5ec   : > { %3916 = vrot.lane.b32.xlu1 %v4040_v51, %s7361_s16  ;;  %v4052_v54 = vpop.permute.xlu0 %4051 }
 0x5ed   : > { %4192 = vperm.xlu2 %6940, %v4186_v11   ;;  %v3967_v53 = vpop.permute.xlu1 %3966 }
 0x5f4   : > { %4127 = vrot.lane.b32.xlu1 %v4040_v51, %s10968_s20  ;;  %v4021_v32 = vpop.permute.xlu0 %4020 }
 0x5f5   : > { %v4058_v41 = vpop.permute.xlu1 %4057 }
 0x5fc   : > { %4125 = vrot.lane.b32.xlu1 %v9717_v57, %s10968_s20  ;;  %v3994_v12 = vpop.permute.xlu0 %3993  ;;  %s11014_s20 = smov 111  }
 0x604   : > { %4197 = vperm.xlu1 %7342, %v4187_v34   ;;  %v4095_v22 = vpop.permute.xlu0 %4094 }
 0x606   : > { %v3969_v30 = vpop.permute.xlu2 %3968 }
 0x607   : > { %v9801_v35 = vsel %vm3974_vm1, %v3967_v53, %v3969_v30  ;;  %3982 = vst.msk [vmem:[#allocation4 + $0x68] sm:$0xff] %vm3902_vm0, %v3969_v30 }
 0x60c   : > { %v4025_v33 = vpop.permute.xlu0 %4024 }
 0x614   : > { %v9804_v27 = vpop.permute.xlu0 %3997 }
 0x617   : > { %v4060_v1 = vpop.permute.xlu2 %4059 }
 0x618   : > { %v4066_v39 = vsel %vm4063_vm2, %v4058_v41, %v4060_v1  ;;  %v4067_v19 = vsel %vm4063_vm2, %v4060_v1, %v4062_v31  ;;  %v4153_v1 = vld [vmem:[#allocation4 + $0x18] sm:$0xff] }
 0x619   : > { %4075 = vst.msk [vmem:[#allocation4 + $0xd8] sm:$0xff] %vm3902_vm0, %v4067_v19  ;;  %v3890_v19 = vld [vmem:[%s10925_s5 + $0x8] sm:$0xff] }
 0x61c   : > { %v9811_v42 = vpop.permute.xlu0 %3944 }
 0x61e   : > { %v4054_v3 = vpop.permute.xlu1 %4053 }
 0x61f   : > { %v3941_v16 = vpop.permute.xlu2 %3940  ;;  %v4064_v6 = vsel %vm4063_vm2, %v4052_v54, %v4054_v3  ;;  %v4065_v24 = vsel %vm4063_vm2, %v4054_v3, %v4056_v15 }
 0x620   : > { %4073 = vst.msk [vmem:[#allocation4 + $0xc8] sm:$0xff] %vm3902_vm0, %v4065_v24  ;;  %v3892_v24 = vld [vmem:[%s10925_s5 + $0x18] sm:$0xff] }
 0x624   : > { %v4091_v23 = vpop.permute.xlu0 %4090 }
 0x625   : > { %v4101_v45 = vsel %vm4100_vm4, %v4089_v10, %v4091_v23  ;;  %v4102_v38 = vsel %vm4100_vm4, %v4091_v23, %v9685_v50 }
 0x626   : > { %v4023_v48 = vpop.permute.xlu1 %4022  ;;  %4110 = vst.msk [vmem:[#allocation4 + $0xe8] sm:$0xff] %vm3902_vm0, %v4102_v38 }
 0x627   : > { %v3921_v40 = vpop.permute.xlu2 %3920  ;;  %v4029_v63 = vsel %vm4028_vm3, %v4021_v32, %v4023_v48  ;;  %4036 = vst.msk [vmem:[#allocation4 + $0xa8] sm:$0xff] %vm3902_vm0, %v4023_v48  ;;  %v4175_v29 = vld [vmem:[#allocation4 + $0xc8] sm:$0xff]  ;;  %v3894_v48 = vld [vmem:[%s10925_s5 + $0x28] sm:$0xff] }
 0x628   : > { %3931 = vst.msk [vmem:[#allocation4 + $0x38] sm:$0xff] %vm3902_vm0, %v3921_v40  ;;  %v4163_v32 = vld [vmem:[#allocation4 + $0x68] sm:$0xff] }
 0x62c   : > { %v3943_v0 = vpop.permute.xlu0 %3942 }
 0x62d   : > { %v3948_v13 = vsel %vm653_vm6, %v3941_v16, %v3943_v0  ;;  %3955 = vst.msk [vmem:[#allocation4 + $0x48] sm:$0xff] %vm3902_vm0, %v3943_v0  ;;  %v4179_v58 = vld [vmem:[#allocation4 + $0xe8] sm:$0xff] }
 0x62e   : > { %v3996_v14 = vpop.permute.xlu1 %3995  ;;  %v4171_v47 = vld [vmem:[#allocation4 + $0xa8] sm:$0xff] }
 0x62f   : > { %v4002_v37 = vsel %vm4001_vm5, %v3994_v12, %v3996_v14  ;;  %4009 = vst.msk [vmem:[#allocation4 + $0x88] sm:$0xff] %vm3902_vm0, %v3996_v14  ;;  %v4134_v25 = vpop.permute.xlu2 %4133  ;;  %v4157_v30 = vld [vmem:[#allocation4 + $0x38] sm:$0xff] }
 0x634   : > { %v3973_v50 = vpop.permute.xlu0 %3972  ;;  %v4159_v53 = vld [vmem:[#allocation4 + $0x48] sm:$0xff] }
 0x635   : > { %v3976_v8 = vsel %vm3974_vm1, %v3971_v7, %v3973_v50  ;;  %3984 = vst.msk [vmem:[#allocation4 + $0x78] sm:$0xff] %vm3902_vm0, %v3973_v50 }
 0x636   : > { %v4097_v62 = vpop.permute.xlu1 %4096  ;;  %v4167_v54 = vld [vmem:[#allocation4 + $0x88] sm:$0xff] }
 0x637   : > { %v4103_v46 = vsel %vm4100_vm4, %v4095_v22, %v4097_v62  ;;  %v4104_v2 = vsel %vm4100_vm4, %v4097_v62, %v9679_v44  ;;  %v4177_v44 = vld [vmem:[#allocation4 + $0xd8] sm:$0xff]  ;;  %v3889_v22 = vld [vmem:[%s10925_s5] sm:$0xff] }
 0x638   : > { %4222 = vmatpush.msra.mxu3 %v4103_v46  ;;  %4112 = vst.msk [vmem:[#allocation4 + $0xf8] sm:$0xff] %vm3902_vm0, %v4104_v2 }
 0x63a   : > { %4223 = vmatpush.msra.mxu3 %v4101_v45 }
 0x63c   : > { %4224 = vmatpush.msra.mxu3 %v4066_v39  ;;  %v3915_v60 = vpop.permute.xlu0 %3914  ;;  %v4165_v10 = vld [vmem:[#allocation4 + $0x78] sm:$0xff]  ;;  %v4151_v39 = vld [vmem:[#allocation4 + $0x8] sm:$0xff] }
 0x63e   : > { %v3919_v21 = vpop.permute.xlu1 %3918  ;;  %4225 = vmatpush.msra.mxu3 %v4064_v6  ;;  %v3893_v6 = vld [vmem:[%s10925_s5 + $0x20] sm:$0xff] }
 0x63f   : > { %v3923_v20 = vsel %vm583_vm7, %v3919_v21, %v3921_v40  ;;  %v4181_v36 = vld [vmem:[#allocation4 + $0xf8] sm:$0xff]  ;;  %v3896_v40 = vld [vmem:[%s10925_s5 + $0x38] sm:$0xff] }
 0x640   : > { %4280 = vmatpush.msrb.mxu1 %v4181_v36 }
 0x642   : > { %4281 = vmatpush.msrb.mxu1 %v4179_v58 }
 0x644   : > { %4282 = vmatpush.msrb.mxu1 %v4177_v44  ;;  %v4136_v49 = vpop.permute.xlu0 %4135 }
 0x645   : > { %v4141_v61 = vsel %vm4137_vm8, %v4134_v25, %v4136_v49 }
 0x646   : > { %v4027_v9 = vpop.permute.xlu1 %4026  ;;  %4283 = vmatpush.msrb.mxu1 %v4175_v29  ;;  %4149 = vst.msk [vmem:[#allocation4 + $0x118] sm:$0xff] %vm3902_vm0, %v4141_v61 }
 0x647   : > { %v4030_v28 = vsel %vm4028_vm3, %v4025_v33, %v4027_v9  ;;  %4038 = vst.msk [vmem:[#allocation4 + $0xb8] sm:$0xff] %vm3902_vm0, %v4027_v9 }
 0x648   : > { %4226 = vmatpush.msra.mxu3 %v4030_v28 }
 0x64a   : > { %4227 = vmatpush.msra.mxu3 %v4029_v63 }
 0x64c   : > { %v4132_v55 = vpop.permute.xlu0 %4131 }
 0x64d   : > { %v4140_v31 = vsel %vm4137_vm8, %v4132_v55, %v4134_v25  ;;  %v4185_v52 = vld [vmem:[#allocation4 + $0x118] sm:$0xff] }
 0x64e   : > { %v4000_v26 = vpop.permute.xlu1 %3999  ;;  %v4173_v51 = vld [vmem:[#allocation4 + $0xb8] sm:$0xff]  ;;  %4323 = vmatpush.msra.mxu2 %v4185_v52  ;;  %4265 = vmatpush.msra.mxu0 %v4140_v31 }
 0x64f   : > { %v4003_v17 = vsel %vm4001_vm5, %v9804_v27, %v4000_v26  ;;  %4011 = vst.msk [vmem:[#allocation4 + $0x98] sm:$0xff] %vm3902_vm0, %v4000_v26  ;;  %4284 = vmatpush.msrb.mxu1 %v4173_v51 }
 0x650   : > { %4228 = vmatpush.msra.mxu3 %v4003_v17 }
 0x651   : > { %4285 = vmatpush.msrb.mxu1 %v4171_v47 }
 0x652   : > { %4229 = vmatpush.msra.mxu3 %v4002_v37 }
 0x654   : > { %4230 = vmatpush.msra.mxu3 %v3976_v8  ;;  %v4203_v25 = vpop.permute.xlu0 %4202 }
 0x656   : > { %v3947_v56 = vpop.permute.xlu1 %3946  ;;  %v4169_v15 = vld [vmem:[#allocation4 + $0x98] sm:$0xff]  ;;  %4231 = vmatpush.msra.mxu3 %v9801_v35  ;;  %v4130_v35 = vpop.permute.xlu2 %4129 }
 0x657   : > { %v3949_v11 = vsel %vm653_vm6, %v9811_v42, %v3947_v56  ;;  %3957 = vst.msk [vmem:[#allocation4 + $0x58] sm:$0xff] %vm3902_vm0, %v3947_v56  ;;  %4286 = vmatpush.msrb.mxu1 %v4169_v15  ;;  %v3895_v42 = vld [vmem:[%s10925_s5 + $0x30] sm:$0xff] }
 0x658   : > { %4232 = vmatpush.msra.mxu3 %v3949_v11 }
 0x659   : > { %4287 = vmatpush.msrb.mxu1 %v4167_v54 }
 0x65a   : > { %4233 = vmatpush.msra.mxu3 %v3948_v13 }
 0x65b   : > { %4288 = vmatpush.msrb.mxu1 %v4165_v10 }
 0x65c   : > { %4234 = vmatpush.msra.mxu3 %v3923_v20 }
 0x65d   : > { %4289 = vmatpush.msrb.mxu1 %v4163_v32 }
 0x65e   : > { %v3917_v7 = vpop.permute.xlu1 %3916  ;;  %v4161_v12 = vld [vmem:[#allocation4 + $0x58] sm:$0xff]  ;;  %v4208_v63 = vpop.permute.xlu2 %4207 }
 0x65f   : > { %v3922_v34 = vsel %vm583_vm7, %v3915_v60, %v3917_v7  ;;  %3929 = vst.msk [vmem:[#allocation4 + $0x28] sm:$0xff] %vm3902_vm0, %v3917_v7  ;;  %4290 = vmatpush.msrb.mxu1 %v4161_v12 }
 0x660   : > { %4235 = vmatpush.msra.mxu3 %v3922_v34 }
 0x661   : > { %4291 = vmatpush.msrb.mxu1 %v4159_v53 }
 0x662   : > { %4236 = vmatpush.msra.mxu3 %v9727_v4  ;;  %v3891_v4 = vld [vmem:[%s10925_s5 + $0x10] sm:$0xff] }
 0x663   : > { %4292 = vmatpush.msrb.mxu1 %v4157_v30 }
 0x664   : > { %4237 = vmatpush.msra.mxu3 %v9717_v57 }
 0x665   : > { %4238 = vmatmul.f32.vlgmr.msra.gmra.mxu3 %v3889_v22 }
 0x666   : > { %v4128_v33 = vpop.permute.xlu1 %4127  ;;  %v4155_v41 = vld [vmem:[#allocation4 + $0x28] sm:$0xff]  ;;  %v4193_v38 = vpop.permute.xlu2 %4192 }
 0x667   : > { %v4139_v27 = vsel %vm4137_vm8, %v4128_v33, %v4130_v35  ;;  %4293 = vmatpush.msrb.mxu1 %v4155_v41 }
 0x668   : > { %4147 = vst.msk [vmem:[#allocation4 + $0x108] sm:$0xff] %vm3902_vm0, %v4139_v27  ;;  %vm5405_vm0 = vcmask 294128  }
 0x669   : > { %4294 = vmatpush.msrb.mxu1 %v4153_v1 }
 0x66b   : > { %4295 = vmatpush.msrb.mxu1 %v4151_v39 }
 0x66c   : > { %4296 = vmatmul.f32.vlgmr.msrb.gmra.mxu1 %v3889_v22 }
 0x66d   : > { %4241 = vmatmul.f32.gmra.mxu3 %v3891_v4 }
 0x66e   : > { %v4126_v57 = vpop.permute.xlu1 %4125 }
 0x66f   : > { %v4138_v3 = vsel %vm4137_vm8, %v4126_v57, %v4128_v33  ;;  %v4183_v16 = vld [vmem:[#allocation4 + $0x108] sm:$0xff] }
 0x670   : > { %4324 = vmatpush.msra.mxu2 %v4183_v16  ;;  %4266 = vmatpush.msra.mxu0 %v4138_v3 }
 0x671   : > { %6822 = vmatmul.msk.f32.vlgmr.msra.gmra.mxu2 %vm2445_vm10, %v3890_v19  ;;  %6818 = vmatmul.msk.f32.vlgmr.msra.gmra.mxu0 %vm2445_vm10, %v3890_v19 }
 0x674   : > { %4299 = vmatmul.f32.gmra.mxu1 %v3891_v4 }
 0x675   : > { %4244 = vmatmul.f32.gmra.mxu3 %v3893_v6 }
 0x676   : > { %v4198_v46 = vpop.permute.xlu1 %4197 }
 0x679   : > { %6823 = vmatmul.msk.f32.gmra.mxu2 %vm2445_vm10, %v3892_v24  ;;  %6819 = vmatmul.msk.f32.gmra.mxu0 %vm2445_vm10, %v3892_v24 }
 0x67c   : > { %4302 = vmatmul.f32.gmra.mxu1 %v3893_v6 }
 0x67d   : > { %4247 = vmatmul.f32.gmra.mxu3 %v3895_v42 }
 0x681   : > { %6824 = vmatmul.msk.f32.gmra.mxu2 %vm2445_vm10, %v3894_v48  ;;  %6820 = vmatmul.msk.f32.gmra.mxu0 %vm2445_vm10, %v3894_v48 }
 0x684   : > { %4305 = vmatmul.f32.gmra.mxu1 %v3895_v42 }
 0x689   : > { %6825 = vmatmul.msk.f32.gmra.mxu2 %vm2445_vm10, %v3896_v40  ;;  %6821 = vmatmul.msk.f32.gmra.mxu0 %vm2445_vm10, %v3896_v40  ;;  %vm5039_vm10 = vcmask 48128  }
 0x6e8   : > { %v4239_v23 = vpop.f32.mrf.mxu3 }
 0x6e9   : > { %v4297_v45 = vpop.f32.mrf.mxu1  ;;  %v4240_v14 = vadd.f32 %v4239_v23, %v4193_v38 }
 0x6ea   : > { %v4298_v2 = vadd.f32 %v4297_v45, %v4193_v38 }
 0x6ee   : > { %v4268_v37 = vpop.f32.mrf.mxu0 }
 0x6ef   : > { %v4269_v0 = vadd.f32 %v4268_v37, %v4240_v14 }
 0x6f0   : > { %v4242_v13 = vpop.f32.mrf.mxu3 }
 0x6f1   : > { %v9883_v62 = vmax.f32 %v4269_v0, 0.0  ;;  %v4300_v50 = vpop.f32.mrf.mxu1  ;;  %v4243_v20 = vadd.f32 %v4242_v13, %v4198_v46 }
 0x6f2   : > { %v4301_v29 = vadd.f32 %v4300_v50, %v4198_v46 }
 0x6f4   : > { %v4326_v8 = vpop.f32.mrf.mxu2 }
 0x6f5   : > { %v4327_v21 = vadd.f32 %v4326_v8, %v4298_v2 }
 0x6f6   : > { %v4271_v60 = vpop.f32.mrf.mxu0 }
 0x6f7   : > { %v9885_v36 = vmax.f32 %v4327_v21, 0.0  ;;  %v4272_v58 = vadd.f32 %v4271_v60, %v4243_v20 }
 0x6f8   : > { %v4245_v44 = vpop.f32.mrf.mxu3 }
 0x6f9   : > { %4521 = vrot.lane.b32.xlu1 %v9885_v36, %s7380_s23  ;;  %4557 = vrot.lane.b32.xlu0 %v9885_v36, %s7365_s22  ;;  %v9891_v9 = vmax.f32 %v4272_v58, 0.0  ;;  %4360 = vst.msk [vmem:[#allocation5 + $0x8] sm:$0xff] %vm4359_vm9, %v9885_v36  ;;  %v4246_v61 = vadd.f32 %v4245_v44, %v4203_v25  ;;  %v4303_v26 = vpop.f32.mrf.mxu1 }
 0x6fa   : > { %4593 = vrot.lane.b32.xlu2 %v9885_v36, %s7379_s29  ;;  %v4304_v52 = vadd.f32 %v4303_v26, %v4203_v25  ;;  %v4736_v25 = vld [vmem:[%s10928_s8 + $0x8] sm:$0xff] }
 0x6fc   : > { %v4329_v28 = vpop.f32.mrf.mxu2 }
 0x6fd   : > { %v4330_v49 = vadd.f32 %v4329_v28, %v4301_v29  ;;  %v4735_v29 = vld [vmem:[%s10928_s8] sm:$0xff] }
 0x6fe   : > { %v4274_v51 = vpop.f32.mrf.mxu0 }
 0x6ff   : > { %v9897_v17 = vmax.f32 %v4330_v49, 0.0  ;;  %v4275_v55 = vadd.f32 %v4274_v51, %v4246_v61 }
 0x700   : > { %v4248_v31 = vpop.f32.mrf.mxu3 }
 0x701   : > { %4377 = vrot.lane.b32.xlu1 %v9885_v36, %s7361_s16  ;;  %4413 = vrot.lane.b32.xlu0 %v9885_v36, %s10977_s30  ;;  %v9903_v47 = vmax.f32 %v4275_v55, 0.0  ;;  %4362 = vst.msk [vmem:[#allocation5 + $0x18] sm:$0xff] %vm4359_vm9, %v9897_v17  ;;  %v4249_v11 = vadd.f32 %v4248_v31, %v4208_v63  ;;  %v4306_v7 = vpop.f32.mrf.mxu1  ;;  %v4738_v55 = vld [vmem:[%s10928_s8 + $0x18] sm:$0xff] }
 0x702   : > { %4449 = vrot.lane.b32.xlu2 %v9885_v36, %s11013_s21  ;;  %v4307_v34 = vadd.f32 %v4306_v7, %v4208_v63 }
 0x704   : > { %v4332_v56 = vpop.f32.mrf.mxu2 }
 0x705   : > { %v4333_v15 = vadd.f32 %v4332_v56, %v4304_v52 }
 0x706   : > { %v4277_v54 = vpop.f32.mrf.mxu0 }
 0x707   : > { %v9909_v10 = vmax.f32 %v4333_v15, 0.0  ;;  %v4278_v32 = vadd.f32 %v4277_v54, %v4249_v11 }
 0x709   : > { %4519 = vrot.lane.b32.xlu0 %v9883_v62, %s7380_s23  ;;  %4591 = vrot.lane.b32.xlu1 %v9883_v62, %s7379_s29  ;;  %v9915_v12 = vmax.f32 %v4278_v32, 0.0  ;;  %4364 = vst.msk [vmem:[#allocation5 + $0x28] sm:$0xff] %vm4359_vm9, %v9909_v10 }
 0x70a   : > { %4555 = vrot.lane.b32.xlu2 %v9883_v62, %s7365_s22 }
 0x70c   : > { %v4335_v53 = vpop.f32.mrf.mxu2 }
 0x70d   : > { %v4336_v30 = vadd.f32 %v4335_v53, %v4307_v34 }
 0x70f   : > { %v4345_v22 = vmax.f32 %v4336_v30, 0.0 }
 0x711   : > { %4375 = vrot.lane.b32.xlu0 %v9883_v62, %s7361_s16  ;;  %4447 = vrot.lane.b32.xlu1 %v9883_v62, %s11013_s21  ;;  %4366 = vst.msk [vmem:[#allocation5 + $0x38] sm:$0xff] %vm4359_vm9, %v4345_v22 }
 0x712   : > { %4411 = vrot.lane.b32.xlu2 %v9883_v62, %s10977_s30 }
 0x719   : > { %4525 = vrot.lane.b32.xlu0 %v9897_v17, %s7380_s23  ;;  %4597 = vrot.lane.b32.xlu1 %v9897_v17, %s7379_s29 }
 0x71a   : > { %4561 = vrot.lane.b32.xlu2 %v9897_v17, %s7365_s22 }
 0x721   : > { %4381 = vrot.lane.b32.xlu0 %v9897_v17, %s7361_s16  ;;  %4453 = vrot.lane.b32.xlu1 %v9897_v17, %s11013_s21 }
 0x722   : > { %4417 = vrot.lane.b32.xlu2 %v9897_v17, %s10977_s30 }
 0x729   : > { %4595 = vrot.lane.b32.xlu0 %v9891_v9, %s7379_s29  ;;  %4489 = vrot.lane.b32.xlu1 %v9897_v17, %s11014_s20 }
 0x72a   : > { %4523 = vrot.lane.b32.xlu2 %v9891_v9, %s7380_s23 }
 0x731   : > { %4451 = vrot.lane.b32.xlu0 %v9891_v9, %s11013_s21  ;;  %4559 = vrot.lane.b32.xlu1 %v9891_v9, %s7365_s22 }
 0x732   : > { %4379 = vrot.lane.b32.xlu2 %v9891_v9, %s7361_s16 }
 0x739   : > { %4487 = vrot.lane.b32.xlu0 %v9891_v9, %s11014_s20  ;;  %4415 = vrot.lane.b32.xlu1 %v9891_v9, %s10977_s30 }
 0x73a   : > { %4529 = vrot.lane.b32.xlu2 %v9909_v10, %s7380_s23 }
 0x741   : > { %4601 = vrot.lane.b32.xlu0 %v9909_v10, %s7379_s29  ;;  %4565 = vrot.lane.b32.xlu1 %v9909_v10, %s7365_s22 }
 0x742   : > { %4385 = vrot.lane.b32.xlu2 %v9909_v10, %s7361_s16 }
 0x749   : > { %4457 = vrot.lane.b32.xlu0 %v9909_v10, %s11013_s21  ;;  %4421 = vrot.lane.b32.xlu1 %v9909_v10, %s10977_s30 }
 0x74a   : > { %4599 = vrot.lane.b32.xlu2 %v9903_v47, %s7379_s29 }
 0x751   : > { %4493 = vrot.lane.b32.xlu0 %v9909_v10, %s11014_s20  ;;  %4527 = vrot.lane.b32.xlu1 %v9903_v47, %s7380_s23 }
 0x752   : > { %4455 = vrot.lane.b32.xlu2 %v9903_v47, %s11013_s21 }
 0x754   : > { %v4594_v35 = vpop.permute.xlu2 %4593 }
 0x755   : > { %4620 = vst.msk [vmem:[#allocation5 + $0x1c8] sm:$0xff] %vm4359_vm9, %v4594_v35 }
 0x759   : > { %4563 = vrot.lane.b32.xlu0 %v9903_v47, %s7365_s22  ;;  %4383 = vrot.lane.b32.xlu1 %v9903_v47, %s7361_s16 }
 0x75a   : > { %4491 = vrot.lane.b32.xlu2 %v9903_v47, %s11014_s20 }
 0x75c   : > { %v4450_v33 = vpop.permute.xlu2 %4449 }
 0x75d   : > { %4476 = vst.msk [vmem:[#allocation5 + $0xc8] sm:$0xff] %vm4359_vm9, %v4450_v33 }
 0x761   : > { %4419 = vrot.lane.b32.xlu0 %v9903_v47, %s10977_s30  ;;  %4605 = vrot.lane.b32.xlu1 %v4345_v22, %s7379_s29 }
 0x762   : > { %4461 = vrot.lane.b32.xlu2 %v4345_v22, %s11013_s21 }
 0x764   : > { %v4556_v41 = vpop.permute.xlu2 %4555 }
 0x769   : > { %4569 = vrot.lane.b32.xlu0 %v4345_v22, %s7365_s22  ;;  %4533 = vrot.lane.b32.xlu1 %v4345_v22, %s7380_s23 }
 0x76a   : > { %4497 = vrot.lane.b32.xlu2 %v4345_v22, %s11014_s20 }
 0x76b   : > { %v4522_v27 = vpop.permute.xlu1 %4521  ;;  %v4558_v1 = vpop.permute.xlu0 %4557 }
 0x76c   : > { %4548 = vst.msk [vmem:[#allocation5 + $0x148] sm:$0xff] %vm4359_vm9, %v4522_v27  ;;  %v9993_v39 = vsel %vm4063_vm2, %v4556_v41, %v4558_v1  ;;  %v4412_v4 = vpop.permute.xlu2 %4411 }
 0x76d   : > { %4584 = vst.msk [vmem:[#allocation5 + $0x188] sm:$0xff] %vm4359_vm9, %v4558_v1 }
 0x771   : > { %4425 = vrot.lane.b32.xlu0 %v4345_v22, %s10977_s30  ;;  %4389 = vrot.lane.b32.xlu1 %v4345_v22, %s7361_s16 }
 0x772   : > { %4641 = vrot.lane.b32.xlu2 %v4345_v22, %s11015_s17 }
 0x773   : > { %v4378_v57 = vpop.permute.xlu1 %4377  ;;  %v4414_v19 = vpop.permute.xlu0 %4413 }
 0x774   : > { %4404 = vst.msk [vmem:[#allocation5 + $0x48] sm:$0xff] %vm4359_vm9, %v4378_v57  ;;  %v10001_v3 = vsel %vm653_vm6, %v4412_v4, %v4414_v19  ;;  %v4562_v16 = vpop.permute.xlu2 %4561 }
 0x775   : > { %4440 = vst.msk [vmem:[#allocation5 + $0x88] sm:$0xff] %vm4359_vm9, %v4414_v19  ;;  %v4688_v19 = vld [vmem:[#allocation5 + $0xc8] sm:$0xff] }
 0x776   : > { %4586 = vst.msk [vmem:[#allocation5 + $0x198] sm:$0xff] %vm4359_vm9, %v4562_v16 }
 0x779   : > { %4603 = vrot.lane.b32.xlu0 %v9915_v12, %s7379_s29  ;;  %4459 = vrot.lane.b32.xlu1 %v9915_v12, %s11013_s21  ;;  %s11016_s29 = smov 32  }
 0x77a   : > { %4567 = vrot.lane.b32.xlu2 %v9915_v12, %s7365_s22 }
 0x77b   : > { %v4520_v6 = vpop.permute.xlu0 %4519  ;;  %v4592_v24 = vpop.permute.xlu1 %4591 }
 0x77c   : > { %v10012_v42 = vsel %vm4028_vm3, %v4520_v6, %v4522_v27  ;;  %v4418_v48 = vpop.permute.xlu2 %4417  ;;  %v10015_v40 = vsel %vm4100_vm4, %v4592_v24, %v4594_v35 }
 0x77d   : > { %4442 = vst.msk [vmem:[#allocation5 + $0x98] sm:$0xff] %vm4359_vm9, %v4418_v48 }
 0x781   : > { %4637 = vrot.lane.b32.xlu0 %v9909_v10, %s11015_s17  ;;  %4483 = vrot.lane.b32.xlu1 %v9883_v62, %s11014_s20 }
 0x782   : > { %4423 = vrot.lane.b32.xlu2 %v9915_v12, %s10977_s30 }
 0x783   : > { %v4376_v63 = vpop.permute.xlu0 %4375  ;;  %v4448_v23 = vpop.permute.xlu1 %4447 }
 0x784   : > { %v10025_v45 = vsel %vm583_vm7, %v4376_v63, %v4378_v57  ;;  %v4524_v38 = vpop.permute.xlu2 %4523  ;;  %v10028_v14 = vsel %vm3974_vm1, %v4448_v23, %v4450_v33 }
 0x789   : > { %4531 = vrot.lane.b32.xlu0 %v9915_v12, %s7380_s23  ;;  %4495 = vrot.lane.b32.xlu1 %v9915_v12, %s11014_s20  ;;  %s7383_s23 = smov 18  }
 0x78a   : > { %4635 = vrot.lane.b32.xlu2 %v9903_v47, %s11015_s17 }
 0x78b   : > { %v4526_v37 = vpop.permute.xlu0 %4525  ;;  %v4598_v0 = vpop.permute.xlu1 %4597 }
 0x78c   : > { %v10037_v13 = vsel %vm4028_vm3, %v4524_v38, %v4526_v37  ;;  %4550 = vst.msk [vmem:[#allocation5 + $0x158] sm:$0xff] %vm4359_vm9, %v4526_v37  ;;  %v4380_v46 = vpop.permute.xlu2 %4379 }
 0x78d   : > { %4622 = vst.msk [vmem:[#allocation5 + $0x1d8] sm:$0xff] %vm4359_vm9, %v4598_v0 }
 0x791   : > { %4387 = vrot.lane.b32.xlu0 %v9915_v12, %s7361_s16  ;;  %4639 = vrot.lane.b32.xlu1 %v9915_v12, %s11015_s17 }
 0x792   : > { %4485 = vrot.lane.b32.xlu2 %v9885_v36, %s11014_s20  ;;  %s10981_s20 = smov 115  }
 0x793   : > { %v4382_v2 = vpop.permute.xlu0 %4381  ;;  %v4454_v50 = vpop.permute.xlu1 %4453 }
 0x794   : > { %v10048_v8 = vsel %vm583_vm7, %v4380_v46, %v4382_v2  ;;  %4406 = vst.msk [vmem:[#allocation5 + $0x58] sm:$0xff] %vm4359_vm9, %v4382_v2  ;;  %v4530_v21 = vpop.permute.xlu2 %4529 }
 0x795   : > { %4552 = vst.msk [vmem:[#allocation5 + $0x168] sm:$0xff] %vm4359_vm9, %v4530_v21 }
 0x796   : > { %4478 = vst.msk [vmem:[#allocation5 + $0xd8] sm:$0xff] %vm4359_vm9, %v4454_v50 }
 0x799   : > { %4631 = vrot.lane.b32.xlu0 %v9891_v9, %s11015_s17  ;;  %4633 = vrot.lane.b32.xlu1 %v9897_v17, %s11015_s17  ;;  %v4737_v17 = vld [vmem:[%s10928_s8 + $0x10] sm:$0xff] }
 0x79a   : > { %4627 = vrot.lane.b32.xlu2 %v9883_v62, %s11015_s17 }
 0x79b   : > { %v4596_v20 = vpop.permute.xlu0 %4595  ;;  %v4490_v60 = vpop.permute.xlu1 %4489 }
 0x79c   : > { %v10060_v58 = vsel %vm4100_vm4, %v4596_v20, %v4598_v0  ;;  %v4386_v44 = vpop.permute.xlu2 %4385  ;;  %4514 = vst.msk [vmem:[#allocation5 + $0x118] sm:$0xff] %vm4359_vm9, %v4490_v60 }
 0x79d   : > { %4408 = vst.msk [vmem:[#allocation5 + $0x68] sm:$0xff] %vm4359_vm9, %v4386_v44  ;;  %v4690_v57 = vld [vmem:[#allocation5 + $0xd8] sm:$0xff] }
 0x7a1   : > { %4629 = vrot.lane.b32.xlu0 %v9885_v36, %s11015_s17  ;;  %4741 = vperm.xlu1 %7342, %v4735_v29   ;;  %s10218_s17 = scalar_lea.vmem %s10934_s14, %s10972_s28 }
 0x7a2   : > { %4746 = vperm.xlu2 %6940, %v4736_v25  }
 0x7a3   : > { %v4452_v28 = vpop.permute.xlu0 %4451  ;;  %v4560_v49 = vpop.permute.xlu1 %4559 }
 0x7a4   : > { %v10073_v61 = vsel %vm3974_vm1, %v4452_v28, %v4454_v50  ;;  %v4600_v26 = vpop.permute.xlu2 %4599  ;;  %v10076_v51 = vsel %vm4063_vm2, %v4560_v49, %v4562_v16 }
 0x7a9   : > { %4751 = vperm.xlu0 %6941, %v4737_v17   ;;  %4756 = vperm.xlu1 %7342, %v4738_v55  }
 0x7ab   : > { %v4488_v36 = vpop.permute.xlu0 %4487  ;;  %v4416_v31 = vpop.permute.xlu1 %4415 }
 0x7ac   : > { %v10085_v52 = vsel %vm4001_vm5, %v4488_v36, %v4490_v60  ;;  %v4456_v56 = vpop.permute.xlu2 %4455  ;;  %v10088_v15 = vsel %vm653_vm6, %v4416_v31, %v4418_v48  ;;  %v4682_v31 = vld [vmem:[#allocation5 + $0x98] sm:$0xff] }
 0x7b3   : > { %v4602_v11 = vpop.permute.xlu0 %4601  ;;  %v4566_v54 = vpop.permute.xlu1 %4565 }
 0x7b4   : > { %v4609_v10 = vsel %vm4100_vm4, %v4600_v26, %v4602_v11  ;;  %4624 = vst.msk [vmem:[#allocation5 + $0x1e8] sm:$0xff] %vm4359_vm9, %v4602_v11  ;;  %v4492_v32 = vpop.permute.xlu2 %4491 }
 0x7b5   : > { %4588 = vst.msk [vmem:[#allocation5 + $0x1a8] sm:$0xff] %vm4359_vm9, %v4566_v54 }
 0x7bb   : > { %v4458_v7 = vpop.permute.xlu0 %4457  ;;  %v4422_v34 = vpop.permute.xlu1 %4421 }
 0x7bc   : > { %v4465_v53 = vsel %vm3974_vm1, %v4456_v56, %v4458_v7  ;;  %4480 = vst.msk [vmem:[#allocation5 + $0xe8] sm:$0xff] %vm4359_vm9, %v4458_v7  ;;  %v4462_v30 = vpop.permute.xlu2 %4461  ;;  %v4680_v56 = vld [vmem:[#allocation5 + $0x88] sm:$0xff] }
 0x7bd   : > { %4482 = vst.msk [vmem:[#allocation5 + $0xf8] sm:$0xff] %vm4359_vm9, %v4462_v30 }
 0x7be   : > { %4444 = vst.msk [vmem:[#allocation5 + $0xa8] sm:$0xff] %vm4359_vm9, %v4422_v34 }
 0x7c3   : > { %v4494_v22 = vpop.permute.xlu0 %4493  ;;  %v4528_v35 = vpop.permute.xlu1 %4527  ;;  %v4692_v4 = vld [vmem:[#allocation5 + $0xe8] sm:$0xff] }
 0x7c4   : > { %v10098_v33 = vsel %vm4001_vm5, %v4492_v32, %v4494_v22  ;;  %4516 = vst.msk [vmem:[#allocation5 + $0x128] sm:$0xff] %vm4359_vm9, %v4494_v22  ;;  %v10101_v41 = vpop.permute.xlu2 %4497  ;;  %v10104_v27 = vsel %vm4028_vm3, %v4528_v35, %v4530_v21  ;;  %v4694_v1 = vld [vmem:[#allocation5 + $0xf8] sm:$0xff]  ;;  %v4668_v35 = vld [vmem:[#allocation5 + $0x28] sm:$0xff] }
 0x7c5   : > { %4518 = vst.msk [vmem:[#allocation5 + $0x138] sm:$0xff] %vm4359_vm9, %v10101_v41  ;;  %4858 = vmatpush.msra.mxu1 %v4694_v1  ;;  %v4684_v36 = vld [vmem:[#allocation5 + $0xa8] sm:$0xff] }
 0x7c7   : > { %4859 = vmatpush.msra.mxu1 %v4692_v4 }
 0x7c9   : > { %4860 = vmatpush.msra.mxu1 %v4690_v57  ;;  %v10165_v57 = vld [vmem:[%s10927_s7 + $0x8] sm:$0xff] }
 0x7cb   : > { %v4564_v16 = vpop.permute.xlu0 %4563  ;;  %v4384_v6 = vpop.permute.xlu1 %4383  ;;  %4861 = vmatpush.msra.mxu1 %v4688_v19 }
 0x7cc   : > { %v4573_v24 = vsel %vm4063_vm2, %v4564_v16, %v4566_v54  ;;  %v10109_v48 = vpop.permute.xlu2 %4641  ;;  %v10112_v63 = vsel %vm583_vm7, %v4384_v6, %v4386_v44 }
 0x7cd   : > { %4662 = vst.msk [vmem:[#allocation5 + $0x238] sm:$0xff] %vm4359_vm9, %v10109_v48 }
 0x7d3   : > { %v4420_v23 = vpop.permute.xlu0 %4419  ;;  %v4606_v38 = vpop.permute.xlu1 %4605 }
 0x7d4   : > { %v4429_v37 = vsel %vm653_vm6, %v4420_v23, %v4422_v34  ;;  %v4568_v0 = vpop.permute.xlu2 %4567  ;;  %4626 = vst.msk [vmem:[#allocation5 + $0x1f8] sm:$0xff] %vm4359_vm9, %v4606_v38  ;;  %v4676_v34 = vld [vmem:[#allocation5 + $0x68] sm:$0xff]  ;;  %v4734_v19 = vld [vmem:[#allocation5 + $0x238] sm:$0xff] }
 0x7d5   : > { %v4720_v23 = vld [vmem:[#allocation5 + $0x1c8] sm:$0xff] }
 0x7db   : > { %v4570_v46 = vpop.permute.xlu0 %4569  ;;  %v4534_v2 = vpop.permute.xlu1 %4533 }
 0x7dc   : > { %v4574_v50 = vsel %vm4063_vm2, %v4568_v0, %v4570_v46  ;;  %4590 = vst.msk [vmem:[#allocation5 + $0x1b8] sm:$0xff] %vm4359_vm9, %v4570_v46  ;;  %v4424_v21 = vpop.permute.xlu2 %4423  ;;  %v4353_v0 = vld [vmem:[%s10927_s7 + $0x38] sm:$0xff]  ;;  %vm5443_vm2 = vcmask 211968  }
 0x7dd   : > { %4554 = vst.msk [vmem:[#allocation5 + $0x178] sm:$0xff] %vm4359_vm9, %v4534_v2 }
 0x7e3   : > { %v4426_v20 = vpop.permute.xlu0 %4425  ;;  %v10121_v60 = vpop.permute.xlu1 %4389  ;;  %v4718_v46 = vld [vmem:[#allocation5 + $0x1b8] sm:$0xff] }
 0x7e4   : > { %v4430_v44 = vsel %vm653_vm6, %v4424_v21, %v4426_v20  ;;  %4446 = vst.msk [vmem:[#allocation5 + $0xb8] sm:$0xff] %vm4359_vm9, %v4426_v20  ;;  %v4636_v29 = vpop.permute.xlu2 %4635  ;;  %v4712_v21 = vld [vmem:[#allocation5 + $0x188] sm:$0xff]  ;;  %v4354_v20 = vld [vmem:[%s10927_s7 + $0x40] sm:$0xff]  ;;  %vm5006_vm6 = vcmask 1043456  }
 0x7e5   : > { %4410 = vst.msk [vmem:[#allocation5 + $0x78] sm:$0xff] %vm4359_vm9, %v10121_v60 }
 0x7eb   : > { %v4604_v25 = vpop.permute.xlu0 %4603  ;;  %v4460_v28 = vpop.permute.xlu1 %4459  ;;  %v4686_v49 = vld [vmem:[#allocation5 + $0xb8] sm:$0xff] }
 0x7ec   : > { %v4610_v26 = vsel %vm4100_vm4, %v4604_v25, %v4606_v38  ;;  %v4486_v17 = vpop.permute.xlu2 %4485  ;;  %v4466_v55 = vsel %vm3974_vm1, %v4460_v28, %v4462_v30  ;;  %4862 = vmatpush.msra.mxu1 %v4686_v49  ;;  %v4678_v32 = vld [vmem:[#allocation5 + $0x78] sm:$0xff]  ;;  %v4704_v28 = vld [vmem:[#allocation5 + $0x148] sm:$0xff]  ;;  %vm5410_vm1 = vcmask 326944  }
 0x7ed   : > { %4771 = vmatpush.msrb.mxu0 %v4466_v55  ;;  %4800 = vmatpush.msrb.mxu2 %v4610_v26  ;;  %4512 = vst.msk [vmem:[#allocation5 + $0x108] sm:$0xff] %vm4359_vm9, %v4486_v17  ;;  %v4706_v25 = vld [vmem:[#allocation5 + $0x158] sm:$0xff]  ;;  %v4357_v49 = vld [vmem:[%s10927_s7 + $0x58] sm:$0xff] }
 0x7ee   : > { %4863 = vmatpush.msra.mxu1 %v4684_v36  ;;  %v4702_v26 = vld [vmem:[#allocation5 + $0x138] sm:$0xff] }
 0x7ef   : > { %4772 = vmatpush.msrb.mxu0 %v4465_v53  ;;  %4801 = vmatpush.msrb.mxu2 %v4609_v10  ;;  %v4670_v53 = vld [vmem:[#allocation5 + $0x38] sm:$0xff] }
 0x7f0   : > { %4864 = vmatpush.msra.mxu1 %v4682_v31  ;;  %v4698_v55 = vld [vmem:[#allocation5 + $0x118] sm:$0xff] }
 0x7f1   : > { %4773 = vmatpush.msrb.mxu0 %v10073_v61  ;;  %4802 = vmatpush.msrb.mxu2 %v10060_v58  ;;  %v4674_v58 = vld [vmem:[#allocation5 + $0x58] sm:$0xff]  ;;  %v4672_v61 = vld [vmem:[#allocation5 + $0x48] sm:$0xff] }
 0x7f2   : > { %4865 = vmatpush.msra.mxu1 %v4680_v56 }
 0x7f3   : > { %v4638_v11 = vpop.permute.xlu0 %4637  ;;  %v4484_v54 = vpop.permute.xlu1 %4483  ;;  %4774 = vmatpush.msrb.mxu0 %v10028_v14  ;;  %4803 = vmatpush.msrb.mxu2 %v10015_v40 }
 0x7f4   : > { %v4645_v7 = vsel %vm4137_vm8, %v4636_v29, %v4638_v11  ;;  %4660 = vst.msk [vmem:[#allocation5 + $0x228] sm:$0xff] %vm4359_vm9, %v4638_v11  ;;  %v4499_v10 = vsel %vm4001_vm5, %v4484_v54, %v4486_v17  ;;  %4866 = vmatpush.msra.mxu1 %v4678_v32  ;;  %v4708_v29 = vld [vmem:[#allocation5 + $0x168] sm:$0xff] }
 0x7f5   : > { %4775 = vmatpush.msrb.mxu0 %v4430_v44  ;;  %4804 = vmatpush.msrb.mxu2 %v4574_v50  ;;  %v4714_v50 = vld [vmem:[#allocation5 + $0x198] sm:$0xff]  ;;  %v4700_v17 = vld [vmem:[#allocation5 + $0x128] sm:$0xff] }
 0x7f6   : > { %4867 = vmatpush.msra.mxu1 %v4676_v34  ;;  %v4710_v44 = vld [vmem:[#allocation5 + $0x178] sm:$0xff]  ;;  %v4696_v36 = vld [vmem:[#allocation5 + $0x108] sm:$0xff] }
 0x7f7   : > { %4776 = vmatpush.msrb.mxu0 %v4429_v37  ;;  %4805 = vmatpush.msrb.mxu2 %v4573_v24  ;;  %v4351_v37 = vld [vmem:[%s10927_s7 + $0x28] sm:$0xff] }
 0x7f8   : > { %4868 = vmatpush.msra.mxu1 %v4674_v58 }
 0x7f9   : > { %4777 = vmatpush.msrb.mxu0 %v10088_v15  ;;  %4806 = vmatpush.msrb.mxu2 %v10076_v51  ;;  %v4666_v15 = vld [vmem:[#allocation5 + $0x18] sm:$0xff]  ;;  %v4346_v51 = vld [vmem:[%s10927_s7] sm:$0xff] }
 0x7fa   : > { %4869 = vmatpush.msra.mxu1 %v4672_v61 }
 0x7fb   : > { %v4532_v40 = vpop.permute.xlu0 %4531  ;;  %v4496_v14 = vpop.permute.xlu1 %4495  ;;  %4778 = vmatpush.msrb.mxu0 %v10001_v3  ;;  %4807 = vmatpush.msrb.mxu2 %v9993_v39  ;;  %v4664_v3 = vld [vmem:[#allocation5 + $0x8] sm:$0xff] }
 0x7fc   : > { %v4538_v30 = vsel %vm4028_vm3, %v4532_v40, %v4534_v2  ;;  %v4502_v22 = vsel %vm4001_vm5, %v4496_v14, %v10101_v41  ;;  %4870 = vmatpush.msra.mxu1 %v4670_v53  ;;  %v4716_v2 = vld [vmem:[#allocation5 + $0x1a8] sm:$0xff] }
 0x7fd   : > { %4808 = vmatpush.msrb.mxu2 %v4538_v30 }
 0x7fe   : > { %4871 = vmatpush.msra.mxu1 %v4668_v35 }
 0x7ff   : > { %4809 = vmatpush.msrb.mxu2 %v10104_v27 }
 0x800   : > { %4872 = vmatpush.msra.mxu1 %v4666_v15 }
 0x801   : > { %4810 = vmatpush.msrb.mxu2 %v10037_v13  ;;  %v4349_v13 = vld [vmem:[%s10927_s7 + $0x18] sm:$0xff] }
 0x802   : > { %4873 = vmatpush.msra.mxu1 %v4664_v3 }
 0x803   : > { %v4388_v39 = vpop.permute.xlu0 %4387  ;;  %4874 = vmatmul.f32.vlgmr.msra.gmra.mxu1 %v4346_v51  ;;  %v4640_v1 = vpop.permute.xlu1 %4639  ;;  %4811 = vmatpush.msrb.mxu2 %v10012_v42 }
 0x804   : > { %v4394_v41 = vsel %vm583_vm7, %v4388_v39, %v10121_v60  ;;  %v4646_v27 = vsel %vm4137_vm8, %v4640_v1, %v10109_v48  ;;  %v4355_v48 = vld [vmem:[%s10927_s7 + $0x48] sm:$0xff]  ;;  %v4356_v60 = vld [vmem:[%s10927_s7 + $0x50] sm:$0xff]  ;;  %vm4993_vm7 = vcmask 97280  }
 0x805   : > { %4779 = vmatpush.msrb.mxu0 %v4394_v41  ;;  %4812 = vmatpush.msrb.mxu2 %v4502_v22 }
 0x806   : > { %4841 = vmatpush.msrb.mxu3 %v4646_v27 }
 0x807   : > { %4780 = vmatpush.msrb.mxu0 %v10112_v63  ;;  %4813 = vmatpush.msrb.mxu2 %v10098_v33  ;;  %v4722_v63 = vld [vmem:[#allocation5 + $0x1d8] sm:$0xff] }
 0x808   : > { %4842 = vmatpush.msrb.mxu3 %v4645_v7 }
 0x809   : > { %4781 = vmatpush.msrb.mxu0 %v10048_v8  ;;  %4814 = vmatpush.msrb.mxu2 %v10085_v52  ;;  %v4732_v8 = vld [vmem:[#allocation5 + $0x228] sm:$0xff]  ;;  %v4628_v52 = vpop.permute.xlu2 %4627 }
 0x80b   : > { %v4632_v42 = vpop.permute.xlu0 %4631  ;;  %4877 = vmatmul.f32.gmra.mxu1 %v4349_v13  ;;  %v4634_v4 = vpop.permute.xlu1 %4633  ;;  %4782 = vmatpush.msrb.mxu0 %v10025_v45  ;;  %v4352_v45 = vld [vmem:[%s10927_s7 + $0x30] sm:$0xff] }
 0x80c   : > { %v4644_v33 = vsel %vm4137_vm8, %v4632_v42, %v4634_v4  ;;  %4658 = vst.msk [vmem:[#allocation5 + $0x218] sm:$0xff] %vm4359_vm9, %v4634_v4  ;;  %4815 = vmatpush.msrb.mxu2 %v4499_v10 }
 0x80d   : > { %4783 = vmatpush.msrb.mxu0 %v9915_v12  ;;  %4843 = vmatpush.msrb.mxu3 %v4644_v33  ;;  %v4348_v12 = vld [vmem:[%s10927_s7 + $0x10] sm:$0xff] }
 0x80e   : > { %4928 = vmatpush.msra.mxu2 %v4734_v19 }
 0x80f   : > { %4816 = vmatmul.f32.vlgmr.msrb.gmra.mxu2 %v10165_v57  ;;  %4784 = vmatpush.msrb.mxu0 %v9903_v47  ;;  %v4350_v47 = vld [vmem:[%s10927_s7 + $0x20] sm:$0xff] }
 0x810   : > { %4929 = vmatpush.msra.mxu2 %v4732_v8 }
 0x811   : > { %4785 = vmatpush.msrb.mxu0 %v9891_v9  ;;  %v4726_v9 = vld [vmem:[#allocation5 + $0x1f8] sm:$0xff]  ;;  %v4747_v61 = vpop.permute.xlu2 %4746 }
 0x813   : > { %v4630_v16 = vpop.permute.xlu0 %4629  ;;  %4880 = vmatmul.f32.gmra.mxu1 %v4352_v45  ;;  %v4730_v6 = vld [vmem:[#allocation5 + $0x218] sm:$0xff]  ;;  %4786 = vmatpush.msrb.mxu0 %v9883_v62  ;;  %v4724_v62 = vld [vmem:[#allocation5 + $0x1e8] sm:$0xff]  ;;  %v4742_v11 = vpop.permute.xlu1 %4741 }
 0x814   : > { %v4643_v24 = vsel %vm4137_vm8, %v4628_v52, %v4630_v16  ;;  %4656 = vst.msk [vmem:[#allocation5 + $0x208] sm:$0xff] %vm4359_vm9, %v4630_v16  ;;  %4930 = vmatpush.msra.mxu2 %v4730_v6  ;;  %4787 = vmatmul.f32.vlgmr.msrb.gmra.mxu0 %v4346_v51 }
 0x815   : > { %4887 = vmatpush.msra.mxu0 %v4726_v9  ;;  %4844 = vmatpush.msrb.mxu3 %v4643_v24 }
 0x816   : > { %6826 = vmatmul.msk.f32.vlgmr.msrb.gmra.mxu3 %vm2924_vm15, %v4348_v12 }
 0x817   : > { %4819 = vmatmul.f32.gmra.mxu2 %v4350_v47  ;;  %4888 = vmatpush.msra.mxu0 %v4724_v62 }
 0x819   : > { %4889 = vmatpush.msra.mxu0 %v4722_v63 }
 0x81b   : > { %4883 = vmatmul.f32.gmra.mxu1 %v4355_v48  ;;  %v4728_v38 = vld [vmem:[#allocation5 + $0x208] sm:$0xff]  ;;  %4890 = vmatpush.msra.mxu0 %v4720_v23  ;;  %v4752_v15 = vpop.permute.xlu0 %4751  ;;  %v4757_v42 = vpop.permute.xlu1 %4756 }
 0x81c   : > { %4931 = vmatpush.msra.mxu2 %v4728_v38  ;;  %4790 = vmatmul.f32.gmra.mxu0 %v4349_v13 }
 0x81d   : > { %4891 = vmatpush.msra.mxu0 %v4718_v46 }
 0x81e   : > { %6827 = vmatmul.msk.f32.gmra.mxu3 %vm2924_vm15, %v4351_v37 }
 0x81f   : > { %4822 = vmatmul.f32.gmra.mxu2 %v4353_v0  ;;  %4892 = vmatpush.msra.mxu0 %v4716_v2 }
 0x821   : > { %4893 = vmatpush.msra.mxu0 %v4714_v50 }
 0x823   : > { %4894 = vmatpush.msra.mxu0 %v4712_v21 }
 0x824   : > { %4793 = vmatmul.f32.gmra.mxu0 %v4352_v45 }
 0x825   : > { %4895 = vmatpush.msra.mxu0 %v4710_v44 }
 0x826   : > { %6828 = vmatmul.msk.f32.gmra.mxu3 %vm2924_vm15, %v4354_v20 }
 0x827   : > { %4825 = vmatmul.f32.gmra.mxu2 %v4356_v60  ;;  %4896 = vmatpush.msra.mxu0 %v4708_v29 }
 0x829   : > { %4897 = vmatpush.msra.mxu0 %v4706_v25 }
 0x82b   : > { %4898 = vmatpush.msra.mxu0 %v4704_v28 }
 0x82c   : > { %4796 = vmatmul.f32.gmra.mxu0 %v4355_v48 }
 0x82d   : > { %4899 = vmatpush.msra.mxu0 %v4702_v26  ;;  %v6719_v26 = vsel %vm9242_vm13, 1.0, %v7378_v18  ;;  %vm5105_vm13 = vcmask 97328  }
 0x82e   : > { %6829 = vmatmul.msk.f32.gmra.mxu3 %vm2924_vm15, %v4357_v49  ;;  %6840 = vmatpush.msk.msrb.mxu1 %vm5006_vm6, %v6719_v26 }
 0x82f   : > { %6830 = vmatmul.msk.f32.vlgmr.msra.gmra.mxu2 %vm2924_vm15, %v4348_v12  ;;  %4900 = vmatpush.msra.mxu0 %v4700_v17 }
 0x830   : > { %6834 = vmatpush.msk.msra.mxu3 %vm5006_vm6, %v6719_v26  ;;  %6852 = vmatpush.msk.msrb.mxu2 %vm5006_vm6, %v6719_v26 }
 0x831   : > { %4901 = vmatpush.msra.mxu0 %v4698_v55  ;;  %6841 = vmatpush.msk.msrb.mxu1 %vm9255_vm14, %v7363_v5 }
 0x832   : > { %6835 = vmatpush.msk.msra.mxu3 %vm9255_vm14, %v7363_v5  ;;  %6853 = vmatpush.msk.msrb.mxu2 %vm9255_vm14, %v7363_v5 }
 0x833   : > { %4902 = vmatpush.msra.mxu0 %v4696_v36  ;;  %6864 = vmatpush.msk.msra.mxu1 %vm5006_vm6, %v6719_v26 }
 0x834   : > { %4903 = vmatmul.f32.vlgmr.msra.gmra.mxu0 %v10165_v57  ;;  %6858 = vmatpush.msk.msrb.mxu3 %vm5006_vm6, %v6719_v26 }
 0x835   : > { %6846 = vmatpush.msk.msrb.mxu0 %vm5006_vm6, %v6719_v26  ;;  %6865 = vmatpush.msk.msra.mxu1 %vm9255_vm14, %v7363_v5 }
 0x836   : > { %6859 = vmatpush.msk.msrb.mxu3 %vm9255_vm14, %v7363_v5 }
 0x837   : > { %6831 = vmatmul.msk.f32.gmra.mxu2 %vm2924_vm15, %v4351_v37  ;;  %6847 = vmatpush.msk.msrb.mxu0 %vm9255_vm14, %v7363_v5  ;;  %vm5171_vm14 = vcmask 146528  }
 0x83c   : > { %4906 = vmatmul.f32.gmra.mxu0 %v4350_v47 }
 0x83f   : > { %6832 = vmatmul.msk.f32.gmra.mxu2 %vm2924_vm15, %v4354_v20 }
 0x844   : > { %4909 = vmatmul.f32.gmra.mxu0 %v4353_v0 }
 0x847   : > { %6833 = vmatmul.msk.f32.gmra.mxu2 %vm2924_vm15, %v4357_v49 }
 0x84c   : > { %4912 = vmatmul.f32.gmra.mxu0 %v4356_v60 }
 0x880   : > { %v4875_v3 = vpop.f32.mrf.mxu1 }
 0x881   : > { %v4876_v57 = vadd.f32 %v4875_v3, %v4742_v11 }
 0x888   : > { %v4878_v33 = vpop.f32.mrf.mxu1 }
 0x889   : > { %v4879_v47 = vadd.f32 %v4878_v33, %v4747_v61 }
 0x890   : > { %v4881_v48 = vpop.f32.mrf.mxu1 }
 0x891   : > { %v4788_v31 = vpop.f32.mrf.mxu0  ;;  %v4882_v23 = vadd.f32 %v4881_v48, %v4752_v15 }
 0x892   : > { %v4817_v56 = vpop.f32.mrf.mxu2  ;;  %v4789_v54 = vadd.f32 %v4788_v31, %v4742_v11 }
 0x894   : > { %v4818_v32 = vadd.f32 %v4817_v56, %v4789_v54 }
 0x898   : > { %v4884_v2 = vpop.f32.mrf.mxu1 }
 0x899   : > { %v4791_v7 = vpop.f32.mrf.mxu0  ;;  %v4846_v10 = vpop.f32.mrf.mxu3  ;;  %v4885_v50 = vadd.f32 %v4884_v2, %v4757_v42 }
 0x89a   : > { %v4847_v34 = vadd.f32 %v4846_v10, %v4818_v32  ;;  %v4820_v58 = vpop.f32.mrf.mxu2  ;;  %v4792_v40 = vadd.f32 %v4791_v7, %v4747_v61 }
 0x89c   : > { %4945 = vst [vmem:[%s10218_s17] sm:$0xff] %v4847_v34  ;;  %4957 = vrot.lane.b32.xlu2 %v4847_v34, %s7361_s16  ;;  %v4821_v14 = vadd.f32 %v4820_v58, %v4792_v40 }
 0x8a1   : > { %v4794_v53 = vpop.f32.mrf.mxu0  ;;  %v4849_v30 = vpop.f32.mrf.mxu3 }
 0x8a2   : > { %v4850_v22 = vadd.f32 %v4849_v30, %v4821_v14  ;;  %v4823_v35 = vpop.f32.mrf.mxu2  ;;  %v4795_v51 = vadd.f32 %v4794_v53, %v4752_v15 }
 0x8a4   : > { %4947 = vst [vmem:[%s10218_s17 + $0x10] sm:$0xff] %v4850_v22  ;;  %4959 = vrot.lane.b32.xlu0 %v4850_v22, %s7361_s16  ;;  %v4824_v39 = vadd.f32 %v4823_v35, %v4795_v51 }
 0x8a9   : > { %v4797_v1 = vpop.f32.mrf.mxu0  ;;  %v4852_v41 = vpop.f32.mrf.mxu3 }
 0x8aa   : > { %v4853_v27 = vadd.f32 %v4852_v41, %v4824_v39  ;;  %v4826_v13 = vpop.f32.mrf.mxu2  ;;  %v4798_v4 = vadd.f32 %v4797_v1, %v4757_v42 }
 0x8ac   : > { %4949 = vst [vmem:[%s10218_s17 + $0x20] sm:$0xff] %v4853_v27  ;;  %4961 = vrot.lane.b32.xlu1 %v4853_v27, %s7361_s16  ;;  %v4827_v19 = vadd.f32 %v4826_v13, %v4798_v4 }
 0x8b1   : > { %v4855_v8 = vpop.f32.mrf.mxu3  ;;  %v4904_v45 = vpop.f32.mrf.mxu0 }
 0x8b2   : > { %v4856_v52 = vadd.f32 %v4855_v8, %v4827_v19  ;;  %v4905_v16 = vadd.f32 %v4904_v45, %v4876_v57  ;;  %v4933_v6 = vpop.f32.mrf.mxu2 }
 0x8b4   : > { %4951 = vst [vmem:[%s10218_s17 + $0x30] sm:$0xff] %v4856_v52  ;;  %v4934_v12 = vadd.f32 %v4933_v6, %v4905_v16  ;;  %4963 = vrot.lane.b32.xlu2 %v4856_v52, %s7361_s16 }
 0x8b6   : > { %4946 = vst.msk [vmem:[%s10218_s17 + $0x8] sm:$0xff] %vm4359_vm9, %v4934_v12  ;;  %5246 = vrot.lane.b32.xlu0 %v4934_v12, %s7361_s16 }
 0x8b9   : > { %v4907_v24 = vpop.f32.mrf.mxu0 }
 0x8ba   : > { %v4908_v9 = vadd.f32 %v4907_v24, %v4879_v47  ;;  %v4936_v62 = vpop.f32.mrf.mxu2 }
 0x8bc   : > { %v4937_v63 = vadd.f32 %v4936_v62, %v4908_v9 }
 0x8be   : > { %4948 = vst.msk [vmem:[%s10218_s17 + $0x18] sm:$0xff] %vm4359_vm9, %v4937_v63  ;;  %5248 = vrot.lane.b32.xlu1 %v4937_v63, %s7361_s16 }
 0x8c1   : > { %v4910_v38 = vpop.f32.mrf.mxu0 }
 0x8c2   : > { %v4911_v37 = vadd.f32 %v4910_v38, %v4882_v23  ;;  %v4939_v0 = vpop.f32.mrf.mxu2 }
 0x8c4   : > { %v4940_v46 = vadd.f32 %v4939_v0, %v4911_v37 }
 0x8c6   : > { %4950 = vst.msk [vmem:[%s10218_s17 + $0x28] sm:$0xff] %vm4359_vm9, %v4940_v46  ;;  %5250 = vrot.lane.b32.xlu0 %v4940_v46, %s7361_s16 }
 0x8c9   : > { %v4913_v21 = vpop.f32.mrf.mxu0 }
 0x8ca   : > { %v4914_v20 = vadd.f32 %v4913_v21, %v4885_v50  ;;  %v4942_v60 = vpop.f32.mrf.mxu2 }
 0x8cc   : > { %v4943_v44 = vadd.f32 %v4942_v60, %v4914_v20 }
 0x8ce   : > { %4952 = vst.msk [vmem:[%s10218_s17 + $0x38] sm:$0xff] %vm4359_vm9, %v4943_v44  ;;  %s7389_s17 = smov 122  }
 0x8f6   : > { %v4958_v29 = vpop.permute.xlu2 %4957 }
 0x8f7   : > { %v4969_v25 = vmax.f32 %v4847_v34, %v4958_v29 }
 0x8f9   : > { %4977 = vrot.lane.b32.xlu2 %v4969_v25, %s11013_s21 }
 0x901   : > { %5252 = vrot.lane.b32.xlu2 %v4943_v44, %s7361_s16 }
 0x90e   : > { %v4964_v17 = vpop.permute.xlu2 %4963 }
 0x90f   : > { %v4972_v36 = vmax.f32 %v4856_v52, %v4964_v17 }
 0x916   : > { %v4960_v28 = vpop.permute.xlu0 %4959 }
 0x917   : > { %v4970_v49 = vmax.f32 %v4850_v22, %v4960_v28 }
 0x919   : > { %4979 = vrot.lane.b32.xlu1 %v4970_v49, %s11013_s21 }
 0x91e   : > { %v4962_v55 = vpop.permute.xlu1 %4961 }
 0x91f   : > { %v4971_v31 = vmax.f32 %v4853_v27, %v4962_v55 }
 0x921   : > { %4981 = vrot.lane.b32.xlu0 %v4971_v31, %s11013_s21  ;;  %4983 = vrot.lane.b32.xlu1 %v4972_v36, %s11013_s21 }
 0x928   : > { %v5247_v59 = vpop.permute.xlu0 %5246 }
 0x929   : > { %v5258_v56 = vmax.f32 %v4934_v12, %v5247_v59 }
 0x92b   : > { %5266 = vrot.lane.b32.xlu2 %v5258_v56, %s11013_s21 }
 0x930   : > { %v5249_v11 = vpop.permute.xlu1 %5248 }
 0x931   : > { %v5259_v54 = vmax.f32 %v4937_v63, %v5249_v11 }
 0x933   : > { %5268 = vrot.lane.b32.xlu0 %v5259_v54, %s11013_s21 }
 0x938   : > { %v5251_v32 = vpop.permute.xlu0 %5250 }
 0x939   : > { %v5260_v7 = vmax.f32 %v4940_v46, %v5251_v32 }
 0x93b   : > { %5270 = vrot.lane.b32.xlu2 %v5260_v7, %s11013_s21 }
 0x953   : > { %v4978_v10 = vpop.permute.xlu2 %4977 }
 0x954   : > { %v4989_v34 = vmax.f32 %v4969_v25, %v4978_v10 }
 0x956   : > { %5044 = vrot.lane.b32.xlu1 %v4989_v34, %s7365_s22  ;;  %6836 = vmatmul.msk.f32.vlgmr.msra.gmra.mxu3 %vm4993_vm7, %v4989_v34 }
 0x95b   : > { %v5253_v5 = vpop.permute.xlu2 %5252 }
 0x95c   : > { %v5261_v43 = vmax.f32 %v4943_v44, %v5253_v5 }
 0x95e   : > { %5272 = vrot.lane.b32.xlu1 %v5261_v43, %s11013_s21  ;;  %s11017_s21 = smov 64  }
 0x966   : > { %5176 = vrot.lane.b32.xlu1 %v4989_v34, %s11016_s29 }
 0x985   : > { %v5267_v58 = vpop.permute.xlu2 %5266 }
 0x986   : > { %v5278_v61 = vmax.f32 %v5258_v56, %v5267_v58 }
 0x988   : > { %5344 = vrot.lane.b32.xlu1 %v5278_v61, %s7365_s22 }
 0x98b   : > { %v4980_v40 = vpop.permute.xlu1 %4979 }
 0x98c   : > { %v4990_v14 = vmax.f32 %v4970_v49, %v4980_v40 }
 0x98e   : > { %5046 = vrot.lane.b32.xlu0 %v4990_v14, %s7365_s22  ;;  %6837 = vmatmul.msk.f32.gmra.mxu3 %vm4993_vm7, %v4990_v14 }
 0x993   : > { %v4982_v53 = vpop.permute.xlu0 %4981  ;;  %v4984_v30 = vpop.permute.xlu1 %4983 }
 0x994   : > { %v4991_v22 = vmax.f32 %v4971_v31, %v4982_v53  ;;  %v4992_v35 = vmax.f32 %v4972_v36, %v4984_v30 }
 0x995   : > { %v5271_v3 = vpop.permute.xlu2 %5270 }
 0x996   : > { %5048 = vrot.lane.b32.xlu2 %v4991_v22, %s7365_s22  ;;  %5050 = vrot.lane.b32.xlu0 %v4992_v35, %s7365_s22  ;;  %v5280_v39 = vmax.f32 %v5260_v7, %v5271_v3 }
 0x997   : > { %6838 = vmatmul.msk.f32.gmra.mxu3 %vm4993_vm7, %v4991_v22 }
 0x99e   : > { %5178 = vrot.lane.b32.xlu0 %v4990_v14, %s11016_s29  ;;  %5110 = vrot.lane.b32.xlu2 %v4989_v34, %s11017_s21 }
 0x99f   : > { %6839 = vmatmul.msk.f32.gmra.mxu3 %vm4993_vm7, %v4992_v35 }
 0x9a5   : > { %v5269_v15 = vpop.permute.xlu0 %5268 }
 0x9a6   : > { %v5279_v51 = vmax.f32 %v5259_v54, %v5269_v15  ;;  %5180 = vrot.lane.b32.xlu0 %v4991_v22, %s11016_s29  ;;  %5112 = vrot.lane.b32.xlu2 %v4990_v14, %s11017_s21 }
 0x9a7   : > { %6860 = vmatmul.msk.f32.vlgmr.msrb.gmra.mxu3 %vm4993_vm7, %v5278_v61 }
 0x9a8   : > { %5346 = vrot.lane.b32.xlu1 %v5279_v51, %s7365_s22 }
 0x9ae   : > { %5182 = vrot.lane.b32.xlu0 %v4992_v35, %s11016_s29  ;;  %5114 = vrot.lane.b32.xlu2 %v4991_v22, %s11017_s21  ;;  %s11019_s29 = smov 120  }
 0x9af   : > { %6861 = vmatmul.msk.f32.gmra.mxu3 %vm4993_vm7, %v5279_v51 }
 0x9b0   : > { %5348 = vrot.lane.b32.xlu1 %v5280_v39, %s7365_s22 }
 0x9b6   : > { %5116 = vrot.lane.b32.xlu2 %v4992_v35, %s11017_s21  ;;  %s10975_s21 = smov 121  }
 0x9b7   : > { %6862 = vmatmul.msk.f32.gmra.mxu3 %vm4993_vm7, %v5280_v39 }
 0x9c8   : > { %v5045_v1 = vpop.permute.xlu1 %5044 }
 0x9c9   : > { %6842 = vmatmul.msk.f32.vlgmr.msrb.gmra.mxu1 %vm4993_vm7, %v5045_v1 }
 0x9d0   : > { %v5273_v41 = vpop.permute.xlu1 %5272 }
 0x9d1   : > { %v5281_v27 = vmax.f32 %v5261_v43, %v5273_v41 }
 0x9d3   : > { %5350 = vrot.lane.b32.xlu0 %v5281_v27, %s7365_s22  ;;  %6863 = vmatmul.msk.f32.gmra.mxu3 %vm4993_vm7, %v5281_v27  ;;  %s11018_s22 = smov 24  }
 0x9d8   : > { %v5177_v13 = vpop.permute.xlu1 %5176 }
 0x9d9   : > { %v5027_v42 = vpop.f32.mrf.mxu3  ;;  %6854 = vmatmul.msk.f32.vlgmr.msrb.gmra.mxu2 %vm4993_vm7, %v5177_v13  ;;  %v5681_v13 = vld [vmem:[%s10930_s10 + $0x28] sm:$0xff] }
 0x9da   : > { %5040 = vst.msk [vmem:[#allocation9] sm:$0xff] %vm5039_vm10, %v5027_v42  ;;  %v5680_v42 = vld [vmem:[%s10930_s10 + $0x20] sm:$0xff] }
 0x9f0   : > { %v5049_v4 = vpop.permute.xlu2 %5048 }
 0x9f8   : > { %v5111_v57 = vpop.permute.xlu2 %5110 }
 0x9f9   : > { %6848 = vmatmul.msk.f32.vlgmr.msrb.gmra.mxu0 %vm4993_vm7, %v5111_v57  ;;  %v5678_v57 = vld [vmem:[%s10930_s10 + $0x10] sm:$0xff] }
 0x9fa   : > { %v5345_v12 = vpop.permute.xlu1 %5344 }
 0xa00   : > { %v5047_v33 = vpop.permute.xlu0 %5046  ;;  %v5113_v19 = vpop.permute.xlu2 %5112 }
 0xa01   : > { %6843 = vmatmul.msk.f32.gmra.mxu1 %vm4993_vm7, %v5047_v33  ;;  %6849 = vmatmul.msk.f32.gmra.mxu0 %vm4993_vm7, %v5113_v19  ;;  %v5682_v33 = vld [vmem:[%s10930_s10 + $0x30] sm:$0xff]  ;;  %v5677_v19 = vld [vmem:[%s10930_s10 + $0x8] sm:$0xff] }
 0xa08   : > { %v5051_v8 = vpop.permute.xlu0 %5050  ;;  %v5115_v45 = vpop.permute.xlu2 %5114 }
 0xa09   : > { %6844 = vmatmul.msk.f32.gmra.mxu1 %vm4993_vm7, %v5049_v4  ;;  %6850 = vmatmul.msk.f32.gmra.mxu0 %vm4993_vm7, %v5115_v45  ;;  %v5679_v45 = vld [vmem:[%s10930_s10 + $0x18] sm:$0xff] }
 0xa10   : > { %v5179_v52 = vpop.permute.xlu0 %5178  ;;  %v5117_v16 = vpop.permute.xlu2 %5116 }
 0xa11   : > { %v5030_v6 = vpop.f32.mrf.mxu3  ;;  %6845 = vmatmul.msk.f32.gmra.mxu1 %vm4993_vm7, %v5051_v8  ;;  %6851 = vmatmul.msk.f32.gmra.mxu0 %vm4993_vm7, %v5117_v16 }
 0xa12   : > { %5041 = vst.msk [vmem:[#allocation9 + $0x8] sm:$0xff] %vm5039_vm10, %v5030_v6  ;;  %6855 = vmatmul.msk.f32.gmra.mxu2 %vm4993_vm7, %v5179_v52  ;;  %v5676_v6 = vld [vmem:[%s10930_s10] sm:$0xff] }
 0xa18   : > { %v5181_v47 = vpop.permute.xlu0 %5180 }
 0xa19   : > { %6866 = vmatmul.msk.f32.vlgmr.msra.gmra.mxu1 %vm4993_vm7, %v5345_v12 }
 0xa1a   : > { %v5033_v24 = vpop.f32.mrf.mxu3  ;;  %6856 = vmatmul.msk.f32.gmra.mxu2 %vm4993_vm7, %v5181_v47  ;;  %v5347_v9 = vpop.permute.xlu1 %5346 }
 0xa1b   : > { %5042 = vst.msk [vmem:[#allocation9 + $0x10] sm:$0xff] %vm5039_vm10, %v5033_v24 }
 0xa20   : > { %v5183_v62 = vpop.permute.xlu0 %5182 }
 0xa21   : > { %6867 = vmatmul.msk.f32.gmra.mxu1 %vm4993_vm7, %v5347_v9 }
 0xa22   : > { %v5036_v48 = vpop.f32.mrf.mxu3  ;;  %6857 = vmatmul.msk.f32.gmra.mxu2 %vm4993_vm7, %v5183_v62  ;;  %v5349_v63 = vpop.permute.xlu1 %5348 }
 0xa23   : > { %5043 = vst.msk [vmem:[#allocation9 + $0x18] sm:$0xff] %vm5039_vm10, %v5036_v48 }
 0xa29   : > { %6868 = vmatmul.msk.f32.gmra.mxu1 %vm4993_vm7, %v5349_v63 }
 0xa2a   : > { %v5311_v23 = vpop.f32.mrf.mxu3 }
 0xa2b   : > { %5327 = vrot.lane.b32.xlu1 %v5311_v23, %s11018_s22 }
 0xa32   : > { %v5314_v38 = vpop.f32.mrf.mxu3 }
 0xa33   : > { %5329 = vrot.lane.b32.xlu1 %v5314_v38, %s11018_s22 }
 0xa3a   : > { %v5317_v37 = vpop.f32.mrf.mxu3 }
 0xa3b   : > { %5331 = vrot.lane.b32.xlu2 %v5317_v37, %s11018_s22 }
 0xa45   : > { %v5351_v0 = vpop.permute.xlu0 %5350 }
 0xa46   : > { %6869 = vmatmul.msk.f32.gmra.mxu1 %vm4993_vm7, %v5351_v0  ;;  %v5077_v50 = vpop.f32.mrf.mxu1 }
 0xa56   : > { %v5320_v46 = vpop.f32.mrf.mxu3 }
 0xa57   : > { %5333 = vrot.lane.b32.xlu0 %v5320_v46, %s11018_s22  ;;  %s10979_s22 = smov 114  }
 0xa5c   : > { %v5209_v2 = vpop.f32.mrf.mxu2 }
 0xa5d   : > { %5225 = vrot.lane.b32.xlu2 %v5209_v2, %s7383_s23 }
 0xa5f   : > { %5093 = vrot.lane.b32.xlu0 %v5077_v50, %s7384_s25 }
 0xa76   : > { %v5143_v21 = vpop.f32.mrf.mxu0 }
 0xa77   : > { %5159 = vrot.lane.b32.xlu0 %v5143_v21, %s7385_s26 }
 0xa7e   : > { %v5080_v20 = vpop.f32.mrf.mxu1  ;;  %v5146_v60 = vpop.f32.mrf.mxu0 }
 0xa7f   : > { %5095 = vrot.lane.b32.xlu1 %v5080_v20, %s7384_s25 }
 0xa86   : > { %v5083_v44 = vpop.f32.mrf.mxu1  ;;  %v5149_v29 = vpop.f32.mrf.mxu0 }
 0xa87   : > { %5097 = vrot.lane.b32.xlu0 %v5083_v44, %s7384_s25  ;;  %5161 = vrot.lane.b32.xlu1 %v5146_v60, %s7385_s26 }
 0xa88   : > { %5163 = vrot.lane.b32.xlu2 %v5149_v29, %s7385_s26 }
 0xa8e   : > { %v5086_v25 = vpop.f32.mrf.mxu1  ;;  %v5152_v55 = vpop.f32.mrf.mxu0 }
 0xa95   : > { %v5212_v28 = vpop.f32.mrf.mxu2  ;;  %v5332_v32 = vpop.permute.xlu2 %5331 }
 0xa96   : > { %5227 = vrot.lane.b32.xlu1 %v5212_v28, %s7383_s23  ;;  %v5377_v49 = vpop.f32.mrf.mxu1 }
 0xa9d   : > { %v5215_v26 = vpop.f32.mrf.mxu2  ;;  %v5328_v54 = vpop.permute.xlu1 %5327 }
 0xa9e   : > { %5099 = vrot.lane.b32.xlu1 %v5086_v25, %s7384_s25  ;;  %5229 = vrot.lane.b32.xlu2 %v5215_v26, %s7383_s23  ;;  %v5380_v17 = vpop.f32.mrf.mxu1  ;;  %s11021_s25 = smov 126  }
 0xa9f   : > { %5395 = vrot.lane.b32.xlu0 %v5380_v17, %s7386_s27 }
 0xaa5   : > { %v5218_v36 = vpop.f32.mrf.mxu2  ;;  %v5330_v10 = vpop.permute.xlu1 %5329 }
 0xaa6   : > { %5231 = vrot.lane.b32.xlu1 %v5218_v36, %s7383_s23  ;;  %5165 = vrot.lane.b32.xlu2 %v5152_v55, %s7385_s26  ;;  %v5383_v31 = vpop.f32.mrf.mxu1  ;;  %s11020_s23 = smov 115   ;;  %s11023_s26 = smov 116  }
 0xaae   : > { %5393 = vrot.lane.b32.xlu2 %v5377_v49, %s7386_s27 }
 0xab6   : > { %5397 = vrot.lane.b32.xlu2 %v5383_v31, %s7386_s27 }
 0xab7   : > { %v5226_v7 = vpop.permute.xlu2 %5225 }
 0xac3   : > { %v5386_v59 = vpop.f32.mrf.mxu1 }
 0xac4   : > { %5399 = vrot.lane.b32.xlu0 %v5386_v59, %s7386_s27 }
 0xac9   : > { %v5334_v56 = vpop.permute.xlu0 %5333 }
 0xad1   : > { %v5094_v11 = vpop.permute.xlu0 %5093 }
 0xad2   : > { %5106 = vst.msk [vmem:[#allocation9] sm:$0xff] %vm5105_vm13, %v5094_v11 }
 0xae2   : > { %v5164_v5 = vpop.permute.xlu2 %5163 }
 0xae9   : > { %v5160_v34 = vpop.permute.xlu0 %5159 }
 0xaea   : > { %5172 = vst.msk [vmem:[#allocation9] sm:$0xff] %vm5171_vm14, %v5160_v34 }
 0xaeb   : > { %5238 = vst.msk [vmem:[#allocation9] sm:$0xff] %vm5237_vm11, %v5226_v7 }
 0xaec   : > { %5340 = vst.msk [vmem:[#allocation9] sm:$0xff] %vm5339_vm12, %v5328_v54 }
 0xaf1   : > { %v5096_v43 = vpop.permute.xlu1 %5095 }
 0xaf2   : > { %5107 = vst.msk [vmem:[#allocation9 + $0x8] sm:$0xff] %vm5105_vm13, %v5096_v43 }
 0xaf8   : > { %v5230_v58 = vpop.permute.xlu2 %5229 }
 0xaf9   : > { %v5098_v61 = vpop.permute.xlu0 %5097  ;;  %v5162_v40 = vpop.permute.xlu1 %5161 }
 0xafa   : > { %5108 = vst.msk [vmem:[#allocation9 + $0x10] sm:$0xff] %vm5105_vm13, %v5098_v61 }
 0xafb   : > { %5174 = vst.msk [vmem:[#allocation9 + $0x10] sm:$0xff] %vm5171_vm14, %v5164_v5 }
 0xafc   : > { %5240 = vst.msk [vmem:[#allocation9 + $0x10] sm:$0xff] %vm5237_vm11, %v5230_v58 }
 0xafd   : > { %5173 = vst.msk [vmem:[#allocation9 + $0x8] sm:$0xff] %vm5171_vm14, %v5162_v40 }
 0xafe   : > { %5342 = vst.msk [vmem:[#allocation9 + $0x10] sm:$0xff] %vm5339_vm12, %v5332_v32 }
 0xb00   : > { %v5166_v14 = vpop.permute.xlu2 %5165 }
 0xb08   : > { %v5228_v53 = vpop.permute.xlu1 %5227  ;;  %v5394_v30 = vpop.permute.xlu2 %5393 }
 0xb09   : > { %5239 = vst.msk [vmem:[#allocation9 + $0x8] sm:$0xff] %vm5237_vm11, %v5228_v53 }
 0xb0a   : > { %5406 = vst.msk [vmem:[#allocation9] sm:$0xff] %vm5405_vm0, %v5394_v30 }
 0xb0b   : > { %5411 = vst.msk [vmem:[#allocation9] sm:$0xff] %vm5410_vm1, %v7378_v18 }
 0xb0c   : > { %5341 = vst.msk [vmem:[#allocation9 + $0x8] sm:$0xff] %vm5339_vm12, %v5330_v10 }
 0xb10   : > { %v5100_v22 = vpop.permute.xlu1 %5099  ;;  %v5398_v35 = vpop.permute.xlu2 %5397 }
 0xb11   : > { %5109 = vst.msk [vmem:[#allocation9 + $0x18] sm:$0xff] %vm5105_vm13, %v5100_v22  ;;  %v5396_v15 = vpop.permute.xlu0 %5395 }
 0xb12   : > { %5175 = vst.msk [vmem:[#allocation9 + $0x18] sm:$0xff] %vm5171_vm14, %v5166_v14  ;;  %v5568_v51 = vld [vmem:[#allocation9] sm:$0xff] }
 0xb13   : > { %5408 = vst.msk [vmem:[#allocation9 + $0x10] sm:$0xff] %vm5405_vm0, %v5398_v35  ;;  %5576 = vrot.lane.b32.xlu1 %v5568_v51, %s10973_s24  ;;  %5600 = vrot.lane.b32.xlu2 %v5568_v51, %s10981_s20 }
 0xb14   : > { %5413 = vst.msk [vmem:[#allocation9 + $0x10] sm:$0xff] %vm5410_vm1, %v7378_v18 }
 0xb15   : > { %5407 = vst.msk [vmem:[#allocation9 + $0x8] sm:$0xff] %vm5405_vm0, %v5396_v15 }
 0xb16   : > { %5412 = vst.msk [vmem:[#allocation9 + $0x8] sm:$0xff] %vm5410_vm1, %v7378_v18 }
 0xb17   : > { %5444 = vst.msk [vmem:[#allocation6] sm:$0xff] %vm5443_vm2, %v5568_v51 }
 0xb18   : > { %v5232_v3 = vpop.permute.xlu1 %5231 }
 0xb19   : > { %5241 = vst.msk [vmem:[#allocation9 + $0x18] sm:$0xff] %vm5237_vm11, %v5232_v3 }
 0xb1a   : > { %5343 = vst.msk [vmem:[#allocation9 + $0x18] sm:$0xff] %vm5339_vm12, %v5334_v56 }
 0xb1b   : > { %5480 = vrot.lane.b32.xlu1 %v5568_v51, %s10977_s30  ;;  %5504 = vrot.lane.b32.xlu2 %v5568_v51, %s7389_s17  ;;  %v5594_v1 = vld [vmem:[#allocation9 + $0x10] sm:$0xff] }
 0xb1c   : > { %5446 = vst.msk [vmem:[#allocation6 + $0x10] sm:$0xff] %vm5443_vm2, %v5594_v1 }
 0xb1d   : > { %v5593_v39 = vld [vmem:[#allocation9 + $0x8] sm:$0xff] }
 0xb1e   : > { %5602 = vrot.lane.b32.xlu0 %v5593_v39, %s10981_s20  ;;  %5445 = vst.msk [vmem:[#allocation6 + $0x8] sm:$0xff] %vm5443_vm2, %v5593_v39 }
 0xb23   : > { %5554 = vrot.lane.b32.xlu1 %v5593_v39, %s11019_s29  ;;  %5578 = vrot.lane.b32.xlu2 %v5593_v39, %s10973_s24 }
 0xb26   : > { %5506 = vrot.lane.b32.xlu0 %v5593_v39, %s7389_s17 }
 0xb2b   : > { %5604 = vrot.lane.b32.xlu1 %v5594_v1, %s10981_s20  ;;  %5482 = vrot.lane.b32.xlu2 %v5593_v39, %s10977_s30 }
 0xb2e   : > { %5580 = vrot.lane.b32.xlu0 %v5594_v1, %s10973_s24 }
 0xb33   : > { %5508 = vrot.lane.b32.xlu1 %v5594_v1, %s7389_s17  ;;  %5556 = vrot.lane.b32.xlu2 %v5594_v1, %s11019_s29 }
 0xb36   : > { %v5400_v41 = vpop.permute.xlu0 %5399  ;;  %5484 = vrot.lane.b32.xlu0 %v5594_v1, %s10977_s30 }
 0xb37   : > { %5409 = vst.msk [vmem:[#allocation9 + $0x18] sm:$0xff] %vm5405_vm0, %v5400_v41 }
 0xb38   : > { %5414 = vst.msk [vmem:[#allocation9 + $0x18] sm:$0xff] %vm5410_vm1, %v7378_v18  ;;  %v5683_v18 = vld [vmem:[%s10930_s10 + $0x38] sm:$0xff] }
 0xb3b   : > { %5458 = vrot.lane.b32.xlu1 %v5593_v39, %s7361_s16 }
 0xb3f   : > { %v5499_v27 = vld [vmem:[#allocation9 + $0x18] sm:$0xff] }
 0xb40   : > { %5510 = vrot.lane.b32.xlu2 %v5499_v27, %s7389_s17  ;;  %5606 = vrot.lane.b32.xlu0 %v5499_v27, %s10981_s20  ;;  %5447 = vst.msk [vmem:[#allocation6 + $0x18] sm:$0xff] %vm5443_vm2, %v5499_v27 }
 0xb43   : > { %5582 = vrot.lane.b32.xlu1 %v5499_v27, %s10973_s24 }
 0xb48   : > { %5552 = vrot.lane.b32.xlu0 %v5568_v51, %s11019_s29  ;;  %5460 = vrot.lane.b32.xlu2 %v5594_v1, %s7361_s16 }
 0xb4b   : > { %5486 = vrot.lane.b32.xlu1 %v5499_v27, %s10977_s30  ;;  %s11025_s30 = sshll.u32 %s11027_s19, 6 }
 0xb50   : > { %5456 = vrot.lane.b32.xlu0 %v5568_v51, %s7361_s16  ;;  %5534 = vrot.lane.b32.xlu2 %v5499_v27, %s10975_s21 }
 0xb53   : > { %5532 = vrot.lane.b32.xlu1 %v5594_v1, %s10975_s21 }
 0xb58   : > { %5558 = vrot.lane.b32.xlu0 %v5499_v27, %s11019_s29  ;;  %5630 = vrot.lane.b32.xlu2 %v5499_v27, %s10979_s22 }
 0xb5b   : > { %5628 = vrot.lane.b32.xlu1 %v5594_v1, %s10979_s22 }
 0xb60   : > { %5462 = vrot.lane.b32.xlu0 %v5499_v27, %s7361_s16  ;;  %5528 = vrot.lane.b32.xlu2 %v5568_v51, %s10975_s21 }
 0xb63   : > { %5624 = vrot.lane.b32.xlu1 %v5568_v51, %s10979_s22 }
 0xb68   : > { %5530 = vrot.lane.b32.xlu0 %v5593_v39, %s10975_s21  ;;  %5721 = vperm.xlu2 %6940, %v5683_v18  }
 0xb6b   : > { %5711 = vperm.xlu1 %7342, %v5681_v13  }
 0xb6d   : > { %v5601_v4 = vpop.permute.xlu2 %5600 }
 0xb6e   : > { %5612 = vst.msk [vmem:[#allocation6 + $0xe0] sm:$0xff] %vm5443_vm2, %v5601_v4  ;;  %v5643_v4 = vld [vmem:[#allocation6 + $0x18] sm:$0xff] }
 0xb70   : > { %5626 = vrot.lane.b32.xlu0 %v5593_v39, %s10979_s22  ;;  %5706 = vperm.xlu2 %6940, %v5680_v42   ;;  %s11022_s22 = smov 121  }
 0xb73   : > { %5696 = vperm.xlu1 %7342, %v5678_v57  }
 0xb75   : > { %v5505_v8 = vpop.permute.xlu2 %5504  ;;  %v5668_v59 = vld [vmem:[#allocation6 + $0xe0] sm:$0xff] }
 0xb76   : > { %5516 = vst.msk [vmem:[#allocation6 + $0x60] sm:$0xff] %vm5443_vm2, %v5505_v8 }
 0xb78   : > { %5716 = vperm.xlu0 %6941, %v5682_v33   ;;  %5691 = vperm.xlu2 %6940, %v5677_v19   ;;  %v5642_v19 = vld [vmem:[#allocation6 + $0x10] sm:$0xff] }
 0xb7d   : > { %v5579_v52 = vpop.permute.xlu2 %5578  ;;  %v5652_v44 = vld [vmem:[#allocation6 + $0x60] sm:$0xff] }
 0xb7e   : > { %5589 = vst.msk [vmem:[#allocation6 + $0xc8] sm:$0xff] %vm5443_vm2, %v5579_v52  ;;  %v5641_v52 = vld [vmem:[#allocation6 + $0x8] sm:$0xff] }
 0xb80   : > { %5701 = vperm.xlu0 %6941, %v5679_v45   ;;  %v5416_v45 = vld [vmem:[%s10929_s9 + $0x8] sm:$0xff] }
 0xb85   : > { %v5577_v16 = vpop.permute.xlu1 %5576  ;;  %v5483_v12 = vpop.permute.xlu2 %5482  ;;  %v5665_v34 = vld [vmem:[#allocation6 + $0xc8] sm:$0xff] }
 0xb86   : > { %5588 = vst.msk [vmem:[#allocation6 + $0xc0] sm:$0xff] %vm5443_vm2, %v5577_v16  ;;  %v5640_v16 = vld [vmem:[#allocation6] sm:$0xff] }
 0xb87   : > { %5493 = vst.msk [vmem:[#allocation6 + $0x48] sm:$0xff] %vm5443_vm2, %v5483_v12 }
 0xb88   : > { %5686 = vperm.xlu0 %6941, %v5676_v6   ;;  %v5415_v6 = vld [vmem:[%s10929_s9] sm:$0xff] }
 0xb8d   : > { %v5481_v47 = vpop.permute.xlu1 %5480  ;;  %v5557_v24 = vpop.permute.xlu2 %5556  ;;  %v5664_v43 = vld [vmem:[#allocation6 + $0xc0] sm:$0xff] }
 0xb8e   : > { %5492 = vst.msk [vmem:[#allocation6 + $0x40] sm:$0xff] %vm5443_vm2, %v5481_v47  ;;  %v5649_v58 = vld [vmem:[#allocation6 + $0x48] sm:$0xff] }
 0xb8f   : > { %5566 = vst.msk [vmem:[#allocation6 + $0xb0] sm:$0xff] %vm5443_vm2, %v5557_v24  ;;  %v5419_v24 = vld [vmem:[%s10929_s9 + $0x20] sm:$0xff] }
 0xb90   : > { %v5603_v9 = vpop.permute.xlu0 %5602 }
 0xb91   : > { %5613 = vst.msk [vmem:[#allocation6 + $0xe8] sm:$0xff] %vm5443_vm2, %v5603_v9  ;;  %v5417_v9 = vld [vmem:[%s10929_s9 + $0x10] sm:$0xff] }
 0xb95   : > { %v5555_v62 = vpop.permute.xlu1 %5554  ;;  %v5648_v40 = vld [vmem:[#allocation6 + $0x40] sm:$0xff] }
 0xb96   : > { %5565 = vst.msk [vmem:[#allocation6 + $0xa8] sm:$0xff] %vm5443_vm2, %v5555_v62  ;;  %v5662_v22 = vld [vmem:[#allocation6 + $0xb0] sm:$0xff]  ;;  %v5418_v62 = vld [vmem:[%s10929_s9 + $0x18] sm:$0xff] }
 0xb98   : > { %v5507_v48 = vpop.permute.xlu0 %5506  ;;  %v5669_v31 = vld [vmem:[#allocation6 + $0xe8] sm:$0xff] }
 0xb99   : > { %5517 = vst.msk [vmem:[#allocation6 + $0x68] sm:$0xff] %vm5443_vm2, %v5507_v48  ;;  %v5422_v48 = vld [vmem:[%s10929_s9 + $0x38] sm:$0xff] }
 0xb9a   : > { %v5511_v63 = vpop.permute.xlu2 %5510 }
 0xb9b   : > { %5519 = vst.msk [vmem:[#allocation6 + $0x78] sm:$0xff] %vm5443_vm2, %v5511_v63  ;;  %v5420_v63 = vld [vmem:[%s10929_s9 + $0x28] sm:$0xff] }
 0xb9d   : > { %v5605_v23 = vpop.permute.xlu1 %5604  ;;  %v5661_v51 = vld [vmem:[#allocation6 + $0xa8] sm:$0xff] }
 0xb9e   : > { %5614 = vst.msk [vmem:[#allocation6 + $0xf0] sm:$0xff] %vm5443_vm2, %v5605_v23  ;;  %v5421_v23 = vld [vmem:[%s10929_s9 + $0x30] sm:$0xff] }
 0xba0   : > { %v5581_v38 = vpop.permute.xlu0 %5580  ;;  %v5653_v60 = vld [vmem:[#allocation6 + $0x68] sm:$0xff] }
 0xba1   : > { %5590 = vst.msk [vmem:[#allocation6 + $0xd0] sm:$0xff] %vm5443_vm2, %v5581_v38  ;;  %v5425_v38 = vld [vmem:[%s10929_s9 + $0x50] sm:$0xff] }
 0xba2   : > { %v5461_v37 = vpop.permute.xlu2 %5460  ;;  %v5655_v0 = vld [vmem:[#allocation6 + $0x78] sm:$0xff] }
 0xba3   : > { %5470 = vst.msk [vmem:[#allocation6 + $0x30] sm:$0xff] %vm5443_vm2, %v5461_v37  ;;  %5748 = vmatpush.msra.mxu0 %v5655_v0  ;;  %v5423_v37 = vld [vmem:[%s10929_s9 + $0x40] sm:$0xff]  ;;  %v5424_v0 = vld [vmem:[%s10929_s9 + $0x48] sm:$0xff] }
 0xba5   : > { %v5509_v46 = vpop.permute.xlu1 %5508  ;;  %v5670_v55 = vld [vmem:[#allocation6 + $0xf0] sm:$0xff] }
 0xba6   : > { %5518 = vst.msk [vmem:[#allocation6 + $0x70] sm:$0xff] %vm5443_vm2, %v5509_v46  ;;  %v5428_v46 = vld [vmem:[%s10929_s9 + $0x68] sm:$0xff] }
 0xba8   : > { %v5485_v2 = vpop.permute.xlu0 %5484  ;;  %v5666_v54 = vld [vmem:[#allocation6 + $0xd0] sm:$0xff] }
 0xba9   : > { %5494 = vst.msk [vmem:[#allocation6 + $0x50] sm:$0xff] %vm5443_vm2, %v5485_v2  ;;  %v5426_v2 = vld [vmem:[%s10929_s9 + $0x58] sm:$0xff] }
 0xbaa   : > { %v5535_v50 = vpop.permute.xlu2 %5534  ;;  %v5646_v18 = vld [vmem:[#allocation6 + $0x30] sm:$0xff] }
 0xbab   : > { %5543 = vst.msk [vmem:[#allocation6 + $0x98] sm:$0xff] %vm5443_vm2, %v5535_v50  ;;  %v5427_v50 = vld [vmem:[%s10929_s9 + $0x60] sm:$0xff] }
 0xbad   : > { %v5459_v21 = vpop.permute.xlu1 %5458  ;;  %v5654_v20 = vld [vmem:[#allocation6 + $0x70] sm:$0xff] }
 0xbae   : > { %5469 = vst.msk [vmem:[#allocation6 + $0x28] sm:$0xff] %vm5443_vm2, %v5459_v21  ;;  %5749 = vmatpush.msra.mxu0 %v5654_v20  ;;  %v5431_v21 = vld [vmem:[%s10929_s9 + $0x80] sm:$0xff]  ;;  %v5429_v20 = vld [vmem:[%s10929_s9 + $0x70] sm:$0xff] }
 0xbb0   : > { %5750 = vmatpush.msra.mxu0 %v5653_v60  ;;  %v5650_v5 = vld [vmem:[#allocation6 + $0x50] sm:$0xff]  ;;  %v5430_v60 = vld [vmem:[%s10929_s9 + $0x78] sm:$0xff] }
 0xbb2   : > { %5751 = vmatpush.msra.mxu0 %v5652_v44  ;;  %v5607_v29 = vpop.permute.xlu0 %5606  ;;  %v5631_v25 = vpop.permute.xlu2 %5630  ;;  %v5659_v39 = vld [vmem:[#allocation6 + $0x98] sm:$0xff]  ;;  %v5434_v44 = vld [vmem:[%s10929_s9 + $0x98] sm:$0xff] }
 0xbb3   : > { %5615 = vst.msk [vmem:[#allocation6 + $0xf8] sm:$0xff] %vm5443_vm2, %v5607_v29  ;;  %v5432_v29 = vld [vmem:[%s10929_s9 + $0x88] sm:$0xff] }
 0xbb4   : > { %5639 = vst.msk [vmem:[#allocation6 + $0x118] sm:$0xff] %vm5443_vm2, %v5631_v25  ;;  %v5433_v25 = vld [vmem:[%s10929_s9 + $0x90] sm:$0xff] }
 0xbb5   : > { %v5583_v28 = vpop.permute.xlu1 %5582  ;;  %v5645_v13 = vld [vmem:[#allocation6 + $0x28] sm:$0xff] }
 0xbb6   : > { %5591 = vst.msk [vmem:[#allocation6 + $0xd8] sm:$0xff] %vm5443_vm2, %v5583_v28  ;;  %v5437_v28 = vld [vmem:[%s10929_s9 + $0xb0] sm:$0xff] }
 0xbba   : > { %v5553_v49 = vpop.permute.xlu0 %5552  ;;  %v5671_v26 = vld [vmem:[#allocation6 + $0xf8] sm:$0xff]  ;;  %v5529_v17 = vpop.permute.xlu2 %5528 }
 0xbbb   : > { %5564 = vst.msk [vmem:[#allocation6 + $0xa0] sm:$0xff] %vm5443_vm2, %v5553_v49  ;;  %5789 = vmatpush.msra.mxu2 %v5671_v26  ;;  %v5675_v10 = vld [vmem:[#allocation6 + $0x118] sm:$0xff]  ;;  %v5435_v49 = vld [vmem:[%s10929_s9 + $0xa0] sm:$0xff] }
 0xbbc   : > { %5540 = vst.msk [vmem:[#allocation6 + $0x80] sm:$0xff] %vm5443_vm2, %v5529_v17  ;;  %5842 = vmatpush.msra.mxu3 %v5675_v10  ;;  %v5436_v26 = vld [vmem:[%s10929_s9 + $0xa8] sm:$0xff]  ;;  %v5438_v17 = vld [vmem:[%s10929_s9 + $0xb8] sm:$0xff] }
 0xbbd   : > { %v5487_v36 = vpop.permute.xlu1 %5486  ;;  %5790 = vmatpush.msra.mxu2 %v5670_v55  ;;  %v5667_v56 = vld [vmem:[#allocation6 + $0xd8] sm:$0xff] }
 0xbbe   : > { %5495 = vst.msk [vmem:[#allocation6 + $0x58] sm:$0xff] %vm5443_vm2, %v5487_v36 }
 0xbbf   : > { %5791 = vmatpush.msra.mxu2 %v5669_v31 }
 0xbc1   : > { %5792 = vmatpush.msra.mxu2 %v5668_v59 }
 0xbc2   : > { %v5457_v11 = vpop.permute.xlu0 %5456  ;;  %v5660_v3 = vld [vmem:[#allocation6 + $0xa0] sm:$0xff]  ;;  %v10519_v36 = vpop.permute.xlu2 %5721 }
 0xbc3   : > { %5468 = vst.msk [vmem:[#allocation6 + $0x20] sm:$0xff] %vm5443_vm2, %v5457_v11  ;;  %5793 = vmatpush.msra.mxu2 %v5667_v56  ;;  %v5656_v8 = vld [vmem:[#allocation6 + $0x80] sm:$0xff] }
 0xbc5   : > { %v5533_v32 = vpop.permute.xlu1 %5532  ;;  %v5651_v7 = vld [vmem:[#allocation6 + $0x58] sm:$0xff]  ;;  %5794 = vmatpush.msra.mxu2 %v5666_v54 }
 0xbc6   : > { %5542 = vst.msk [vmem:[#allocation6 + $0x90] sm:$0xff] %vm5443_vm2, %v5533_v32  ;;  %5752 = vmatpush.msra.mxu0 %v5651_v7 }
 0xbc7   : > { %5795 = vmatpush.msra.mxu2 %v5665_v34 }
 0xbc8   : > { %5753 = vmatpush.msra.mxu0 %v5650_v5 }
 0xbc9   : > { %5796 = vmatpush.msra.mxu2 %v5664_v43 }
 0xbca   : > { %5754 = vmatpush.msra.mxu0 %v5649_v58  ;;  %v5559_v61 = vpop.permute.xlu0 %5558  ;;  %v5644_v42 = vld [vmem:[#allocation6 + $0x20] sm:$0xff]  ;;  %v5707_v56 = vpop.permute.xlu2 %5706 }
 0xbcb   : > { %5567 = vst.msk [vmem:[#allocation6 + $0xb8] sm:$0xff] %vm5443_vm2, %v5559_v61 }
 0xbcc   : > { %5755 = vmatpush.msra.mxu0 %v5648_v40 }
 0xbcd   : > { %v5629_v14 = vpop.permute.xlu1 %5628  ;;  %v5658_v27 = vld [vmem:[#allocation6 + $0x90] sm:$0xff] }
 0xbce   : > { %5638 = vst.msk [vmem:[#allocation6 + $0x110] sm:$0xff] %vm5443_vm2, %v5629_v14 }
 0xbd2   : > { %v5463_v53 = vpop.permute.xlu0 %5462  ;;  %v5663_v30 = vld [vmem:[#allocation6 + $0xb8] sm:$0xff]  ;;  %v5692_v61 = vpop.permute.xlu2 %5691 }
 0xbd3   : > { %5471 = vst.msk [vmem:[#allocation6 + $0x38] sm:$0xff] %vm5443_vm2, %v5463_v53  ;;  %5797 = vmatpush.msra.mxu2 %v5663_v30 }
 0xbd5   : > { %v5625_v35 = vpop.permute.xlu1 %5624  ;;  %5798 = vmatpush.msra.mxu2 %v5662_v22  ;;  %v5674_v15 = vld [vmem:[#allocation6 + $0x110] sm:$0xff] }
 0xbd6   : > { %5636 = vst.msk [vmem:[#allocation6 + $0x100] sm:$0xff] %vm5443_vm2, %v5625_v35  ;;  %5843 = vmatpush.msra.mxu3 %v5674_v15 }
 0xbd7   : > { %5799 = vmatpush.msra.mxu2 %v5661_v51 }
 0xbd9   : > { %5800 = vmatpush.msra.mxu2 %v5660_v3 }
 0xbda   : > { %v5531_v1 = vpop.permute.xlu0 %5530  ;;  %v5647_v41 = vld [vmem:[#allocation6 + $0x38] sm:$0xff] }
 0xbdb   : > { %5541 = vst.msk [vmem:[#allocation6 + $0x88] sm:$0xff] %vm5443_vm2, %v5531_v1  ;;  %5756 = vmatpush.msra.mxu0 %v5647_v41  ;;  %5801 = vmatpush.msra.mxu2 %v5659_v39 }
 0xbdd   : > { %5757 = vmatpush.msra.mxu0 %v5646_v18  ;;  %5802 = vmatpush.msra.mxu2 %v5658_v27  ;;  %v5672_v47 = vld [vmem:[#allocation6 + $0x100] sm:$0xff]  ;;  %v5712_v10 = vpop.permute.xlu1 %5711 }
 0xbdf   : > { %5758 = vmatpush.msra.mxu0 %v5645_v13 }
 0xbe1   : > { %5759 = vmatpush.msra.mxu0 %v5644_v42 }
 0xbe2   : > { %v5627_v57 = vpop.permute.xlu0 %5626  ;;  %v5657_v33 = vld [vmem:[#allocation6 + $0x88] sm:$0xff] }
 0xbe3   : > { %5637 = vst.msk [vmem:[#allocation6 + $0x108] sm:$0xff] %vm5443_vm2, %v5627_v57  ;;  %5760 = vmatpush.msra.mxu0 %v5643_v4  ;;  %5803 = vmatpush.msra.mxu2 %v5657_v33 }
 0xbe5   : > { %5761 = vmatpush.msra.mxu0 %v5642_v19  ;;  %5804 = vmatpush.msra.mxu2 %v5656_v8  ;;  %v5697_v51 = vpop.permute.xlu1 %5696 }
 0xbe6   : > { %5805 = vmatmul.f32.vlgmr.msra.gmra.mxu2 %v5416_v45 }
 0xbe7   : > { %5762 = vmatpush.msra.mxu0 %v5641_v52 }
 0xbe9   : > { %5763 = vmatpush.msra.mxu0 %v5640_v16 }
 0xbea   : > { %5764 = vmatmul.f32.vlgmr.msra.gmra.mxu0 %v5415_v6  ;;  %v5673_v12 = vld [vmem:[#allocation6 + $0x108] sm:$0xff]  ;;  %v10517_v55 = vpop.permute.xlu0 %5716 }
 0xbeb   : > { %5844 = vmatpush.msra.mxu3 %v5673_v12 }
 0xbed   : > { %5845 = vmatpush.msra.mxu3 %v5672_v47 }
 0xbee   : > { %5808 = vmatmul.f32.gmra.mxu2 %v5419_v24  ;;  %6870 = vmatmul.msk.f32.vlgmr.msra.gmra.mxu3 %vm2924_vm15, %v5417_v9 }
 0xbf2   : > { %5767 = vmatmul.f32.gmra.mxu0 %v5418_v62  ;;  %v5702_v31 = vpop.permute.xlu0 %5701 }
 0xbf6   : > { %5811 = vmatmul.f32.gmra.mxu2 %v5422_v48  ;;  %6871 = vmatmul.msk.f32.gmra.mxu3 %vm2924_vm15, %v5420_v63 }
 0xbfa   : > { %5770 = vmatmul.f32.gmra.mxu0 %v5421_v23  ;;  %v5687_v54 = vpop.permute.xlu0 %5686 }
 0xbfe   : > { %5814 = vmatmul.f32.gmra.mxu2 %v5425_v38  ;;  %6872 = vmatmul.msk.f32.gmra.mxu3 %vm2924_vm15, %v5423_v37 }
 0xc02   : > { %5773 = vmatmul.f32.gmra.mxu0 %v5424_v0 }
 0xc06   : > { %5817 = vmatmul.f32.gmra.mxu2 %v5428_v46  ;;  %6873 = vmatmul.msk.f32.gmra.mxu3 %vm2924_vm15, %v5426_v2 }
 0xc0a   : > { %5776 = vmatmul.f32.gmra.mxu0 %v5427_v50 }
 0xc0e   : > { %5820 = vmatmul.f32.gmra.mxu2 %v5431_v21  ;;  %6874 = vmatmul.msk.f32.gmra.mxu3 %vm2924_vm15, %v5429_v20 }
 0xc12   : > { %5779 = vmatmul.f32.gmra.mxu0 %v5430_v60 }
 0xc16   : > { %5823 = vmatmul.f32.gmra.mxu2 %v5434_v44  ;;  %6875 = vmatmul.msk.f32.gmra.mxu3 %vm2924_vm15, %v5432_v29 }
 0xc1a   : > { %5782 = vmatmul.f32.gmra.mxu0 %v5433_v25 }
 0xc1e   : > { %5826 = vmatmul.f32.gmra.mxu2 %v5437_v28  ;;  %6876 = vmatmul.msk.f32.gmra.mxu3 %vm2924_vm15, %v5435_v49 }
 0xc22   : > { %5785 = vmatmul.f32.gmra.mxu0 %v5436_v26 }
 0xc26   : > { %6877 = vmatmul.msk.f32.gmra.mxu3 %vm2924_vm15, %v5438_v17 }
 0xc67   : > { %v5765_v59 = vpop.f32.mrf.mxu0 }
 0xc68   : > { %v5766_v32 = vadd.f32 %v5765_v59, %v5687_v54 }
 0xc69   : > { %v5806_v11 = vpop.f32.mrf.mxu2 }
 0xc6a   : > { %v5807_v34 = vadd.f32 %v5806_v11, %v5766_v32 }
 0xc6f   : > { %v5768_v7 = vpop.f32.mrf.mxu0 }
 0xc70   : > { %v5769_v40 = vadd.f32 %v5768_v7, %v5692_v61 }
 0xc71   : > { %v5809_v5 = vpop.f32.mrf.mxu2  ;;  %v5847_v43 = vpop.f32.mrf.mxu3 }
 0xc72   : > { %v5848_v58 = vadd.f32 %v5847_v43, %v5807_v34  ;;  %v5810_v30 = vadd.f32 %v5809_v5, %v5769_v40 }
 0xc74   : > { %v10521_v14 = vmax.f32 %v5848_v58, 0.0 }
 0xc76   : > { %5919 = vst.msk [vmem:[#allocation7] sm:$0xff] %vm4993_vm7, %v10521_v14  ;;  %5999 = vrot.lane.b32.xlu0 %v10521_v14, %s7389_s17  ;;  %6063 = vrot.lane.b32.xlu1 %v10521_v14, %s11019_s29 }
 0xc77   : > { %5935 = vrot.lane.b32.xlu2 %v10521_v14, %s7361_s16  ;;  %v5771_v53 = vpop.f32.mrf.mxu0 }
 0xc78   : > { %v5772_v3 = vadd.f32 %v5771_v53, %v5697_v51 }
 0xc79   : > { %v5812_v22 = vpop.f32.mrf.mxu2  ;;  %v5850_v35 = vpop.f32.mrf.mxu3 }
 0xc7a   : > { %v5851_v15 = vadd.f32 %v5850_v35, %v5810_v30  ;;  %v5813_v41 = vadd.f32 %v5812_v22, %v5772_v3 }
 0xc7c   : > { %v10531_v39 = vmax.f32 %v5851_v15, 0.0 }
 0xc7e   : > { %5920 = vst.msk [vmem:[#allocation7 + $0x8] sm:$0xff] %vm4993_vm7, %v10531_v39  ;;  %6001 = vrot.lane.b32.xlu0 %v10531_v39, %s7389_s17  ;;  %5937 = vrot.lane.b32.xlu1 %v10531_v39, %s7361_s16 }
 0xc7f   : > { %6127 = vrot.lane.b32.xlu2 %v10521_v14, %s11020_s23  ;;  %v5774_v1 = vpop.f32.mrf.mxu0 }
 0xc80   : > { %v5775_v42 = vadd.f32 %v5774_v1, %v5702_v31 }
 0xc81   : > { %v5815_v27 = vpop.f32.mrf.mxu2  ;;  %v5853_v18 = vpop.f32.mrf.mxu3 }
 0xc82   : > { %v5854_v13 = vadd.f32 %v5853_v18, %v5813_v41  ;;  %v5816_v33 = vadd.f32 %v5815_v27, %v5775_v42  ;;  %v6264_v41 = vld [vmem:[%s10932_s12 + $0x8] sm:$0xff]  ;;  %v6267_v42 = vld [vmem:[%s10932_s12 + $0x20] sm:$0xff] }
 0xc84   : > { %v10541_v4 = vmax.f32 %v5854_v13, 0.0 }
 0xc86   : > { %5921 = vst.msk [vmem:[#allocation7 + $0x10] sm:$0xff] %vm4993_vm7, %v10541_v4  ;;  %5939 = vrot.lane.b32.xlu0 %v10541_v4, %s7361_s16  ;;  %6065 = vrot.lane.b32.xlu1 %v10531_v39, %s11019_s29 }
 0xc87   : > { %6129 = vrot.lane.b32.xlu2 %v10531_v39, %s11020_s23  ;;  %v5777_v57 = vpop.f32.mrf.mxu0 }
 0xc88   : > { %v5778_v52 = vadd.f32 %v5777_v57, %v5707_v56 }
 0xc89   : > { %v5818_v19 = vpop.f32.mrf.mxu2  ;;  %v5856_v8 = vpop.f32.mrf.mxu3 }
 0xc8a   : > { %v5857_v45 = vadd.f32 %v5856_v8, %v5816_v33  ;;  %v5819_v12 = vadd.f32 %v5818_v19, %v5778_v52  ;;  %v6270_v8 = vld [vmem:[%s10932_s12 + $0x38] sm:$0xff]  ;;  %v6269_v52 = vld [vmem:[%s10932_s12 + $0x30] sm:$0xff] }
 0xc8c   : > { %v10551_v16 = vmax.f32 %v5857_v45, 0.0  ;;  %v6268_v45 = vld [vmem:[%s10932_s12 + $0x28] sm:$0xff] }
 0xc8e   : > { %5922 = vst.msk [vmem:[#allocation7 + $0x18] sm:$0xff] %vm4993_vm7, %v10551_v16  ;;  %6003 = vrot.lane.b32.xlu0 %v10541_v4, %s7389_s17  ;;  %6067 = vrot.lane.b32.xlu1 %v10541_v4, %s11019_s29 }
 0xc8f   : > { %6131 = vrot.lane.b32.xlu2 %v10541_v4, %s11020_s23  ;;  %v5780_v6 = vpop.f32.mrf.mxu0 }
 0xc90   : > { %v5781_v62 = vadd.f32 %v5780_v6, %v5712_v10 }
 0xc91   : > { %v5821_v47 = vpop.f32.mrf.mxu2  ;;  %v5859_v24 = vpop.f32.mrf.mxu3 }
 0xc92   : > { %v5860_v9 = vadd.f32 %v5859_v24, %v5819_v12  ;;  %v5822_v23 = vadd.f32 %v5821_v47, %v5781_v62 }
 0xc94   : > { %v10561_v48 = vmax.f32 %v5860_v9, 0.0 }
 0xc96   : > { %5923 = vst.msk [vmem:[#allocation7 + $0x20] sm:$0xff] %vm4993_vm7, %v10561_v48  ;;  %6005 = vrot.lane.b32.xlu0 %v10551_v16, %s7389_s17  ;;  %6069 = vrot.lane.b32.xlu1 %v10551_v16, %s11019_s29 }
 0xc97   : > { %5941 = vrot.lane.b32.xlu2 %v10551_v16, %s7361_s16  ;;  %v5783_v63 = vpop.f32.mrf.mxu0 }
 0xc98   : > { %v5784_v46 = vadd.f32 %v5783_v63, %v10517_v55 }
 0xc99   : > { %v5862_v38 = vpop.f32.mrf.mxu3  ;;  %v5824_v0 = vpop.f32.mrf.mxu2 }
 0xc9a   : > { %v5863_v37 = vadd.f32 %v5862_v38, %v5822_v23  ;;  %v5825_v50 = vadd.f32 %v5824_v0, %v5784_v46 }
 0xc9c   : > { %v10572_v2 = vmax.f32 %v5863_v37, 0.0 }
 0xc9e   : > { %5924 = vst.msk [vmem:[#allocation7 + $0x28] sm:$0xff] %vm4993_vm7, %v10572_v2  ;;  %6007 = vrot.lane.b32.xlu0 %v10561_v48, %s7389_s17  ;;  %5943 = vrot.lane.b32.xlu1 %v10561_v48, %s7361_s16 }
 0xc9f   : > { %6133 = vrot.lane.b32.xlu2 %v10551_v16, %s11020_s23  ;;  %v5786_v21 = vpop.f32.mrf.mxu0 }
 0xca0   : > { %v5787_v44 = vadd.f32 %v5786_v21, %v10519_v36 }
 0xca1   : > { %v5865_v20 = vpop.f32.mrf.mxu3  ;;  %v5827_v25 = vpop.f32.mrf.mxu2 }
 0xca2   : > { %v5866_v60 = vadd.f32 %v5865_v20, %v5825_v50  ;;  %v5828_v28 = vadd.f32 %v5827_v25, %v5787_v44 }
 0xca4   : > { %v5877_v29 = vmax.f32 %v5866_v60, 0.0 }
 0xca6   : > { %5925 = vst.msk [vmem:[#allocation7 + $0x30] sm:$0xff] %vm4993_vm7, %v5877_v29  ;;  %5945 = vrot.lane.b32.xlu0 %v10572_v2, %s7361_s16  ;;  %6071 = vrot.lane.b32.xlu1 %v10561_v48, %s11019_s29 }
 0xca7   : > { %6135 = vrot.lane.b32.xlu2 %v10561_v48, %s11020_s23 }
 0xca9   : > { %v5868_v49 = vpop.f32.mrf.mxu3 }
 0xcaa   : > { %v5869_v26 = vadd.f32 %v5868_v49, %v5828_v28  ;;  %v6196_v28 = vld [vmem:[#allocation7 + $0x28] sm:$0xff]  ;;  %v6195_v49 = vld [vmem:[#allocation7 + $0x20] sm:$0xff] }
 0xcac   : > { %v10590_v17 = vmax.f32 %v5869_v26, 0.0 }
 0xcad   : > { %v6197_v25 = vld [vmem:[#allocation7 + $0x30] sm:$0xff] }
 0xcae   : > { %5926 = vst.msk [vmem:[#allocation7 + $0x38] sm:$0xff] %vm4993_vm7, %v10590_v17  ;;  %6009 = vrot.lane.b32.xlu0 %v10572_v2, %s7389_s17  ;;  %6073 = vrot.lane.b32.xlu1 %v10572_v2, %s11019_s29 }
 0xcaf   : > { %6137 = vrot.lane.b32.xlu2 %v10572_v2, %s11020_s23 }
 0xcb6   : > { %6011 = vrot.lane.b32.xlu0 %v5877_v29, %s7389_s17  ;;  %6075 = vrot.lane.b32.xlu1 %v5877_v29, %s11019_s29 }
 0xcb7   : > { %5947 = vrot.lane.b32.xlu2 %v5877_v29, %s7361_s16 }
 0xcbe   : > { %5979 = vrot.lane.b32.xlu0 %v5877_v29, %s11021_s25  ;;  %5949 = vrot.lane.b32.xlu1 %v10590_v17, %s7361_s16  ;;  %s11024_s16 = smov 114  }
 0xcbf   : > { %6139 = vrot.lane.b32.xlu2 %v5877_v29, %s11020_s23 }
 0xcc6   : > { %5977 = vrot.lane.b32.xlu0 %v10572_v2, %s11021_s25  ;;  %6043 = vrot.lane.b32.xlu1 %v5877_v29, %s11022_s22 }
 0xcc7   : > { %6107 = vrot.lane.b32.xlu2 %v5877_v29, %s11023_s26 }
 0xcce   : > { %5975 = vrot.lane.b32.xlu0 %v10561_v48, %s11021_s25  ;;  %6041 = vrot.lane.b32.xlu1 %v10572_v2, %s11022_s22 }
 0xccf   : > { %6105 = vrot.lane.b32.xlu2 %v10572_v2, %s11023_s26 }
 0xcd1   : > { %v5936_v55 = vpop.permute.xlu2 %5935 }
 0xcd2   : > { %5959 = vst.msk [vmem:[#allocation7 + $0x40] sm:$0xff] %vm4993_vm7, %v5936_v55 }
 0xcd6   : > { %6099 = vrot.lane.b32.xlu0 %v10541_v4, %s11023_s26  ;;  %6039 = vrot.lane.b32.xlu1 %v10561_v48, %s11022_s22 }
 0xcd7   : > { %6103 = vrot.lane.b32.xlu2 %v10561_v48, %s11023_s26 }
 0xcd9   : > { %v6128_v36 = vpop.permute.xlu2 %6127  ;;  %v6199_v21 = vld [vmem:[#allocation7 + $0x40] sm:$0xff] }
 0xcda   : > { %6151 = vst.msk [vmem:[#allocation7 + $0x1c0] sm:$0xff] %vm4993_vm7, %v6128_v36  ;;  %v6194_v36 = vld [vmem:[#allocation7 + $0x18] sm:$0xff] }
 0xcde   : > { %6077 = vrot.lane.b32.xlu0 %v10590_v17, %s11019_s29  ;;  %6037 = vrot.lane.b32.xlu1 %v10551_v16, %s11022_s22 }
 0xcdf   : > { %6101 = vrot.lane.b32.xlu2 %v10551_v16, %s11023_s26 }
 0xce1   : > { %v6130_v31 = vpop.permute.xlu2 %6129 }
 0xce2   : > { %6152 = vst.msk [vmem:[#allocation7 + $0x1c8] sm:$0xff] %vm4993_vm7, %v6130_v31 }
 0xce6   : > { %6031 = vrot.lane.b32.xlu0 %v10521_v14, %s11022_s22  ;;  %6035 = vrot.lane.b32.xlu1 %v10541_v4, %s11022_s22 }
 0xce7   : > { %6033 = vrot.lane.b32.xlu2 %v10531_v39, %s11022_s22 }
 0xce8   : > { %v6000_v59 = vpop.permute.xlu0 %5999  ;;  %v6064_v56 = vpop.permute.xlu1 %6063 }
 0xce9   : > { %6023 = vst.msk [vmem:[#allocation7 + $0xc0] sm:$0xff] %vm4993_vm7, %v6000_v59  ;;  %v6132_v11 = vpop.permute.xlu2 %6131  ;;  %v6193_v59 = vld [vmem:[#allocation7 + $0x10] sm:$0xff] }
 0xcea   : > { %6087 = vst.msk [vmem:[#allocation7 + $0x140] sm:$0xff] %vm4993_vm7, %v6064_v56 }
 0xceb   : > { %6153 = vst.msk [vmem:[#allocation7 + $0x1d0] sm:$0xff] %vm4993_vm7, %v6132_v11  ;;  %v6192_v11 = vld [vmem:[#allocation7 + $0x8] sm:$0xff] }
 0xcee   : > { %6013 = vrot.lane.b32.xlu0 %v10590_v17, %s7389_s17  ;;  %5973 = vrot.lane.b32.xlu1 %v10551_v16, %s11021_s25 }
 0xcef   : > { %6141 = vrot.lane.b32.xlu2 %v10590_v17, %s11020_s23  ;;  %s10897_s23 = scalar_lea.vmem %s10935_s15, %s11025_s30 }
 0xcf0   : > { %v6002_v54 = vpop.permute.xlu0 %6001  ;;  %v5938_v32 = vpop.permute.xlu1 %5937 }
 0xcf1   : > { %6024 = vst.msk [vmem:[#allocation7 + $0xc8] sm:$0xff] %vm4993_vm7, %v6002_v54  ;;  %v5942_v7 = vpop.permute.xlu2 %5941 }
 0xcf2   : > { %5960 = vst.msk [vmem:[#allocation7 + $0x48] sm:$0xff] %vm4993_vm7, %v5938_v32  ;;  %v5879_v32 = vld [vmem:[%s10931_s11] sm:$0xff] }
 0xcf3   : > { %5962 = vst.msk [vmem:[#allocation7 + $0x58] sm:$0xff] %vm4993_vm7, %v5942_v7  ;;  %v6191_v7 = vld [vmem:[#allocation7] sm:$0xff] }
 0xcf6   : > { %5969 = vrot.lane.b32.xlu0 %v10531_v39, %s11021_s25  ;;  %6171 = vrot.lane.b32.xlu1 %v5877_v29, %s11024_s16  ;;  %v6198_v29 = vld [vmem:[#allocation7 + $0x38] sm:$0xff] }
 0xcf7   : > { %5971 = vrot.lane.b32.xlu2 %v10541_v4, %s11021_s25 }
 0xcf8   : > { %v5940_v10 = vpop.permute.xlu0 %5939  ;;  %v6066_v34 = vpop.permute.xlu1 %6065 }
 0xcf9   : > { %5961 = vst.msk [vmem:[#allocation7 + $0x50] sm:$0xff] %vm4993_vm7, %v5940_v10  ;;  %v6134_v5 = vpop.permute.xlu2 %6133  ;;  %v6200_v50 = vld [vmem:[#allocation7 + $0x48] sm:$0xff] }
 0xcfa   : > { %6088 = vst.msk [vmem:[#allocation7 + $0x148] sm:$0xff] %vm4993_vm7, %v6066_v34  ;;  %v6202_v46 = vld [vmem:[#allocation7 + $0x58] sm:$0xff] }
 0xcfb   : > { %6154 = vst.msk [vmem:[#allocation7 + $0x1d8] sm:$0xff] %vm4993_vm7, %v6134_v5 }
 0xcfe   : > { %5981 = vrot.lane.b32.xlu0 %v10590_v17, %s11021_s25  ;;  %6097 = vrot.lane.b32.xlu1 %v10531_v39, %s11023_s26 }
 0xcff   : > { %6109 = vrot.lane.b32.xlu2 %v10590_v17, %s11023_s26 }
 0xd00   : > { %v6004_v43 = vpop.permute.xlu0 %6003  ;;  %v6068_v58 = vpop.permute.xlu1 %6067 }
 0xd01   : > { %6025 = vst.msk [vmem:[#allocation7 + $0xd0] sm:$0xff] %vm4993_vm7, %v6004_v43  ;;  %v6136_v61 = vpop.permute.xlu2 %6135 }
 0xd02   : > { %6089 = vst.msk [vmem:[#allocation7 + $0x150] sm:$0xff] %vm4993_vm7, %v6068_v58 }
 0xd03   : > { %6155 = vst.msk [vmem:[#allocation7 + $0x1e0] sm:$0xff] %vm4993_vm7, %v6136_v61  ;;  %v6250_v61 = vld [vmem:[#allocation7 + $0x1d8] sm:$0xff] }
 0xd06   : > { %6173 = vrot.lane.b32.xlu0 %v10590_v17, %s11024_s16  ;;  %6045 = vrot.lane.b32.xlu1 %v10590_v17, %s11022_s22 }
 0xd07   : > { %6169 = vrot.lane.b32.xlu2 %v10572_v2, %s11024_s16  ;;  %v6201_v2 = vld [vmem:[#allocation7 + $0x50] sm:$0xff] }
 0xd08   : > { %v6006_v40 = vpop.permute.xlu0 %6005  ;;  %v6070_v53 = vpop.permute.xlu1 %6069 }
 0xd09   : > { %6026 = vst.msk [vmem:[#allocation7 + $0xd8] sm:$0xff] %vm4993_vm7, %v6006_v40  ;;  %v6138_v30 = vpop.permute.xlu2 %6137 }
 0xd0a   : > { %6090 = vst.msk [vmem:[#allocation7 + $0x158] sm:$0xff] %vm4993_vm7, %v6070_v53  ;;  %v6251_v10 = vld [vmem:[#allocation7 + $0x1e0] sm:$0xff]  ;;  %v6249_v53 = vld [vmem:[#allocation7 + $0x1d0] sm:$0xff] }
 0xd0b   : > { %6156 = vst.msk [vmem:[#allocation7 + $0x1e8] sm:$0xff] %vm4993_vm7, %v6138_v30 }
 0xd0e   : > { %5967 = vrot.lane.b32.xlu0 %v10521_v14, %s11021_s25  ;;  %6095 = vrot.lane.b32.xlu1 %v10521_v14, %s11023_s26 }
 0xd0f   : > { %6167 = vrot.lane.b32.xlu2 %v10561_v48, %s11024_s16 }
 0xd10   : > { %v6008_v22 = vpop.permute.xlu0 %6007  ;;  %v5944_v35 = vpop.permute.xlu1 %5943 }
 0xd11   : > { %6027 = vst.msk [vmem:[#allocation7 + $0xe0] sm:$0xff] %vm4993_vm7, %v6008_v22  ;;  %v5948_v15 = vpop.permute.xlu2 %5947  ;;  %v6248_v22 = vld [vmem:[#allocation7 + $0x1c8] sm:$0xff] }
 0xd12   : > { %5963 = vst.msk [vmem:[#allocation7 + $0x60] sm:$0xff] %vm4993_vm7, %v5944_v35  ;;  %v6252_v54 = vld [vmem:[#allocation7 + $0x1e8] sm:$0xff]  ;;  %v5884_v35 = vld [vmem:[%s10931_s11 + $0x28] sm:$0xff] }
 0xd13   : > { %5965 = vst.msk [vmem:[#allocation7 + $0x70] sm:$0xff] %vm4993_vm7, %v5948_v15 }
 0xd16   : > { %6161 = vrot.lane.b32.xlu0 %v10531_v39, %s11024_s16  ;;  %6165 = vrot.lane.b32.xlu1 %v10551_v16, %s11024_s16  ;;  %v6263_v39 = vld [vmem:[%s10932_s12] sm:$0xff] }
 0xd17   : > { %6163 = vrot.lane.b32.xlu2 %v10541_v4, %s11024_s16  ;;  %v6265_v4 = vld [vmem:[%s10932_s12 + $0x10] sm:$0xff] }
 0xd18   : > { %v5946_v51 = vpop.permute.xlu0 %5945  ;;  %v6072_v3 = vpop.permute.xlu1 %6071 }
 0xd19   : > { %5964 = vst.msk [vmem:[#allocation7 + $0x68] sm:$0xff] %vm4993_vm7, %v5946_v51  ;;  %v6140_v1 = vpop.permute.xlu2 %6139  ;;  %v6203_v23 = vld [vmem:[#allocation7 + $0x60] sm:$0xff] }
 0xd1a   : > { %6091 = vst.msk [vmem:[#allocation7 + $0x160] sm:$0xff] %vm4993_vm7, %v6072_v3  ;;  %v6205_v48 = vld [vmem:[#allocation7 + $0x70] sm:$0xff]  ;;  %v6247_v51 = vld [vmem:[#allocation7 + $0x1c0] sm:$0xff] }
 0xd1b   : > { %6157 = vst.msk [vmem:[#allocation7 + $0x1f0] sm:$0xff] %vm4993_vm7, %v6140_v1 }
 0xd1e   : > { %6278 = vperm.xlu0 %6941, %v6264_v41   ;;  %6159 = vrot.lane.b32.xlu1 %v10521_v14, %s11024_s16  ;;  %v6266_v14 = vld [vmem:[%s10932_s12 + $0x18] sm:$0xff] }
 0xd1f   : > { %6273 = vperm.xlu2 %6940, %v6263_v39   ;;  %v6234_v39 = vld [vmem:[#allocation7 + $0x158] sm:$0xff] }
 0xd20   : > { %v6010_v27 = vpop.permute.xlu0 %6009  ;;  %v6074_v18 = vpop.permute.xlu1 %6073  ;;  %v6204_v63 = vld [vmem:[#allocation7 + $0x68] sm:$0xff] }
 0xd21   : > { %6028 = vst.msk [vmem:[#allocation7 + $0xe8] sm:$0xff] %vm4993_vm7, %v6010_v27  ;;  %v6108_v13 = vpop.permute.xlu2 %6107  ;;  %v6235_v15 = vld [vmem:[#allocation7 + $0x160] sm:$0xff] }
 0xd22   : > { %6092 = vst.msk [vmem:[#allocation7 + $0x168] sm:$0xff] %vm4993_vm7, %v6074_v18  ;;  %v6253_v56 = vld [vmem:[#allocation7 + $0x1f0] sm:$0xff] }
 0xd23   : > { %6125 = vst.msk [vmem:[#allocation7 + $0x1b0] sm:$0xff] %vm4993_vm7, %v6108_v13  ;;  %v6233_v18 = vld [vmem:[#allocation7 + $0x150] sm:$0xff] }
 0xd26   : > { %6293 = vperm.xlu0 %6941, %v6267_v42   ;;  %6283 = vperm.xlu1 %7342, %v6265_v4   ;;  %v6232_v42 = vld [vmem:[#allocation7 + $0x148] sm:$0xff] }
 0xd27   : > { %6288 = vperm.xlu2 %6940, %v6266_v14   ;;  %v5889_v14 = vld [vmem:[%s10931_s11 + $0x50] sm:$0xff] }
 0xd28   : > { %v6012_v57 = vpop.permute.xlu0 %6011  ;;  %v6076_v33 = vpop.permute.xlu1 %6075 }
 0xd29   : > { %6029 = vst.msk [vmem:[#allocation7 + $0xf0] sm:$0xff] %vm4993_vm7, %v6012_v57  ;;  %v6106_v19 = vpop.permute.xlu2 %6105  ;;  %v6236_v30 = vld [vmem:[#allocation7 + $0x168] sm:$0xff]  ;;  %v6231_v57 = vld [vmem:[#allocation7 + $0x140] sm:$0xff] }
 0xd2a   : > { %6093 = vst.msk [vmem:[#allocation7 + $0x170] sm:$0xff] %vm4993_vm7, %v6076_v33  ;;  %v6245_v13 = vld [vmem:[#allocation7 + $0x1b0] sm:$0xff] }
 0xd2b   : > { %6124 = vst.msk [vmem:[#allocation7 + $0x1a8] sm:$0xff] %vm4993_vm7, %v6106_v19 }
 0xd2e   : > { %6308 = vperm.xlu0 %6941, %v6270_v8   ;;  %6298 = vperm.xlu1 %7342, %v6268_v45  }
 0xd2f   : > { %6303 = vperm.xlu2 %6940, %v6269_v52  }
 0xd30   : > { %v5980_v16 = vpop.permute.xlu0 %5979  ;;  %v5950_v6 = vpop.permute.xlu1 %5949 }
 0xd31   : > { %5997 = vst.msk [vmem:[#allocation7 + $0xb0] sm:$0xff] %vm4993_vm7, %v5980_v16  ;;  %v6104_v12 = vpop.permute.xlu2 %6103  ;;  %v6237_v40 = vld [vmem:[#allocation7 + $0x170] sm:$0xff] }
 0xd32   : > { %5966 = vst.msk [vmem:[#allocation7 + $0x78] sm:$0xff] %vm4993_vm7, %v5950_v6  ;;  %v6244_v4 = vld [vmem:[#allocation7 + $0x1a8] sm:$0xff]  ;;  %v6221_v6 = vld [vmem:[#allocation7 + $0xf0] sm:$0xff] }
 0xd33   : > { %6123 = vst.msk [vmem:[#allocation7 + $0x1a0] sm:$0xff] %vm4993_vm7, %v6104_v12 }
 0xd38   : > { %v5978_v47 = vpop.permute.xlu0 %5977  ;;  %v6044_v24 = vpop.permute.xlu1 %6043 }
 0xd39   : > { %5996 = vst.msk [vmem:[#allocation7 + $0xa8] sm:$0xff] %vm4993_vm7, %v5978_v47  ;;  %v6102_v9 = vpop.permute.xlu2 %6101  ;;  %v6206_v62 = vld [vmem:[#allocation7 + $0x78] sm:$0xff]  ;;  %v6220_v47 = vld [vmem:[#allocation7 + $0xe8] sm:$0xff] }
 0xd3a   : > { %6061 = vst.msk [vmem:[#allocation7 + $0x130] sm:$0xff] %vm4993_vm7, %v6044_v24  ;;  %6335 = vmatpush.msrb.mxu1 %v6206_v62  ;;  %v6243_v33 = vld [vmem:[#allocation7 + $0x1a0] sm:$0xff]  ;;  %v5894_v24 = vld [vmem:[%s10931_s11 + $0x78] sm:$0xff] }
 0xd3b   : > { %6122 = vst.msk [vmem:[#allocation7 + $0x198] sm:$0xff] %vm4993_vm7, %v6102_v9  ;;  %v6219_v9 = vld [vmem:[#allocation7 + $0xe0] sm:$0xff] }
 0xd3c   : > { %6336 = vmatpush.msrb.mxu1 %v6205_v48 }
 0xd3e   : > { %6337 = vmatpush.msrb.mxu1 %v6204_v63 }
 0xd40   : > { %6338 = vmatpush.msrb.mxu1 %v6203_v23  ;;  %v5976_v38 = vpop.permute.xlu0 %5975  ;;  %v6042_v37 = vpop.permute.xlu1 %6041  ;;  %v6218_v23 = vld [vmem:[#allocation7 + $0xd8] sm:$0xff] }
 0xd41   : > { %5995 = vst.msk [vmem:[#allocation7 + $0xa0] sm:$0xff] %vm4993_vm7, %v5976_v38  ;;  %v6034_v0 = vpop.permute.xlu2 %6033  ;;  %v6217_v38 = vld [vmem:[#allocation7 + $0xd0] sm:$0xff] }
 0xd42   : > { %6060 = vst.msk [vmem:[#allocation7 + $0x128] sm:$0xff] %vm4993_vm7, %v6042_v37  ;;  %6339 = vmatpush.msrb.mxu1 %v6202_v46  ;;  %v6242_v16 = vld [vmem:[#allocation7 + $0x198] sm:$0xff]  ;;  %v6216_v37 = vld [vmem:[#allocation7 + $0xc8] sm:$0xff]  ;;  %v6215_v46 = vld [vmem:[#allocation7 + $0xc0] sm:$0xff] }
 0xd43   : > { %6056 = vst.msk [vmem:[#allocation7 + $0x108] sm:$0xff] %vm4993_vm7, %v6034_v0  ;;  %v5899_v0 = vld [vmem:[%s10931_s11 + $0xa0] sm:$0xff] }
 0xd44   : > { %6340 = vmatpush.msrb.mxu1 %v6201_v2 }
 0xd46   : > { %6341 = vmatpush.msrb.mxu1 %v6200_v50 }
 0xd48   : > { %6342 = vmatpush.msrb.mxu1 %v6199_v21  ;;  %v6100_v20 = vpop.permute.xlu0 %6099  ;;  %v6040_v60 = vpop.permute.xlu1 %6039 }
 0xd49   : > { %6121 = vst.msk [vmem:[#allocation7 + $0x190] sm:$0xff] %vm4993_vm7, %v6100_v20  ;;  %v6142_v44 = vpop.permute.xlu2 %6141 }
 0xd4a   : > { %6059 = vst.msk [vmem:[#allocation7 + $0x120] sm:$0xff] %vm4993_vm7, %v6040_v60  ;;  %6343 = vmatpush.msrb.mxu1 %v6198_v29  ;;  %v6213_v60 = vld [vmem:[#allocation7 + $0xb0] sm:$0xff]  ;;  %v5904_v29 = vld [vmem:[%s10931_s11 + $0xc8] sm:$0xff] }
 0xd4b   : > { %6158 = vst.msk [vmem:[#allocation7 + $0x1f8] sm:$0xff] %vm4993_vm7, %v6142_v44  ;;  %v6212_v44 = vld [vmem:[#allocation7 + $0xa8] sm:$0xff] }
 0xd4c   : > { %6344 = vmatpush.msrb.mxu1 %v6197_v25  ;;  %v6211_v25 = vld [vmem:[#allocation7 + $0xa0] sm:$0xff] }
 0xd4e   : > { %6345 = vmatpush.msrb.mxu1 %v6196_v28 }
 0xd50   : > { %6346 = vmatpush.msrb.mxu1 %v6195_v49  ;;  %v6078_v26 = vpop.permute.xlu0 %6077  ;;  %v6038_v17 = vpop.permute.xlu1 %6037  ;;  %v6241_v12 = vld [vmem:[#allocation7 + $0x190] sm:$0xff] }
 0xd51   : > { %6094 = vst.msk [vmem:[#allocation7 + $0x178] sm:$0xff] %vm4993_vm7, %v6078_v26  ;;  %v5972_v55 = vpop.permute.xlu2 %5971 }
 0xd52   : > { %6058 = vst.msk [vmem:[#allocation7 + $0x118] sm:$0xff] %vm4993_vm7, %v6038_v17  ;;  %6347 = vmatpush.msrb.mxu1 %v6194_v36  ;;  %v6254_v31 = vld [vmem:[#allocation7 + $0x1f8] sm:$0xff] }
 0xd53   : > { %5993 = vst.msk [vmem:[#allocation7 + $0x90] sm:$0xff] %vm4993_vm7, %v5972_v55  ;;  %6458 = vmatpush.msrb.mxu3 %v6254_v31  ;;  %v6229_v31 = vld [vmem:[#allocation7 + $0x130] sm:$0xff] }
 0xd54   : > { %6348 = vmatpush.msrb.mxu1 %v6193_v59 }
 0xd55   : > { %6459 = vmatpush.msrb.mxu3 %v6253_v56 }
 0xd56   : > { %6349 = vmatpush.msrb.mxu1 %v6192_v11  ;;  %v6228_v11 = vld [vmem:[#allocation7 + $0x128] sm:$0xff] }
 0xd57   : > { %6460 = vmatpush.msrb.mxu3 %v6252_v54 }
 0xd58   : > { %6350 = vmatpush.msrb.mxu1 %v6191_v7  ;;  %v6032_v34 = vpop.permute.xlu0 %6031  ;;  %v6036_v5 = vpop.permute.xlu1 %6035  ;;  %v6238_v43 = vld [vmem:[#allocation7 + $0x178] sm:$0xff]  ;;  %v5909_v7 = vld [vmem:[%s10931_s11 + $0xf0] sm:$0xff] }
 0xd59   : > { %6461 = vmatpush.msrb.mxu3 %v6251_v10  ;;  %6055 = vst.msk [vmem:[#allocation7 + $0x100] sm:$0xff] %vm4993_vm7, %v6032_v34  ;;  %6351 = vmatmul.f32.vlgmr.msrb.gmra.mxu1 %v5879_v32  ;;  %v6110_v58 = vpop.permute.xlu2 %6109  ;;  %v6227_v32 = vld [vmem:[#allocation7 + $0x120] sm:$0xff] }
 0xd5a   : > { %6057 = vst.msk [vmem:[#allocation7 + $0x110] sm:$0xff] %vm4993_vm7, %v6036_v5  ;;  %6417 = vmatpush.msrb.mxu2 %v6238_v43  ;;  %v6209_v36 = vld [vmem:[#allocation7 + $0x90] sm:$0xff] }
 0xd5b   : > { %6126 = vst.msk [vmem:[#allocation7 + $0x1b8] sm:$0xff] %vm4993_vm7, %v6110_v58  ;;  %6462 = vmatpush.msrb.mxu3 %v6250_v61  ;;  %v5880_v58 = vld [vmem:[%s10931_s11 + $0x8] sm:$0xff] }
 0xd5c   : > { %6418 = vmatpush.msrb.mxu2 %v6237_v40  ;;  %v6226_v61 = vld [vmem:[#allocation7 + $0x118] sm:$0xff] }
 0xd5d   : > { %6463 = vmatpush.msrb.mxu3 %v6249_v53  ;;  %v5882_v53 = vld [vmem:[%s10931_s11 + $0x18] sm:$0xff] }
 0xd5e   : > { %6419 = vmatpush.msrb.mxu2 %v6236_v30 }
 0xd5f   : > { %6464 = vmatpush.msrb.mxu3 %v6248_v22  ;;  %v6224_v22 = vld [vmem:[#allocation7 + $0x108] sm:$0xff] }
 0xd60   : > { %6420 = vmatpush.msrb.mxu2 %v6235_v15  ;;  %v6014_v3 = vpop.permute.xlu0 %6013  ;;  %v5974_v1 = vpop.permute.xlu1 %5973  ;;  %v6223_v15 = vld [vmem:[#allocation7 + $0x100] sm:$0xff] }
 0xd61   : > { %6465 = vmatpush.msrb.mxu3 %v6247_v51  ;;  %6030 = vst.msk [vmem:[#allocation7 + $0xf8] sm:$0xff] %vm4993_vm7, %v6014_v3  ;;  %6354 = vmatmul.f32.gmra.mxu1 %v5884_v35  ;;  %v6170_v41 = vpop.permute.xlu2 %6169  ;;  %v6225_v30 = vld [vmem:[#allocation7 + $0x110] sm:$0xff]  ;;  %v5881_v35 = vld [vmem:[%s10931_s11 + $0x10] sm:$0xff]  ;;  %v5914_v51 = vld [vmem:[%s10931_s11 + $0x118] sm:$0xff] }
 0xd62   : > { %5994 = vst.msk [vmem:[#allocation7 + $0x98] sm:$0xff] %vm4993_vm7, %v5974_v1  ;;  %6421 = vmatpush.msrb.mxu2 %v6234_v39  ;;  %v6246_v27 = vld [vmem:[#allocation7 + $0x1b8] sm:$0xff]  ;;  %v5885_v1 = vld [vmem:[%s10931_s11 + $0x30] sm:$0xff]  ;;  %v5887_v39 = vld [vmem:[%s10931_s11 + $0x40] sm:$0xff] }
 0xd63   : > { %6188 = vst.msk [vmem:[#allocation7 + $0x228] sm:$0xff] %vm4993_vm7, %v6170_v41  ;;  %6466 = vmatpush.msrb.mxu3 %v6246_v27 }
 0xd64   : > { %6422 = vmatpush.msrb.mxu2 %v6233_v18 }
 0xd65   : > { %6467 = vmatpush.msrb.mxu3 %v6245_v13  ;;  %v5886_v13 = vld [vmem:[%s10931_s11 + $0x38] sm:$0xff] }
 0xd66   : > { %6423 = vmatpush.msrb.mxu2 %v6232_v42  ;;  %v5883_v42 = vld [vmem:[%s10931_s11 + $0x20] sm:$0xff] }
 0xd67   : > { %6468 = vmatpush.msrb.mxu3 %v6244_v4 }
 0xd68   : > { %6424 = vmatpush.msrb.mxu2 %v6231_v57  ;;  %v5970_v19 = vpop.permute.xlu0 %5969  ;;  %v6172_v8 = vpop.permute.xlu1 %6171  ;;  %v6222_v45 = vld [vmem:[#allocation7 + $0xf8] sm:$0xff] }
 0xd69   : > { %6469 = vmatpush.msrb.mxu3 %v6243_v33  ;;  %5992 = vst.msk [vmem:[#allocation7 + $0x88] sm:$0xff] %vm4993_vm7, %v5970_v19  ;;  %6357 = vmatmul.f32.gmra.mxu1 %v5889_v14  ;;  %v6168_v52 = vpop.permute.xlu2 %6167  ;;  %v6210_v17 = vld [vmem:[#allocation7 + $0x98] sm:$0xff]  ;;  %v5890_v14 = vld [vmem:[%s10931_s11 + $0x58] sm:$0xff]  ;;  %v5891_v33 = vld [vmem:[%s10931_s11 + $0x60] sm:$0xff] }
 0xd6a   : > { %6189 = vst.msk [vmem:[#allocation7 + $0x230] sm:$0xff] %vm4993_vm7, %v6172_v8  ;;  %6376 = vmatpush.msrb.mxu0 %v6222_v45  ;;  %v6260_v54 = vld [vmem:[#allocation7 + $0x228] sm:$0xff]  ;;  %v5892_v57 = vld [vmem:[%s10931_s11 + $0x68] sm:$0xff]  ;;  %v5895_v8 = vld [vmem:[%s10931_s11 + $0x80] sm:$0xff] }
 0xd6b   : > { %6187 = vst.msk [vmem:[#allocation7 + $0x220] sm:$0xff] %vm4993_vm7, %v6168_v52  ;;  %6470 = vmatpush.msrb.mxu3 %v6242_v16  ;;  %v5888_v19 = vld [vmem:[%s10931_s11 + $0x48] sm:$0xff]  ;;  %v5897_v45 = vld [vmem:[%s10931_s11 + $0x90] sm:$0xff] }
 0xd6c   : > { %6377 = vmatpush.msrb.mxu0 %v6221_v6  ;;  %v5896_v52 = vld [vmem:[%s10931_s11 + $0x88] sm:$0xff]  ;;  %v5893_v16 = vld [vmem:[%s10931_s11 + $0x70] sm:$0xff] }
 0xd6d   : > { %6471 = vmatpush.msrb.mxu3 %v6241_v12  ;;  %v5900_v6 = vld [vmem:[%s10931_s11 + $0xa8] sm:$0xff]  ;;  %v5902_v12 = vld [vmem:[%s10931_s11 + $0xb8] sm:$0xff] }
 0xd6e   : > { %6378 = vmatpush.msrb.mxu0 %v6220_v47  ;;  %v5901_v47 = vld [vmem:[%s10931_s11 + $0xb0] sm:$0xff] }
 0xd70   : > { %6379 = vmatpush.msrb.mxu0 %v6219_v9  ;;  %v5982_v62 = vpop.permute.xlu0 %5981  ;;  %v6098_v48 = vpop.permute.xlu1 %6097  ;;  %v6208_v56 = vld [vmem:[#allocation7 + $0x88] sm:$0xff]  ;;  %v5905_v9 = vld [vmem:[%s10931_s11 + $0xd0] sm:$0xff] }
 0xd71   : > { %5998 = vst.msk [vmem:[#allocation7 + $0xb8] sm:$0xff] %vm4993_vm7, %v5982_v62  ;;  %6360 = vmatmul.f32.gmra.mxu1 %v5894_v24  ;;  %v6164_v63 = vpop.permute.xlu2 %6163  ;;  %v6261_v59 = vld [vmem:[#allocation7 + $0x230] sm:$0xff]  ;;  %v5898_v24 = vld [vmem:[%s10931_s11 + $0x98] sm:$0xff] }
 0xd72   : > { %6120 = vst.msk [vmem:[#allocation7 + $0x188] sm:$0xff] %vm4993_vm7, %v6098_v48  ;;  %6380 = vmatpush.msrb.mxu0 %v6218_v23  ;;  %v6259_v10 = vld [vmem:[#allocation7 + $0x220] sm:$0xff]  ;;  %v5907_v62 = vld [vmem:[%s10931_s11 + $0xe0] sm:$0xff]  ;;  %v5906_v48 = vld [vmem:[%s10931_s11 + $0xd8] sm:$0xff] }
 0xd73   : > { %6185 = vst.msk [vmem:[#allocation7 + $0x210] sm:$0xff] %vm4993_vm7, %v6164_v63  ;;  %v5903_v63 = vld [vmem:[%s10931_s11 + $0xc0] sm:$0xff]  ;;  %v5910_v23 = vld [vmem:[%s10931_s11 + $0xf8] sm:$0xff] }
 0xd74   : > { %6381 = vmatpush.msrb.mxu0 %v6217_v38  ;;  %v5912_v38 = vld [vmem:[%s10931_s11 + $0x108] sm:$0xff] }
 0xd76   : > { %6382 = vmatpush.msrb.mxu0 %v6216_v37  ;;  %v5911_v37 = vld [vmem:[%s10931_s11 + $0x100] sm:$0xff] }
 0xd78   : > { %6383 = vmatpush.msrb.mxu0 %v6215_v46  ;;  %v6174_v2 = vpop.permute.xlu0 %6173  ;;  %v6046_v50 = vpop.permute.xlu1 %6045  ;;  %v6214_v21 = vld [vmem:[#allocation7 + $0xb8] sm:$0xff]  ;;  %v5915_v46 = vld [vmem:[%s10931_s11 + $0x120] sm:$0xff] }
 0xd79   : > { %6190 = vst.msk [vmem:[#allocation7 + $0x238] sm:$0xff] %vm4993_vm7, %v6174_v2  ;;  %6363 = vmatmul.f32.gmra.mxu1 %v5899_v0  ;;  %v6240_v20 = vld [vmem:[#allocation7 + $0x188] sm:$0xff]  ;;  %v5908_v0 = vld [vmem:[%s10931_s11 + $0xe8] sm:$0xff]  ;;  %v5917_v2 = vld [vmem:[%s10931_s11 + $0x130] sm:$0xff] }
 0xd7a   : > { %6062 = vst.msk [vmem:[#allocation7 + $0x138] sm:$0xff] %vm4993_vm7, %v6046_v50  ;;  %6384 = vmatpush.msrb.mxu0 %v6214_v21  ;;  %6472 = vmatpush.msrb.mxu3 %v6240_v20  ;;  %v6257_v27 = vld [vmem:[#allocation7 + $0x210] sm:$0xff]  ;;  %v5916_v50 = vld [vmem:[%s10931_s11 + $0x128] sm:$0xff]  ;;  %v5913_v21 = vld [vmem:[%s10931_s11 + $0x110] sm:$0xff] }
 0xd7b   : > { %v5918_v20 = vld [vmem:[%s10931_s11 + $0x138] sm:$0xff] }
 0xd7c   : > { %6385 = vmatpush.msrb.mxu0 %v6213_v60 }
 0xd7e   : > { %6386 = vmatpush.msrb.mxu0 %v6212_v44 }
 0xd80   : > { %6387 = vmatpush.msrb.mxu0 %v6211_v25  ;;  %v5968_v28 = vpop.permute.xlu0 %5967  ;;  %v6096_v49 = vpop.permute.xlu1 %6095  ;;  %v6262_v26 = vld [vmem:[#allocation7 + $0x238] sm:$0xff] }
 0xd81   : > { %5991 = vst.msk [vmem:[#allocation7 + $0x80] sm:$0xff] %vm4993_vm7, %v5968_v28  ;;  %6366 = vmatmul.f32.gmra.mxu1 %v5904_v29  ;;  %v6230_v55 = vld [vmem:[#allocation7 + $0x138] sm:$0xff] }
 0xd82   : > { %6119 = vst.msk [vmem:[#allocation7 + $0x180] sm:$0xff] %vm4993_vm7, %v6096_v49  ;;  %6388 = vmatpush.msrb.mxu0 %v6210_v17  ;;  %6425 = vmatpush.msrb.mxu2 %v6230_v55 }
 0xd83   : > { %6507 = vmatpush.msra.mxu1 %v6262_v26 }
 0xd84   : > { %6389 = vmatpush.msrb.mxu0 %v6209_v36  ;;  %6426 = vmatpush.msrb.mxu2 %v6229_v31  ;;  %v6274_v31 = vpop.permute.xlu2 %6273 }
 0xd85   : > { %6508 = vmatpush.msra.mxu1 %v6261_v59 }
 0xd86   : > { %6390 = vmatpush.msrb.mxu0 %v6208_v56  ;;  %6427 = vmatpush.msrb.mxu2 %v6228_v11 }
 0xd87   : > { %6509 = vmatpush.msra.mxu1 %v6260_v54 }
 0xd88   : > { %6428 = vmatpush.msrb.mxu2 %v6227_v32  ;;  %v6162_v34 = vpop.permute.xlu0 %6161  ;;  %v6166_v5 = vpop.permute.xlu1 %6165  ;;  %v6207_v43 = vld [vmem:[#allocation7 + $0x80] sm:$0xff] }
 0xd89   : > { %6510 = vmatpush.msra.mxu1 %v6259_v10  ;;  %6184 = vst.msk [vmem:[#allocation7 + $0x208] sm:$0xff] %vm4993_vm7, %v6162_v34  ;;  %6391 = vmatpush.msrb.mxu0 %v6207_v43  ;;  %v6239_v40 = vld [vmem:[#allocation7 + $0x180] sm:$0xff] }
 0xd8a   : > { %6186 = vst.msk [vmem:[#allocation7 + $0x218] sm:$0xff] %vm4993_vm7, %v6166_v5  ;;  %6369 = vmatmul.f32.gmra.mxu1 %v5909_v7  ;;  %6429 = vmatpush.msrb.mxu2 %v6226_v61 }
 0xd8b   : > { %6473 = vmatpush.msrb.mxu3 %v6239_v40  ;;  %6392 = vmatmul.f32.vlgmr.msrb.gmra.mxu0 %v5880_v58 }
 0xd8c   : > { %6430 = vmatpush.msrb.mxu2 %v6225_v30  ;;  %6474 = vmatmul.f32.vlgmr.msrb.gmra.mxu3 %v5882_v53 }
 0xd8e   : > { %6431 = vmatpush.msrb.mxu2 %v6224_v22 }
 0xd90   : > { %6432 = vmatpush.msrb.mxu2 %v6223_v15  ;;  %v6160_v3 = vpop.permute.xlu1 %6159  ;;  %v6256_v18 = vld [vmem:[#allocation7 + $0x208] sm:$0xff]  ;;  %v6279_v5 = vpop.permute.xlu0 %6278 }
 0xd91   : > { %6183 = vst.msk [vmem:[#allocation7 + $0x200] sm:$0xff] %vm4993_vm7, %v6160_v3  ;;  %6433 = vmatmul.f32.vlgmr.msrb.gmra.mxu2 %v5881_v35  ;;  %v6258_v41 = vld [vmem:[#allocation7 + $0x218] sm:$0xff] }
 0xd92   : > { %6372 = vmatmul.f32.gmra.mxu1 %v5914_v51 }
 0xd93   : > { %6511 = vmatpush.msra.mxu1 %v6258_v41  ;;  %6395 = vmatmul.f32.gmra.mxu0 %v5885_v1 }
 0xd94   : > { %6477 = vmatmul.f32.gmra.mxu3 %v5887_v39 }
 0xd95   : > { %6512 = vmatpush.msra.mxu1 %v6257_v27 }
 0xd97   : > { %6513 = vmatpush.msra.mxu1 %v6256_v18 }
 0xd98   : > { %v6255_v4 = vld [vmem:[#allocation7 + $0x200] sm:$0xff]  ;;  %v6284_v51 = vpop.permute.xlu1 %6283 }
 0xd99   : > { %6436 = vmatmul.f32.gmra.mxu2 %v5886_v13  ;;  %6514 = vmatpush.msra.mxu1 %v6255_v4 }
 0xd9a   : > { %6878 = vmatmul.msk.f32.vlgmr.msra.gmra.mxu1 %vm4359_vm9, %v5883_v42 }
 0xd9b   : > { %6398 = vmatmul.f32.gmra.mxu0 %v5890_v14  ;;  %v6289_v14 = vpop.permute.xlu2 %6288 }
 0xd9c   : > { %6480 = vmatmul.f32.gmra.mxu3 %v5892_v57 }
 0xda1   : > { %6439 = vmatmul.f32.gmra.mxu2 %v5891_v33 }
 0xda2   : > { %6879 = vmatmul.msk.f32.gmra.mxu1 %vm4359_vm9, %v5888_v19 }
 0xda3   : > { %6401 = vmatmul.f32.gmra.mxu0 %v5895_v8 }
 0xda4   : > { %6483 = vmatmul.f32.gmra.mxu3 %v5897_v45 }
 0xda9   : > { %6442 = vmatmul.f32.gmra.mxu2 %v5896_v52 }
 0xdaa   : > { %6880 = vmatmul.msk.f32.gmra.mxu1 %vm4359_vm9, %v5893_v16 }
 0xdab   : > { %6404 = vmatmul.f32.gmra.mxu0 %v5900_v6 }
 0xdac   : > { %6486 = vmatmul.f32.gmra.mxu3 %v5902_v12 }
 0xdb1   : > { %6445 = vmatmul.f32.gmra.mxu2 %v5901_v47  ;;  %v6294_v47 = vpop.permute.xlu0 %6293 }
 0xdb2   : > { %6881 = vmatmul.msk.f32.gmra.mxu1 %vm4359_vm9, %v5898_v24 }
 0xdb3   : > { %6407 = vmatmul.f32.gmra.mxu0 %v5905_v9 }
 0xdb4   : > { %6489 = vmatmul.f32.gmra.mxu3 %v5907_v62 }
 0xdb9   : > { %6448 = vmatmul.f32.gmra.mxu2 %v5906_v48 }
 0xdba   : > { %6882 = vmatmul.msk.f32.gmra.mxu1 %vm4359_vm9, %v5903_v63 }
 0xdbb   : > { %6410 = vmatmul.f32.gmra.mxu0 %v5910_v23 }
 0xdbc   : > { %6492 = vmatmul.f32.gmra.mxu3 %v5912_v38 }
 0xdc1   : > { %6451 = vmatmul.f32.gmra.mxu2 %v5911_v37 }
 0xdc2   : > { %6883 = vmatmul.msk.f32.gmra.mxu1 %vm4359_vm9, %v5908_v0  ;;  %v6299_v0 = vpop.permute.xlu1 %6298 }
 0xdc3   : > { %6413 = vmatmul.f32.gmra.mxu0 %v5915_v46 }
 0xdc4   : > { %6495 = vmatmul.f32.gmra.mxu3 %v5917_v2 }
 0xdc9   : > { %6454 = vmatmul.f32.gmra.mxu2 %v5916_v50 }
 0xdca   : > { %6884 = vmatmul.msk.f32.gmra.mxu1 %vm4359_vm9, %v5913_v21 }
 0xdd2   : > { %6885 = vmatmul.msk.f32.gmra.mxu1 %vm4359_vm9, %v5918_v20 }
 0xdd6   : > { %v6352_v60 = vpop.f32.mrf.mxu1 }
 0xdd7   : > { %v6353_v56 = vadd.f32 %v6352_v60, %v6274_v31 }
 0xdde   : > { %v6355_v44 = vpop.f32.mrf.mxu1 }
 0xddf   : > { %v6356_v58 = vadd.f32 %v6355_v44, %v6279_v5 }
 0xde6   : > { %v6358_v29 = vpop.f32.mrf.mxu1 }
 0xde7   : > { %v6359_v1 = vadd.f32 %v6358_v29, %v6284_v51 }
 0xdee   : > { %v6361_v25 = vpop.f32.mrf.mxu1 }
 0xdef   : > { %v6362_v57 = vadd.f32 %v6361_v25, %v6289_v14 }
 0xdf6   : > { %v6364_v28 = vpop.f32.mrf.mxu1 }
 0xdf7   : > { %v6365_v24 = vadd.f32 %v6364_v28, %v6294_v47  ;;  %v6304_v28 = vpop.permute.xlu2 %6303 }
 0xdfe   : > { %v6367_v49 = vpop.f32.mrf.mxu1 }
 0xdff   : > { %v6368_v2 = vadd.f32 %v6367_v49, %v6299_v0 }
 0xe07   : > { %v10888_v26 = vpop.f32.mrf.mxu1 }
 0xe08   : > { %v6393_v17 = vpop.f32.mrf.mxu0 }
 0xe09   : > { %v6394_v11 = vadd.f32 %v6393_v17, %v6353_v56  ;;  %v6371_v17 = vadd.f32 %v10888_v26, %v6304_v28 }
 0xe0f   : > { %v10890_v55 = vpop.f32.mrf.mxu1  ;;  %v6475_v36 = vpop.f32.mrf.mxu3 }
 0xe10   : > { %v6396_v59 = vpop.f32.mrf.mxu0 }
 0xe11   : > { %v6397_v40 = vadd.f32 %v6396_v59, %v6356_v58 }
 0xe14   : > { %v6434_v54 = vpop.f32.mrf.mxu2 }
 0xe15   : > { %v6435_v32 = vadd.f32 %v6434_v54, %v6394_v11 }
 0xe17   : > { %v6476_v7 = vadd.f32 %v6475_v36, %v6435_v32  ;;  %v6516_v10 = vpop.f32.mrf.mxu1  ;;  %v6478_v34 = vpop.f32.mrf.mxu3 }
 0xe18   : > { %v6399_v43 = vpop.f32.mrf.mxu0  ;;  %v6309_v32 = vpop.permute.xlu0 %6308 }
 0xe19   : > { %v6517_v61 = vadd.f32 %v6516_v10, %v6476_v7  ;;  %v6400_v39 = vadd.f32 %v6399_v43, %v6359_v1  ;;  %v6374_v10 = vadd.f32 %v10890_v55, %v6309_v32 }
 0xe1b   : > { %6540 = vst.msk [vmem:[%s10897_s23] sm:$0xff] %vm4993_vm7, %v6517_v61 }
 0xe1c   : > { %v6437_v53 = vpop.f32.mrf.mxu2 }
 0xe1d   : > { %v6438_v30 = vadd.f32 %v6437_v53, %v6397_v40 }
 0xe1f   : > { %v6479_v22 = vadd.f32 %v6478_v34, %v6438_v30  ;;  %v6519_v35 = vpop.f32.mrf.mxu1  ;;  %v6481_v15 = vpop.f32.mrf.mxu3 }
 0xe20   : > { %v6402_v3 = vpop.f32.mrf.mxu0 }
 0xe21   : > { %v6520_v41 = vadd.f32 %v6519_v35, %v6479_v22  ;;  %v6403_v8 = vadd.f32 %v6402_v3, %v6362_v57 }
 0xe23   : > { %6541 = vst.msk [vmem:[%s10897_s23 + $0x8] sm:$0xff] %vm4993_vm7, %v6520_v41 }
 0xe24   : > { %v6440_v27 = vpop.f32.mrf.mxu2 }
 0xe25   : > { %v6441_v18 = vadd.f32 %v6440_v27, %v6400_v39 }
 0xe27   : > { %v6482_v13 = vadd.f32 %v6481_v15, %v6441_v18  ;;  %v6522_v42 = vpop.f32.mrf.mxu1  ;;  %v6484_v4 = vpop.f32.mrf.mxu3 }
 0xe28   : > { %v6405_v19 = vpop.f32.mrf.mxu0 }
 0xe29   : > { %v6523_v33 = vadd.f32 %v6522_v42, %v6482_v13  ;;  %v6406_v62 = vadd.f32 %v6405_v19, %v6365_v24 }
 0xe2b   : > { %6542 = vst.msk [vmem:[%s10897_s23 + $0x10] sm:$0xff] %vm4993_vm7, %v6523_v33 }
 0xe2c   : > { %v6443_v45 = vpop.f32.mrf.mxu2 }
 0xe2d   : > { %v6444_v52 = vadd.f32 %v6443_v45, %v6403_v8 }
 0xe2f   : > { %v6485_v16 = vadd.f32 %v6484_v4, %v6444_v52  ;;  %v6525_v6 = vpop.f32.mrf.mxu1  ;;  %v6487_v12 = vpop.f32.mrf.mxu3 }
 0xe30   : > { %v6408_v48 = vpop.f32.mrf.mxu0 }
 0xe31   : > { %v6526_v9 = vadd.f32 %v6525_v6, %v6485_v16  ;;  %v6409_v21 = vadd.f32 %v6408_v48, %v6368_v2 }
 0xe33   : > { %6543 = vst.msk [vmem:[%s10897_s23 + $0x18] sm:$0xff] %vm4993_vm7, %v6526_v9 }
 0xe34   : > { %v6446_v63 = vpop.f32.mrf.mxu2 }
 0xe35   : > { %v6447_v23 = vadd.f32 %v6446_v63, %v6406_v62 }
 0xe37   : > { %v6488_v38 = vadd.f32 %v6487_v12, %v6447_v23  ;;  %v6528_v37 = vpop.f32.mrf.mxu1  ;;  %v6490_v46 = vpop.f32.mrf.mxu3 }
 0xe38   : > { %v6411_v44 = vpop.f32.mrf.mxu0 }
 0xe39   : > { %v6529_v50 = vadd.f32 %v6528_v37, %v6488_v38  ;;  %v6412_v59 = vadd.f32 %v6411_v44, %v6371_v17 }
 0xe3b   : > { %6544 = vst.msk [vmem:[%s10897_s23 + $0x20] sm:$0xff] %vm4993_vm7, %v6529_v50 }
 0xe3c   : > { %v6449_v20 = vpop.f32.mrf.mxu2 }
 0xe3d   : > { %v6450_v60 = vadd.f32 %v6449_v20, %v6409_v21 }
 0xe3f   : > { %v6491_v29 = vadd.f32 %v6490_v46, %v6450_v60  ;;  %v6531_v25 = vpop.f32.mrf.mxu1  ;;  %v6493_v31 = vpop.f32.mrf.mxu3 }
 0xe40   : > { %v6414_v7 = vpop.f32.mrf.mxu0 }
 0xe41   : > { %v6532_v36 = vadd.f32 %v6531_v25, %v6491_v29  ;;  %v6415_v5 = vadd.f32 %v6414_v7, %v6374_v10 }
 0xe43   : > { %6545 = vst.msk [vmem:[%s10897_s23 + $0x28] sm:$0xff] %vm4993_vm7, %v6532_v36 }
 0xe44   : > { %v6452_v56 = vpop.f32.mrf.mxu2 }
 0xe45   : > { %v6453_v49 = vadd.f32 %v6452_v56, %v6412_v59 }
 0xe47   : > { %v6494_v11 = vadd.f32 %v6493_v31, %v6453_v49  ;;  %v6534_v54 = vpop.f32.mrf.mxu1  ;;  %v6496_v26 = vpop.f32.mrf.mxu3 }
 0xe49   : > { %v6535_v34 = vadd.f32 %v6534_v54, %v6494_v11 }
 0xe4b   : > { %6546 = vst.msk [vmem:[%s10897_s23 + $0x30] sm:$0xff] %vm4993_vm7, %v6535_v34 }
 0xe4c   : > { %v6455_v43 = vpop.f32.mrf.mxu2 }
 0xe4d   : > { %v6456_v58 = vadd.f32 %v6455_v43, %v6415_v5 }
 0xe4f   : > { %v6497_v61 = vadd.f32 %v6496_v26, %v6456_v58  ;;  %v6537_v40 = vpop.f32.mrf.mxu1 }
 0xe51   : > { %v6538_v53 = vadd.f32 %v6537_v40, %v6497_v61 }
 0xe53   : > { %6547 = vst.msk [vmem:[%s10897_s23 + $0x38] sm:$0xff] %vm4993_vm7, %v6538_v53 }
 0xe54 PF: > { %s26_s18 = sadd.s32 1, %s7352_s18  }
 0xe55   : > { %p23_p4 = scmp.ge.s32.totalorder %s26_s18, 4  }
 0xe57   :  { %25 = sbr.rel (!%p23_p4) target bundleno = 1 (0x1), region = 126 }

</bundles_post_ra>
